<compile_context>
chip_gen: v7x
topology: tpu7x:2x2x1
jax: 0.10.0
libtpu: 0.0.40
codegen_flags: <defaults>
</compile_context>

<pallas_src>
import functools

import jax
import jax.numpy as jnp
from jax import lax
from jax.experimental import pallas as pl
from jax.experimental.pallas import tpu as pltpu


def _round_up(v, m):
    return (v + m - 1) // m * m


def _lstm_kernel(maxlen_ref, len_ref, gx_ref, whh_ref, wfc_ref, bfc_ref,
                 out_ref, h_sc, c_sc, *, time_chunk, unroll):
    b = pl.program_id(0)                      # batch-block index (parallel axis)
    chunk = pl.program_id(1)                  # time-chunk index (serial axis)
    H = h_sc.shape[1]                         # padded hidden size

    @pl.when(chunk == 0)
    def _init():
        h_sc[...] = jnp.zeros_like(h_sc)
        c_sc[...] = jnp.zeros_like(c_sc)

    base = chunk * time_chunk

    # Skip all compute for chunks past THIS batch block's longest sequence.
    @pl.when(base < maxlen_ref[b])
    def _compute():
        lengths = len_ref[...]                # (Bt, 1) int32

        def step(j, carry):
            h, c = carry                      # f32 state
            # gates = (x_t @ w_ih + b) [precomputed, bf16 stream, f32 upcast]
            #       + h @ w_hh         [bf16 MXU operands, f32 accumulation]
            gates = (gx_ref[j].astype(jnp.float32)
                     + jnp.dot(h.astype(jnp.bfloat16), whh_ref[...],
                               preferred_element_type=jnp.float32))
            i_g = jax.nn.sigmoid(gates[:, 0 * H:1 * H])
            f_g = jax.nn.sigmoid(gates[:, 1 * H:2 * H])
            g_g = jnp.tanh(gates[:, 2 * H:3 * H])
            o_g = jax.nn.sigmoid(gates[:, 3 * H:4 * H])
            c_new = f_g * c + i_g * g_g
            h_new = o_g * jnp.tanh(c_new)
            # pack_padded_sequence semantics: state freezes once t >= lengths[b]
            valid = lengths > (base + j)      # (Bt, 1) bool
            h = jnp.where(valid, h_new, h)
            c = jnp.where(valid, c_new, c)
            return h, c

        h, c = lax.fori_loop(0, time_chunk, step,
                             (h_sc[...], c_sc[...]), unroll=unroll)
        h_sc[...] = h
        c_sc[...] = c

    @pl.when(chunk == pl.num_programs(1) - 1)
    def _finalize():
        out_ref[...] = (jnp.dot(h_sc[...], wfc_ref[...],
                                preferred_element_type=jnp.float32)
                        + bfc_ref[...])


def _default_batch_block(B_pad):
    """Split the batch across TensorCores on multi-TC chips (v7x)."""
    try:
        kind = jax.devices()[0].device_kind.lower()
    except Exception:  # pragma: no cover - no device / query failed
        kind = ""
    if "v7" in kind and B_pad >= 16:
        return _round_up(B_pad // 2, 8)
    return B_pad  # single TensorCore (v5e/v6e): keep one block, maximize MXU M


def dynamic_lstm_forward(x, lengths, params, pred_steps, *,
                         time_chunk=16, batch_block=None):
    """x: (B, T, I) f32 (batch_first), lengths: (B,) int.
    params = (w_ih, w_hh, bias, w_fc, b_fc), pre-transposed for right-mult:
      w_ih:(I,4H)  w_hh:(H,4H)  bias:(1,4H)=b_ih+b_hh  w_fc:(H, pred*label)
      b_fc:(1, pred*label); gate order along 4H is PyTorch's (i, f, g, o).
    Returns (B, pred_steps, label)."""
    B, T, I = x.shape
    w_ih, w_hh, bias, w_fc, b_fc = params
    H = w_hh.shape[0]
    O = w_fc.shape[1]

    # ---- pad everything to TPU tile boundaries ---------------------------
    B_pad = _round_up(B, 8)
    H_pad = _round_up(H, 128)          # gate slices lane-tile aligned
    O_pad = _round_up(O, 128)          # lane-dense output stores
    T_pad = _round_up(T, time_chunk)
    G = 4 * H_pad

    def pad_gate_cols(w):              # (..., 4H) -> (..., 4*H_pad), gate-aware
        lead = w.shape[:-1]
        w4 = w.reshape(lead + (4, H))
        w4 = jnp.pad(w4, [(0, 0)] * len(lead) + [(0, 0), (0, H_pad - H)])
        return w4.reshape(lead + (G,))

    w_ih_p = pad_gate_cols(w_ih)                                        # (I, G)
    bias_p = pad_gate_cols(bias)                                        # (1, G)
    # w_hh stored bf16: only the MXU sees it; accumulation stays f32.
    w_hh_p = jnp.pad(pad_gate_cols(w_hh),
                     ((0, H_pad - H), (0, 0))).astype(jnp.bfloat16)     # (H_pad, G)
    w_fc_p = jnp.pad(w_fc, ((0, H_pad - H), (0, O_pad - O)))            # (H_pad, O_pad)
    b_fc_p = jnp.pad(b_fc, ((0, 0), (0, O_pad - O)))                    # (1, O_pad)

    x_p = jnp.pad(x.astype(jnp.float32),
                  ((0, B_pad - B), (0, T_pad - T), (0, 0)))             # (B_pad,T_pad,I)
    len_p = jnp.pad(lengths.astype(jnp.int32), (0, B_pad - B)).reshape(B_pad, 1)

    # ---- hoist the input projection out of the recurrence ----------------
    # Fused transpose+matmul to (T, B, 4H); stream it in bf16 (upcast in-kernel).
    gx = (jnp.einsum('bti,ig->tbg', x_p, w_ih_p) + bias_p).astype(jnp.bfloat16)

    if batch_block is None:
        batch_block = _default_batch_block(B_pad)
    Bt = _round_up(min(batch_block, B_pad), 8)
    nb = B_pad // Bt
    nc = T_pad // time_chunk

    # Per-batch-block max length (SMEM scalar prefetch) -> per-block chunk skip.
    blk_maxlen = jnp.max(len_p.reshape(nb, Bt), axis=1).astype(jnp.int32)  # (nb,)

    # Partial unroll for large hidden sizes to avoid vreg spills.
    unroll = True if H_pad <= 256 else 4
    kernel = functools.partial(_lstm_kernel, time_chunk=time_chunk,
                               unroll=unroll)

    # ---- explicit VMEM budget --------------------------------------------
    gx_blk = time_chunk * Bt * G * 2            # bf16 stream
    w_bytes = H_pad * G * 2 + H_pad * O_pad * 4 + O_pad * 4
    state_bytes = 2 * Bt * H_pad * 4
    out_blk = Bt * O_pad * 4
    len_blk = Bt * 4
    budget = 2 * gx_blk + 2 * w_bytes + state_bytes + 2 * out_blk + 2 * len_blk
    vmem_limit = min(max(int(budget * 1.25) + (4 << 20), 16 << 20), 100 << 20)

    def build(single_buffer_weights):
        # Constant-index weights: single-buffer (no point double-buffering a
        # block whose index_map never changes).
        wkw = ({"pipeline_mode": pl.Buffered(buffer_count=1)}
               if single_buffer_weights else {})
        return pl.pallas_call(
            kernel,
            out_shape=jax.ShapeDtypeStruct((B_pad, O_pad), jnp.float32),
            grid_spec=pltpu.PrefetchScalarGridSpec(
                num_scalar_prefetch=1,                      # blk_maxlen -> SMEM
                grid=(nb, nc),
                in_specs=[
                    pl.BlockSpec((Bt, 1), lambda b, c, ml: (b, 0)),        # lengths
                    pl.BlockSpec((time_chunk, Bt, G),
                                 lambda b, c, ml: (c, b, 0)),              # gx chunk
                    pl.BlockSpec((H_pad, G),
                                 lambda b, c, ml: (0, 0), **wkw),          # w_hh
                    pl.BlockSpec((H_pad, O_pad),
                                 lambda b, c, ml: (0, 0), **wkw),          # w_fc
                    pl.BlockSpec((1, O_pad),
                                 lambda b, c, ml: (0, 0), **wkw),          # b_fc
                ],
                out_specs=pl.BlockSpec((Bt, O_pad),
                                       lambda b, c, ml: (b, 0)),           # resident
                scratch_shapes=[
                    pltpu.VMEM((Bt, H_pad), jnp.float32),   # h state
                    pltpu.VMEM((Bt, H_pad), jnp.float32),   # c state
                ],
            ),
            compiler_params=pltpu.CompilerParams(
                dimension_semantics=("parallel", "arbitrary"),
                vmem_limit_bytes=vmem_limit),
        )

    args = (blk_maxlen, len_p, gx, w_hh_p, w_fc_p, b_fc_p)
    try:
        out_padded = build(True)(*args)
    except Exception:
        # Fallback for JAX versions where pipeline_mode=pl.Buffered(1) is not
        # accepted on the main pallas_call pipeline: default double buffering.
        out_padded = build(False)(*args)

    return out_padded[:B, :O].reshape(B, pred_steps, -1)


def _reference(x, lengths, params, pred_steps):
    """Pure-JAX f32 reference reproducing the PyTorch packed-LSTM semantics."""
    w_ih, w_hh, bias, w_fc, b_fc = params
    B, T, _ = x.shape
    H = w_hh.shape[0]
    h = jnp.zeros((B, H), jnp.float32)
    c = jnp.zeros((B, H), jnp.float32)
    for t in range(T):
        g = x[:, t, :] @ w_ih + h @ w_hh + bias
        i = jax.nn.sigmoid(g[:, 0 * H:1 * H])
        f = jax.nn.sigmoid(g[:, 1 * H:2 * H])
        gg = jnp.tanh(g[:, 2 * H:3 * H])
        o = jax.nn.sigmoid(g[:, 3 * H:4 * H])
        c_new = f * c + i * gg
        h_new = o * jnp.tanh(c_new)
        valid = (lengths > t)[:, None]
        h = jnp.where(valid, h_new, h)
        c = jnp.where(valid, c_new, c)
    out = h @ w_fc + b_fc
    return out.reshape(B, pred_steps, -1)


if __name__ == "__main__":
    # module hyperparameters
    input_size = 4
    label_size = 3
    neural_size = 32
    prediction_steps = 2
    batch = 2
    seq = 8

    key = jax.random.PRNGKey(0)
    k = jax.random.split(key, 7)

    scale = 0.1
    w_ih = scale * jax.random.normal(k[0], (input_size, 4 * neural_size), jnp.float32)
    w_hh = scale * jax.random.normal(k[1], (neural_size, 4 * neural_size), jnp.float32)
    bias = scale * jax.random.normal(k[2], (1, 4 * neural_size), jnp.float32)  # b_ih + b_hh pre-summed
    w_fc = scale * jax.random.normal(k[3], (neural_size, label_size * prediction_steps), jnp.float32)
    b_fc = scale * jax.random.normal(k[4], (1, label_size * prediction_steps), jnp.float32)
    params = (w_ih, w_hh, bias, w_fc, b_fc)

    x = jax.random.normal(k[5], (batch, seq, input_size), jnp.float32)
    lengths = jnp.array([seq, 5], dtype=jnp.int32)  # variable-length sequences

    out = dynamic_lstm_forward(x, lengths, params, prediction_steps)
    out = jax.block_until_ready(out)

    ref = _reference(x, lengths, params, prediction_steps)
    assert out.shape == (batch, prediction_steps, label_size), out.shape
    # bf16 MXU operands + bf16 gx stream (state/gate math in f32): tolerance
    # reflects mixed-precision vs. the pure-f32 PyTorch-style reference.
    assert jnp.allclose(out, ref, atol=2e-2, rtol=2e-2), "mismatch vs reference"

    print("KERNEL_OK")
</pallas_src>

<mosaic_0001>
module attributes {stable_mosaic.version = 11 : i64} {
  func.func @_lstm_kernel(%arg0: i32, %arg1: i32, %arg2: memref<1xi32, #tpu.memory_space<smem>>, %arg3: memref<8x1xi32, #tpu.memory_space<vmem>>, %arg4: memref<16x8x512xbf16, #tpu.memory_space<vmem>>, %arg5: memref<128x512xbf16, #tpu.memory_space<vmem>>, %arg6: memref<128x128xf32, #tpu.memory_space<vmem>>, %arg7: memref<1x128xf32, #tpu.memory_space<vmem>>, %arg8: memref<8x128xf32, #tpu.memory_space<vmem>>, %arg9: memref<8x128xf32, #tpu.memory_space<vmem>>, %arg10: memref<8x128xf32, #tpu.memory_space<vmem>>) attributes {dimension_semantics = [#tpu.dimension_semantics<parallel>, #tpu.dimension_semantics<arbitrary>], iteration_bounds = array<i64: 1, 1>, scalar_prefetch = 1 : i64, scratch_operands = 2 : i64, tpu.core_type = #tpu.core_type<tc>, window_params = [{transform_indices = @transform_0, window_bounds = array<i64: 8, 1>}, {transform_indices = @transform_1, window_bounds = array<i64: 16, 8, 512>}, {pipeline_mode = #tpu.pipeline_mode<synchronous>, transform_indices = @transform_2, window_bounds = array<i64: 128, 512>}, {pipeline_mode = #tpu.pipeline_mode<synchronous>, transform_indices = @transform_3, window_bounds = array<i64: 128, 128>}, {pipeline_mode = #tpu.pipeline_mode<synchronous>, transform_indices = @transform_4, window_bounds = array<i64: 1, 128>}, {transform_indices = @transform_5, window_bounds = array<i64: 8, 128>}]} {
    %c0_i32 = arith.constant 0 : i32
    %0 = arith.cmpi eq, %arg1, %c0_i32 : i32
    %1 = arith.extui %0 : i1 to i32
    %c0_i32_0 = arith.constant 0 : i32
    %2 = arith.cmpi ne, %1, %c0_i32_0 : i32
    scf.if %2 {
      %cst = arith.constant 0.000000e+00 : f32
      %12 = vector.broadcast %cst : f32 to vector<8x128xf32>
      %c0 = arith.constant 0 : index
      %c0_4 = arith.constant 0 : index
      %13 = vector.load %arg9[%c0, %c0_4] : memref<8x128xf32, #tpu.memory_space<vmem>>, vector<8x128xf32>
      tpu.vector_store %arg9[%c0, %c0_4], %12 {strides = array<i32>} : memref<8x128xf32, #tpu.memory_space<vmem>>, vector<8x128xf32>,
      %cst_5 = arith.constant 0.000000e+00 : f32
      %14 = vector.broadcast %cst_5 : f32 to vector<8x128xf32>
      %c0_6 = arith.constant 0 : index
      %c0_7 = arith.constant 0 : index
      %15 = vector.load %arg10[%c0_6, %c0_7] : memref<8x128xf32, #tpu.memory_space<vmem>>, vector<8x128xf32>
      tpu.vector_store %arg10[%c0_6, %c0_7], %14 {strides = array<i32>} : memref<8x128xf32, #tpu.memory_space<vmem>>, vector<8x128xf32>,
    } else {
    }
    %c16_i32 = arith.constant 16 : i32
    %3 = arith.muli %arg1, %c16_i32 : i32
    %4 = arith.index_cast %arg0 : i32 to index
    %5 = memref.load %arg2[%4] : memref<1xi32, #tpu.memory_space<smem>>
    %6 = arith.cmpi slt, %3, %5 : i32
    %7 = arith.extui %6 : i1 to i32
    %c0_i32_1 = arith.constant 0 : i32
    %8 = arith.cmpi ne, %7, %c0_i32_1 : i32
    scf.if %8 {
      %c0 = arith.constant 0 : index
      %c0_4 = arith.constant 0 : index
      %12 = vector.load %arg3[%c0, %c0_4] : memref<8x1xi32, #tpu.memory_space<vmem>>, vector<8x1xi32>
      %c0_5 = arith.constant 0 : index
      %c0_6 = arith.constant 0 : index
      %13 = vector.load %arg9[%c0_5, %c0_6] : memref<8x128xf32, #tpu.memory_space<vmem>>, vector<8x128xf32>
      %c0_7 = arith.constant 0 : index
      %c0_8 = arith.constant 0 : index
      %14 = vector.load %arg10[%c0_7, %c0_8] : memref<8x128xf32, #tpu.memory_space<vmem>>, vector<8x128xf32>
      %c0_i32_9 = arith.constant 0 : i32
      %15 = arith.index_cast %c0_i32_9 : i32 to index
      %c0_10 = arith.constant 0 : index
      %c0_11 = arith.constant 0 : index
      %16 = vector.load %arg4[%15, %c0_10, %c0_11] : memref<16x8x512xbf16, #tpu.memory_space<vmem>>, vector<1x8x512xbf16>
      %17 = vector.shape_cast %16 : vector<1x8x512xbf16> to vector<8x512xbf16>
      %18 = arith.extf %17 : vector<8x512xbf16> to vector<8x512xf32>
      %19 = arith.truncf %13 : vector<8x128xf32> to vector<8x128xbf16>
      %c0_12 = arith.constant 0 : index
      %c0_13 = arith.constant 0 : index
      %20 = vector.load %arg5[%c0_12, %c0_13] : memref<128x512xbf16, #tpu.memory_space<vmem>>, vector<128x512xbf16>
      %cst = arith.constant dense<0.000000e+00> : vector<8x512xf32>
      %21 = tpu.matmul %19, %20, %cst {dimension_numbers = #tpu.dot_dimension_numbers<[1], [0], [0], [1], [0, 0, 1, 1], [], []>} : vector<8x128xbf16>, vector<128x512xbf16>, vector<8x512xf32> -> vector<8x512xf32>
      %22 = arith.addf %18, %21 : vector<8x512xf32>
      %23 = vector.extract_strided_slice %22 {offsets = [0, 0], sizes = [8, 128], strides = [1, 1]} : vector<8x512xf32> to vector<8x128xf32>
      %24 = arith.negf %23 : vector<8x128xf32>
      %25 = math.exp %24 : vector<8x128xf32>
      %cst_14 = arith.constant 1.000000e+00 : f32
      %26 = vector.broadcast %cst_14 : f32 to vector<8x128xf32>
      %27 = arith.addf %26, %25 : vector<8x128xf32>
      %28 = arith.divf %26, %27 : vector<8x128xf32>
      %29 = vector.extract_strided_slice %22 {offsets = [0, 128], sizes = [8, 128], strides = [1, 1]} : vector<8x512xf32> to vector<8x128xf32>
      %30 = arith.negf %29 : vector<8x128xf32>
      %31 = math.exp %30 : vector<8x128xf32>
      %cst_15 = arith.constant 1.000000e+00 : f32
      %32 = vector.broadcast %cst_15 : f32 to vector<8x128xf32>
      %33 = arith.addf %32, %31 : vector<8x128xf32>
      %34 = arith.divf %32, %33 : vector<8x128xf32>
      %35 = vector.extract_strided_slice %22 {offsets = [0, 256], sizes = [8, 128], strides = [1, 1]} : vector<8x512xf32> to vector<8x128xf32>
      %36 = math.tanh %35 : vector<8x128xf32>
      %37 = vector.extract_strided_slice %22 {offsets = [0, 384], sizes = [8, 128], strides = [1, 1]} : vector<8x512xf32> to vector<8x128xf32>
      %38 = arith.negf %37 : vector<8x128xf32>
      %39 = math.exp %38 : vector<8x128xf32>
      %cst_16 = arith.constant 1.000000e+00 : f32
      %40 = vector.broadcast %cst_16 : f32 to vector<8x128xf32>
      %41 = arith.addf %40, %39 : vector<8x128xf32>
      %42 = arith.divf %40, %41 : vector<8x128xf32>
      %43 = arith.mulf %34, %14 : vector<8x128xf32>
      %44 = arith.mulf %28, %36 : vector<8x128xf32>
      %45 = arith.addf %43, %44 : vector<8x128xf32>
      %46 = math.tanh %45 : vector<8x128xf32>
      %47 = arith.mulf %42, %46 : vector<8x128xf32>
      %48 = arith.addi %3, %c0_i32_9 : i32
      %49 = vector.broadcast %48 : i32 to vector<8x1xi32>
      %50 = arith.cmpi sgt, %12, %49 : vector<8x1xi32>
      %51 = vector.shape_cast %50 : vector<8x1xi1> to vector<8x1xi1>
      %52 = vector.broadcast %51 : vector<8x1xi1> to vector<8x128xi1>
      %53 = arith.select %52, %47, %13 : vector<8x128xi1>, vector<8x128xf32>
      %54 = vector.shape_cast %50 : vector<8x1xi1> to vector<8x1xi1>
      %55 = vector.broadcast %54 : vector<8x1xi1> to vector<8x128xi1>
      %56 = arith.select %55, %45, %14 : vector<8x128xi1>, vector<8x128xf32>
      %c1_i32 = arith.constant 1 : i32
      %57 = arith.index_cast %c1_i32 : i32 to index
      %c0_17 = arith.constant 0 : index
      %c0_18 = arith.constant 0 : index
      %58 = vector.load %arg4[%57, %c0_17, %c0_18] : memref<16x8x512xbf16, #tpu.memory_space<vmem>>, vector<1x8x512xbf16>
      %59 = vector.shape_cast %58 : vector<1x8x512xbf16> to vector<8x512xbf16>
      %60 = arith.extf %59 : vector<8x512xbf16> to vector<8x512xf32>
      %61 = arith.truncf %53 : vector<8x128xf32> to vector<8x128xbf16>
      %c0_19 = arith.constant 0 : index
      %c0_20 = arith.constant 0 : index
      %62 = vector.load %arg5[%c0_19, %c0_20] : memref<128x512xbf16, #tpu.memory_space<vmem>>, vector<128x512xbf16>
      %cst_21 = arith.constant dense<0.000000e+00> : vector<8x512xf32>
      %63 = tpu.matmul %61, %62, %cst_21 {dimension_numbers = #tpu.dot_dimension_numbers<[1], [0], [0], [1], [0, 0, 1, 1], [], []>} : vector<8x128xbf16>, vector<128x512xbf16>, vector<8x512xf32> -> vector<8x512xf32>
      %64 = arith.addf %60, %63 : vector<8x512xf32>
      %65 = vector.extract_strided_slice %64 {offsets = [0, 0], sizes = [8, 128], strides = [1, 1]} : vector<8x512xf32> to vector<8x128xf32>
      %66 = arith.negf %65 : vector<8x128xf32>
      %67 = math.exp %66 : vector<8x128xf32>
      %cst_22 = arith.constant 1.000000e+00 : f32
      %68 = vector.broadcast %cst_22 : f32 to vector<8x128xf32>
      %69 = arith.addf %68, %67 : vector<8x128xf32>
      %70 = arith.divf %68, %69 : vector<8x128xf32>
      %71 = vector.extract_strided_slice %64 {offsets = [0, 128], sizes = [8, 128], strides = [1, 1]} : vector<8x512xf32> to vector<8x128xf32>
      %72 = arith.negf %71 : vector<8x128xf32>
      %73 = math.exp %72 : vector<8x128xf32>
      %cst_23 = arith.constant 1.000000e+00 : f32
      %74 = vector.broadcast %cst_23 : f32 to vector<8x128xf32>
      %75 = arith.addf %74, %73 : vector<8x128xf32>
      %76 = arith.divf %74, %75 : vector<8x128xf32>
      %77 = vector.extract_strided_slice %64 {offsets = [0, 256], sizes = [8, 128], strides = [1, 1]} : vector<8x512xf32> to vector<8x128xf32>
      %78 = math.tanh %77 : vector<8x128xf32>
      %79 = vector.extract_strided_slice %64 {offsets = [0, 384], sizes = [8, 128], strides = [1, 1]} : vector<8x512xf32> to vector<8x128xf32>
      %80 = arith.negf %79 : vector<8x128xf32>
      %81 = math.exp %80 : vector<8x128xf32>
      %cst_24 = arith.constant 1.000000e+00 : f32
      %82 = vector.broadcast %cst_24 : f32 to vector<8x128xf32>
      %83 = arith.addf %82, %81 : vector<8x128xf32>
      %84 = arith.divf %82, %83 : vector<8x128xf32>
      %85 = arith.mulf %76, %56 : vector<8x128xf32>
      %86 = arith.mulf %70, %78 : vector<8x128xf32>
      %87 = arith.addf %85, %86 : vector<8x128xf32>
      %88 = math.tanh %87 : vector<8x128xf32>
      %89 = arith.mulf %84, %88 : vector<8x128xf32>
      %90 = arith.addi %3, %c1_i32 : i32
      %91 = vector.broadcast %90 : i32 to vector<8x1xi32>
      %92 = arith.cmpi sgt, %12, %91 : vector<8x1xi32>
      %93 = vector.shape_cast %92 : vector<8x1xi1> to vector<8x1xi1>
      %94 = vector.broadcast %93 : vector<8x1xi1> to vector<8x128xi1>
      %95 = arith.select %94, %89, %53 : vector<8x128xi1>, vector<8x128xf32>
      %96 = vector.shape_cast %92 : vector<8x1xi1> to vector<8x1xi1>
      %97 = vector.broadcast %96 : vector<8x1xi1> to vector<8x128xi1>
      %98 = arith.select %97, %87, %56 : vector<8x128xi1>, vector<8x128xf32>
      %c2_i32 = arith.constant 2 : i32
      %99 = arith.index_cast %c2_i32 : i32 to index
      %c0_25 = arith.constant 0 : index
      %c0_26 = arith.constant 0 : index
      %100 = vector.load %arg4[%99, %c0_25, %c0_26] : memref<16x8x512xbf16, #tpu.memory_space<vmem>>, vector<1x8x512xbf16>
      %101 = vector.shape_cast %100 : vector<1x8x512xbf16> to vector<8x512xbf16>
      %102 = arith.extf %101 : vector<8x512xbf16> to vector<8x512xf32>
      %103 = arith.truncf %95 : vector<8x128xf32> to vector<8x128xbf16>
      %c0_27 = arith.constant 0 : index
      %c0_28 = arith.constant 0 : index
      %104 = vector.load %arg5[%c0_27, %c0_28] : memref<128x512xbf16, #tpu.memory_space<vmem>>, vector<128x512xbf16>
      %cst_29 = arith.constant dense<0.000000e+00> : vector<8x512xf32>
      %105 = tpu.matmul %103, %104, %cst_29 {dimension_numbers = #tpu.dot_dimension_numbers<[1], [0], [0], [1], [0, 0, 1, 1], [], []>} : vector<8x128xbf16>, vector<128x512xbf16>, vector<8x512xf32> -> vector<8x512xf32>
      %106 = arith.addf %102, %105 : vector<8x512xf32>
      %107 = vector.extract_strided_slice %106 {offsets = [0, 0], sizes = [8, 128], strides = [1, 1]} : vector<8x512xf32> to vector<8x128xf32>
      %108 = arith.negf %107 : vector<8x128xf32>
      %109 = math.exp %108 : vector<8x128xf32>
      %cst_30 = arith.constant 1.000000e+00 : f32
      %110 = vector.broadcast %cst_30 : f32 to vector<8x128xf32>
      %111 = arith.addf %110, %109 : vector<8x128xf32>
      %112 = arith.divf %110, %111 : vector<8x128xf32>
      %113 = vector.extract_strided_slice %106 {offsets = [0, 128], sizes = [8, 128], strides = [1, 1]} : vector<8x512xf32> to vector<8x128xf32>
      %114 = arith.negf %113 : vector<8x128xf32>
      %115 = math.exp %114 : vector<8x128xf32>
      %cst_31 = arith.constant 1.000000e+00 : f32
      %116 = vector.broadcast %cst_31 : f32 to vector<8x128xf32>
      %117 = arith.addf %116, %115 : vector<8x128xf32>
      %118 = arith.divf %116, %117 : vector<8x128xf32>
      %119 = vector.extract_strided_slice %106 {offsets = [0, 256], sizes = [8, 128], strides = [1, 1]} : vector<8x512xf32> to vector<8x128xf32>
      %120 = math.tanh %119 : vector<8x128xf32>
      %121 = vector.extract_strided_slice %106 {offsets = [0, 384], sizes = [8, 128], strides = [1, 1]} : vector<8x512xf32> to vector<8x128xf32>
      %122 = arith.negf %121 : vector<8x128xf32>
      %123 = math.exp %122 : vector<8x128xf32>
      %cst_32 = arith.constant 1.000000e+00 : f32
      %124 = vector.broadcast %cst_32 : f32 to vector<8x128xf32>
      %125 = arith.addf %124, %123 : vector<8x128xf32>
      %126 = arith.divf %124, %125 : vector<8x128xf32>
      %127 = arith.mulf %118, %98 : vector<8x128xf32>
      %128 = arith.mulf %112, %120 : vector<8x128xf32>
      %129 = arith.addf %127, %128 : vector<8x128xf32>
      %130 = math.tanh %129 : vector<8x128xf32>
      %131 = arith.mulf %126, %130 : vector<8x128xf32>
      %132 = arith.addi %3, %c2_i32 : i32
      %133 = vector.broadcast %132 : i32 to vector<8x1xi32>
      %134 = arith.cmpi sgt, %12, %133 : vector<8x1xi32>
      %135 = vector.shape_cast %134 : vector<8x1xi1> to vector<8x1xi1>
      %136 = vector.broadcast %135 : vector<8x1xi1> to vector<8x128xi1>
      %137 = arith.select %136, %131, %95 : vector<8x128xi1>, vector<8x128xf32>
      %138 = vector.shape_cast %134 : vector<8x1xi1> to vector<8x1xi1>
      %139 = vector.broadcast %138 : vector<8x1xi1> to vector<8x128xi1>
      %140 = arith.select %139, %129, %98 : vector<8x128xi1>, vector<8x128xf32>
      %c3_i32 = arith.constant 3 : i32
      %141 = arith.index_cast %c3_i32 : i32 to index
      %c0_33 = arith.constant 0 : index
      %c0_34 = arith.constant 0 : index
      %142 = vector.load %arg4[%141, %c0_33, %c0_34] : memref<16x8x512xbf16, #tpu.memory_space<vmem>>, vector<1x8x512xbf16>
      %143 = vector.shape_cast %142 : vector<1x8x512xbf16> to vector<8x512xbf16>
      %144 = arith.extf %143 : vector<8x512xbf16> to vector<8x512xf32>
      %145 = arith.truncf %137 : vector<8x128xf32> to vector<8x128xbf16>
      %c0_35 = arith.constant 0 : index
      %c0_36 = arith.constant 0 : index
      %146 = vector.load %arg5[%c0_35, %c0_36] : memref<128x512xbf16, #tpu.memory_space<vmem>>, vector<128x512xbf16>
      %cst_37 = arith.constant dense<0.000000e+00> : vector<8x512xf32>
      %147 = tpu.matmul %145, %146, %cst_37 {dimension_numbers = #tpu.dot_dimension_numbers<[1], [0], [0], [1], [0, 0, 1, 1], [], []>} : vector<8x128xbf16>, vector<128x512xbf16>, vector<8x512xf32> -> vector<8x512xf32>
      %148 = arith.addf %144, %147 : vector<8x512xf32>
      %149 = vector.extract_strided_slice %148 {offsets = [0, 0], sizes = [8, 128], strides = [1, 1]} : vector<8x512xf32> to vector<8x128xf32>
      %150 = arith.negf %149 : vector<8x128xf32>
      %151 = math.exp %150 : vector<8x128xf32>
      %cst_38 = arith.constant 1.000000e+00 : f32
      %152 = vector.broadcast %cst_38 : f32 to vector<8x128xf32>
      %153 = arith.addf %152, %151 : vector<8x128xf32>
      %154 = arith.divf %152, %153 : vector<8x128xf32>
      %155 = vector.extract_strided_slice %148 {offsets = [0, 128], sizes = [8, 128], strides = [1, 1]} : vector<8x512xf32> to vector<8x128xf32>
      %156 = arith.negf %155 : vector<8x128xf32>
      %157 = math.exp %156 : vector<8x128xf32>
      %cst_39 = arith.constant 1.000000e+00 : f32
      %158 = vector.broadcast %cst_39 : f32 to vector<8x128xf32>
      %159 = arith.addf %158, %157 : vector<8x128xf32>
      %160 = arith.divf %158, %159 : vector<8x128xf32>
      %161 = vector.extract_strided_slice %148 {offsets = [0, 256], sizes = [8, 128], strides = [1, 1]} : vector<8x512xf32> to vector<8x128xf32>
      %162 = math.tanh %161 : vector<8x128xf32>
      %163 = vector.extract_strided_slice %148 {offsets = [0, 384], sizes = [8, 128], strides = [1, 1]} : vector<8x512xf32> to vector<8x128xf32>
      %164 = arith.negf %163 : vector<8x128xf32>
      %165 = math.exp %164 : vector<8x128xf32>
      %cst_40 = arith.constant 1.000000e+00 : f32
      %166 = vector.broadcast %cst_40 : f32 to vector<8x128xf32>
      %167 = arith.addf %166, %165 : vector<8x128xf32>
      %168 = arith.divf %166, %167 : vector<8x128xf32>
      %169 = arith.mulf %160, %140 : vector<8x128xf32>
      %170 = arith.mulf %154, %162 : vector<8x128xf32>
      %171 = arith.addf %169, %170 : vector<8x128xf32>
      %172 = math.tanh %171 : vector<8x128xf32>
      %173 = arith.mulf %168, %172 : vector<8x128xf32>
      %174 = arith.addi %3, %c3_i32 : i32
      %175 = vector.broadcast %174 : i32 to vector<8x1xi32>
      %176 = arith.cmpi sgt, %12, %175 : vector<8x1xi32>
      %177 = vector.shape_cast %176 : vector<8x1xi1> to vector<8x1xi1>
      %178 = vector.broadcast %177 : vector<8x1xi1> to vector<8x128xi1>
      %179 = arith.select %178, %173, %137 : vector<8x128xi1>, vector<8x128xf32>
      %180 = vector.shape_cast %176 : vector<8x1xi1> to vector<8x1xi1>
      %181 = vector.broadcast %180 : vector<8x1xi1> to vector<8x128xi1>
      %182 = arith.select %181, %171, %140 : vector<8x128xi1>, vector<8x128xf32>
      %c4_i32 = arith.constant 4 : i32
      %183 = arith.index_cast %c4_i32 : i32 to index
      %c0_41 = arith.constant 0 : index
      %c0_42 = arith.constant 0 : index
      %184 = vector.load %arg4[%183, %c0_41, %c0_42] : memref<16x8x512xbf16, #tpu.memory_space<vmem>>, vector<1x8x512xbf16>
      %185 = vector.shape_cast %184 : vector<1x8x512xbf16> to vector<8x512xbf16>
      %186 = arith.extf %185 : vector<8x512xbf16> to vector<8x512xf32>
      %187 = arith.truncf %179 : vector<8x128xf32> to vector<8x128xbf16>
      %c0_43 = arith.constant 0 : index
      %c0_44 = arith.constant 0 : index
      %188 = vector.load %arg5[%c0_43, %c0_44] : memref<128x512xbf16, #tpu.memory_space<vmem>>, vector<128x512xbf16>
      %cst_45 = arith.constant dense<0.000000e+00> : vector<8x512xf32>
      %189 = tpu.matmul %187, %188, %cst_45 {dimension_numbers = #tpu.dot_dimension_numbers<[1], [0], [0], [1], [0, 0, 1, 1], [], []>} : vector<8x128xbf16>, vector<128x512xbf16>, vector<8x512xf32> -> vector<8x512xf32>
      %190 = arith.addf %186, %189 : vector<8x512xf32>
      %191 = vector.extract_strided_slice %190 {offsets = [0, 0], sizes = [8, 128], strides = [1, 1]} : vector<8x512xf32> to vector<8x128xf32>
      %192 = arith.negf %191 : vector<8x128xf32>
      %193 = math.exp %192 : vector<8x128xf32>
      %cst_46 = arith.constant 1.000000e+00 : f32
      %194 = vector.broadcast %cst_46 : f32 to vector<8x128xf32>
      %195 = arith.addf %194, %193 : vector<8x128xf32>
      %196 = arith.divf %194, %195 : vector<8x128xf32>
      %197 = vector.extract_strided_slice %190 {offsets = [0, 128], sizes = [8, 128], strides = [1, 1]} : vector<8x512xf32> to vector<8x128xf32>
      %198 = arith.negf %197 : vector<8x128xf32>
      %199 = math.exp %198 : vector<8x128xf32>
      %cst_47 = arith.constant 1.000000e+00 : f32
      %200 = vector.broadcast %cst_47 : f32 to vector<8x128xf32>
      %201 = arith.addf %200, %199 : vector<8x128xf32>
      %202 = arith.divf %200, %201 : vector<8x128xf32>
      %203 = vector.extract_strided_slice %190 {offsets = [0, 256], sizes = [8, 128], strides = [1, 1]} : vector<8x512xf32> to vector<8x128xf32>
      %204 = math.tanh %203 : vector<8x128xf32>
      %205 = vector.extract_strided_slice %190 {offsets = [0, 384], sizes = [8, 128], strides = [1, 1]} : vector<8x512xf32> to vector<8x128xf32>
      %206 = arith.negf %205 : vector<8x128xf32>
      %207 = math.exp %206 : vector<8x128xf32>
      %cst_48 = arith.constant 1.000000e+00 : f32
      %208 = vector.broadcast %cst_48 : f32 to vector<8x128xf32>
      %209 = arith.addf %208, %207 : vector<8x128xf32>
      %210 = arith.divf %208, %209 : vector<8x128xf32>
      %211 = arith.mulf %202, %182 : vector<8x128xf32>
      %212 = arith.mulf %196, %204 : vector<8x128xf32>
      %213 = arith.addf %211, %212 : vector<8x128xf32>
      %214 = math.tanh %213 : vector<8x128xf32>
      %215 = arith.mulf %210, %214 : vector<8x128xf32>
      %216 = arith.addi %3, %c4_i32 : i32
      %217 = vector.broadcast %216 : i32 to vector<8x1xi32>
      %218 = arith.cmpi sgt, %12, %217 : vector<8x1xi32>
      %219 = vector.shape_cast %218 : vector<8x1xi1> to vector<8x1xi1>
      %220 = vector.broadcast %219 : vector<8x1xi1> to vector<8x128xi1>
      %221 = arith.select %220, %215, %179 : vector<8x128xi1>, vector<8x128xf32>
      %222 = vector.shape_cast %218 : vector<8x1xi1> to vector<8x1xi1>
      %223 = vector.broadcast %222 : vector<8x1xi1> to vector<8x128xi1>
      %224 = arith.select %223, %213, %182 : vector<8x128xi1>, vector<8x128xf32>
      %c5_i32 = arith.constant 5 : i32
      %225 = arith.index_cast %c5_i32 : i32 to index
      %c0_49 = arith.constant 0 : index
      %c0_50 = arith.constant 0 : index
      %226 = vector.load %arg4[%225, %c0_49, %c0_50] : memref<16x8x512xbf16, #tpu.memory_space<vmem>>, vector<1x8x512xbf16>
      %227 = vector.shape_cast %226 : vector<1x8x512xbf16> to vector<8x512xbf16>
      %228 = arith.extf %227 : vector<8x512xbf16> to vector<8x512xf32>
      %229 = arith.truncf %221 : vector<8x128xf32> to vector<8x128xbf16>
      %c0_51 = arith.constant 0 : index
      %c0_52 = arith.constant 0 : index
      %230 = vector.load %arg5[%c0_51, %c0_52] : memref<128x512xbf16, #tpu.memory_space<vmem>>, vector<128x512xbf16>
      %cst_53 = arith.constant dense<0.000000e+00> : vector<8x512xf32>
      %231 = tpu.matmul %229, %230, %cst_53 {dimension_numbers = #tpu.dot_dimension_numbers<[1], [0], [0], [1], [0, 0, 1, 1], [], []>} : vector<8x128xbf16>, vector<128x512xbf16>, vector<8x512xf32> -> vector<8x512xf32>
      %232 = arith.addf %228, %231 : vector<8x512xf32>
      %233 = vector.extract_strided_slice %232 {offsets = [0, 0], sizes = [8, 128], strides = [1, 1]} : vector<8x512xf32> to vector<8x128xf32>
      %234 = arith.negf %233 : vector<8x128xf32>
      %235 = math.exp %234 : vector<8x128xf32>
      %cst_54 = arith.constant 1.000000e+00 : f32
      %236 = vector.broadcast %cst_54 : f32 to vector<8x128xf32>
      %237 = arith.addf %236, %235 : vector<8x128xf32>
      %238 = arith.divf %236, %237 : vector<8x128xf32>
      %239 = vector.extract_strided_slice %232 {offsets = [0, 128], sizes = [8, 128], strides = [1, 1]} : vector<8x512xf32> to vector<8x128xf32>
      %240 = arith.negf %239 : vector<8x128xf32>
      %241 = math.exp %240 : vector<8x128xf32>
      %cst_55 = arith.constant 1.000000e+00 : f32
      %242 = vector.broadcast %cst_55 : f32 to vector<8x128xf32>
      %243 = arith.addf %242, %241 : vector<8x128xf32>
      %244 = arith.divf %242, %243 : vector<8x128xf32>
      %245 = vector.extract_strided_slice %232 {offsets = [0, 256], sizes = [8, 128], strides = [1, 1]} : vector<8x512xf32> to vector<8x128xf32>
      %246 = math.tanh %245 : vector<8x128xf32>
      %247 = vector.extract_strided_slice %232 {offsets = [0, 384], sizes = [8, 128], strides = [1, 1]} : vector<8x512xf32> to vector<8x128xf32>
      %248 = arith.negf %247 : vector<8x128xf32>
      %249 = math.exp %248 : vector<8x128xf32>
      %cst_56 = arith.constant 1.000000e+00 : f32
      %250 = vector.broadcast %cst_56 : f32 to vector<8x128xf32>
      %251 = arith.addf %250, %249 : vector<8x128xf32>
      %252 = arith.divf %250, %251 : vector<8x128xf32>
      %253 = arith.mulf %244, %224 : vector<8x128xf32>
      %254 = arith.mulf %238, %246 : vector<8x128xf32>
      %255 = arith.addf %253, %254 : vector<8x128xf32>
      %256 = math.tanh %255 : vector<8x128xf32>
      %257 = arith.mulf %252, %256 : vector<8x128xf32>
      %258 = arith.addi %3, %c5_i32 : i32
      %259 = vector.broadcast %258 : i32 to vector<8x1xi32>
      %260 = arith.cmpi sgt, %12, %259 : vector<8x1xi32>
      %261 = vector.shape_cast %260 : vector<8x1xi1> to vector<8x1xi1>
      %262 = vector.broadcast %261 : vector<8x1xi1> to vector<8x128xi1>
      %263 = arith.select %262, %257, %221 : vector<8x128xi1>, vector<8x128xf32>
      %264 = vector.shape_cast %260 : vector<8x1xi1> to vector<8x1xi1>
      %265 = vector.broadcast %264 : vector<8x1xi1> to vector<8x128xi1>
      %266 = arith.select %265, %255, %224 : vector<8x128xi1>, vector<8x128xf32>
      %c6_i32 = arith.constant 6 : i32
      %267 = arith.index_cast %c6_i32 : i32 to index
      %c0_57 = arith.constant 0 : index
      %c0_58 = arith.constant 0 : index
      %268 = vector.load %arg4[%267, %c0_57, %c0_58] : memref<16x8x512xbf16, #tpu.memory_space<vmem>>, vector<1x8x512xbf16>
      %269 = vector.shape_cast %268 : vector<1x8x512xbf16> to vector<8x512xbf16>
      %270 = arith.extf %269 : vector<8x512xbf16> to vector<8x512xf32>
      %271 = arith.truncf %263 : vector<8x128xf32> to vector<8x128xbf16>
      %c0_59 = arith.constant 0 : index
      %c0_60 = arith.constant 0 : index
      %272 = vector.load %arg5[%c0_59, %c0_60] : memref<128x512xbf16, #tpu.memory_space<vmem>>, vector<128x512xbf16>
      %cst_61 = arith.constant dense<0.000000e+00> : vector<8x512xf32>
      %273 = tpu.matmul %271, %272, %cst_61 {dimension_numbers = #tpu.dot_dimension_numbers<[1], [0], [0], [1], [0, 0, 1, 1], [], []>} : vector<8x128xbf16>, vector<128x512xbf16>, vector<8x512xf32> -> vector<8x512xf32>
      %274 = arith.addf %270, %273 : vector<8x512xf32>
      %275 = vector.extract_strided_slice %274 {offsets = [0, 0], sizes = [8, 128], strides = [1, 1]} : vector<8x512xf32> to vector<8x128xf32>
      %276 = arith.negf %275 : vector<8x128xf32>
      %277 = math.exp %276 : vector<8x128xf32>
      %cst_62 = arith.constant 1.000000e+00 : f32
      %278 = vector.broadcast %cst_62 : f32 to vector<8x128xf32>
      %279 = arith.addf %278, %277 : vector<8x128xf32>
      %280 = arith.divf %278, %279 : vector<8x128xf32>
      %281 = vector.extract_strided_slice %274 {offsets = [0, 128], sizes = [8, 128], strides = [1, 1]} : vector<8x512xf32> to vector<8x128xf32>
      %282 = arith.negf %281 : vector<8x128xf32>
      %283 = math.exp %282 : vector<8x128xf32>
      %cst_63 = arith.constant 1.000000e+00 : f32
      %284 = vector.broadcast %cst_63 : f32 to vector<8x128xf32>
      %285 = arith.addf %284, %283 : vector<8x128xf32>
      %286 = arith.divf %284, %285 : vector<8x128xf32>
      %287 = vector.extract_strided_slice %274 {offsets = [0, 256], sizes = [8, 128], strides = [1, 1]} : vector<8x512xf32> to vector<8x128xf32>
      %288 = math.tanh %287 : vector<8x128xf32>
      %289 = vector.extract_strided_slice %274 {offsets = [0, 384], sizes = [8, 128], strides = [1, 1]} : vector<8x512xf32> to vector<8x128xf32>
      %290 = arith.negf %289 : vector<8x128xf32>
      %291 = math.exp %290 : vector<8x128xf32>
      %cst_64 = arith.constant 1.000000e+00 : f32
      %292 = vector.broadcast %cst_64 : f32 to vector<8x128xf32>
      %293 = arith.addf %292, %291 : vector<8x128xf32>
      %294 = arith.divf %292, %293 : vector<8x128xf32>
      %295 = arith.mulf %286, %266 : vector<8x128xf32>
      %296 = arith.mulf %280, %288 : vector<8x128xf32>
      %297 = arith.addf %295, %296 : vector<8x128xf32>
      %298 = math.tanh %297 : vector<8x128xf32>
      %299 = arith.mulf %294, %298 : vector<8x128xf32>
      %300 = arith.addi %3, %c6_i32 : i32
      %301 = vector.broadcast %300 : i32 to vector<8x1xi32>
      %302 = arith.cmpi sgt, %12, %301 : vector<8x1xi32>
      %303 = vector.shape_cast %302 : vector<8x1xi1> to vector<8x1xi1>
      %304 = vector.broadcast %303 : vector<8x1xi1> to vector<8x128xi1>
      %305 = arith.select %304, %299, %263 : vector<8x128xi1>, vector<8x128xf32>
      %306 = vector.shape_cast %302 : vector<8x1xi1> to vector<8x1xi1>
      %307 = vector.broadcast %306 : vector<8x1xi1> to vector<8x128xi1>
      %308 = arith.select %307, %297, %266 : vector<8x128xi1>, vector<8x128xf32>
      %c7_i32 = arith.constant 7 : i32
      %309 = arith.index_cast %c7_i32 : i32 to index
      %c0_65 = arith.constant 0 : index
      %c0_66 = arith.constant 0 : index
      %310 = vector.load %arg4[%309, %c0_65, %c0_66] : memref<16x8x512xbf16, #tpu.memory_space<vmem>>, vector<1x8x512xbf16>
      %311 = vector.shape_cast %310 : vector<1x8x512xbf16> to vector<8x512xbf16>
      %312 = arith.extf %311 : vector<8x512xbf16> to vector<8x512xf32>
      %313 = arith.truncf %305 : vector<8x128xf32> to vector<8x128xbf16>
      %c0_67 = arith.constant 0 : index
      %c0_68 = arith.constant 0 : index
      %314 = vector.load %arg5[%c0_67, %c0_68] : memref<128x512xbf16, #tpu.memory_space<vmem>>, vector<128x512xbf16>
      %cst_69 = arith.constant dense<0.000000e+00> : vector<8x512xf32>
      %315 = tpu.matmul %313, %314, %cst_69 {dimension_numbers = #tpu.dot_dimension_numbers<[1], [0], [0], [1], [0, 0, 1, 1], [], []>} : vector<8x128xbf16>, vector<128x512xbf16>, vector<8x512xf32> -> vector<8x512xf32>
      %316 = arith.addf %312, %315 : vector<8x512xf32>
      %317 = vector.extract_strided_slice %316 {offsets = [0, 0], sizes = [8, 128], strides = [1, 1]} : vector<8x512xf32> to vector<8x128xf32>
      %318 = arith.negf %317 : vector<8x128xf32>
      %319 = math.exp %318 : vector<8x128xf32>
      %cst_70 = arith.constant 1.000000e+00 : f32
      %320 = vector.broadcast %cst_70 : f32 to vector<8x128xf32>
      %321 = arith.addf %320, %319 : vector<8x128xf32>
      %322 = arith.divf %320, %321 : vector<8x128xf32>
      %323 = vector.extract_strided_slice %316 {offsets = [0, 128], sizes = [8, 128], strides = [1, 1]} : vector<8x512xf32> to vector<8x128xf32>
      %324 = arith.negf %323 : vector<8x128xf32>
      %325 = math.exp %324 : vector<8x128xf32>
      %cst_71 = arith.constant 1.000000e+00 : f32
      %326 = vector.broadcast %cst_71 : f32 to vector<8x128xf32>
      %327 = arith.addf %326, %325 : vector<8x128xf32>
      %328 = arith.divf %326, %327 : vector<8x128xf32>
      %329 = vector.extract_strided_slice %316 {offsets = [0, 256], sizes = [8, 128], strides = [1, 1]} : vector<8x512xf32> to vector<8x128xf32>
      %330 = math.tanh %329 : vector<8x128xf32>
      %331 = vector.extract_strided_slice %316 {offsets = [0, 384], sizes = [8, 128], strides = [1, 1]} : vector<8x512xf32> to vector<8x128xf32>
      %332 = arith.negf %331 : vector<8x128xf32>
      %333 = math.exp %332 : vector<8x128xf32>
      %cst_72 = arith.constant 1.000000e+00 : f32
      %334 = vector.broadcast %cst_72 : f32 to vector<8x128xf32>
      %335 = arith.addf %334, %333 : vector<8x128xf32>
      %336 = arith.divf %334, %335 : vector<8x128xf32>
      %337 = arith.mulf %328, %308 : vector<8x128xf32>
      %338 = arith.mulf %322, %330 : vector<8x128xf32>
      %339 = arith.addf %337, %338 : vector<8x128xf32>
      %340 = math.tanh %339 : vector<8x128xf32>
      %341 = arith.mulf %336, %340 : vector<8x128xf32>
      %342 = arith.addi %3, %c7_i32 : i32
      %343 = vector.broadcast %342 : i32 to vector<8x1xi32>
      %344 = arith.cmpi sgt, %12, %343 : vector<8x1xi32>
      %345 = vector.shape_cast %344 : vector<8x1xi1> to vector<8x1xi1>
      %346 = vector.broadcast %345 : vector<8x1xi1> to vector<8x128xi1>
      %347 = arith.select %346, %341, %305 : vector<8x128xi1>, vector<8x128xf32>
      %348 = vector.shape_cast %344 : vector<8x1xi1> to vector<8x1xi1>
      %349 = vector.broadcast %348 : vector<8x1xi1> to vector<8x128xi1>
      %350 = arith.select %349, %339, %308 : vector<8x128xi1>, vector<8x128xf32>
      %c8_i32 = arith.constant 8 : i32
      %351 = arith.index_cast %c8_i32 : i32 to index
      %c0_73 = arith.constant 0 : index
      %c0_74 = arith.constant 0 : index
      %352 = vector.load %arg4[%351, %c0_73, %c0_74] : memref<16x8x512xbf16, #tpu.memory_space<vmem>>, vector<1x8x512xbf16>
      %353 = vector.shape_cast %352 : vector<1x8x512xbf16> to vector<8x512xbf16>
      %354 = arith.extf %353 : vector<8x512xbf16> to vector<8x512xf32>
      %355 = arith.truncf %347 : vector<8x128xf32> to vector<8x128xbf16>
      %c0_75 = arith.constant 0 : index
      %c0_76 = arith.constant 0 : index
      %356 = vector.load %arg5[%c0_75, %c0_76] : memref<128x512xbf16, #tpu.memory_space<vmem>>, vector<128x512xbf16>
      %cst_77 = arith.constant dense<0.000000e+00> : vector<8x512xf32>
      %357 = tpu.matmul %355, %356, %cst_77 {dimension_numbers = #tpu.dot_dimension_numbers<[1], [0], [0], [1], [0, 0, 1, 1], [], []>} : vector<8x128xbf16>, vector<128x512xbf16>, vector<8x512xf32> -> vector<8x512xf32>
      %358 = arith.addf %354, %357 : vector<8x512xf32>
      %359 = vector.extract_strided_slice %358 {offsets = [0, 0], sizes = [8, 128], strides = [1, 1]} : vector<8x512xf32> to vector<8x128xf32>
      %360 = arith.negf %359 : vector<8x128xf32>
      %361 = math.exp %360 : vector<8x128xf32>
      %cst_78 = arith.constant 1.000000e+00 : f32
      %362 = vector.broadcast %cst_78 : f32 to vector<8x128xf32>
      %363 = arith.addf %362, %361 : vector<8x128xf32>
      %364 = arith.divf %362, %363 : vector<8x128xf32>
      %365 = vector.extract_strided_slice %358 {offsets = [0, 128], sizes = [8, 128], strides = [1, 1]} : vector<8x512xf32> to vector<8x128xf32>
      %366 = arith.negf %365 : vector<8x128xf32>
      %367 = math.exp %366 : vector<8x128xf32>
      %cst_79 = arith.constant 1.000000e+00 : f32
      %368 = vector.broadcast %cst_79 : f32 to vector<8x128xf32>
      %369 = arith.addf %368, %367 : vector<8x128xf32>
      %370 = arith.divf %368, %369 : vector<8x128xf32>
      %371 = vector.extract_strided_slice %358 {offsets = [0, 256], sizes = [8, 128], strides = [1, 1]} : vector<8x512xf32> to vector<8x128xf32>
      %372 = math.tanh %371 : vector<8x128xf32>
      %373 = vector.extract_strided_slice %358 {offsets = [0, 384], sizes = [8, 128], strides = [1, 1]} : vector<8x512xf32> to vector<8x128xf32>
      %374 = arith.negf %373 : vector<8x128xf32>
      %375 = math.exp %374 : vector<8x128xf32>
      %cst_80 = arith.constant 1.000000e+00 : f32
      %376 = vector.broadcast %cst_80 : f32 to vector<8x128xf32>
      %377 = arith.addf %376, %375 : vector<8x128xf32>
      %378 = arith.divf %376, %377 : vector<8x128xf32>
      %379 = arith.mulf %370, %350 : vector<8x128xf32>
      %380 = arith.mulf %364, %372 : vector<8x128xf32>
      %381 = arith.addf %379, %380 : vector<8x128xf32>
      %382 = math.tanh %381 : vector<8x128xf32>
      %383 = arith.mulf %378, %382 : vector<8x128xf32>
      %384 = arith.addi %3, %c8_i32 : i32
      %385 = vector.broadcast %384 : i32 to vector<8x1xi32>
      %386 = arith.cmpi sgt, %12, %385 : vector<8x1xi32>
      %387 = vector.shape_cast %386 : vector<8x1xi1> to vector<8x1xi1>
      %388 = vector.broadcast %387 : vector<8x1xi1> to vector<8x128xi1>
      %389 = arith.select %388, %383, %347 : vector<8x128xi1>, vector<8x128xf32>
      %390 = vector.shape_cast %386 : vector<8x1xi1> to vector<8x1xi1>
      %391 = vector.broadcast %390 : vector<8x1xi1> to vector<8x128xi1>
      %392 = arith.select %391, %381, %350 : vector<8x128xi1>, vector<8x128xf32>
      %c9_i32 = arith.constant 9 : i32
      %393 = arith.index_cast %c9_i32 : i32 to index
      %c0_81 = arith.constant 0 : index
      %c0_82 = arith.constant 0 : index
      %394 = vector.load %arg4[%393, %c0_81, %c0_82] : memref<16x8x512xbf16, #tpu.memory_space<vmem>>, vector<1x8x512xbf16>
      %395 = vector.shape_cast %394 : vector<1x8x512xbf16> to vector<8x512xbf16>
      %396 = arith.extf %395 : vector<8x512xbf16> to vector<8x512xf32>
      %397 = arith.truncf %389 : vector<8x128xf32> to vector<8x128xbf16>
      %c0_83 = arith.constant 0 : index
      %c0_84 = arith.constant 0 : index
      %398 = vector.load %arg5[%c0_83, %c0_84] : memref<128x512xbf16, #tpu.memory_space<vmem>>, vector<128x512xbf16>
      %cst_85 = arith.constant dense<0.000000e+00> : vector<8x512xf32>
      %399 = tpu.matmul %397, %398, %cst_85 {dimension_numbers = #tpu.dot_dimension_numbers<[1], [0], [0], [1], [0, 0, 1, 1], [], []>} : vector<8x128xbf16>, vector<128x512xbf16>, vector<8x512xf32> -> vector<8x512xf32>
      %400 = arith.addf %396, %399 : vector<8x512xf32>
      %401 = vector.extract_strided_slice %400 {offsets = [0, 0], sizes = [8, 128], strides = [1, 1]} : vector<8x512xf32> to vector<8x128xf32>
      %402 = arith.negf %401 : vector<8x128xf32>
      %403 = math.exp %402 : vector<8x128xf32>
      %cst_86 = arith.constant 1.000000e+00 : f32
      %404 = vector.broadcast %cst_86 : f32 to vector<8x128xf32>
      %405 = arith.addf %404, %403 : vector<8x128xf32>
      %406 = arith.divf %404, %405 : vector<8x128xf32>
      %407 = vector.extract_strided_slice %400 {offsets = [0, 128], sizes = [8, 128], strides = [1, 1]} : vector<8x512xf32> to vector<8x128xf32>
      %408 = arith.negf %407 : vector<8x128xf32>
      %409 = math.exp %408 : vector<8x128xf32>
      %cst_87 = arith.constant 1.000000e+00 : f32
      %410 = vector.broadcast %cst_87 : f32 to vector<8x128xf32>
      %411 = arith.addf %410, %409 : vector<8x128xf32>
      %412 = arith.divf %410, %411 : vector<8x128xf32>
      %413 = vector.extract_strided_slice %400 {offsets = [0, 256], sizes = [8, 128], strides = [1, 1]} : vector<8x512xf32> to vector<8x128xf32>
      %414 = math.tanh %413 : vector<8x128xf32>
      %415 = vector.extract_strided_slice %400 {offsets = [0, 384], sizes = [8, 128], strides = [1, 1]} : vector<8x512xf32> to vector<8x128xf32>
      %416 = arith.negf %415 : vector<8x128xf32>
      %417 = math.exp %416 : vector<8x128xf32>
      %cst_88 = arith.constant 1.000000e+00 : f32
      %418 = vector.broadcast %cst_88 : f32 to vector<8x128xf32>
      %419 = arith.addf %418, %417 : vector<8x128xf32>
      %420 = arith.divf %418, %419 : vector<8x128xf32>
      %421 = arith.mulf %412, %392 : vector<8x128xf32>
      %422 = arith.mulf %406, %414 : vector<8x128xf32>
      %423 = arith.addf %421, %422 : vector<8x128xf32>
      %424 = math.tanh %423 : vector<8x128xf32>
      %425 = arith.mulf %420, %424 : vector<8x128xf32>
      %426 = arith.addi %3, %c9_i32 : i32
      %427 = vector.broadcast %426 : i32 to vector<8x1xi32>
      %428 = arith.cmpi sgt, %12, %427 : vector<8x1xi32>
      %429 = vector.shape_cast %428 : vector<8x1xi1> to vector<8x1xi1>
      %430 = vector.broadcast %429 : vector<8x1xi1> to vector<8x128xi1>
      %431 = arith.select %430, %425, %389 : vector<8x128xi1>, vector<8x128xf32>
      %432 = vector.shape_cast %428 : vector<8x1xi1> to vector<8x1xi1>
      %433 = vector.broadcast %432 : vector<8x1xi1> to vector<8x128xi1>
      %434 = arith.select %433, %423, %392 : vector<8x128xi1>, vector<8x128xf32>
      %c10_i32 = arith.constant 10 : i32
      %435 = arith.index_cast %c10_i32 : i32 to index
      %c0_89 = arith.constant 0 : index
      %c0_90 = arith.constant 0 : index
      %436 = vector.load %arg4[%435, %c0_89, %c0_90] : memref<16x8x512xbf16, #tpu.memory_space<vmem>>, vector<1x8x512xbf16>
      %437 = vector.shape_cast %436 : vector<1x8x512xbf16> to vector<8x512xbf16>
      %438 = arith.extf %437 : vector<8x512xbf16> to vector<8x512xf32>
      %439 = arith.truncf %431 : vector<8x128xf32> to vector<8x128xbf16>
      %c0_91 = arith.constant 0 : index
      %c0_92 = arith.constant 0 : index
      %440 = vector.load %arg5[%c0_91, %c0_92] : memref<128x512xbf16, #tpu.memory_space<vmem>>, vector<128x512xbf16>
      %cst_93 = arith.constant dense<0.000000e+00> : vector<8x512xf32>
      %441 = tpu.matmul %439, %440, %cst_93 {dimension_numbers = #tpu.dot_dimension_numbers<[1], [0], [0], [1], [0, 0, 1, 1], [], []>} : vector<8x128xbf16>, vector<128x512xbf16>, vector<8x512xf32> -> vector<8x512xf32>
      %442 = arith.addf %438, %441 : vector<8x512xf32>
      %443 = vector.extract_strided_slice %442 {offsets = [0, 0], sizes = [8, 128], strides = [1, 1]} : vector<8x512xf32> to vector<8x128xf32>
      %444 = arith.negf %443 : vector<8x128xf32>
      %445 = math.exp %444 : vector<8x128xf32>
      %cst_94 = arith.constant 1.000000e+00 : f32
      %446 = vector.broadcast %cst_94 : f32 to vector<8x128xf32>
      %447 = arith.addf %446, %445 : vector<8x128xf32>
      %448 = arith.divf %446, %447 : vector<8x128xf32>
      %449 = vector.extract_strided_slice %442 {offsets = [0, 128], sizes = [8, 128], strides = [1, 1]} : vector<8x512xf32> to vector<8x128xf32>
      %450 = arith.negf %449 : vector<8x128xf32>
      %451 = math.exp %450 : vector<8x128xf32>
      %cst_95 = arith.constant 1.000000e+00 : f32
      %452 = vector.broadcast %cst_95 : f32 to vector<8x128xf32>
      %453 = arith.addf %452, %451 : vector<8x128xf32>
      %454 = arith.divf %452, %453 : vector<8x128xf32>
      %455 = vector.extract_strided_slice %442 {offsets = [0, 256], sizes = [8, 128], strides = [1, 1]} : vector<8x512xf32> to vector<8x128xf32>
      %456 = math.tanh %455 : vector<8x128xf32>
      %457 = vector.extract_strided_slice %442 {offsets = [0, 384], sizes = [8, 128], strides = [1, 1]} : vector<8x512xf32> to vector<8x128xf32>
      %458 = arith.negf %457 : vector<8x128xf32>
      %459 = math.exp %458 : vector<8x128xf32>
      %cst_96 = arith.constant 1.000000e+00 : f32
      %460 = vector.broadcast %cst_96 : f32 to vector<8x128xf32>
      %461 = arith.addf %460, %459 : vector<8x128xf32>
      %462 = arith.divf %460, %461 : vector<8x128xf32>
      %463 = arith.mulf %454, %434 : vector<8x128xf32>
      %464 = arith.mulf %448, %456 : vector<8x128xf32>
      %465 = arith.addf %463, %464 : vector<8x128xf32>
      %466 = math.tanh %465 : vector<8x128xf32>
      %467 = arith.mulf %462, %466 : vector<8x128xf32>
      %468 = arith.addi %3, %c10_i32 : i32
      %469 = vector.broadcast %468 : i32 to vector<8x1xi32>
      %470 = arith.cmpi sgt, %12, %469 : vector<8x1xi32>
      %471 = vector.shape_cast %470 : vector<8x1xi1> to vector<8x1xi1>
      %472 = vector.broadcast %471 : vector<8x1xi1> to vector<8x128xi1>
      %473 = arith.select %472, %467, %431 : vector<8x128xi1>, vector<8x128xf32>
      %474 = vector.shape_cast %470 : vector<8x1xi1> to vector<8x1xi1>
      %475 = vector.broadcast %474 : vector<8x1xi1> to vector<8x128xi1>
      %476 = arith.select %475, %465, %434 : vector<8x128xi1>, vector<8x128xf32>
      %c11_i32 = arith.constant 11 : i32
      %477 = arith.index_cast %c11_i32 : i32 to index
      %c0_97 = arith.constant 0 : index
      %c0_98 = arith.constant 0 : index
      %478 = vector.load %arg4[%477, %c0_97, %c0_98] : memref<16x8x512xbf16, #tpu.memory_space<vmem>>, vector<1x8x512xbf16>
      %479 = vector.shape_cast %478 : vector<1x8x512xbf16> to vector<8x512xbf16>
      %480 = arith.extf %479 : vector<8x512xbf16> to vector<8x512xf32>
      %481 = arith.truncf %473 : vector<8x128xf32> to vector<8x128xbf16>
      %c0_99 = arith.constant 0 : index
      %c0_100 = arith.constant 0 : index
      %482 = vector.load %arg5[%c0_99, %c0_100] : memref<128x512xbf16, #tpu.memory_space<vmem>>, vector<128x512xbf16>
      %cst_101 = arith.constant dense<0.000000e+00> : vector<8x512xf32>
      %483 = tpu.matmul %481, %482, %cst_101 {dimension_numbers = #tpu.dot_dimension_numbers<[1], [0], [0], [1], [0, 0, 1, 1], [], []>} : vector<8x128xbf16>, vector<128x512xbf16>, vector<8x512xf32> -> vector<8x512xf32>
      %484 = arith.addf %480, %483 : vector<8x512xf32>
      %485 = vector.extract_strided_slice %484 {offsets = [0, 0], sizes = [8, 128], strides = [1, 1]} : vector<8x512xf32> to vector<8x128xf32>
      %486 = arith.negf %485 : vector<8x128xf32>
      %487 = math.exp %486 : vector<8x128xf32>
      %cst_102 = arith.constant 1.000000e+00 : f32
      %488 = vector.broadcast %cst_102 : f32 to vector<8x128xf32>
      %489 = arith.addf %488, %487 : vector<8x128xf32>
      %490 = arith.divf %488, %489 : vector<8x128xf32>
      %491 = vector.extract_strided_slice %484 {offsets = [0, 128], sizes = [8, 128], strides = [1, 1]} : vector<8x512xf32> to vector<8x128xf32>
      %492 = arith.negf %491 : vector<8x128xf32>
      %493 = math.exp %492 : vector<8x128xf32>
      %cst_103 = arith.constant 1.000000e+00 : f32
      %494 = vector.broadcast %cst_103 : f32 to vector<8x128xf32>
      %495 = arith.addf %494, %493 : vector<8x128xf32>
      %496 = arith.divf %494, %495 : vector<8x128xf32>
      %497 = vector.extract_strided_slice %484 {offsets = [0, 256], sizes = [8, 128], strides = [1, 1]} : vector<8x512xf32> to vector<8x128xf32>
      %498 = math.tanh %497 : vector<8x128xf32>
      %499 = vector.extract_strided_slice %484 {offsets = [0, 384], sizes = [8, 128], strides = [1, 1]} : vector<8x512xf32> to vector<8x128xf32>
      %500 = arith.negf %499 : vector<8x128xf32>
      %501 = math.exp %500 : vector<8x128xf32>
      %cst_104 = arith.constant 1.000000e+00 : f32
      %502 = vector.broadcast %cst_104 : f32 to vector<8x128xf32>
      %503 = arith.addf %502, %501 : vector<8x128xf32>
      %504 = arith.divf %502, %503 : vector<8x128xf32>
      %505 = arith.mulf %496, %476 : vector<8x128xf32>
      %506 = arith.mulf %490, %498 : vector<8x128xf32>
      %507 = arith.addf %505, %506 : vector<8x128xf32>
      %508 = math.tanh %507 : vector<8x128xf32>
      %509 = arith.mulf %504, %508 : vector<8x128xf32>
      %510 = arith.addi %3, %c11_i32 : i32
      %511 = vector.broadcast %510 : i32 to vector<8x1xi32>
      %512 = arith.cmpi sgt, %12, %511 : vector<8x1xi32>
      %513 = vector.shape_cast %512 : vector<8x1xi1> to vector<8x1xi1>
      %514 = vector.broadcast %513 : vector<8x1xi1> to vector<8x128xi1>
      %515 = arith.select %514, %509, %473 : vector<8x128xi1>, vector<8x128xf32>
      %516 = vector.shape_cast %512 : vector<8x1xi1> to vector<8x1xi1>
      %517 = vector.broadcast %516 : vector<8x1xi1> to vector<8x128xi1>
      %518 = arith.select %517, %507, %476 : vector<8x128xi1>, vector<8x128xf32>
      %c12_i32 = arith.constant 12 : i32
      %519 = arith.index_cast %c12_i32 : i32 to index
      %c0_105 = arith.constant 0 : index
      %c0_106 = arith.constant 0 : index
      %520 = vector.load %arg4[%519, %c0_105, %c0_106] : memref<16x8x512xbf16, #tpu.memory_space<vmem>>, vector<1x8x512xbf16>
      %521 = vector.shape_cast %520 : vector<1x8x512xbf16> to vector<8x512xbf16>
      %522 = arith.extf %521 : vector<8x512xbf16> to vector<8x512xf32>
      %523 = arith.truncf %515 : vector<8x128xf32> to vector<8x128xbf16>
      %c0_107 = arith.constant 0 : index
      %c0_108 = arith.constant 0 : index
      %524 = vector.load %arg5[%c0_107, %c0_108] : memref<128x512xbf16, #tpu.memory_space<vmem>>, vector<128x512xbf16>
      %cst_109 = arith.constant dense<0.000000e+00> : vector<8x512xf32>
      %525 = tpu.matmul %523, %524, %cst_109 {dimension_numbers = #tpu.dot_dimension_numbers<[1], [0], [0], [1], [0, 0, 1, 1], [], []>} : vector<8x128xbf16>, vector<128x512xbf16>, vector<8x512xf32> -> vector<8x512xf32>
      %526 = arith.addf %522, %525 : vector<8x512xf32>
      %527 = vector.extract_strided_slice %526 {offsets = [0, 0], sizes = [8, 128], strides = [1, 1]} : vector<8x512xf32> to vector<8x128xf32>
      %528 = arith.negf %527 : vector<8x128xf32>
      %529 = math.exp %528 : vector<8x128xf32>
      %cst_110 = arith.constant 1.000000e+00 : f32
      %530 = vector.broadcast %cst_110 : f32 to vector<8x128xf32>
      %531 = arith.addf %530, %529 : vector<8x128xf32>
      %532 = arith.divf %530, %531 : vector<8x128xf32>
      %533 = vector.extract_strided_slice %526 {offsets = [0, 128], sizes = [8, 128], strides = [1, 1]} : vector<8x512xf32> to vector<8x128xf32>
      %534 = arith.negf %533 : vector<8x128xf32>
      %535 = math.exp %534 : vector<8x128xf32>
      %cst_111 = arith.constant 1.000000e+00 : f32
      %536 = vector.broadcast %cst_111 : f32 to vector<8x128xf32>
      %537 = arith.addf %536, %535 : vector<8x128xf32>
      %538 = arith.divf %536, %537 : vector<8x128xf32>
      %539 = vector.extract_strided_slice %526 {offsets = [0, 256], sizes = [8, 128], strides = [1, 1]} : vector<8x512xf32> to vector<8x128xf32>
      %540 = math.tanh %539 : vector<8x128xf32>
      %541 = vector.extract_strided_slice %526 {offsets = [0, 384], sizes = [8, 128], strides = [1, 1]} : vector<8x512xf32> to vector<8x128xf32>
      %542 = arith.negf %541 : vector<8x128xf32>
      %543 = math.exp %542 : vector<8x128xf32>
      %cst_112 = arith.constant 1.000000e+00 : f32
      %544 = vector.broadcast %cst_112 : f32 to vector<8x128xf32>
      %545 = arith.addf %544, %543 : vector<8x128xf32>
      %546 = arith.divf %544, %545 : vector<8x128xf32>
      %547 = arith.mulf %538, %518 : vector<8x128xf32>
      %548 = arith.mulf %532, %540 : vector<8x128xf32>
      %549 = arith.addf %547, %548 : vector<8x128xf32>
      %550 = math.tanh %549 : vector<8x128xf32>
      %551 = arith.mulf %546, %550 : vector<8x128xf32>
      %552 = arith.addi %3, %c12_i32 : i32
      %553 = vector.broadcast %552 : i32 to vector<8x1xi32>
      %554 = arith.cmpi sgt, %12, %553 : vector<8x1xi32>
      %555 = vector.shape_cast %554 : vector<8x1xi1> to vector<8x1xi1>
      %556 = vector.broadcast %555 : vector<8x1xi1> to vector<8x128xi1>
      %557 = arith.select %556, %551, %515 : vector<8x128xi1>, vector<8x128xf32>
      %558 = vector.shape_cast %554 : vector<8x1xi1> to vector<8x1xi1>
      %559 = vector.broadcast %558 : vector<8x1xi1> to vector<8x128xi1>
      %560 = arith.select %559, %549, %518 : vector<8x128xi1>, vector<8x128xf32>
      %c13_i32 = arith.constant 13 : i32
      %561 = arith.index_cast %c13_i32 : i32 to index
      %c0_113 = arith.constant 0 : index
      %c0_114 = arith.constant 0 : index
      %562 = vector.load %arg4[%561, %c0_113, %c0_114] : memref<16x8x512xbf16, #tpu.memory_space<vmem>>, vector<1x8x512xbf16>
      %563 = vector.shape_cast %562 : vector<1x8x512xbf16> to vector<8x512xbf16>
      %564 = arith.extf %563 : vector<8x512xbf16> to vector<8x512xf32>
      %565 = arith.truncf %557 : vector<8x128xf32> to vector<8x128xbf16>
      %c0_115 = arith.constant 0 : index
      %c0_116 = arith.constant 0 : index
      %566 = vector.load %arg5[%c0_115, %c0_116] : memref<128x512xbf16, #tpu.memory_space<vmem>>, vector<128x512xbf16>
      %cst_117 = arith.constant dense<0.000000e+00> : vector<8x512xf32>
      %567 = tpu.matmul %565, %566, %cst_117 {dimension_numbers = #tpu.dot_dimension_numbers<[1], [0], [0], [1], [0, 0, 1, 1], [], []>} : vector<8x128xbf16>, vector<128x512xbf16>, vector<8x512xf32> -> vector<8x512xf32>
      %568 = arith.addf %564, %567 : vector<8x512xf32>
      %569 = vector.extract_strided_slice %568 {offsets = [0, 0], sizes = [8, 128], strides = [1, 1]} : vector<8x512xf32> to vector<8x128xf32>
      %570 = arith.negf %569 : vector<8x128xf32>
      %571 = math.exp %570 : vector<8x128xf32>
      %cst_118 = arith.constant 1.000000e+00 : f32
      %572 = vector.broadcast %cst_118 : f32 to vector<8x128xf32>
      %573 = arith.addf %572, %571 : vector<8x128xf32>
      %574 = arith.divf %572, %573 : vector<8x128xf32>
      %575 = vector.extract_strided_slice %568 {offsets = [0, 128], sizes = [8, 128], strides = [1, 1]} : vector<8x512xf32> to vector<8x128xf32>
      %576 = arith.negf %575 : vector<8x128xf32>
      %577 = math.exp %576 : vector<8x128xf32>
      %cst_119 = arith.constant 1.000000e+00 : f32
      %578 = vector.broadcast %cst_119 : f32 to vector<8x128xf32>
      %579 = arith.addf %578, %577 : vector<8x128xf32>
      %580 = arith.divf %578, %579 : vector<8x128xf32>
      %581 = vector.extract_strided_slice %568 {offsets = [0, 256], sizes = [8, 128], strides = [1, 1]} : vector<8x512xf32> to vector<8x128xf32>
      %582 = math.tanh %581 : vector<8x128xf32>
      %583 = vector.extract_strided_slice %568 {offsets = [0, 384], sizes = [8, 128], strides = [1, 1]} : vector<8x512xf32> to vector<8x128xf32>
      %584 = arith.negf %583 : vector<8x128xf32>
      %585 = math.exp %584 : vector<8x128xf32>
      %cst_120 = arith.constant 1.000000e+00 : f32
      %586 = vector.broadcast %cst_120 : f32 to vector<8x128xf32>
      %587 = arith.addf %586, %585 : vector<8x128xf32>
      %588 = arith.divf %586, %587 : vector<8x128xf32>
      %589 = arith.mulf %580, %560 : vector<8x128xf32>
      %590 = arith.mulf %574, %582 : vector<8x128xf32>
      %591 = arith.addf %589, %590 : vector<8x128xf32>
      %592 = math.tanh %591 : vector<8x128xf32>
      %593 = arith.mulf %588, %592 : vector<8x128xf32>
      %594 = arith.addi %3, %c13_i32 : i32
      %595 = vector.broadcast %594 : i32 to vector<8x1xi32>
      %596 = arith.cmpi sgt, %12, %595 : vector<8x1xi32>
      %597 = vector.shape_cast %596 : vector<8x1xi1> to vector<8x1xi1>
      %598 = vector.broadcast %597 : vector<8x1xi1> to vector<8x128xi1>
      %599 = arith.select %598, %593, %557 : vector<8x128xi1>, vector<8x128xf32>
      %600 = vector.shape_cast %596 : vector<8x1xi1> to vector<8x1xi1>
      %601 = vector.broadcast %600 : vector<8x1xi1> to vector<8x128xi1>
      %602 = arith.select %601, %591, %560 : vector<8x128xi1>, vector<8x128xf32>
      %c14_i32 = arith.constant 14 : i32
      %603 = arith.index_cast %c14_i32 : i32 to index
      %c0_121 = arith.constant 0 : index
      %c0_122 = arith.constant 0 : index
      %604 = vector.load %arg4[%603, %c0_121, %c0_122] : memref<16x8x512xbf16, #tpu.memory_space<vmem>>, vector<1x8x512xbf16>
      %605 = vector.shape_cast %604 : vector<1x8x512xbf16> to vector<8x512xbf16>
      %606 = arith.extf %605 : vector<8x512xbf16> to vector<8x512xf32>
      %607 = arith.truncf %599 : vector<8x128xf32> to vector<8x128xbf16>
      %c0_123 = arith.constant 0 : index
      %c0_124 = arith.constant 0 : index
      %608 = vector.load %arg5[%c0_123, %c0_124] : memref<128x512xbf16, #tpu.memory_space<vmem>>, vector<128x512xbf16>
      %cst_125 = arith.constant dense<0.000000e+00> : vector<8x512xf32>
      %609 = tpu.matmul %607, %608, %cst_125 {dimension_numbers = #tpu.dot_dimension_numbers<[1], [0], [0], [1], [0, 0, 1, 1], [], []>} : vector<8x128xbf16>, vector<128x512xbf16>, vector<8x512xf32> -> vector<8x512xf32>
      %610 = arith.addf %606, %609 : vector<8x512xf32>
      %611 = vector.extract_strided_slice %610 {offsets = [0, 0], sizes = [8, 128], strides = [1, 1]} : vector<8x512xf32> to vector<8x128xf32>
      %612 = arith.negf %611 : vector<8x128xf32>
      %613 = math.exp %612 : vector<8x128xf32>
      %cst_126 = arith.constant 1.000000e+00 : f32
      %614 = vector.broadcast %cst_126 : f32 to vector<8x128xf32>
      %615 = arith.addf %614, %613 : vector<8x128xf32>
      %616 = arith.divf %614, %615 : vector<8x128xf32>
      %617 = vector.extract_strided_slice %610 {offsets = [0, 128], sizes = [8, 128], strides = [1, 1]} : vector<8x512xf32> to vector<8x128xf32>
      %618 = arith.negf %617 : vector<8x128xf32>
      %619 = math.exp %618 : vector<8x128xf32>
      %cst_127 = arith.constant 1.000000e+00 : f32
      %620 = vector.broadcast %cst_127 : f32 to vector<8x128xf32>
      %621 = arith.addf %620, %619 : vector<8x128xf32>
      %622 = arith.divf %620, %621 : vector<8x128xf32>
      %623 = vector.extract_strided_slice %610 {offsets = [0, 256], sizes = [8, 128], strides = [1, 1]} : vector<8x512xf32> to vector<8x128xf32>
      %624 = math.tanh %623 : vector<8x128xf32>
      %625 = vector.extract_strided_slice %610 {offsets = [0, 384], sizes = [8, 128], strides = [1, 1]} : vector<8x512xf32> to vector<8x128xf32>
      %626 = arith.negf %625 : vector<8x128xf32>
      %627 = math.exp %626 : vector<8x128xf32>
      %cst_128 = arith.constant 1.000000e+00 : f32
      %628 = vector.broadcast %cst_128 : f32 to vector<8x128xf32>
      %629 = arith.addf %628, %627 : vector<8x128xf32>
      %630 = arith.divf %628, %629 : vector<8x128xf32>
      %631 = arith.mulf %622, %602 : vector<8x128xf32>
      %632 = arith.mulf %616, %624 : vector<8x128xf32>
      %633 = arith.addf %631, %632 : vector<8x128xf32>
      %634 = math.tanh %633 : vector<8x128xf32>
      %635 = arith.mulf %630, %634 : vector<8x128xf32>
      %636 = arith.addi %3, %c14_i32 : i32
      %637 = vector.broadcast %636 : i32 to vector<8x1xi32>
      %638 = arith.cmpi sgt, %12, %637 : vector<8x1xi32>
      %639 = vector.shape_cast %638 : vector<8x1xi1> to vector<8x1xi1>
      %640 = vector.broadcast %639 : vector<8x1xi1> to vector<8x128xi1>
      %641 = arith.select %640, %635, %599 : vector<8x128xi1>, vector<8x128xf32>
      %642 = vector.shape_cast %638 : vector<8x1xi1> to vector<8x1xi1>
      %643 = vector.broadcast %642 : vector<8x1xi1> to vector<8x128xi1>
      %644 = arith.select %643, %633, %602 : vector<8x128xi1>, vector<8x128xf32>
      %c15_i32 = arith.constant 15 : i32
      %645 = arith.index_cast %c15_i32 : i32 to index
      %c0_129 = arith.constant 0 : index
      %c0_130 = arith.constant 0 : index
      %646 = vector.load %arg4[%645, %c0_129, %c0_130] : memref<16x8x512xbf16, #tpu.memory_space<vmem>>, vector<1x8x512xbf16>
      %647 = vector.shape_cast %646 : vector<1x8x512xbf16> to vector<8x512xbf16>
      %648 = arith.extf %647 : vector<8x512xbf16> to vector<8x512xf32>
      %649 = arith.truncf %641 : vector<8x128xf32> to vector<8x128xbf16>
      %c0_131 = arith.constant 0 : index
      %c0_132 = arith.constant 0 : index
      %650 = vector.load %arg5[%c0_131, %c0_132] : memref<128x512xbf16, #tpu.memory_space<vmem>>, vector<128x512xbf16>
      %cst_133 = arith.constant dense<0.000000e+00> : vector<8x512xf32>
      %651 = tpu.matmul %649, %650, %cst_133 {dimension_numbers = #tpu.dot_dimension_numbers<[1], [0], [0], [1], [0, 0, 1, 1], [], []>} : vector<8x128xbf16>, vector<128x512xbf16>, vector<8x512xf32> -> vector<8x512xf32>
      %652 = arith.addf %648, %651 : vector<8x512xf32>
      %653 = vector.extract_strided_slice %652 {offsets = [0, 0], sizes = [8, 128], strides = [1, 1]} : vector<8x512xf32> to vector<8x128xf32>
      %654 = arith.negf %653 : vector<8x128xf32>
      %655 = math.exp %654 : vector<8x128xf32>
      %cst_134 = arith.constant 1.000000e+00 : f32
      %656 = vector.broadcast %cst_134 : f32 to vector<8x128xf32>
      %657 = arith.addf %656, %655 : vector<8x128xf32>
      %658 = arith.divf %656, %657 : vector<8x128xf32>
      %659 = vector.extract_strided_slice %652 {offsets = [0, 128], sizes = [8, 128], strides = [1, 1]} : vector<8x512xf32> to vector<8x128xf32>
      %660 = arith.negf %659 : vector<8x128xf32>
      %661 = math.exp %660 : vector<8x128xf32>
      %cst_135 = arith.constant 1.000000e+00 : f32
      %662 = vector.broadcast %cst_135 : f32 to vector<8x128xf32>
      %663 = arith.addf %662, %661 : vector<8x128xf32>
      %664 = arith.divf %662, %663 : vector<8x128xf32>
      %665 = vector.extract_strided_slice %652 {offsets = [0, 256], sizes = [8, 128], strides = [1, 1]} : vector<8x512xf32> to vector<8x128xf32>
      %666 = math.tanh %665 : vector<8x128xf32>
      %667 = vector.extract_strided_slice %652 {offsets = [0, 384], sizes = [8, 128], strides = [1, 1]} : vector<8x512xf32> to vector<8x128xf32>
      %668 = arith.negf %667 : vector<8x128xf32>
      %669 = math.exp %668 : vector<8x128xf32>
      %cst_136 = arith.constant 1.000000e+00 : f32
      %670 = vector.broadcast %cst_136 : f32 to vector<8x128xf32>
      %671 = arith.addf %670, %669 : vector<8x128xf32>
      %672 = arith.divf %670, %671 : vector<8x128xf32>
      %673 = arith.mulf %664, %644 : vector<8x128xf32>
      %674 = arith.mulf %658, %666 : vector<8x128xf32>
      %675 = arith.addf %673, %674 : vector<8x128xf32>
      %676 = math.tanh %675 : vector<8x128xf32>
      %677 = arith.mulf %672, %676 : vector<8x128xf32>
      %678 = arith.addi %3, %c15_i32 : i32
      %679 = vector.broadcast %678 : i32 to vector<8x1xi32>
      %680 = arith.cmpi sgt, %12, %679 : vector<8x1xi32>
      %681 = vector.shape_cast %680 : vector<8x1xi1> to vector<8x1xi1>
      %682 = vector.broadcast %681 : vector<8x1xi1> to vector<8x128xi1>
      %683 = arith.select %682, %677, %641 : vector<8x128xi1>, vector<8x128xf32>
      %684 = vector.shape_cast %680 : vector<8x1xi1> to vector<8x1xi1>
      %685 = vector.broadcast %684 : vector<8x1xi1> to vector<8x128xi1>
      %686 = arith.select %685, %675, %644 : vector<8x128xi1>, vector<8x128xf32>
      %c16_i32_137 = arith.constant 16 : i32
      %c0_138 = arith.constant 0 : index
      %c0_139 = arith.constant 0 : index
      %687 = vector.load %arg9[%c0_138, %c0_139] : memref<8x128xf32, #tpu.memory_space<vmem>>, vector<8x128xf32>
      tpu.vector_store %arg9[%c0_138, %c0_139], %683 {strides = array<i32>} : memref<8x128xf32, #tpu.memory_space<vmem>>, vector<8x128xf32>,
      %c0_140 = arith.constant 0 : index
      %c0_141 = arith.constant 0 : index
      %688 = vector.load %arg10[%c0_140, %c0_141] : memref<8x128xf32, #tpu.memory_space<vmem>>, vector<8x128xf32>
      tpu.vector_store %arg10[%c0_140, %c0_141], %686 {strides = array<i32>} : memref<8x128xf32, #tpu.memory_space<vmem>>, vector<8x128xf32>,
    } else {
    }
    %c0_i32_2 = arith.constant 0 : i32
    %9 = arith.cmpi eq, %arg1, %c0_i32_2 : i32
    %10 = arith.extui %9 : i1 to i32
    %c0_i32_3 = arith.constant 0 : i32
    %11 = arith.cmpi ne, %10, %c0_i32_3 : i32
    scf.if %11 {
      %c0 = arith.constant 0 : index
      %c0_4 = arith.constant 0 : index
      %12 = vector.load %arg9[%c0, %c0_4] : memref<8x128xf32, #tpu.memory_space<vmem>>, vector<8x128xf32>
      %c0_5 = arith.constant 0 : index
      %c0_6 = arith.constant 0 : index
      %13 = vector.load %arg6[%c0_5, %c0_6] : memref<128x128xf32, #tpu.memory_space<vmem>>, vector<128x128xf32>
      %cst = arith.constant dense<0.000000e+00> : vector<8x128xf32>
      %14 = tpu.matmul %12, %13, %cst {dimension_numbers = #tpu.dot_dimension_numbers<[1], [0], [0], [1], [0, 0, 1, 1], [], []>} : vector<8x128xf32>, vector<128x128xf32>, vector<8x128xf32> -> vector<8x128xf32>
      %c0_7 = arith.constant 0 : index
      %c0_8 = arith.constant 0 : index
      %15 = vector.load %arg7[%c0_7, %c0_8] : memref<1x128xf32, #tpu.memory_space<vmem>>, vector<1x128xf32>
      %16 = vector.broadcast %15 : vector<1x128xf32> to vector<8x128xf32>
      %17 = arith.addf %14, %16 : vector<8x128xf32>
      %c0_9 = arith.constant 0 : index
      %c0_10 = arith.constant 0 : index
      %18 = vector.load %arg8[%c0_9, %c0_10] : memref<8x128xf32, #tpu.memory_space<vmem>>, vector<8x128xf32>
      tpu.vector_store %arg8[%c0_9, %c0_10], %17 {strides = array<i32>} : memref<8x128xf32, #tpu.memory_space<vmem>>, vector<8x128xf32>,
    } else {
    }
    return
  }
  func.func @transform_0(%arg0: i32, %arg1: i32, %arg2: memref<1xi32, #tpu.memory_space<smem>>) -> (i32, i32) {
    %c0_i32 = arith.constant 0 : i32
    %c0_i32_0 = arith.constant 0 : i32
    return %arg0, %c0_i32 : i32, i32
  }
  func.func @transform_1(%arg0: i32, %arg1: i32, %arg2: memref<1xi32, #tpu.memory_space<smem>>) -> (i32, i32, i32) {
    %c0_i32 = arith.constant 0 : i32
    %c0_i32_0 = arith.constant 0 : i32
    return %arg1, %arg0, %c0_i32 : i32, i32, i32
  }
  func.func @transform_2(%arg0: i32, %arg1: i32, %arg2: memref<1xi32, #tpu.memory_space<smem>>) -> (i32, i32) {
    %c0_i32 = arith.constant 0 : i32
    %c0_i32_0 = arith.constant 0 : i32
    %c0_i32_1 = arith.constant 0 : i32
    return %c0_i32, %c0_i32_0 : i32, i32
  }
  func.func @transform_3(%arg0: i32, %arg1: i32, %arg2: memref<1xi32, #tpu.memory_space<smem>>) -> (i32, i32) {
    %c0_i32 = arith.constant 0 : i32
    %c0_i32_0 = arith.constant 0 : i32
    %c0_i32_1 = arith.constant 0 : i32
    return %c0_i32, %c0_i32_0 : i32, i32
  }
  func.func @transform_4(%arg0: i32, %arg1: i32, %arg2: memref<1xi32, #tpu.memory_space<smem>>) -> (i32, i32) {
    %c0_i32 = arith.constant 0 : i32
    %c0_i32_0 = arith.constant 0 : i32
    %c0_i32_1 = arith.constant 0 : i32
    return %c0_i32, %c0_i32_0 : i32, i32
  }
  func.func @transform_5(%arg0: i32, %arg1: i32, %arg2: memref<1xi32, #tpu.memory_space<smem>>) -> (i32, i32) {
    %c0_i32 = arith.constant 0 : i32
    %c0_i32_0 = arith.constant 0 : i32
    return %arg0, %c0_i32 : i32, i32
  }
}

module attributes {stable_mosaic.version = 11 : i64} {
  func.func @_lstm_kernel(%arg0: i32, %arg1: i32, %arg2: memref<1xi32, #tpu.memory_space<smem>>, %arg3: memref<8x1xi32, #tpu.memory_space<vmem>>, %arg4: memref<16x8x512xbf16, #tpu.memory_space<vmem>>, %arg5: memref<128x512xbf16, #tpu.memory_space<vmem>>, %arg6: memref<128x128xf32, #tpu.memory_space<vmem>>, %arg7: memref<1x128xf32, #tpu.memory_space<vmem>>, %arg8: memref<8x128xf32, #tpu.memory_space<vmem>>, %arg9: memref<8x128xf32, #tpu.memory_space<vmem>>, %arg10: memref<8x128xf32, #tpu.memory_space<vmem>>) attributes {dimension_semantics = [#tpu.dimension_semantics<parallel>, #tpu.dimension_semantics<arbitrary>], iteration_bounds = array<i64: 1, 1>, scalar_prefetch = 1 : i64, scratch_operands = 2 : i64, tpu.core_type = #tpu.core_type<tc>, window_params = [{transform_indices = @transform_0, window_bounds = array<i64: 8, 1>}, {transform_indices = @transform_1, window_bounds = array<i64: 16, 8, 512>}, {pipeline_mode = #tpu.pipeline_mode<synchronous>, transform_indices = @transform_2, window_bounds = array<i64: 128, 512>}, {pipeline_mode = #tpu.pipeline_mode<synchronous>, transform_indices = @transform_3, window_bounds = array<i64: 128, 128>}, {pipeline_mode = #tpu.pipeline_mode<synchronous>, transform_indices = @transform_4, window_bounds = array<i64: 1, 128>}, {transform_indices = @transform_5, window_bounds = array<i64: 8, 128>}]} {
    %c0_i32 = arith.constant 0 : i32
    %0 = arith.cmpi eq, %arg1, %c0_i32 : i32
    %1 = arith.extui %0 : i1 to i32
    %c0_i32_0 = arith.constant 0 : i32
    %2 = arith.cmpi ne, %1, %c0_i32_0 : i32
    scf.if %2 {
      %cst = arith.constant 0.000000e+00 : f32
      %12 = vector.broadcast %cst : f32 to vector<8x128xf32>
      %c0 = arith.constant 0 : index
      %c0_4 = arith.constant 0 : index
      %13 = vector.load %arg9[%c0, %c0_4] : memref<8x128xf32, #tpu.memory_space<vmem>>, vector<8x128xf32>
      tpu.vector_store %arg9[%c0, %c0_4], %12 {strides = array<i32>} : memref<8x128xf32, #tpu.memory_space<vmem>>, vector<8x128xf32>,
      %cst_5 = arith.constant 0.000000e+00 : f32
      %14 = vector.broadcast %cst_5 : f32 to vector<8x128xf32>
      %c0_6 = arith.constant 0 : index
      %c0_7 = arith.constant 0 : index
      %15 = vector.load %arg10[%c0_6, %c0_7] : memref<8x128xf32, #tpu.memory_space<vmem>>, vector<8x128xf32>
      tpu.vector_store %arg10[%c0_6, %c0_7], %14 {strides = array<i32>} : memref<8x128xf32, #tpu.memory_space<vmem>>, vector<8x128xf32>,
    } else {
    }
    %c16_i32 = arith.constant 16 : i32
    %3 = arith.muli %arg1, %c16_i32 : i32
    %4 = arith.index_cast %arg0 : i32 to index
    %5 = memref.load %arg2[%4] : memref<1xi32, #tpu.memory_space<smem>>
    %6 = arith.cmpi slt, %3, %5 : i32
    %7 = arith.extui %6 : i1 to i32
    %c0_i32_1 = arith.constant 0 : i32
    %8 = arith.cmpi ne, %7, %c0_i32_1 : i32
    scf.if %8 {
      %c0 = arith.constant 0 : index
      %c0_4 = arith.constant 0 : index
      %12 = vector.load %arg3[%c0, %c0_4] : memref<8x1xi32, #tpu.memory_space<vmem>>, vector<8x1xi32>
      %c0_5 = arith.constant 0 : index
      %c0_6 = arith.constant 0 : index
      %13 = vector.load %arg9[%c0_5, %c0_6] : memref<8x128xf32, #tpu.memory_space<vmem>>, vector<8x128xf32>
      %c0_7 = arith.constant 0 : index
      %c0_8 = arith.constant 0 : index
      %14 = vector.load %arg10[%c0_7, %c0_8] : memref<8x128xf32, #tpu.memory_space<vmem>>, vector<8x128xf32>
      %c0_i32_9 = arith.constant 0 : i32
      %15 = arith.index_cast %c0_i32_9 : i32 to index
      %c0_10 = arith.constant 0 : index
      %c0_11 = arith.constant 0 : index
      %16 = vector.load %arg4[%15, %c0_10, %c0_11] : memref<16x8x512xbf16, #tpu.memory_space<vmem>>, vector<1x8x512xbf16>
      %17 = vector.shape_cast %16 : vector<1x8x512xbf16> to vector<8x512xbf16>
      %18 = arith.extf %17 : vector<8x512xbf16> to vector<8x512xf32>
      %19 = arith.truncf %13 : vector<8x128xf32> to vector<8x128xbf16>
      %c0_12 = arith.constant 0 : index
      %c0_13 = arith.constant 0 : index
      %20 = vector.load %arg5[%c0_12, %c0_13] : memref<128x512xbf16, #tpu.memory_space<vmem>>, vector<128x512xbf16>
      %cst = arith.constant dense<0.000000e+00> : vector<8x512xf32>
      %21 = tpu.matmul %19, %20, %cst {dimension_numbers = #tpu.dot_dimension_numbers<[1], [0], [0], [1], [0, 0, 1, 1], [], []>} : vector<8x128xbf16>, vector<128x512xbf16>, vector<8x512xf32> -> vector<8x512xf32>
      %22 = arith.addf %18, %21 : vector<8x512xf32>
      %23 = vector.extract_strided_slice %22 {offsets = [0, 0], sizes = [8, 128], strides = [1, 1]} : vector<8x512xf32> to vector<8x128xf32>
      %24 = arith.negf %23 : vector<8x128xf32>
      %25 = math.exp %24 : vector<8x128xf32>
      %cst_14 = arith.constant 1.000000e+00 : f32
      %26 = vector.broadcast %cst_14 : f32 to vector<8x128xf32>
      %27 = arith.addf %26, %25 : vector<8x128xf32>
      %28 = arith.divf %26, %27 : vector<8x128xf32>
      %29 = vector.extract_strided_slice %22 {offsets = [0, 128], sizes = [8, 128], strides = [1, 1]} : vector<8x512xf32> to vector<8x128xf32>
      %30 = arith.negf %29 : vector<8x128xf32>
      %31 = math.exp %30 : vector<8x128xf32>
      %cst_15 = arith.constant 1.000000e+00 : f32
      %32 = vector.broadcast %cst_15 : f32 to vector<8x128xf32>
      %33 = arith.addf %32, %31 : vector<8x128xf32>
      %34 = arith.divf %32, %33 : vector<8x128xf32>
      %35 = vector.extract_strided_slice %22 {offsets = [0, 256], sizes = [8, 128], strides = [1, 1]} : vector<8x512xf32> to vector<8x128xf32>
      %36 = math.tanh %35 : vector<8x128xf32>
      %37 = vector.extract_strided_slice %22 {offsets = [0, 384], sizes = [8, 128], strides = [1, 1]} : vector<8x512xf32> to vector<8x128xf32>
      %38 = arith.negf %37 : vector<8x128xf32>
      %39 = math.exp %38 : vector<8x128xf32>
      %cst_16 = arith.constant 1.000000e+00 : f32
      %40 = vector.broadcast %cst_16 : f32 to vector<8x128xf32>
      %41 = arith.addf %40, %39 : vector<8x128xf32>
      %42 = arith.divf %40, %41 : vector<8x128xf32>
      %43 = arith.mulf %34, %14 : vector<8x128xf32>
      %44 = arith.mulf %28, %36 : vector<8x128xf32>
      %45 = arith.addf %43, %44 : vector<8x128xf32>
      %46 = math.tanh %45 : vector<8x128xf32>
      %47 = arith.mulf %42, %46 : vector<8x128xf32>
      %48 = arith.addi %3, %c0_i32_9 : i32
      %49 = vector.broadcast %48 : i32 to vector<8x1xi32>
      %50 = arith.cmpi sgt, %12, %49 : vector<8x1xi32>
      %51 = vector.shape_cast %50 : vector<8x1xi1> to vector<8x1xi1>
      %52 = vector.broadcast %51 : vector<8x1xi1> to vector<8x128xi1>
      %53 = arith.select %52, %47, %13 : vector<8x128xi1>, vector<8x128xf32>
      %54 = vector.shape_cast %50 : vector<8x1xi1> to vector<8x1xi1>
      %55 = vector.broadcast %54 : vector<8x1xi1> to vector<8x128xi1>
      %56 = arith.select %55, %45, %14 : vector<8x128xi1>, vector<8x128xf32>
      %c1_i32 = arith.constant 1 : i32
      %57 = arith.index_cast %c1_i32 : i32 to index
      %c0_17 = arith.constant 0 : index
      %c0_18 = arith.constant 0 : index
      %58 = vector.load %arg4[%57, %c0_17, %c0_18] : memref<16x8x512xbf16, #tpu.memory_space<vmem>>, vector<1x8x512xbf16>
      %59 = vector.shape_cast %58 : vector<1x8x512xbf16> to vector<8x512xbf16>
      %60 = arith.extf %59 : vector<8x512xbf16> to vector<8x512xf32>
      %61 = arith.truncf %53 : vector<8x128xf32> to vector<8x128xbf16>
      %c0_19 = arith.constant 0 : index
      %c0_20 = arith.constant 0 : index
      %62 = vector.load %arg5[%c0_19, %c0_20] : memref<128x512xbf16, #tpu.memory_space<vmem>>, vector<128x512xbf16>
      %cst_21 = arith.constant dense<0.000000e+00> : vector<8x512xf32>
      %63 = tpu.matmul %61, %62, %cst_21 {dimension_numbers = #tpu.dot_dimension_numbers<[1], [0], [0], [1], [0, 0, 1, 1], [], []>} : vector<8x128xbf16>, vector<128x512xbf16>, vector<8x512xf32> -> vector<8x512xf32>
      %64 = arith.addf %60, %63 : vector<8x512xf32>
      %65 = vector.extract_strided_slice %64 {offsets = [0, 0], sizes = [8, 128], strides = [1, 1]} : vector<8x512xf32> to vector<8x128xf32>
      %66 = arith.negf %65 : vector<8x128xf32>
      %67 = math.exp %66 : vector<8x128xf32>
      %cst_22 = arith.constant 1.000000e+00 : f32
      %68 = vector.broadcast %cst_22 : f32 to vector<8x128xf32>
      %69 = arith.addf %68, %67 : vector<8x128xf32>
      %70 = arith.divf %68, %69 : vector<8x128xf32>
      %71 = vector.extract_strided_slice %64 {offsets = [0, 128], sizes = [8, 128], strides = [1, 1]} : vector<8x512xf32> to vector<8x128xf32>
      %72 = arith.negf %71 : vector<8x128xf32>
      %73 = math.exp %72 : vector<8x128xf32>
      %cst_23 = arith.constant 1.000000e+00 : f32
      %74 = vector.broadcast %cst_23 : f32 to vector<8x128xf32>
      %75 = arith.addf %74, %73 : vector<8x128xf32>
      %76 = arith.divf %74, %75 : vector<8x128xf32>
      %77 = vector.extract_strided_slice %64 {offsets = [0, 256], sizes = [8, 128], strides = [1, 1]} : vector<8x512xf32> to vector<8x128xf32>
      %78 = math.tanh %77 : vector<8x128xf32>
      %79 = vector.extract_strided_slice %64 {offsets = [0, 384], sizes = [8, 128], strides = [1, 1]} : vector<8x512xf32> to vector<8x128xf32>
      %80 = arith.negf %79 : vector<8x128xf32>
      %81 = math.exp %80 : vector<8x128xf32>
      %cst_24 = arith.constant 1.000000e+00 : f32
      %82 = vector.broadcast %cst_24 : f32 to vector<8x128xf32>
      %83 = arith.addf %82, %81 : vector<8x128xf32>
      %84 = arith.divf %82, %83 : vector<8x128xf32>
      %85 = arith.mulf %76, %56 : vector<8x128xf32>
      %86 = arith.mulf %70, %78 : vector<8x128xf32>
      %87 = arith.addf %85, %86 : vector<8x128xf32>
      %88 = math.tanh %87 : vector<8x128xf32>
      %89 = arith.mulf %84, %88 : vector<8x128xf32>
      %90 = arith.addi %3, %c1_i32 : i32
      %91 = vector.broadcast %90 : i32 to vector<8x1xi32>
      %92 = arith.cmpi sgt, %12, %91 : vector<8x1xi32>
      %93 = vector.shape_cast %92 : vector<8x1xi1> to vector<8x1xi1>
      %94 = vector.broadcast %93 : vector<8x1xi1> to vector<8x128xi1>
      %95 = arith.select %94, %89, %53 : vector<8x128xi1>, vector<8x128xf32>
      %96 = vector.shape_cast %92 : vector<8x1xi1> to vector<8x1xi1>
      %97 = vector.broadcast %96 : vector<8x1xi1> to vector<8x128xi1>
      %98 = arith.select %97, %87, %56 : vector<8x128xi1>, vector<8x128xf32>
      %c2_i32 = arith.constant 2 : i32
      %99 = arith.index_cast %c2_i32 : i32 to index
      %c0_25 = arith.constant 0 : index
      %c0_26 = arith.constant 0 : index
      %100 = vector.load %arg4[%99, %c0_25, %c0_26] : memref<16x8x512xbf16, #tpu.memory_space<vmem>>, vector<1x8x512xbf16>
      %101 = vector.shape_cast %100 : vector<1x8x512xbf16> to vector<8x512xbf16>
      %102 = arith.extf %101 : vector<8x512xbf16> to vector<8x512xf32>
      %103 = arith.truncf %95 : vector<8x128xf32> to vector<8x128xbf16>
      %c0_27 = arith.constant 0 : index
      %c0_28 = arith.constant 0 : index
      %104 = vector.load %arg5[%c0_27, %c0_28] : memref<128x512xbf16, #tpu.memory_space<vmem>>, vector<128x512xbf16>
      %cst_29 = arith.constant dense<0.000000e+00> : vector<8x512xf32>
      %105 = tpu.matmul %103, %104, %cst_29 {dimension_numbers = #tpu.dot_dimension_numbers<[1], [0], [0], [1], [0, 0, 1, 1], [], []>} : vector<8x128xbf16>, vector<128x512xbf16>, vector<8x512xf32> -> vector<8x512xf32>
      %106 = arith.addf %102, %105 : vector<8x512xf32>
      %107 = vector.extract_strided_slice %106 {offsets = [0, 0], sizes = [8, 128], strides = [1, 1]} : vector<8x512xf32> to vector<8x128xf32>
      %108 = arith.negf %107 : vector<8x128xf32>
      %109 = math.exp %108 : vector<8x128xf32>
      %cst_30 = arith.constant 1.000000e+00 : f32
      %110 = vector.broadcast %cst_30 : f32 to vector<8x128xf32>
      %111 = arith.addf %110, %109 : vector<8x128xf32>
      %112 = arith.divf %110, %111 : vector<8x128xf32>
      %113 = vector.extract_strided_slice %106 {offsets = [0, 128], sizes = [8, 128], strides = [1, 1]} : vector<8x512xf32> to vector<8x128xf32>
      %114 = arith.negf %113 : vector<8x128xf32>
      %115 = math.exp %114 : vector<8x128xf32>
      %cst_31 = arith.constant 1.000000e+00 : f32
      %116 = vector.broadcast %cst_31 : f32 to vector<8x128xf32>
      %117 = arith.addf %116, %115 : vector<8x128xf32>
      %118 = arith.divf %116, %117 : vector<8x128xf32>
      %119 = vector.extract_strided_slice %106 {offsets = [0, 256], sizes = [8, 128], strides = [1, 1]} : vector<8x512xf32> to vector<8x128xf32>
      %120 = math.tanh %119 : vector<8x128xf32>
      %121 = vector.extract_strided_slice %106 {offsets = [0, 384], sizes = [8, 128], strides = [1, 1]} : vector<8x512xf32> to vector<8x128xf32>
      %122 = arith.negf %121 : vector<8x128xf32>
      %123 = math.exp %122 : vector<8x128xf32>
      %cst_32 = arith.constant 1.000000e+00 : f32
      %124 = vector.broadcast %cst_32 : f32 to vector<8x128xf32>
      %125 = arith.addf %124, %123 : vector<8x128xf32>
      %126 = arith.divf %124, %125 : vector<8x128xf32>
      %127 = arith.mulf %118, %98 : vector<8x128xf32>
      %128 = arith.mulf %112, %120 : vector<8x128xf32>
      %129 = arith.addf %127, %128 : vector<8x128xf32>
      %130 = math.tanh %129 : vector<8x128xf32>
      %131 = arith.mulf %126, %130 : vector<8x128xf32>
      %132 = arith.addi %3, %c2_i32 : i32
      %133 = vector.broadcast %132 : i32 to vector<8x1xi32>
      %134 = arith.cmpi sgt, %12, %133 : vector<8x1xi32>
      %135 = vector.shape_cast %134 : vector<8x1xi1> to vector<8x1xi1>
      %136 = vector.broadcast %135 : vector<8x1xi1> to vector<8x128xi1>
      %137 = arith.select %136, %131, %95 : vector<8x128xi1>, vector<8x128xf32>
      %138 = vector.shape_cast %134 : vector<8x1xi1> to vector<8x1xi1>
      %139 = vector.broadcast %138 : vector<8x1xi1> to vector<8x128xi1>
      %140 = arith.select %139, %129, %98 : vector<8x128xi1>, vector<8x128xf32>
      %c3_i32 = arith.constant 3 : i32
      %141 = arith.index_cast %c3_i32 : i32 to index
      %c0_33 = arith.constant 0 : index
      %c0_34 = arith.constant 0 : index
      %142 = vector.load %arg4[%141, %c0_33, %c0_34] : memref<16x8x512xbf16, #tpu.memory_space<vmem>>, vector<1x8x512xbf16>
      %143 = vector.shape_cast %142 : vector<1x8x512xbf16> to vector<8x512xbf16>
      %144 = arith.extf %143 : vector<8x512xbf16> to vector<8x512xf32>
      %145 = arith.truncf %137 : vector<8x128xf32> to vector<8x128xbf16>
      %c0_35 = arith.constant 0 : index
      %c0_36 = arith.constant 0 : index
      %146 = vector.load %arg5[%c0_35, %c0_36] : memref<128x512xbf16, #tpu.memory_space<vmem>>, vector<128x512xbf16>
      %cst_37 = arith.constant dense<0.000000e+00> : vector<8x512xf32>
      %147 = tpu.matmul %145, %146, %cst_37 {dimension_numbers = #tpu.dot_dimension_numbers<[1], [0], [0], [1], [0, 0, 1, 1], [], []>} : vector<8x128xbf16>, vector<128x512xbf16>, vector<8x512xf32> -> vector<8x512xf32>
      %148 = arith.addf %144, %147 : vector<8x512xf32>
      %149 = vector.extract_strided_slice %148 {offsets = [0, 0], sizes = [8, 128], strides = [1, 1]} : vector<8x512xf32> to vector<8x128xf32>
      %150 = arith.negf %149 : vector<8x128xf32>
      %151 = math.exp %150 : vector<8x128xf32>
      %cst_38 = arith.constant 1.000000e+00 : f32
      %152 = vector.broadcast %cst_38 : f32 to vector<8x128xf32>
      %153 = arith.addf %152, %151 : vector<8x128xf32>
      %154 = arith.divf %152, %153 : vector<8x128xf32>
      %155 = vector.extract_strided_slice %148 {offsets = [0, 128], sizes = [8, 128], strides = [1, 1]} : vector<8x512xf32> to vector<8x128xf32>
      %156 = arith.negf %155 : vector<8x128xf32>
      %157 = math.exp %156 : vector<8x128xf32>
      %cst_39 = arith.constant 1.000000e+00 : f32
      %158 = vector.broadcast %cst_39 : f32 to vector<8x128xf32>
      %159 = arith.addf %158, %157 : vector<8x128xf32>
      %160 = arith.divf %158, %159 : vector<8x128xf32>
      %161 = vector.extract_strided_slice %148 {offsets = [0, 256], sizes = [8, 128], strides = [1, 1]} : vector<8x512xf32> to vector<8x128xf32>
      %162 = math.tanh %161 : vector<8x128xf32>
      %163 = vector.extract_strided_slice %148 {offsets = [0, 384], sizes = [8, 128], strides = [1, 1]} : vector<8x512xf32> to vector<8x128xf32>
      %164 = arith.negf %163 : vector<8x128xf32>
      %165 = math.exp %164 : vector<8x128xf32>
      %cst_40 = arith.constant 1.000000e+00 : f32
      %166 = vector.broadcast %cst_40 : f32 to vector<8x128xf32>
      %167 = arith.addf %166, %165 : vector<8x128xf32>
      %168 = arith.divf %166, %167 : vector<8x128xf32>
      %169 = arith.mulf %160, %140 : vector<8x128xf32>
      %170 = arith.mulf %154, %162 : vector<8x128xf32>
      %171 = arith.addf %169, %170 : vector<8x128xf32>
      %172 = math.tanh %171 : vector<8x128xf32>
      %173 = arith.mulf %168, %172 : vector<8x128xf32>
      %174 = arith.addi %3, %c3_i32 : i32
      %175 = vector.broadcast %174 : i32 to vector<8x1xi32>
      %176 = arith.cmpi sgt, %12, %175 : vector<8x1xi32>
      %177 = vector.shape_cast %176 : vector<8x1xi1> to vector<8x1xi1>
      %178 = vector.broadcast %177 : vector<8x1xi1> to vector<8x128xi1>
      %179 = arith.select %178, %173, %137 : vector<8x128xi1>, vector<8x128xf32>
      %180 = vector.shape_cast %176 : vector<8x1xi1> to vector<8x1xi1>
      %181 = vector.broadcast %180 : vector<8x1xi1> to vector<8x128xi1>
      %182 = arith.select %181, %171, %140 : vector<8x128xi1>, vector<8x128xf32>
      %c4_i32 = arith.constant 4 : i32
      %183 = arith.index_cast %c4_i32 : i32 to index
      %c0_41 = arith.constant 0 : index
      %c0_42 = arith.constant 0 : index
      %184 = vector.load %arg4[%183, %c0_41, %c0_42] : memref<16x8x512xbf16, #tpu.memory_space<vmem>>, vector<1x8x512xbf16>
      %185 = vector.shape_cast %184 : vector<1x8x512xbf16> to vector<8x512xbf16>
      %186 = arith.extf %185 : vector<8x512xbf16> to vector<8x512xf32>
      %187 = arith.truncf %179 : vector<8x128xf32> to vector<8x128xbf16>
      %c0_43 = arith.constant 0 : index
      %c0_44 = arith.constant 0 : index
      %188 = vector.load %arg5[%c0_43, %c0_44] : memref<128x512xbf16, #tpu.memory_space<vmem>>, vector<128x512xbf16>
      %cst_45 = arith.constant dense<0.000000e+00> : vector<8x512xf32>
      %189 = tpu.matmul %187, %188, %cst_45 {dimension_numbers = #tpu.dot_dimension_numbers<[1], [0], [0], [1], [0, 0, 1, 1], [], []>} : vector<8x128xbf16>, vector<128x512xbf16>, vector<8x512xf32> -> vector<8x512xf32>
      %190 = arith.addf %186, %189 : vector<8x512xf32>
      %191 = vector.extract_strided_slice %190 {offsets = [0, 0], sizes = [8, 128], strides = [1, 1]} : vector<8x512xf32> to vector<8x128xf32>
      %192 = arith.negf %191 : vector<8x128xf32>
      %193 = math.exp %192 : vector<8x128xf32>
      %cst_46 = arith.constant 1.000000e+00 : f32
      %194 = vector.broadcast %cst_46 : f32 to vector<8x128xf32>
      %195 = arith.addf %194, %193 : vector<8x128xf32>
      %196 = arith.divf %194, %195 : vector<8x128xf32>
      %197 = vector.extract_strided_slice %190 {offsets = [0, 128], sizes = [8, 128], strides = [1, 1]} : vector<8x512xf32> to vector<8x128xf32>
      %198 = arith.negf %197 : vector<8x128xf32>
      %199 = math.exp %198 : vector<8x128xf32>
      %cst_47 = arith.constant 1.000000e+00 : f32
      %200 = vector.broadcast %cst_47 : f32 to vector<8x128xf32>
      %201 = arith.addf %200, %199 : vector<8x128xf32>
      %202 = arith.divf %200, %201 : vector<8x128xf32>
      %203 = vector.extract_strided_slice %190 {offsets = [0, 256], sizes = [8, 128], strides = [1, 1]} : vector<8x512xf32> to vector<8x128xf32>
      %204 = math.tanh %203 : vector<8x128xf32>
      %205 = vector.extract_strided_slice %190 {offsets = [0, 384], sizes = [8, 128], strides = [1, 1]} : vector<8x512xf32> to vector<8x128xf32>
      %206 = arith.negf %205 : vector<8x128xf32>
      %207 = math.exp %206 : vector<8x128xf32>
      %cst_48 = arith.constant 1.000000e+00 : f32
      %208 = vector.broadcast %cst_48 : f32 to vector<8x128xf32>
      %209 = arith.addf %208, %207 : vector<8x128xf32>
      %210 = arith.divf %208, %209 : vector<8x128xf32>
      %211 = arith.mulf %202, %182 : vector<8x128xf32>
      %212 = arith.mulf %196, %204 : vector<8x128xf32>
      %213 = arith.addf %211, %212 : vector<8x128xf32>
      %214 = math.tanh %213 : vector<8x128xf32>
      %215 = arith.mulf %210, %214 : vector<8x128xf32>
      %216 = arith.addi %3, %c4_i32 : i32
      %217 = vector.broadcast %216 : i32 to vector<8x1xi32>
      %218 = arith.cmpi sgt, %12, %217 : vector<8x1xi32>
      %219 = vector.shape_cast %218 : vector<8x1xi1> to vector<8x1xi1>
      %220 = vector.broadcast %219 : vector<8x1xi1> to vector<8x128xi1>
      %221 = arith.select %220, %215, %179 : vector<8x128xi1>, vector<8x128xf32>
      %222 = vector.shape_cast %218 : vector<8x1xi1> to vector<8x1xi1>
      %223 = vector.broadcast %222 : vector<8x1xi1> to vector<8x128xi1>
      %224 = arith.select %223, %213, %182 : vector<8x128xi1>, vector<8x128xf32>
      %c5_i32 = arith.constant 5 : i32
      %225 = arith.index_cast %c5_i32 : i32 to index
      %c0_49 = arith.constant 0 : index
      %c0_50 = arith.constant 0 : index
      %226 = vector.load %arg4[%225, %c0_49, %c0_50] : memref<16x8x512xbf16, #tpu.memory_space<vmem>>, vector<1x8x512xbf16>
      %227 = vector.shape_cast %226 : vector<1x8x512xbf16> to vector<8x512xbf16>
      %228 = arith.extf %227 : vector<8x512xbf16> to vector<8x512xf32>
      %229 = arith.truncf %221 : vector<8x128xf32> to vector<8x128xbf16>
      %c0_51 = arith.constant 0 : index
      %c0_52 = arith.constant 0 : index
      %230 = vector.load %arg5[%c0_51, %c0_52] : memref<128x512xbf16, #tpu.memory_space<vmem>>, vector<128x512xbf16>
      %cst_53 = arith.constant dense<0.000000e+00> : vector<8x512xf32>
      %231 = tpu.matmul %229, %230, %cst_53 {dimension_numbers = #tpu.dot_dimension_numbers<[1], [0], [0], [1], [0, 0, 1, 1], [], []>} : vector<8x128xbf16>, vector<128x512xbf16>, vector<8x512xf32> -> vector<8x512xf32>
      %232 = arith.addf %228, %231 : vector<8x512xf32>
      %233 = vector.extract_strided_slice %232 {offsets = [0, 0], sizes = [8, 128], strides = [1, 1]} : vector<8x512xf32> to vector<8x128xf32>
      %234 = arith.negf %233 : vector<8x128xf32>
      %235 = math.exp %234 : vector<8x128xf32>
      %cst_54 = arith.constant 1.000000e+00 : f32
      %236 = vector.broadcast %cst_54 : f32 to vector<8x128xf32>
      %237 = arith.addf %236, %235 : vector<8x128xf32>
      %238 = arith.divf %236, %237 : vector<8x128xf32>
      %239 = vector.extract_strided_slice %232 {offsets = [0, 128], sizes = [8, 128], strides = [1, 1]} : vector<8x512xf32> to vector<8x128xf32>
      %240 = arith.negf %239 : vector<8x128xf32>
      %241 = math.exp %240 : vector<8x128xf32>
      %cst_55 = arith.constant 1.000000e+00 : f32
      %242 = vector.broadcast %cst_55 : f32 to vector<8x128xf32>
      %243 = arith.addf %242, %241 : vector<8x128xf32>
      %244 = arith.divf %242, %243 : vector<8x128xf32>
      %245 = vector.extract_strided_slice %232 {offsets = [0, 256], sizes = [8, 128], strides = [1, 1]} : vector<8x512xf32> to vector<8x128xf32>
      %246 = math.tanh %245 : vector<8x128xf32>
      %247 = vector.extract_strided_slice %232 {offsets = [0, 384], sizes = [8, 128], strides = [1, 1]} : vector<8x512xf32> to vector<8x128xf32>
      %248 = arith.negf %247 : vector<8x128xf32>
      %249 = math.exp %248 : vector<8x128xf32>
      %cst_56 = arith.constant 1.000000e+00 : f32
      %250 = vector.broadcast %cst_56 : f32 to vector<8x128xf32>
      %251 = arith.addf %250, %249 : vector<8x128xf32>
      %252 = arith.divf %250, %251 : vector<8x128xf32>
      %253 = arith.mulf %244, %224 : vector<8x128xf32>
      %254 = arith.mulf %238, %246 : vector<8x128xf32>
      %255 = arith.addf %253, %254 : vector<8x128xf32>
      %256 = math.tanh %255 : vector<8x128xf32>
      %257 = arith.mulf %252, %256 : vector<8x128xf32>
      %258 = arith.addi %3, %c5_i32 : i32
      %259 = vector.broadcast %258 : i32 to vector<8x1xi32>
      %260 = arith.cmpi sgt, %12, %259 : vector<8x1xi32>
      %261 = vector.shape_cast %260 : vector<8x1xi1> to vector<8x1xi1>
      %262 = vector.broadcast %261 : vector<8x1xi1> to vector<8x128xi1>
      %263 = arith.select %262, %257, %221 : vector<8x128xi1>, vector<8x128xf32>
      %264 = vector.shape_cast %260 : vector<8x1xi1> to vector<8x1xi1>
      %265 = vector.broadcast %264 : vector<8x1xi1> to vector<8x128xi1>
      %266 = arith.select %265, %255, %224 : vector<8x128xi1>, vector<8x128xf32>
      %c6_i32 = arith.constant 6 : i32
      %267 = arith.index_cast %c6_i32 : i32 to index
      %c0_57 = arith.constant 0 : index
      %c0_58 = arith.constant 0 : index
      %268 = vector.load %arg4[%267, %c0_57, %c0_58] : memref<16x8x512xbf16, #tpu.memory_space<vmem>>, vector<1x8x512xbf16>
      %269 = vector.shape_cast %268 : vector<1x8x512xbf16> to vector<8x512xbf16>
      %270 = arith.extf %269 : vector<8x512xbf16> to vector<8x512xf32>
      %271 = arith.truncf %263 : vector<8x128xf32> to vector<8x128xbf16>
      %c0_59 = arith.constant 0 : index
      %c0_60 = arith.constant 0 : index
      %272 = vector.load %arg5[%c0_59, %c0_60] : memref<128x512xbf16, #tpu.memory_space<vmem>>, vector<128x512xbf16>
      %cst_61 = arith.constant dense<0.000000e+00> : vector<8x512xf32>
      %273 = tpu.matmul %271, %272, %cst_61 {dimension_numbers = #tpu.dot_dimension_numbers<[1], [0], [0], [1], [0, 0, 1, 1], [], []>} : vector<8x128xbf16>, vector<128x512xbf16>, vector<8x512xf32> -> vector<8x512xf32>
      %274 = arith.addf %270, %273 : vector<8x512xf32>
      %275 = vector.extract_strided_slice %274 {offsets = [0, 0], sizes = [8, 128], strides = [1, 1]} : vector<8x512xf32> to vector<8x128xf32>
      %276 = arith.negf %275 : vector<8x128xf32>
      %277 = math.exp %276 : vector<8x128xf32>
      %cst_62 = arith.constant 1.000000e+00 : f32
      %278 = vector.broadcast %cst_62 : f32 to vector<8x128xf32>
      %279 = arith.addf %278, %277 : vector<8x128xf32>
      %280 = arith.divf %278, %279 : vector<8x128xf32>
      %281 = vector.extract_strided_slice %274 {offsets = [0, 128], sizes = [8, 128], strides = [1, 1]} : vector<8x512xf32> to vector<8x128xf32>
      %282 = arith.negf %281 : vector<8x128xf32>
      %283 = math.exp %282 : vector<8x128xf32>
      %cst_63 = arith.constant 1.000000e+00 : f32
      %284 = vector.broadcast %cst_63 : f32 to vector<8x128xf32>
      %285 = arith.addf %284, %283 : vector<8x128xf32>
      %286 = arith.divf %284, %285 : vector<8x128xf32>
      %287 = vector.extract_strided_slice %274 {offsets = [0, 256], sizes = [8, 128], strides = [1, 1]} : vector<8x512xf32> to vector<8x128xf32>
      %288 = math.tanh %287 : vector<8x128xf32>
      %289 = vector.extract_strided_slice %274 {offsets = [0, 384], sizes = [8, 128], strides = [1, 1]} : vector<8x512xf32> to vector<8x128xf32>
      %290 = arith.negf %289 : vector<8x128xf32>
      %291 = math.exp %290 : vector<8x128xf32>
      %cst_64 = arith.constant 1.000000e+00 : f32
      %292 = vector.broadcast %cst_64 : f32 to vector<8x128xf32>
      %293 = arith.addf %292, %291 : vector<8x128xf32>
      %294 = arith.divf %292, %293 : vector<8x128xf32>
      %295 = arith.mulf %286, %266 : vector<8x128xf32>
      %296 = arith.mulf %280, %288 : vector<8x128xf32>
      %297 = arith.addf %295, %296 : vector<8x128xf32>
      %298 = math.tanh %297 : vector<8x128xf32>
      %299 = arith.mulf %294, %298 : vector<8x128xf32>
      %300 = arith.addi %3, %c6_i32 : i32
      %301 = vector.broadcast %300 : i32 to vector<8x1xi32>
      %302 = arith.cmpi sgt, %12, %301 : vector<8x1xi32>
      %303 = vector.shape_cast %302 : vector<8x1xi1> to vector<8x1xi1>
      %304 = vector.broadcast %303 : vector<8x1xi1> to vector<8x128xi1>
      %305 = arith.select %304, %299, %263 : vector<8x128xi1>, vector<8x128xf32>
      %306 = vector.shape_cast %302 : vector<8x1xi1> to vector<8x1xi1>
      %307 = vector.broadcast %306 : vector<8x1xi1> to vector<8x128xi1>
      %308 = arith.select %307, %297, %266 : vector<8x128xi1>, vector<8x128xf32>
      %c7_i32 = arith.constant 7 : i32
      %309 = arith.index_cast %c7_i32 : i32 to index
      %c0_65 = arith.constant 0 : index
      %c0_66 = arith.constant 0 : index
      %310 = vector.load %arg4[%309, %c0_65, %c0_66] : memref<16x8x512xbf16, #tpu.memory_space<vmem>>, vector<1x8x512xbf16>
      %311 = vector.shape_cast %310 : vector<1x8x512xbf16> to vector<8x512xbf16>
      %312 = arith.extf %311 : vector<8x512xbf16> to vector<8x512xf32>
      %313 = arith.truncf %305 : vector<8x128xf32> to vector<8x128xbf16>
      %c0_67 = arith.constant 0 : index
      %c0_68 = arith.constant 0 : index
      %314 = vector.load %arg5[%c0_67, %c0_68] : memref<128x512xbf16, #tpu.memory_space<vmem>>, vector<128x512xbf16>
      %cst_69 = arith.constant dense<0.000000e+00> : vector<8x512xf32>
      %315 = tpu.matmul %313, %314, %cst_69 {dimension_numbers = #tpu.dot_dimension_numbers<[1], [0], [0], [1], [0, 0, 1, 1], [], []>} : vector<8x128xbf16>, vector<128x512xbf16>, vector<8x512xf32> -> vector<8x512xf32>
      %316 = arith.addf %312, %315 : vector<8x512xf32>
      %317 = vector.extract_strided_slice %316 {offsets = [0, 0], sizes = [8, 128], strides = [1, 1]} : vector<8x512xf32> to vector<8x128xf32>
      %318 = arith.negf %317 : vector<8x128xf32>
      %319 = math.exp %318 : vector<8x128xf32>
      %cst_70 = arith.constant 1.000000e+00 : f32
      %320 = vector.broadcast %cst_70 : f32 to vector<8x128xf32>
      %321 = arith.addf %320, %319 : vector<8x128xf32>
      %322 = arith.divf %320, %321 : vector<8x128xf32>
      %323 = vector.extract_strided_slice %316 {offsets = [0, 128], sizes = [8, 128], strides = [1, 1]} : vector<8x512xf32> to vector<8x128xf32>
      %324 = arith.negf %323 : vector<8x128xf32>
      %325 = math.exp %324 : vector<8x128xf32>
      %cst_71 = arith.constant 1.000000e+00 : f32
      %326 = vector.broadcast %cst_71 : f32 to vector<8x128xf32>
      %327 = arith.addf %326, %325 : vector<8x128xf32>
      %328 = arith.divf %326, %327 : vector<8x128xf32>
      %329 = vector.extract_strided_slice %316 {offsets = [0, 256], sizes = [8, 128], strides = [1, 1]} : vector<8x512xf32> to vector<8x128xf32>
      %330 = math.tanh %329 : vector<8x128xf32>
      %331 = vector.extract_strided_slice %316 {offsets = [0, 384], sizes = [8, 128], strides = [1, 1]} : vector<8x512xf32> to vector<8x128xf32>
      %332 = arith.negf %331 : vector<8x128xf32>
      %333 = math.exp %332 : vector<8x128xf32>
      %cst_72 = arith.constant 1.000000e+00 : f32
      %334 = vector.broadcast %cst_72 : f32 to vector<8x128xf32>
      %335 = arith.addf %334, %333 : vector<8x128xf32>
      %336 = arith.divf %334, %335 : vector<8x128xf32>
      %337 = arith.mulf %328, %308 : vector<8x128xf32>
      %338 = arith.mulf %322, %330 : vector<8x128xf32>
      %339 = arith.addf %337, %338 : vector<8x128xf32>
      %340 = math.tanh %339 : vector<8x128xf32>
      %341 = arith.mulf %336, %340 : vector<8x128xf32>
      %342 = arith.addi %3, %c7_i32 : i32
      %343 = vector.broadcast %342 : i32 to vector<8x1xi32>
      %344 = arith.cmpi sgt, %12, %343 : vector<8x1xi32>
      %345 = vector.shape_cast %344 : vector<8x1xi1> to vector<8x1xi1>
      %346 = vector.broadcast %345 : vector<8x1xi1> to vector<8x128xi1>
      %347 = arith.select %346, %341, %305 : vector<8x128xi1>, vector<8x128xf32>
      %348 = vector.shape_cast %344 : vector<8x1xi1> to vector<8x1xi1>
      %349 = vector.broadcast %348 : vector<8x1xi1> to vector<8x128xi1>
      %350 = arith.select %349, %339, %308 : vector<8x128xi1>, vector<8x128xf32>
      %c8_i32 = arith.constant 8 : i32
      %351 = arith.index_cast %c8_i32 : i32 to index
      %c0_73 = arith.constant 0 : index
      %c0_74 = arith.constant 0 : index
      %352 = vector.load %arg4[%351, %c0_73, %c0_74] : memref<16x8x512xbf16, #tpu.memory_space<vmem>>, vector<1x8x512xbf16>
      %353 = vector.shape_cast %352 : vector<1x8x512xbf16> to vector<8x512xbf16>
      %354 = arith.extf %353 : vector<8x512xbf16> to vector<8x512xf32>
      %355 = arith.truncf %347 : vector<8x128xf32> to vector<8x128xbf16>
      %c0_75 = arith.constant 0 : index
      %c0_76 = arith.constant 0 : index
      %356 = vector.load %arg5[%c0_75, %c0_76] : memref<128x512xbf16, #tpu.memory_space<vmem>>, vector<128x512xbf16>
      %cst_77 = arith.constant dense<0.000000e+00> : vector<8x512xf32>
      %357 = tpu.matmul %355, %356, %cst_77 {dimension_numbers = #tpu.dot_dimension_numbers<[1], [0], [0], [1], [0, 0, 1, 1], [], []>} : vector<8x128xbf16>, vector<128x512xbf16>, vector<8x512xf32> -> vector<8x512xf32>
      %358 = arith.addf %354, %357 : vector<8x512xf32>
      %359 = vector.extract_strided_slice %358 {offsets = [0, 0], sizes = [8, 128], strides = [1, 1]} : vector<8x512xf32> to vector<8x128xf32>
      %360 = arith.negf %359 : vector<8x128xf32>
      %361 = math.exp %360 : vector<8x128xf32>
      %cst_78 = arith.constant 1.000000e+00 : f32
      %362 = vector.broadcast %cst_78 : f32 to vector<8x128xf32>
      %363 = arith.addf %362, %361 : vector<8x128xf32>
      %364 = arith.divf %362, %363 : vector<8x128xf32>
      %365 = vector.extract_strided_slice %358 {offsets = [0, 128], sizes = [8, 128], strides = [1, 1]} : vector<8x512xf32> to vector<8x128xf32>
      %366 = arith.negf %365 : vector<8x128xf32>
      %367 = math.exp %366 : vector<8x128xf32>
      %cst_79 = arith.constant 1.000000e+00 : f32
      %368 = vector.broadcast %cst_79 : f32 to vector<8x128xf32>
      %369 = arith.addf %368, %367 : vector<8x128xf32>
      %370 = arith.divf %368, %369 : vector<8x128xf32>
      %371 = vector.extract_strided_slice %358 {offsets = [0, 256], sizes = [8, 128], strides = [1, 1]} : vector<8x512xf32> to vector<8x128xf32>
      %372 = math.tanh %371 : vector<8x128xf32>
      %373 = vector.extract_strided_slice %358 {offsets = [0, 384], sizes = [8, 128], strides = [1, 1]} : vector<8x512xf32> to vector<8x128xf32>
      %374 = arith.negf %373 : vector<8x128xf32>
      %375 = math.exp %374 : vector<8x128xf32>
      %cst_80 = arith.constant 1.000000e+00 : f32
      %376 = vector.broadcast %cst_80 : f32 to vector<8x128xf32>
      %377 = arith.addf %376, %375 : vector<8x128xf32>
      %378 = arith.divf %376, %377 : vector<8x128xf32>
      %379 = arith.mulf %370, %350 : vector<8x128xf32>
      %380 = arith.mulf %364, %372 : vector<8x128xf32>
      %381 = arith.addf %379, %380 : vector<8x128xf32>
      %382 = math.tanh %381 : vector<8x128xf32>
      %383 = arith.mulf %378, %382 : vector<8x128xf32>
      %384 = arith.addi %3, %c8_i32 : i32
      %385 = vector.broadcast %384 : i32 to vector<8x1xi32>
      %386 = arith.cmpi sgt, %12, %385 : vector<8x1xi32>
      %387 = vector.shape_cast %386 : vector<8x1xi1> to vector<8x1xi1>
      %388 = vector.broadcast %387 : vector<8x1xi1> to vector<8x128xi1>
      %389 = arith.select %388, %383, %347 : vector<8x128xi1>, vector<8x128xf32>
      %390 = vector.shape_cast %386 : vector<8x1xi1> to vector<8x1xi1>
      %391 = vector.broadcast %390 : vector<8x1xi1> to vector<8x128xi1>
      %392 = arith.select %391, %381, %350 : vector<8x128xi1>, vector<8x128xf32>
      %c9_i32 = arith.constant 9 : i32
      %393 = arith.index_cast %c9_i32 : i32 to index
      %c0_81 = arith.constant 0 : index
      %c0_82 = arith.constant 0 : index
      %394 = vector.load %arg4[%393, %c0_81, %c0_82] : memref<16x8x512xbf16, #tpu.memory_space<vmem>>, vector<1x8x512xbf16>
      %395 = vector.shape_cast %394 : vector<1x8x512xbf16> to vector<8x512xbf16>
      %396 = arith.extf %395 : vector<8x512xbf16> to vector<8x512xf32>
      %397 = arith.truncf %389 : vector<8x128xf32> to vector<8x128xbf16>
      %c0_83 = arith.constant 0 : index
      %c0_84 = arith.constant 0 : index
      %398 = vector.load %arg5[%c0_83, %c0_84] : memref<128x512xbf16, #tpu.memory_space<vmem>>, vector<128x512xbf16>
      %cst_85 = arith.constant dense<0.000000e+00> : vector<8x512xf32>
      %399 = tpu.matmul %397, %398, %cst_85 {dimension_numbers = #tpu.dot_dimension_numbers<[1], [0], [0], [1], [0, 0, 1, 1], [], []>} : vector<8x128xbf16>, vector<128x512xbf16>, vector<8x512xf32> -> vector<8x512xf32>
      %400 = arith.addf %396, %399 : vector<8x512xf32>
      %401 = vector.extract_strided_slice %400 {offsets = [0, 0], sizes = [8, 128], strides = [1, 1]} : vector<8x512xf32> to vector<8x128xf32>
      %402 = arith.negf %401 : vector<8x128xf32>
      %403 = math.exp %402 : vector<8x128xf32>
      %cst_86 = arith.constant 1.000000e+00 : f32
      %404 = vector.broadcast %cst_86 : f32 to vector<8x128xf32>
      %405 = arith.addf %404, %403 : vector<8x128xf32>
      %406 = arith.divf %404, %405 : vector<8x128xf32>
      %407 = vector.extract_strided_slice %400 {offsets = [0, 128], sizes = [8, 128], strides = [1, 1]} : vector<8x512xf32> to vector<8x128xf32>
      %408 = arith.negf %407 : vector<8x128xf32>
      %409 = math.exp %408 : vector<8x128xf32>
      %cst_87 = arith.constant 1.000000e+00 : f32
      %410 = vector.broadcast %cst_87 : f32 to vector<8x128xf32>
      %411 = arith.addf %410, %409 : vector<8x128xf32>
      %412 = arith.divf %410, %411 : vector<8x128xf32>
      %413 = vector.extract_strided_slice %400 {offsets = [0, 256], sizes = [8, 128], strides = [1, 1]} : vector<8x512xf32> to vector<8x128xf32>
      %414 = math.tanh %413 : vector<8x128xf32>
      %415 = vector.extract_strided_slice %400 {offsets = [0, 384], sizes = [8, 128], strides = [1, 1]} : vector<8x512xf32> to vector<8x128xf32>
      %416 = arith.negf %415 : vector<8x128xf32>
      %417 = math.exp %416 : vector<8x128xf32>
      %cst_88 = arith.constant 1.000000e+00 : f32
      %418 = vector.broadcast %cst_88 : f32 to vector<8x128xf32>
      %419 = arith.addf %418, %417 : vector<8x128xf32>
      %420 = arith.divf %418, %419 : vector<8x128xf32>
      %421 = arith.mulf %412, %392 : vector<8x128xf32>
      %422 = arith.mulf %406, %414 : vector<8x128xf32>
      %423 = arith.addf %421, %422 : vector<8x128xf32>
      %424 = math.tanh %423 : vector<8x128xf32>
      %425 = arith.mulf %420, %424 : vector<8x128xf32>
      %426 = arith.addi %3, %c9_i32 : i32
      %427 = vector.broadcast %426 : i32 to vector<8x1xi32>
      %428 = arith.cmpi sgt, %12, %427 : vector<8x1xi32>
      %429 = vector.shape_cast %428 : vector<8x1xi1> to vector<8x1xi1>
      %430 = vector.broadcast %429 : vector<8x1xi1> to vector<8x128xi1>
      %431 = arith.select %430, %425, %389 : vector<8x128xi1>, vector<8x128xf32>
      %432 = vector.shape_cast %428 : vector<8x1xi1> to vector<8x1xi1>
      %433 = vector.broadcast %432 : vector<8x1xi1> to vector<8x128xi1>
      %434 = arith.select %433, %423, %392 : vector<8x128xi1>, vector<8x128xf32>
      %c10_i32 = arith.constant 10 : i32
      %435 = arith.index_cast %c10_i32 : i32 to index
      %c0_89 = arith.constant 0 : index
      %c0_90 = arith.constant 0 : index
      %436 = vector.load %arg4[%435, %c0_89, %c0_90] : memref<16x8x512xbf16, #tpu.memory_space<vmem>>, vector<1x8x512xbf16>
      %437 = vector.shape_cast %436 : vector<1x8x512xbf16> to vector<8x512xbf16>
      %438 = arith.extf %437 : vector<8x512xbf16> to vector<8x512xf32>
      %439 = arith.truncf %431 : vector<8x128xf32> to vector<8x128xbf16>
      %c0_91 = arith.constant 0 : index
      %c0_92 = arith.constant 0 : index
      %440 = vector.load %arg5[%c0_91, %c0_92] : memref<128x512xbf16, #tpu.memory_space<vmem>>, vector<128x512xbf16>
      %cst_93 = arith.constant dense<0.000000e+00> : vector<8x512xf32>
      %441 = tpu.matmul %439, %440, %cst_93 {dimension_numbers = #tpu.dot_dimension_numbers<[1], [0], [0], [1], [0, 0, 1, 1], [], []>} : vector<8x128xbf16>, vector<128x512xbf16>, vector<8x512xf32> -> vector<8x512xf32>
      %442 = arith.addf %438, %441 : vector<8x512xf32>
      %443 = vector.extract_strided_slice %442 {offsets = [0, 0], sizes = [8, 128], strides = [1, 1]} : vector<8x512xf32> to vector<8x128xf32>
      %444 = arith.negf %443 : vector<8x128xf32>
      %445 = math.exp %444 : vector<8x128xf32>
      %cst_94 = arith.constant 1.000000e+00 : f32
      %446 = vector.broadcast %cst_94 : f32 to vector<8x128xf32>
      %447 = arith.addf %446, %445 : vector<8x128xf32>
      %448 = arith.divf %446, %447 : vector<8x128xf32>
      %449 = vector.extract_strided_slice %442 {offsets = [0, 128], sizes = [8, 128], strides = [1, 1]} : vector<8x512xf32> to vector<8x128xf32>
      %450 = arith.negf %449 : vector<8x128xf32>
      %451 = math.exp %450 : vector<8x128xf32>
      %cst_95 = arith.constant 1.000000e+00 : f32
      %452 = vector.broadcast %cst_95 : f32 to vector<8x128xf32>
      %453 = arith.addf %452, %451 : vector<8x128xf32>
      %454 = arith.divf %452, %453 : vector<8x128xf32>
      %455 = vector.extract_strided_slice %442 {offsets = [0, 256], sizes = [8, 128], strides = [1, 1]} : vector<8x512xf32> to vector<8x128xf32>
      %456 = math.tanh %455 : vector<8x128xf32>
      %457 = vector.extract_strided_slice %442 {offsets = [0, 384], sizes = [8, 128], strides = [1, 1]} : vector<8x512xf32> to vector<8x128xf32>
      %458 = arith.negf %457 : vector<8x128xf32>
      %459 = math.exp %458 : vector<8x128xf32>
      %cst_96 = arith.constant 1.000000e+00 : f32
      %460 = vector.broadcast %cst_96 : f32 to vector<8x128xf32>
      %461 = arith.addf %460, %459 : vector<8x128xf32>
      %462 = arith.divf %460, %461 : vector<8x128xf32>
      %463 = arith.mulf %454, %434 : vector<8x128xf32>
      %464 = arith.mulf %448, %456 : vector<8x128xf32>
      %465 = arith.addf %463, %464 : vector<8x128xf32>
      %466 = math.tanh %465 : vector<8x128xf32>
      %467 = arith.mulf %462, %466 : vector<8x128xf32>
      %468 = arith.addi %3, %c10_i32 : i32
      %469 = vector.broadcast %468 : i32 to vector<8x1xi32>
      %470 = arith.cmpi sgt, %12, %469 : vector<8x1xi32>
      %471 = vector.shape_cast %470 : vector<8x1xi1> to vector<8x1xi1>
      %472 = vector.broadcast %471 : vector<8x1xi1> to vector<8x128xi1>
      %473 = arith.select %472, %467, %431 : vector<8x128xi1>, vector<8x128xf32>
      %474 = vector.shape_cast %470 : vector<8x1xi1> to vector<8x1xi1>
      %475 = vector.broadcast %474 : vector<8x1xi1> to vector<8x128xi1>
      %476 = arith.select %475, %465, %434 : vector<8x128xi1>, vector<8x128xf32>
      %c11_i32 = arith.constant 11 : i32
      %477 = arith.index_cast %c11_i32 : i32 to index
      %c0_97 = arith.constant 0 : index
      %c0_98 = arith.constant 0 : index
      %478 = vector.load %arg4[%477, %c0_97, %c0_98] : memref<16x8x512xbf16, #tpu.memory_space<vmem>>, vector<1x8x512xbf16>
      %479 = vector.shape_cast %478 : vector<1x8x512xbf16> to vector<8x512xbf16>
      %480 = arith.extf %479 : vector<8x512xbf16> to vector<8x512xf32>
      %481 = arith.truncf %473 : vector<8x128xf32> to vector<8x128xbf16>
      %c0_99 = arith.constant 0 : index
      %c0_100 = arith.constant 0 : index
      %482 = vector.load %arg5[%c0_99, %c0_100] : memref<128x512xbf16, #tpu.memory_space<vmem>>, vector<128x512xbf16>
      %cst_101 = arith.constant dense<0.000000e+00> : vector<8x512xf32>
      %483 = tpu.matmul %481, %482, %cst_101 {dimension_numbers = #tpu.dot_dimension_numbers<[1], [0], [0], [1], [0, 0, 1, 1], [], []>} : vector<8x128xbf16>, vector<128x512xbf16>, vector<8x512xf32> -> vector<8x512xf32>
      %484 = arith.addf %480, %483 : vector<8x512xf32>
      %485 = vector.extract_strided_slice %484 {offsets = [0, 0], sizes = [8, 128], strides = [1, 1]} : vector<8x512xf32> to vector<8x128xf32>
      %486 = arith.negf %485 : vector<8x128xf32>
      %487 = math.exp %486 : vector<8x128xf32>
      %cst_102 = arith.constant 1.000000e+00 : f32
      %488 = vector.broadcast %cst_102 : f32 to vector<8x128xf32>
      %489 = arith.addf %488, %487 : vector<8x128xf32>
      %490 = arith.divf %488, %489 : vector<8x128xf32>
      %491 = vector.extract_strided_slice %484 {offsets = [0, 128], sizes = [8, 128], strides = [1, 1]} : vector<8x512xf32> to vector<8x128xf32>
      %492 = arith.negf %491 : vector<8x128xf32>
      %493 = math.exp %492 : vector<8x128xf32>
      %cst_103 = arith.constant 1.000000e+00 : f32
      %494 = vector.broadcast %cst_103 : f32 to vector<8x128xf32>
      %495 = arith.addf %494, %493 : vector<8x128xf32>
      %496 = arith.divf %494, %495 : vector<8x128xf32>
      %497 = vector.extract_strided_slice %484 {offsets = [0, 256], sizes = [8, 128], strides = [1, 1]} : vector<8x512xf32> to vector<8x128xf32>
      %498 = math.tanh %497 : vector<8x128xf32>
      %499 = vector.extract_strided_slice %484 {offsets = [0, 384], sizes = [8, 128], strides = [1, 1]} : vector<8x512xf32> to vector<8x128xf32>
      %500 = arith.negf %499 : vector<8x128xf32>
      %501 = math.exp %500 : vector<8x128xf32>
      %cst_104 = arith.constant 1.000000e+00 : f32
      %502 = vector.broadcast %cst_104 : f32 to vector<8x128xf32>
      %503 = arith.addf %502, %501 : vector<8x128xf32>
      %504 = arith.divf %502, %503 : vector<8x128xf32>
      %505 = arith.mulf %496, %476 : vector<8x128xf32>
      %506 = arith.mulf %490, %498 : vector<8x128xf32>
      %507 = arith.addf %505, %506 : vector<8x128xf32>
      %508 = math.tanh %507 : vector<8x128xf32>
      %509 = arith.mulf %504, %508 : vector<8x128xf32>
      %510 = arith.addi %3, %c11_i32 : i32
      %511 = vector.broadcast %510 : i32 to vector<8x1xi32>
      %512 = arith.cmpi sgt, %12, %511 : vector<8x1xi32>
      %513 = vector.shape_cast %512 : vector<8x1xi1> to vector<8x1xi1>
      %514 = vector.broadcast %513 : vector<8x1xi1> to vector<8x128xi1>
      %515 = arith.select %514, %509, %473 : vector<8x128xi1>, vector<8x128xf32>
      %516 = vector.shape_cast %512 : vector<8x1xi1> to vector<8x1xi1>
      %517 = vector.broadcast %516 : vector<8x1xi1> to vector<8x128xi1>
      %518 = arith.select %517, %507, %476 : vector<8x128xi1>, vector<8x128xf32>
      %c12_i32 = arith.constant 12 : i32
      %519 = arith.index_cast %c12_i32 : i32 to index
      %c0_105 = arith.constant 0 : index
      %c0_106 = arith.constant 0 : index
      %520 = vector.load %arg4[%519, %c0_105, %c0_106] : memref<16x8x512xbf16, #tpu.memory_space<vmem>>, vector<1x8x512xbf16>
      %521 = vector.shape_cast %520 : vector<1x8x512xbf16> to vector<8x512xbf16>
      %522 = arith.extf %521 : vector<8x512xbf16> to vector<8x512xf32>
      %523 = arith.truncf %515 : vector<8x128xf32> to vector<8x128xbf16>
      %c0_107 = arith.constant 0 : index
      %c0_108 = arith.constant 0 : index
      %524 = vector.load %arg5[%c0_107, %c0_108] : memref<128x512xbf16, #tpu.memory_space<vmem>>, vector<128x512xbf16>
      %cst_109 = arith.constant dense<0.000000e+00> : vector<8x512xf32>
      %525 = tpu.matmul %523, %524, %cst_109 {dimension_numbers = #tpu.dot_dimension_numbers<[1], [0], [0], [1], [0, 0, 1, 1], [], []>} : vector<8x128xbf16>, vector<128x512xbf16>, vector<8x512xf32> -> vector<8x512xf32>
      %526 = arith.addf %522, %525 : vector<8x512xf32>
      %527 = vector.extract_strided_slice %526 {offsets = [0, 0], sizes = [8, 128], strides = [1, 1]} : vector<8x512xf32> to vector<8x128xf32>
      %528 = arith.negf %527 : vector<8x128xf32>
      %529 = math.exp %528 : vector<8x128xf32>
      %cst_110 = arith.constant 1.000000e+00 : f32
      %530 = vector.broadcast %cst_110 : f32 to vector<8x128xf32>
      %531 = arith.addf %530, %529 : vector<8x128xf32>
      %532 = arith.divf %530, %531 : vector<8x128xf32>
      %533 = vector.extract_strided_slice %526 {offsets = [0, 128], sizes = [8, 128], strides = [1, 1]} : vector<8x512xf32> to vector<8x128xf32>
      %534 = arith.negf %533 : vector<8x128xf32>
      %535 = math.exp %534 : vector<8x128xf32>
      %cst_111 = arith.constant 1.000000e+00 : f32
      %536 = vector.broadcast %cst_111 : f32 to vector<8x128xf32>
      %537 = arith.addf %536, %535 : vector<8x128xf32>
      %538 = arith.divf %536, %537 : vector<8x128xf32>
      %539 = vector.extract_strided_slice %526 {offsets = [0, 256], sizes = [8, 128], strides = [1, 1]} : vector<8x512xf32> to vector<8x128xf32>
      %540 = math.tanh %539 : vector<8x128xf32>
      %541 = vector.extract_strided_slice %526 {offsets = [0, 384], sizes = [8, 128], strides = [1, 1]} : vector<8x512xf32> to vector<8x128xf32>
      %542 = arith.negf %541 : vector<8x128xf32>
      %543 = math.exp %542 : vector<8x128xf32>
      %cst_112 = arith.constant 1.000000e+00 : f32
      %544 = vector.broadcast %cst_112 : f32 to vector<8x128xf32>
      %545 = arith.addf %544, %543 : vector<8x128xf32>
      %546 = arith.divf %544, %545 : vector<8x128xf32>
      %547 = arith.mulf %538, %518 : vector<8x128xf32>
      %548 = arith.mulf %532, %540 : vector<8x128xf32>
      %549 = arith.addf %547, %548 : vector<8x128xf32>
      %550 = math.tanh %549 : vector<8x128xf32>
      %551 = arith.mulf %546, %550 : vector<8x128xf32>
      %552 = arith.addi %3, %c12_i32 : i32
      %553 = vector.broadcast %552 : i32 to vector<8x1xi32>
      %554 = arith.cmpi sgt, %12, %553 : vector<8x1xi32>
      %555 = vector.shape_cast %554 : vector<8x1xi1> to vector<8x1xi1>
      %556 = vector.broadcast %555 : vector<8x1xi1> to vector<8x128xi1>
      %557 = arith.select %556, %551, %515 : vector<8x128xi1>, vector<8x128xf32>
      %558 = vector.shape_cast %554 : vector<8x1xi1> to vector<8x1xi1>
      %559 = vector.broadcast %558 : vector<8x1xi1> to vector<8x128xi1>
      %560 = arith.select %559, %549, %518 : vector<8x128xi1>, vector<8x128xf32>
      %c13_i32 = arith.constant 13 : i32
      %561 = arith.index_cast %c13_i32 : i32 to index
      %c0_113 = arith.constant 0 : index
      %c0_114 = arith.constant 0 : index
      %562 = vector.load %arg4[%561, %c0_113, %c0_114] : memref<16x8x512xbf16, #tpu.memory_space<vmem>>, vector<1x8x512xbf16>
      %563 = vector.shape_cast %562 : vector<1x8x512xbf16> to vector<8x512xbf16>
      %564 = arith.extf %563 : vector<8x512xbf16> to vector<8x512xf32>
      %565 = arith.truncf %557 : vector<8x128xf32> to vector<8x128xbf16>
      %c0_115 = arith.constant 0 : index
      %c0_116 = arith.constant 0 : index
      %566 = vector.load %arg5[%c0_115, %c0_116] : memref<128x512xbf16, #tpu.memory_space<vmem>>, vector<128x512xbf16>
      %cst_117 = arith.constant dense<0.000000e+00> : vector<8x512xf32>
      %567 = tpu.matmul %565, %566, %cst_117 {dimension_numbers = #tpu.dot_dimension_numbers<[1], [0], [0], [1], [0, 0, 1, 1], [], []>} : vector<8x128xbf16>, vector<128x512xbf16>, vector<8x512xf32> -> vector<8x512xf32>
      %568 = arith.addf %564, %567 : vector<8x512xf32>
      %569 = vector.extract_strided_slice %568 {offsets = [0, 0], sizes = [8, 128], strides = [1, 1]} : vector<8x512xf32> to vector<8x128xf32>
      %570 = arith.negf %569 : vector<8x128xf32>
      %571 = math.exp %570 : vector<8x128xf32>
      %cst_118 = arith.constant 1.000000e+00 : f32
      %572 = vector.broadcast %cst_118 : f32 to vector<8x128xf32>
      %573 = arith.addf %572, %571 : vector<8x128xf32>
      %574 = arith.divf %572, %573 : vector<8x128xf32>
      %575 = vector.extract_strided_slice %568 {offsets = [0, 128], sizes = [8, 128], strides = [1, 1]} : vector<8x512xf32> to vector<8x128xf32>
      %576 = arith.negf %575 : vector<8x128xf32>
      %577 = math.exp %576 : vector<8x128xf32>
      %cst_119 = arith.constant 1.000000e+00 : f32
      %578 = vector.broadcast %cst_119 : f32 to vector<8x128xf32>
      %579 = arith.addf %578, %577 : vector<8x128xf32>
      %580 = arith.divf %578, %579 : vector<8x128xf32>
      %581 = vector.extract_strided_slice %568 {offsets = [0, 256], sizes = [8, 128], strides = [1, 1]} : vector<8x512xf32> to vector<8x128xf32>
      %582 = math.tanh %581 : vector<8x128xf32>
      %583 = vector.extract_strided_slice %568 {offsets = [0, 384], sizes = [8, 128], strides = [1, 1]} : vector<8x512xf32> to vector<8x128xf32>
      %584 = arith.negf %583 : vector<8x128xf32>
      %585 = math.exp %584 : vector<8x128xf32>
      %cst_120 = arith.constant 1.000000e+00 : f32
      %586 = vector.broadcast %cst_120 : f32 to vector<8x128xf32>
      %587 = arith.addf %586, %585 : vector<8x128xf32>
      %588 = arith.divf %586, %587 : vector<8x128xf32>
      %589 = arith.mulf %580, %560 : vector<8x128xf32>
      %590 = arith.mulf %574, %582 : vector<8x128xf32>
      %591 = arith.addf %589, %590 : vector<8x128xf32>
      %592 = math.tanh %591 : vector<8x128xf32>
      %593 = arith.mulf %588, %592 : vector<8x128xf32>
      %594 = arith.addi %3, %c13_i32 : i32
      %595 = vector.broadcast %594 : i32 to vector<8x1xi32>
      %596 = arith.cmpi sgt, %12, %595 : vector<8x1xi32>
      %597 = vector.shape_cast %596 : vector<8x1xi1> to vector<8x1xi1>
      %598 = vector.broadcast %597 : vector<8x1xi1> to vector<8x128xi1>
      %599 = arith.select %598, %593, %557 : vector<8x128xi1>, vector<8x128xf32>
      %600 = vector.shape_cast %596 : vector<8x1xi1> to vector<8x1xi1>
      %601 = vector.broadcast %600 : vector<8x1xi1> to vector<8x128xi1>
      %602 = arith.select %601, %591, %560 : vector<8x128xi1>, vector<8x128xf32>
      %c14_i32 = arith.constant 14 : i32
      %603 = arith.index_cast %c14_i32 : i32 to index
      %c0_121 = arith.constant 0 : index
      %c0_122 = arith.constant 0 : index
      %604 = vector.load %arg4[%603, %c0_121, %c0_122] : memref<16x8x512xbf16, #tpu.memory_space<vmem>>, vector<1x8x512xbf16>
      %605 = vector.shape_cast %604 : vector<1x8x512xbf16> to vector<8x512xbf16>
      %606 = arith.extf %605 : vector<8x512xbf16> to vector<8x512xf32>
      %607 = arith.truncf %599 : vector<8x128xf32> to vector<8x128xbf16>
      %c0_123 = arith.constant 0 : index
      %c0_124 = arith.constant 0 : index
      %608 = vector.load %arg5[%c0_123, %c0_124] : memref<128x512xbf16, #tpu.memory_space<vmem>>, vector<128x512xbf16>
      %cst_125 = arith.constant dense<0.000000e+00> : vector<8x512xf32>
      %609 = tpu.matmul %607, %608, %cst_125 {dimension_numbers = #tpu.dot_dimension_numbers<[1], [0], [0], [1], [0, 0, 1, 1], [], []>} : vector<8x128xbf16>, vector<128x512xbf16>, vector<8x512xf32> -> vector<8x512xf32>
      %610 = arith.addf %606, %609 : vector<8x512xf32>
      %611 = vector.extract_strided_slice %610 {offsets = [0, 0], sizes = [8, 128], strides = [1, 1]} : vector<8x512xf32> to vector<8x128xf32>
      %612 = arith.negf %611 : vector<8x128xf32>
      %613 = math.exp %612 : vector<8x128xf32>
      %cst_126 = arith.constant 1.000000e+00 : f32
      %614 = vector.broadcast %cst_126 : f32 to vector<8x128xf32>
      %615 = arith.addf %614, %613 : vector<8x128xf32>
      %616 = arith.divf %614, %615 : vector<8x128xf32>
      %617 = vector.extract_strided_slice %610 {offsets = [0, 128], sizes = [8, 128], strides = [1, 1]} : vector<8x512xf32> to vector<8x128xf32>
      %618 = arith.negf %617 : vector<8x128xf32>
      %619 = math.exp %618 : vector<8x128xf32>
      %cst_127 = arith.constant 1.000000e+00 : f32
      %620 = vector.broadcast %cst_127 : f32 to vector<8x128xf32>
      %621 = arith.addf %620, %619 : vector<8x128xf32>
      %622 = arith.divf %620, %621 : vector<8x128xf32>
      %623 = vector.extract_strided_slice %610 {offsets = [0, 256], sizes = [8, 128], strides = [1, 1]} : vector<8x512xf32> to vector<8x128xf32>
      %624 = math.tanh %623 : vector<8x128xf32>
      %625 = vector.extract_strided_slice %610 {offsets = [0, 384], sizes = [8, 128], strides = [1, 1]} : vector<8x512xf32> to vector<8x128xf32>
      %626 = arith.negf %625 : vector<8x128xf32>
      %627 = math.exp %626 : vector<8x128xf32>
      %cst_128 = arith.constant 1.000000e+00 : f32
      %628 = vector.broadcast %cst_128 : f32 to vector<8x128xf32>
      %629 = arith.addf %628, %627 : vector<8x128xf32>
      %630 = arith.divf %628, %629 : vector<8x128xf32>
      %631 = arith.mulf %622, %602 : vector<8x128xf32>
      %632 = arith.mulf %616, %624 : vector<8x128xf32>
      %633 = arith.addf %631, %632 : vector<8x128xf32>
      %634 = math.tanh %633 : vector<8x128xf32>
      %635 = arith.mulf %630, %634 : vector<8x128xf32>
      %636 = arith.addi %3, %c14_i32 : i32
      %637 = vector.broadcast %636 : i32 to vector<8x1xi32>
      %638 = arith.cmpi sgt, %12, %637 : vector<8x1xi32>
      %639 = vector.shape_cast %638 : vector<8x1xi1> to vector<8x1xi1>
      %640 = vector.broadcast %639 : vector<8x1xi1> to vector<8x128xi1>
      %641 = arith.select %640, %635, %599 : vector<8x128xi1>, vector<8x128xf32>
      %642 = vector.shape_cast %638 : vector<8x1xi1> to vector<8x1xi1>
      %643 = vector.broadcast %642 : vector<8x1xi1> to vector<8x128xi1>
      %644 = arith.select %643, %633, %602 : vector<8x128xi1>, vector<8x128xf32>
      %c15_i32 = arith.constant 15 : i32
      %645 = arith.index_cast %c15_i32 : i32 to index
      %c0_129 = arith.constant 0 : index
      %c0_130 = arith.constant 0 : index
      %646 = vector.load %arg4[%645, %c0_129, %c0_130] : memref<16x8x512xbf16, #tpu.memory_space<vmem>>, vector<1x8x512xbf16>
      %647 = vector.shape_cast %646 : vector<1x8x512xbf16> to vector<8x512xbf16>
      %648 = arith.extf %647 : vector<8x512xbf16> to vector<8x512xf32>
      %649 = arith.truncf %641 : vector<8x128xf32> to vector<8x128xbf16>
      %c0_131 = arith.constant 0 : index
      %c0_132 = arith.constant 0 : index
      %650 = vector.load %arg5[%c0_131, %c0_132] : memref<128x512xbf16, #tpu.memory_space<vmem>>, vector<128x512xbf16>
      %cst_133 = arith.constant dense<0.000000e+00> : vector<8x512xf32>
      %651 = tpu.matmul %649, %650, %cst_133 {dimension_numbers = #tpu.dot_dimension_numbers<[1], [0], [0], [1], [0, 0, 1, 1], [], []>} : vector<8x128xbf16>, vector<128x512xbf16>, vector<8x512xf32> -> vector<8x512xf32>
      %652 = arith.addf %648, %651 : vector<8x512xf32>
      %653 = vector.extract_strided_slice %652 {offsets = [0, 0], sizes = [8, 128], strides = [1, 1]} : vector<8x512xf32> to vector<8x128xf32>
      %654 = arith.negf %653 : vector<8x128xf32>
      %655 = math.exp %654 : vector<8x128xf32>
      %cst_134 = arith.constant 1.000000e+00 : f32
      %656 = vector.broadcast %cst_134 : f32 to vector<8x128xf32>
      %657 = arith.addf %656, %655 : vector<8x128xf32>
      %658 = arith.divf %656, %657 : vector<8x128xf32>
      %659 = vector.extract_strided_slice %652 {offsets = [0, 128], sizes = [8, 128], strides = [1, 1]} : vector<8x512xf32> to vector<8x128xf32>
      %660 = arith.negf %659 : vector<8x128xf32>
      %661 = math.exp %660 : vector<8x128xf32>
      %cst_135 = arith.constant 1.000000e+00 : f32
      %662 = vector.broadcast %cst_135 : f32 to vector<8x128xf32>
      %663 = arith.addf %662, %661 : vector<8x128xf32>
      %664 = arith.divf %662, %663 : vector<8x128xf32>
      %665 = vector.extract_strided_slice %652 {offsets = [0, 256], sizes = [8, 128], strides = [1, 1]} : vector<8x512xf32> to vector<8x128xf32>
      %666 = math.tanh %665 : vector<8x128xf32>
      %667 = vector.extract_strided_slice %652 {offsets = [0, 384], sizes = [8, 128], strides = [1, 1]} : vector<8x512xf32> to vector<8x128xf32>
      %668 = arith.negf %667 : vector<8x128xf32>
      %669 = math.exp %668 : vector<8x128xf32>
      %cst_136 = arith.constant 1.000000e+00 : f32
      %670 = vector.broadcast %cst_136 : f32 to vector<8x128xf32>
      %671 = arith.addf %670, %669 : vector<8x128xf32>
      %672 = arith.divf %670, %671 : vector<8x128xf32>
      %673 = arith.mulf %664, %644 : vector<8x128xf32>
      %674 = arith.mulf %658, %666 : vector<8x128xf32>
      %675 = arith.addf %673, %674 : vector<8x128xf32>
      %676 = math.tanh %675 : vector<8x128xf32>
      %677 = arith.mulf %672, %676 : vector<8x128xf32>
      %678 = arith.addi %3, %c15_i32 : i32
      %679 = vector.broadcast %678 : i32 to vector<8x1xi32>
      %680 = arith.cmpi sgt, %12, %679 : vector<8x1xi32>
      %681 = vector.shape_cast %680 : vector<8x1xi1> to vector<8x1xi1>
      %682 = vector.broadcast %681 : vector<8x1xi1> to vector<8x128xi1>
      %683 = arith.select %682, %677, %641 : vector<8x128xi1>, vector<8x128xf32>
      %684 = vector.shape_cast %680 : vector<8x1xi1> to vector<8x1xi1>
      %685 = vector.broadcast %684 : vector<8x1xi1> to vector<8x128xi1>
      %686 = arith.select %685, %675, %644 : vector<8x128xi1>, vector<8x128xf32>
      %c16_i32_137 = arith.constant 16 : i32
      %c0_138 = arith.constant 0 : index
      %c0_139 = arith.constant 0 : index
      %687 = vector.load %arg9[%c0_138, %c0_139] : memref<8x128xf32, #tpu.memory_space<vmem>>, vector<8x128xf32>
      tpu.vector_store %arg9[%c0_138, %c0_139], %683 {strides = array<i32>} : memref<8x128xf32, #tpu.memory_space<vmem>>, vector<8x128xf32>,
      %c0_140 = arith.constant 0 : index
      %c0_141 = arith.constant 0 : index
      %688 = vector.load %arg10[%c0_140, %c0_141] : memref<8x128xf32, #tpu.memory_space<vmem>>, vector<8x128xf32>
      tpu.vector_store %arg10[%c0_140, %c0_141], %686 {strides = array<i32>} : memref<8x128xf32, #tpu.memory_space<vmem>>, vector<8x128xf32>,
    } else {
    }
    %c0_i32_2 = arith.constant 0 : i32
    %9 = arith.cmpi eq, %arg1, %c0_i32_2 : i32
    %10 = arith.extui %9 : i1 to i32
    %c0_i32_3 = arith.constant 0 : i32
    %11 = arith.cmpi ne, %10, %c0_i32_3 : i32
    scf.if %11 {
      %c0 = arith.constant 0 : index
      %c0_4 = arith.constant 0 : index
      %12 = vector.load %arg9[%c0, %c0_4] : memref<8x128xf32, #tpu.memory_space<vmem>>, vector<8x128xf32>
      %c0_5 = arith.constant 0 : index
      %c0_6 = arith.constant 0 : index
      %13 = vector.load %arg6[%c0_5, %c0_6] : memref<128x128xf32, #tpu.memory_space<vmem>>, vector<128x128xf32>
      %cst = arith.constant dense<0.000000e+00> : vector<8x128xf32>
      %14 = tpu.matmul %12, %13, %cst {dimension_numbers = #tpu.dot_dimension_numbers<[1], [0], [0], [1], [0, 0, 1, 1], [], []>} : vector<8x128xf32>, vector<128x128xf32>, vector<8x128xf32> -> vector<8x128xf32>
      %c0_7 = arith.constant 0 : index
      %c0_8 = arith.constant 0 : index
      %15 = vector.load %arg7[%c0_7, %c0_8] : memref<1x128xf32, #tpu.memory_space<vmem>>, vector<1x128xf32>
      %16 = vector.broadcast %15 : vector<1x128xf32> to vector<8x128xf32>
      %17 = arith.addf %14, %16 : vector<8x128xf32>
      %c0_9 = arith.constant 0 : index
      %c0_10 = arith.constant 0 : index
      %18 = vector.load %arg8[%c0_9, %c0_10] : memref<8x128xf32, #tpu.memory_space<vmem>>, vector<8x128xf32>
      tpu.vector_store %arg8[%c0_9, %c0_10], %17 {strides = array<i32>} : memref<8x128xf32, #tpu.memory_space<vmem>>, vector<8x128xf32>,
    } else {
    }
    return
  }
  func.func @transform_0(%arg0: i32, %arg1: i32, %arg2: memref<1xi32, #tpu.memory_space<smem>>) -> (i32, i32) {
    %c0_i32 = arith.constant 0 : i32
    %c0_i32_0 = arith.constant 0 : i32
    return %arg0, %c0_i32 : i32, i32
  }
  func.func @transform_1(%arg0: i32, %arg1: i32, %arg2: memref<1xi32, #tpu.memory_space<smem>>) -> (i32, i32, i32) {
    %c0_i32 = arith.constant 0 : i32
    %c0_i32_0 = arith.constant 0 : i32
    return %arg1, %arg0, %c0_i32 : i32, i32, i32
  }
  func.func @transform_2(%arg0: i32, %arg1: i32, %arg2: memref<1xi32, #tpu.memory_space<smem>>) -> (i32, i32) {
    %c0_i32 = arith.constant 0 : i32
    %c0_i32_0 = arith.constant 0 : i32
    %c0_i32_1 = arith.constant 0 : i32
    return %c0_i32, %c0_i32_0 : i32, i32
  }
  func.func @transform_3(%arg0: i32, %arg1: i32, %arg2: memref<1xi32, #tpu.memory_space<smem>>) -> (i32, i32) {
    %c0_i32 = arith.constant 0 : i32
    %c0_i32_0 = arith.constant 0 : i32
    %c0_i32_1 = arith.constant 0 : i32
    return %c0_i32, %c0_i32_0 : i32, i32
  }
  func.func @transform_4(%arg0: i32, %arg1: i32, %arg2: memref<1xi32, #tpu.memory_space<smem>>) -> (i32, i32) {
    %c0_i32 = arith.constant 0 : i32
    %c0_i32_0 = arith.constant 0 : i32
    %c0_i32_1 = arith.constant 0 : i32
    return %c0_i32, %c0_i32_0 : i32, i32
  }
  func.func @transform_5(%arg0: i32, %arg1: i32, %arg2: memref<1xi32, #tpu.memory_space<smem>>) -> (i32, i32) {
    %c0_i32 = arith.constant 0 : i32
    %c0_i32_0 = arith.constant 0 : i32
    return %arg0, %c0_i32 : i32, i32
  }
}

</mosaic_0001>

<bundles_post_ra>
// kernel: tpu_custom_call.1
= control target key start
LH: loop header
LB: loop body
LE: loop exit
PB: predicated region body
PF: predicated region fallthrough
CT: control target
= control target key end

     0   :  { %12 = vsyncpa [#allocation7], 0  ;;  %s4086_s0 = inlined_call_operand.<no memory space> [shape: s32[1], index: 0, kind: input, shape index: {}]   ;;  %s4087_s1 = inlined_call_operand.vmem [shape: s32[8,1], index: 1, kind: input, shape index: {}]   ;;  %s4088_s2 = inlined_call_operand.hbm [shape: bf16[16,8,512], index: 2, kind: input, shape index: {}]   ;;  %s4089_s3 = inlined_call_operand.hbm [shape: bf16[128,512], index: 3, kind: input, shape index: {}]   ;;  %s4090_s4 = inlined_call_operand.hbm [shape: f32[128,128], index: 4, kind: input, shape index: {}]   ;;  %s4091_s5 = inlined_call_operand.vmem [shape: f32[1,128], index: 5, kind: input, shape index: {}]   ;;  %s4092_s6 = inlined_call_operand.hbm [shape: f32[8,128], index: 6, kind: output, shape index: {}]  }
   0x1   :  { %13 = vsyncpa [#allocation10], 0 }
   0x2   :  { %14 = vsyncpa [#allocation8], 0  ;;  %s3069_s21 = smov [#allocation9]   ;;  %s3070_s23 = smov [#allocation6]  }
   0x3   :  { %s34_s22 = sshll.u32 %s3069_s21, 4  ;;  %s22_s24 = sshll.u32 %s3070_s23, 4  ;;  %s35_s22 = int_to_ptr.vmem [resolvable:$true] %s34_s22  ;;  %s3116_s24 = int_to_ptr.vmem [resolvable:$true] %s22_s24 }
   0x4   :  { %s2975_s27 = scalar_lea.hbm %s4089_s3, 4096 }
   0x5   :  { %p2976_p0 = scmp.ne.s32.totalorder %s4089_s3, %s2975_s27  ;;  %p2979_p1 = scmp.lt.u32.totalorder %s2975_s27, %s4089_s3 }
   0x7   :  { %p2981_p2 = pnand %p2979_p1, %p2976_p0 }
   0x9   :  { %2984 = shalt.err (!%p2981_p2)
}
   0xa   :  { %s2985_s8 = scalar_lea.vmem %s35_s22, 4096  ;;  %p2990_p4 = scmp.lt.s32.totalorder %s35_s22, %s35_s22 }
   0xb   :  { %p2986_p3 = scmp.ne.s32.totalorder %s35_s22, %s2985_s8  ;;  %p2991_p5 = scmp.lt.s32.totalorder %s2985_s8, %s2985_s8 }
   0xd   :  { %p2992_p6 = por %p2991_p5, %p2990_p4 }
   0xf   :  { %p2993_p7 = pnand %p2992_p6, %p2986_p3 }
  0x11   :  { %2996 = shalt.err (!%p2993_p7)
}
  0x12   :  { %s3071_s9 = smov 256   ;;  %s3072_s10 = smov 16  }
  0x13   :  { %40 = dma.hbm_to_vmem [thread:$0]  %s4089_s3, 4096, %s35_s22, [#allocation10], %s3071_s9, %s3071_s9, %s3072_s10  }
  0x14   :  { %s2997_s15 = scalar_lea.hbm %s4088_s2, 4096 }
  0x15   :  { %p2998_p8 = scmp.ne.s32.totalorder %s4088_s2, %s2997_s15  ;;  %p3001_p9 = scmp.lt.u32.totalorder %s2997_s15, %s4088_s2 }
  0x17   :  { %p3003_p10 = pnand %p3001_p9, %p2998_p8 }
  0x19   :  { %3006 = shalt.err (!%p3003_p10)
}
  0x1a   :  { %s3007_s20 = scalar_lea.vmem %s3116_s24, 4096  ;;  %p3012_p12 = scmp.lt.s32.totalorder %s3116_s24, %s3116_s24 }
  0x1b   :  { %p3008_p11 = scmp.ne.s32.totalorder %s3116_s24, %s3007_s20  ;;  %p3013_p13 = scmp.lt.s32.totalorder %s3007_s20, %s3007_s20 }
  0x1d   :  { %p3014_p0 = por %p3013_p13, %p3012_p12 }
  0x1f   :  { %p3015_p1 = pnand %p3014_p0, %p3008_p11 }
  0x21   :  { %3018 = shalt.err (!%p3015_p1)
}
  0x22   :  { %28 = dma.hbm_to_vmem [thread:$0]  %s4088_s2, 4096, %s3116_s24, [#allocation7], %s3071_s9, %s3071_s9, %s3072_s10  }
  0x23   :  { %s3073_s22 = smov [#allocation11]   ;;  %s3019_s27 = scalar_lea.hbm %s4090_s4, 2048 }
  0x24   :  { %s46_s23 = sshll.u32 %s3073_s22, 4  ;;  %p3020_p2 = scmp.ne.s32.totalorder %s4090_s4, %s3019_s27  ;;  %s47_s23 = int_to_ptr.vmem [resolvable:$true] %s46_s23 }
  0x25   :  { %p3023_p3 = scmp.lt.u32.totalorder %s3019_s27, %s4090_s4 }
  0x27   :  { %p3025_p4 = pnand %p3023_p3, %p3020_p2 }
  0x29   :  { %3028 = shalt.err (!%p3025_p4)
}
  0x2a   :  { %s3029_s8 = scalar_lea.vmem %s47_s23, 2048  ;;  %p3034_p6 = scmp.lt.s32.totalorder %s47_s23, %s47_s23 }
  0x2b   :  { %p3030_p5 = scmp.ne.s32.totalorder %s47_s23, %s3029_s8  ;;  %p3035_p7 = scmp.lt.s32.totalorder %s3029_s8, %s3029_s8 }
  0x2d   :  { %p3036_p8 = por %p3035_p7, %p3034_p6 }
  0x2f   :  { %p3037_p9 = pnand %p3036_p8, %p3030_p5 }
  0x31   :  { %3040 = shalt.err (!%p3037_p9)
}
  0x32   :  { %s3074_s2 = smov 128   ;;  %s3075_s24 = smov 8  }
  0x33   :  { %52 = dma.hbm_to_vmem [thread:$0]  %s4090_s4, 2048, %s47_s23, [#allocation10], %s3074_s2, %s3074_s2, %s3075_s24  }
  0x34   :  { %3063 = dma.done.wait [#allocation7], 4096  }
  0x35   :  { %3064 = vsyncadd [#allocation7], 4294963200 }
  0x36   :  { %3065 = dma.done.wait [#allocation10], 6144  }
  0x37   :  { %3066 = vsyncadd [#allocation10], 4294961152  ;;  %v3076_v0 = vmov 0.0   ;;  %p2435_p10 = scmp.le.s32.totalorder %s4086_s0, 0 }
  0x38   :  { %69 = vst [vmem:[#allocation2] sm:$0xff] %v3076_v0  ;;  %70 = vst [vmem:[#allocation3] sm:$0xff] %v3076_v0  ;;  %v3164_v1 = vld [vmem:[#allocation9 + $0x4] ss:$16 sps:$4 sm:$0xff] (!%p2435_p10)   ;;  %v3166_v2 = vld [vmem:[#allocation9] ss:$16 sps:$4 sm:$0xff] (!%p2435_p10)  }
  0x39   :  { %76 = sbr.rel (%p2435_p10) target bundleno = 4265 (0x10a9), region = 41  ;;  %v3077_v3 = vmov (!%p2435_p10), 0   ;;  %279 = vmatprep.subr.bf16.mxu0 (!%p2435_p10), %v3164_v1  ;;  %v3171_v4 = vld [vmem:[#allocation9 + $0x24] ss:$16 sps:$4 sm:$0xff] (!%p2435_p10)   ;;  %v3175_v5 = vld [vmem:[#allocation9 + $0x20] ss:$16 sps:$4 sm:$0xff] (!%p2435_p10)  }
  0x3a   :  { %311 = vmatprep.mubr.bf16.mxu0 (!%p2435_p10), %v3077_v3  ;;  %352 = vmatprep.mubr.bf16.mxu1 (!%p2435_p10), %v3077_v3  ;;  %v3179_v6 = vld [vmem:[#allocation9 + $0x44] ss:$16 sps:$4 sm:$0xff] (!%p2435_p10)   ;;  %v3181_v7 = vld [vmem:[#allocation9 + $0xc] ss:$16 sps:$4 sm:$0xff] (!%p2435_p10)   ;;  %v3183_v8 = vld [vmem:[#allocation9 + $0x8] ss:$16 sps:$4 sm:$0xff] (!%p2435_p10)  }
  0x3b   :  { %2605 = vset.pattern.permute.xlu0 (!%p2435_p10), %v3077_v3  ;;  %280 = vmatpush1.bf16.msra.mxu0 (!%p2435_p10), %v3166_v2  ;;  %v3186_v9 = vld [vmem:[#allocation9 + $0x40] ss:$16 sps:$4 sm:$0xff] (!%p2435_p10)   ;;  %v3190_v10 = vld [vmem:[#allocation9 + $0x64] ss:$16 sps:$4 sm:$0xff] (!%p2435_p10)   ;;  %v3193_v11 = vld [vmem:[#allocation9 + $0x2c] ss:$16 sps:$4 sm:$0xff] (!%p2435_p10)  }
  0x3c   :  { %2606 = vset.pattern.permute.xlu1 (!%p2435_p10), %v3077_v3  ;;  %281 = vmatprep.subr.bf16.mxu0 (!%p2435_p10), %v3171_v4  ;;  %v3195_v12 = vld [vmem:[#allocation9 + $0x28] ss:$16 sps:$4 sm:$0xff] (!%p2435_p10)   ;;  %v3199_v13 = vld [vmem:[#allocation9 + $0x60] ss:$16 sps:$4 sm:$0xff] (!%p2435_p10)   ;;  %v3201_v14 = vld [vmem:[#allocation9 + $0x84] ss:$16 sps:$4 sm:$0xff] (!%p2435_p10)  }
  0x3d   :  { %320 = vmatprep.subr.bf16.mxu1 (!%p2435_p10), %v3181_v7  ;;  %v3203_v15 = vld [vmem:[#allocation9 + $0x4c] ss:$16 sps:$4 sm:$0xff] (!%p2435_p10)   ;;  %v3207_v16 = vld [vmem:[#allocation9 + $0x48] ss:$16 sps:$4 sm:$0xff] (!%p2435_p10)   ;;  %v3213_v18 = vld [vmem:[#allocation9 + $0x80] ss:$16 sps:$4 sm:$0xff] (!%p2435_p10)  }
  0x3e   :  { %321 = vmatpush1.bf16.msra.mxu1 (!%p2435_p10), %v3183_v8  ;;  %v3210_v17 = vld [vmem:[#allocation9 + $0x6c] ss:$16 sps:$4 sm:$0xff] (!%p2435_p10)   ;;  %v3216_v19 = vld [vmem:[#allocation9 + $0xa4] ss:$16 sps:$4 sm:$0xff] (!%p2435_p10)   ;;  %v3219_v20 = vld [vmem:[#allocation9 + $0x68] ss:$16 sps:$4 sm:$0xff] (!%p2435_p10)  }
  0x3f   :  { %282 = vmatpush1.bf16.msra.mxu0 (!%p2435_p10), %v3175_v5  ;;  %322 = vmatprep.subr.bf16.mxu1 (!%p2435_p10), %v3193_v11  ;;  %v3222_v21 = vld [vmem:[#allocation9 + $0x8c] ss:$16 sps:$4 sm:$0xff] (!%p2435_p10)   ;;  %v3224_v22 = vld [vmem:[#allocation9 + $0xa0] ss:$16 sps:$4 sm:$0xff] (!%p2435_p10)   ;;  %v3227_v23 = vld [vmem:[#allocation9 + $0xc4] ss:$16 sps:$4 sm:$0xff] (!%p2435_p10)  }
  0x40   :  { %283 = vmatprep.subr.bf16.mxu0 %v3179_v6  ;;  %v3231_v24 = vld [vmem:[#allocation9 + $0x88] ss:$16 sps:$4 sm:$0xff]   ;;  %v3234_v25 = vld [vmem:[#allocation9 + $0xac] ss:$16 sps:$4 sm:$0xff]   ;;  %v3239_v26 = vld [vmem:[%s4087_s1] sm:$0xff] }
  0x41   :  { %vm390_vm0 = vcmp.gt.s32.totalorder %v3239_v26, 0  ;;  %v3243_v27 = vld [vmem:[#allocation9 + $0xc0] ss:$16 sps:$4 sm:$0xff]   ;;  %vm518_vm1 = vcmp.gt.s32.totalorder %v3239_v26, 1  ;;  %v3248_v29 = vld [vmem:[#allocation9 + $0xe4] ss:$16 sps:$4 sm:$0xff]  }
  0x42   :  { %323 = vmatpush1.bf16.msra.mxu1 %v3195_v12  ;;  %v391_v28 = vsel %vm390_vm0, 1, %v3077_v3  ;;  %v3251_v30 = vld [vmem:[#allocation9 + $0xa8] ss:$16 sps:$4 sm:$0xff]   ;;  %v3254_v31 = vld [vmem:[#allocation9 + $0xcc] ss:$16 sps:$4 sm:$0xff]   ;;  %v519_v32 = vsel %vm518_vm1, 1, %v3077_v3 }
  0x43   :  { %284 = vmatpush1.bf16.msra.mxu0 %v3186_v9  ;;  %324 = vmatprep.subr.bf16.mxu1 %v3203_v15  ;;  %v3258_v33 = vld [vmem:[#allocation9 + $0xe0] ss:$16 sps:$4 sm:$0xff]   ;;  %vm902_vm2 = vcmp.gt.s32.totalorder %v3239_v26, 4  ;;  %v3265_v35 = vld [vmem:[#allocation9 + $0xc8] ss:$16 sps:$4 sm:$0xff]   ;;  %vm1158_vm3 = vcmp.gt.s32.totalorder %v3239_v26, 6 }
  0x44   :  { %285 = vmatprep.subr.bf16.mxu0 %v3190_v10  ;;  %393 = vperm.xlu0 %2605, %v391_v28   ;;  %v3260_v34 = vld [vmem:[#allocation2] sm:$0xff]  ;;  %v3268_v36 = vld [vmem:[#allocation9 + $0xec] ss:$16 sps:$4 sm:$0xff]   ;;  %v903_v38 = vsel %vm902_vm2, 1, %v3077_v3  ;;  %v3276_v39 = vld [vmem:[#allocation9 + $0xe8] ss:$16 sps:$4 sm:$0xff]  }
  0x45   :  { %v86_v37 = vpack.c.bf16 %v3260_v34, %v3260_v34  ;;  %v1159_v40 = vsel %vm1158_vm3, 1, %v3077_v3  ;;  %vm1414_vm4 = vcmp.gt.s32.totalorder %v3239_v26, 8  ;;  %vm1670_vm5 = vcmp.gt.s32.totalorder %v3239_v26, 10  ;;  %v80_v45 = vld [vmem:[#allocation6] sm:$0xff]  ;;  %v81_v49 = vld [vmem:[#allocation6 + $0x8] sm:$0xff] }
  0x46   :  { %325 = vmatpush1.bf16.msra.mxu1 %v3207_v16  ;;  %v1415_v41 = vsel %vm1414_vm4, 1, %v3077_v3  ;;  %v1671_v42 = vsel %vm1670_vm5, 1, %v3077_v3  ;;  %vm1926_vm6 = vcmp.gt.s32.totalorder %v3239_v26, 12  ;;  %vm2182_vm7 = vcmp.gt.s32.totalorder %v3239_v26, 14 }
  0x47   :  { %286 = vmatpush1.bf16.msra.mxu0 %v3199_v13  ;;  %326 = vmatprep.subr.bf16.mxu1 %v3210_v17  ;;  %v1927_v43 = vsel %vm1926_vm6, 1, %v3077_v3  ;;  %v2183_v44 = vsel %vm2182_vm7, 1, %v3077_v3  ;;  %v82_v46 = vunpack.c.l.bf16 %v80_v45  ;;  %v83_v47 = vunpack.c.h.bf16 %v80_v45 }
  0x48   :  { %287 = vmatprep.subr.bf16.mxu0 %v3201_v14  ;;  %521 = vperm.xlu0 %2605, %v519_v32   ;;  %v85_v56 = vunpack.c.h.bf16 %v81_v49  ;;  %v84_v62 = vunpack.c.l.bf16 %v81_v49  ;;  %vm646_vm9 = vcmp.gt.s32.totalorder %v3239_v26, 2  ;;  %vm774_vm10 = vcmp.gt.s32.totalorder %v3239_v26, 3 }
  0x49   :  { %vm1030_vm11 = vcmp.gt.s32.totalorder %v3239_v26, 5  ;;  %vm1286_vm12 = vcmp.gt.s32.totalorder %v3239_v26, 7  ;;  %vm1542_vm13 = vcmp.gt.s32.totalorder %v3239_v26, 9  ;;  %vm1798_vm14 = vcmp.gt.s32.totalorder %v3239_v26, 11 }
  0x4a   :  { %327 = vmatpush1.bf16.msra.mxu1 %v3219_v20  ;;  %vm2054_vm15 = vcmp.gt.s32.totalorder %v3239_v26, 13  ;;  %vm2310_vm0 = vcmp.gt.s32.totalorder %v3239_v26, 15 }
  0x4b   :  { %288 = vmatpush1.bf16.msra.mxu0 %v3213_v18  ;;  %328 = vmatprep.subr.bf16.mxu1 %v3222_v21 }
  0x4c   :  { %289 = vmatprep.subr.bf16.mxu0 %v3216_v19  ;;  %905 = vperm.xlu0 %2605, %v903_v38  }
  0x4e   :  { %329 = vmatpush1.bf16.msra.mxu1 %v3231_v24 }
  0x4f   :  { %290 = vmatpush1.bf16.msra.mxu0 %v3224_v22  ;;  %330 = vmatprep.subr.bf16.mxu1 %v3234_v25 }
  0x50   :  { %291 = vmatprep.subr.bf16.mxu0 %v3227_v23  ;;  %1161 = vperm.xlu0 %2605, %v1159_v40  }
  0x52   :  { %331 = vmatpush1.bf16.msra.mxu1 %v3251_v30 }
  0x53   :  { %292 = vmatpush1.bf16.msra.mxu0 %v3243_v27  ;;  %332 = vmatprep.subr.bf16.mxu1 %v3254_v31 }
  0x54   :  { %293 = vmatprep.subr.bf16.mxu0 %v3248_v29  ;;  %1417 = vperm.xlu0 %2605, %v1415_v41  }
  0x56   :  { %333 = vmatpush1.bf16.msra.mxu1 %v3265_v35 }
  0x57   :  { %294 = vmatpush1.bf16.msra.mxu0 %v3258_v33  ;;  %334 = vmatprep.subr.bf16.mxu1 %v3268_v36 }
  0x58   :  { %406 = vmatprep.subr.bf16.mxu0 %v3164_v1  ;;  %1673 = vperm.xlu0 %2605, %v1671_v42  }
  0x5a   :  { %312 = vmatmul.mubr.bf16.vlgmr.msra.gmra.mrb[0].mxu0 %v86_v37  ;;  %335 = vmatpush1.bf16.msra.mxu1 %v3276_v39 }
  0x5b   :  { %407 = vmatpush1.bf16.msra.mxu0 %v3166_v2  ;;  %438 = vmatprep.mubr.bf16.mxu0 %v3077_v3 }
  0x5c   :  { %408 = vmatprep.subr.bf16.mxu0 %v3171_v4  ;;  %447 = vmatprep.subr.bf16.mxu1 %v3181_v7 }
  0x5d   :  { %353 = vmatmul.mubr.bf16.vlgmr.msra.gmra.mrb[0].mxu1 %v86_v37  ;;  %1929 = vperm.xlu0 %2605, %v1927_v43  }
  0x5e   :  { %448 = vmatpush1.bf16.msra.mxu1 %v3183_v8  ;;  %479 = vmatprep.mubr.bf16.mxu1 %v3077_v3 }
  0x5f   :  { %409 = vmatpush1.bf16.msra.mxu0 %v3175_v5  ;;  %449 = vmatprep.subr.bf16.mxu1 %v3193_v11 }
  0x60   :  { %410 = vmatprep.subr.bf16.mxu0 %v3179_v6 }
  0x61   :  { %2185 = vperm.xlu0 %2605, %v2183_v44   ;;  %v79_v44 = vld [vmem:[#allocation3] sm:$0xff] }
  0x62   :  { %450 = vmatpush1.bf16.msra.mxu1 %v3195_v12 }
  0x63   :  { %411 = vmatpush1.bf16.msra.mxu0 %v3186_v9  ;;  %451 = vmatprep.subr.bf16.mxu1 %v3203_v15 }
  0x64   :  { %412 = vmatprep.subr.bf16.mxu0 %v3190_v10 }
  0x66   :  { %452 = vmatpush1.bf16.msra.mxu1 %v3207_v16 }
  0x67   :  { %413 = vmatpush1.bf16.msra.mxu0 %v3199_v13  ;;  %453 = vmatprep.subr.bf16.mxu1 %v3210_v17 }
  0x68   :  { %414 = vmatprep.subr.bf16.mxu0 %v3201_v14 }
  0x6a   :  { %454 = vmatpush1.bf16.msra.mxu1 %v3219_v20 }
  0x6b   :  { %415 = vmatpush1.bf16.msra.mxu0 %v3213_v18  ;;  %455 = vmatprep.subr.bf16.mxu1 %v3222_v21 }
  0x6c   :  { %416 = vmatprep.subr.bf16.mxu0 %v3216_v19 }
  0x6e   :  { %456 = vmatpush1.bf16.msra.mxu1 %v3231_v24 }
  0x6f   :  { %417 = vmatpush1.bf16.msra.mxu0 %v3224_v22  ;;  %457 = vmatprep.subr.bf16.mxu1 %v3234_v25 }
  0x70   :  { %418 = vmatprep.subr.bf16.mxu0 %v3227_v23 }
  0x72   :  { %458 = vmatpush1.bf16.msra.mxu1 %v3251_v30 }
  0x73   :  { %419 = vmatpush1.bf16.msra.mxu0 %v3243_v27  ;;  %459 = vmatprep.subr.bf16.mxu1 %v3254_v31 }
  0x74   :  { %420 = vmatprep.subr.bf16.mxu0 %v3248_v29 }
  0x76   :  { %460 = vmatpush1.bf16.msra.mxu1 %v3265_v35 }
  0x77   :  { %421 = vmatpush1.bf16.msra.mxu0 %v3258_v33  ;;  %461 = vmatprep.subr.bf16.mxu1 %v3268_v36 }
  0x78   :  { %534 = vmatprep.subr.bf16.mxu0 %v3164_v1 }
  0x7a   :  { %462 = vmatpush1.bf16.msra.mxu1 %v3276_v39 }
  0x7b   :  { %575 = vmatprep.subr.bf16.mxu1 %v3181_v7 }
  0xc3   :  { %v394_v49 = vpop.permute.xlu0 %393 }
  0xc4   :  { %vm395_vm8 = vcmp.eq.s32.totalorder %v394_v49, 1 }
 0x12d   :  { %v313_v48 = vpop.f32.mrb[0].mxu0 }
 0x12e   :  { %v361_v50 = vadd.f32 %v313_v48, %v82_v46  ;;  %v315_v51 = vpop.f32.mrb[1].mxu0 }
 0x12f   :  { %v362_v52 = vadd.f32 %v315_v51, %v83_v47  ;;  %v317_v53 = vpop.f32.mrb[2].mxu0 }
 0x130   :  { %v2468_v54 = vmul.f32 -1.442695, %v361_v50  ;;  %v318_v55 = vpop.f32.mrb[3].mxu0  ;;  %v354_v58 = vpop.f32.mrb[0].mxu1 }
 0x131   :  { %v2469_v57 = vmul.f32 -1.442695, %v362_v52  ;;  %v356_v59 = vpop.f32.mrb[1].mxu1  ;;  %v363_v32 = vadd.f32 %v354_v58, %v84_v62  ;;  %v775_v58 = vsel %vm774_vm10, 1, %v3077_v3  ;;  %v1799_v62 = vsel %vm1798_vm14, 1, %v3077_v3 }
 0x132   :  { %2655 = vpow2.f32 %v2468_v54  ;;  %v364_v60 = vadd.f32 %v356_v59, %v85_v56  ;;  %v358_v61 = vpop.f32.mrb[2].mxu1  ;;  %v1031_v59 = vsel %vm1030_vm11, 1, %v3077_v3 }
 0x133   :  { %2657 = vpow2.f32 %v2469_v57  ;;  %v359_v63 = vpop.f32.mrb[3].mxu1  ;;  %v1543_v61 = vsel %vm1542_vm13, 1, %v3077_v3 }
 0x134   :  { %v2470_v28 = vmul.f32 -1.442695, %v364_v60  ;;  %v1287_v60 = vsel %vm1286_vm12, 1, %v3077_v3  ;;  %v2055_v63 = vsel %vm2054_vm15, 1, %v3077_v3 }
 0x136   :  { %2659 = vpow2.f32 %v2470_v28  ;;  %v2311_v28 = vsel %vm2310_vm0, 1, %v3077_v3 }
 0x137   :  { %2661 = vtanh.f32 %v363_v32  ;;  %v399_v32 = vld [vmem:[#allocation6 + $0x10] sm:$0xff] }
 0x13c   :  { %v2656_v37 = vpop.eup %2655 }
 0x13d   :  { %v2658_v38 = vpop.eup %2657  ;;  %v368_v40 = vadd.f32 1.0, %v2656_v37  ;;  %v401_v37 = vunpack.c.l.bf16 %v399_v32 }
 0x13e   :  { %v374_v41 = vadd.f32 1.0, %v2658_v38  ;;  %v402_v38 = vunpack.c.h.bf16 %v399_v32 }
 0x13f   :  { %2663 = vrcp.f32 %v368_v40 }
 0x140   :  { %2665 = vrcp.f32 %v374_v41  ;;  %v2660_v42 = vpop.eup %2659 }
 0x141   :  { %v2662_v43 = vpop.eup %2661  ;;  %v381_v46 = vadd.f32 1.0, %v2660_v42 }
 0x143   :  { %2667 = vrcp.f32 %v381_v46 }
 0x149   :  { %v2664_v45 = vpop.eup %2663 }
 0x14a   :  { %v2666_v47 = vpop.eup %2665  ;;  %v385_v48 = vmul.f32 %v2664_v45, %v2662_v43  ;;  %v400_v43 = vld [vmem:[#allocation6 + $0x18] sm:$0xff] }
 0x14b   :  { %v384_v50 = vmul.f32 %v2666_v47, %v79_v44 }
 0x14d   :  { %v386_v51 = vadd.f32 %v385_v48, %v384_v50  ;;  %v2668_v53 = vpop.eup %2667 }
 0x14f   :  { %2669 = vtanh.f32 %v386_v51  ;;  %v3325_v52 = vsel %vm395_vm8, %v386_v51, %v79_v44 }
 0x159   :  { %v2670_v54 = vpop.eup %2669 }
 0x15a   :  { %v388_v55 = vmul.f32 %v2670_v54, %v2668_v53  ;;  %v404_v53 = vunpack.c.h.bf16 %v400_v43 }
 0x15c   :  { %v3328_v56 = vsel %vm395_vm8, %v388_v55, %v3260_v34  ;;  %v647_v34 = vsel %vm646_vm9, 1, %v3077_v3  ;;  %v403_v55 = vunpack.c.l.bf16 %v400_v43 }
 0x15d   :  { %v405_v57 = vpack.c.bf16 %v3328_v56, %v3328_v56  ;;  %649 = vperm.xlu1 %2606, %v647_v34  }
 0x15f   :  { %439 = vmatmul.mubr.bf16.vlgmr.msra.gmra.mrb[4].mxu0 %v405_v57  ;;  %480 = vmatmul.mubr.bf16.vlgmr.msra.gmra.mrb[4].mxu1 %v405_v57 }
 0x160   :  { %535 = vmatpush1.bf16.msra.mxu0 %v3166_v2  ;;  %576 = vmatpush1.bf16.msra.mxu1 %v3183_v8 }
 0x161   :  { %536 = vmatprep.subr.bf16.mxu0 %v3171_v4  ;;  %577 = vmatprep.subr.bf16.mxu1 %v3193_v11 }
 0x162   :  { %566 = vmatprep.mubr.bf16.mxu0 %v3077_v3  ;;  %607 = vmatprep.mubr.bf16.mxu1 %v3077_v3 }
 0x163   :  { %777 = vperm.xlu1 %2606, %v775_v58  }
 0x164   :  { %537 = vmatpush1.bf16.msra.mxu0 %v3175_v5  ;;  %578 = vmatpush1.bf16.msra.mxu1 %v3195_v12 }
 0x165   :  { %538 = vmatprep.subr.bf16.mxu0 %v3179_v6  ;;  %579 = vmatprep.subr.bf16.mxu1 %v3203_v15 }
 0x167   :  { %1033 = vperm.xlu1 %2606, %v1031_v59  }
 0x168   :  { %539 = vmatpush1.bf16.msra.mxu0 %v3186_v9  ;;  %580 = vmatpush1.bf16.msra.mxu1 %v3207_v16 }
 0x169   :  { %540 = vmatprep.subr.bf16.mxu0 %v3190_v10  ;;  %581 = vmatprep.subr.bf16.mxu1 %v3210_v17 }
 0x16b   :  { %1289 = vperm.xlu1 %2606, %v1287_v60  }
 0x16c   :  { %541 = vmatpush1.bf16.msra.mxu0 %v3199_v13  ;;  %582 = vmatpush1.bf16.msra.mxu1 %v3219_v20 }
 0x16d   :  { %542 = vmatprep.subr.bf16.mxu0 %v3201_v14  ;;  %583 = vmatprep.subr.bf16.mxu1 %v3222_v21 }
 0x16f   :  { %1545 = vperm.xlu1 %2606, %v1543_v61  }
 0x170   :  { %543 = vmatpush1.bf16.msra.mxu0 %v3213_v18  ;;  %584 = vmatpush1.bf16.msra.mxu1 %v3231_v24 }
 0x171   :  { %544 = vmatprep.subr.bf16.mxu0 %v3216_v19  ;;  %585 = vmatprep.subr.bf16.mxu1 %v3234_v25 }
 0x173   :  { %1801 = vperm.xlu1 %2606, %v1799_v62  }
 0x174   :  { %545 = vmatpush1.bf16.msra.mxu0 %v3224_v22  ;;  %586 = vmatpush1.bf16.msra.mxu1 %v3251_v30 }
 0x175   :  { %546 = vmatprep.subr.bf16.mxu0 %v3227_v23  ;;  %587 = vmatprep.subr.bf16.mxu1 %v3254_v31 }
 0x177   :  { %2057 = vperm.xlu1 %2606, %v2055_v63  }
 0x178   :  { %547 = vmatpush1.bf16.msra.mxu0 %v3243_v27  ;;  %588 = vmatpush1.bf16.msra.mxu1 %v3265_v35 }
 0x179   :  { %548 = vmatprep.subr.bf16.mxu0 %v3248_v29  ;;  %589 = vmatprep.subr.bf16.mxu1 %v3268_v36 }
 0x17b   :  { %2313 = vperm.xlu1 %2606, %v2311_v28  }
 0x17c   :  { %549 = vmatpush1.bf16.msra.mxu0 %v3258_v33  ;;  %590 = vmatpush1.bf16.msra.mxu1 %v3276_v39 }
 0x17d   :  { %662 = vmatprep.subr.bf16.mxu0 %v3164_v1  ;;  %703 = vmatprep.subr.bf16.mxu1 %v3181_v7 }
 0x232   :  { %v440_v40 = vpop.f32.mrb[4].mxu0  ;;  %v481_v41 = vpop.f32.mrb[4].mxu1 }
 0x233   :  { %v488_v42 = vadd.f32 %v440_v40, %v401_v37  ;;  %v442_v44 = vpop.f32.mrb[5].mxu0  ;;  %v483_v45 = vpop.f32.mrb[5].mxu1  ;;  %v490_v34 = vadd.f32 %v481_v41, %v403_v55 }
 0x234   :  { %v489_v46 = vadd.f32 %v442_v44, %v402_v38  ;;  %v444_v47 = vpop.f32.mrb[6].mxu0  ;;  %v485_v48 = vpop.f32.mrb[6].mxu1  ;;  %v491_v54 = vadd.f32 %v483_v45, %v404_v53  ;;  %v528_v53 = vld [vmem:[#allocation6 + $0x28] sm:$0xff] }
 0x235   :  { %v2471_v50 = vmul.f32 -1.442695, %v488_v42  ;;  %v445_v49 = vpop.f32.mrb[7].mxu0  ;;  %v486_v51 = vpop.f32.mrb[7].mxu1 }
 0x236   :  { %v2472_v26 = vmul.f32 -1.442695, %v489_v46  ;;  %v2473_v57 = vmul.f32 -1.442695, %v491_v54  ;;  %v522_v42 = vpop.permute.xlu0 %521 }
 0x237   :  { %2671 = vpow2.f32 %v2471_v50  ;;  %vm523_vm1 = vcmp.eq.s32.totalorder %v522_v42, 1 }
 0x238   :  { %2673 = vpow2.f32 %v2472_v26 }
 0x239   :  { %2675 = vpow2.f32 %v2473_v57 }
 0x23a   :  { %2677 = vtanh.f32 %v490_v34 }
 0x241   :  { %v2672_v58 = vpop.eup %2671 }
 0x242   :  { %v2674_v59 = vpop.eup %2673  ;;  %v495_v60 = vadd.f32 1.0, %v2672_v58 }
 0x243   :  { %v501_v61 = vadd.f32 1.0, %v2674_v59  ;;  %v2676_v62 = vpop.eup %2675 }
 0x244   :  { %2679 = vrcp.f32 %v495_v60  ;;  %v2678_v63 = vpop.eup %2677  ;;  %v508_v38 = vadd.f32 1.0, %v2676_v62 }
 0x245   :  { %2681 = vrcp.f32 %v501_v61 }
 0x246   :  { %2683 = vrcp.f32 %v508_v38 }
 0x24e   :  { %v2680_v28 = vpop.eup %2679 }
 0x24f   :  { %v2682_v32 = vpop.eup %2681  ;;  %v512_v37 = vmul.f32 %v2680_v28, %v2678_v63  ;;  %v532_v63 = vunpack.c.h.bf16 %v528_v53 }
 0x250   :  { %v511_v40 = vmul.f32 %v2682_v32, %v3325_v52  ;;  %v2684_v44 = vpop.eup %2683  ;;  %v531_v32 = vunpack.c.l.bf16 %v528_v53 }
 0x252   :  { %v513_v43 = vadd.f32 %v512_v37, %v511_v40 }
 0x254   :  { %2685 = vtanh.f32 %v513_v43  ;;  %v3384_v41 = vsel %vm523_vm1, %v513_v43, %v3325_v52  ;;  %v527_v52 = vld [vmem:[#allocation6 + $0x20] sm:$0xff] }
 0x255   :  { %v530_v50 = vunpack.c.h.bf16 %v527_v52 }
 0x25e   :  { %v2686_v45 = vpop.eup %2685 }
 0x25f   :  { %v515_v46 = vmul.f32 %v2686_v45, %v2684_v44 }
 0x261   :  { %v3387_v47 = vsel %vm523_vm1, %v515_v46, %v3328_v56  ;;  %v529_v56 = vunpack.c.l.bf16 %v527_v52 }
 0x262   :  { %v533_v48 = vpack.c.bf16 %v3387_v47, %v3387_v47 }
 0x264   :  { %567 = vmatmul.mubr.bf16.vlgmr.msra.gmra.mrb[8].mxu0 %v533_v48  ;;  %608 = vmatmul.mubr.bf16.vlgmr.msra.gmra.mrb[8].mxu1 %v533_v48 }
 0x265   :  { %663 = vmatpush1.bf16.msra.mxu0 %v3166_v2  ;;  %704 = vmatpush1.bf16.msra.mxu1 %v3183_v8 }
 0x266   :  { %664 = vmatprep.subr.bf16.mxu0 %v3171_v4  ;;  %705 = vmatprep.subr.bf16.mxu1 %v3193_v11 }
 0x267   :  { %694 = vmatprep.mubr.bf16.mxu0 %v3077_v3  ;;  %735 = vmatprep.mubr.bf16.mxu1 %v3077_v3 }
 0x269   :  { %665 = vmatpush1.bf16.msra.mxu0 %v3175_v5  ;;  %706 = vmatpush1.bf16.msra.mxu1 %v3195_v12 }
 0x26a   :  { %666 = vmatprep.subr.bf16.mxu0 %v3179_v6  ;;  %707 = vmatprep.subr.bf16.mxu1 %v3203_v15 }
 0x26d   :  { %667 = vmatpush1.bf16.msra.mxu0 %v3186_v9  ;;  %708 = vmatpush1.bf16.msra.mxu1 %v3207_v16 }
 0x26e   :  { %668 = vmatprep.subr.bf16.mxu0 %v3190_v10  ;;  %709 = vmatprep.subr.bf16.mxu1 %v3210_v17 }
 0x271   :  { %669 = vmatpush1.bf16.msra.mxu0 %v3199_v13  ;;  %710 = vmatpush1.bf16.msra.mxu1 %v3219_v20 }
 0x272   :  { %670 = vmatprep.subr.bf16.mxu0 %v3201_v14  ;;  %711 = vmatprep.subr.bf16.mxu1 %v3222_v21 }
 0x275   :  { %671 = vmatpush1.bf16.msra.mxu0 %v3213_v18  ;;  %712 = vmatpush1.bf16.msra.mxu1 %v3231_v24 }
 0x276   :  { %672 = vmatprep.subr.bf16.mxu0 %v3216_v19  ;;  %713 = vmatprep.subr.bf16.mxu1 %v3234_v25 }
 0x279   :  { %673 = vmatpush1.bf16.msra.mxu0 %v3224_v22  ;;  %714 = vmatpush1.bf16.msra.mxu1 %v3251_v30 }
 0x27a   :  { %674 = vmatprep.subr.bf16.mxu0 %v3227_v23  ;;  %715 = vmatprep.subr.bf16.mxu1 %v3254_v31 }
 0x27d   :  { %675 = vmatpush1.bf16.msra.mxu0 %v3243_v27  ;;  %716 = vmatpush1.bf16.msra.mxu1 %v3265_v35 }
 0x27e   :  { %676 = vmatprep.subr.bf16.mxu0 %v3248_v29  ;;  %717 = vmatprep.subr.bf16.mxu1 %v3268_v36 }
 0x281   :  { %677 = vmatpush1.bf16.msra.mxu0 %v3258_v33  ;;  %718 = vmatpush1.bf16.msra.mxu1 %v3276_v39 }
 0x282   :  { %790 = vmatprep.subr.bf16.mxu0 %v3164_v1  ;;  %831 = vmatprep.subr.bf16.mxu1 %v3181_v7 }
 0x337   :  { %v568_v49 = vpop.f32.mrb[8].mxu0  ;;  %v609_v51 = vpop.f32.mrb[8].mxu1 }
 0x338   :  { %v616_v26 = vadd.f32 %v568_v49, %v529_v56  ;;  %v570_v54 = vpop.f32.mrb[9].mxu0  ;;  %v611_v55 = vpop.f32.mrb[9].mxu1  ;;  %v618_v38 = vadd.f32 %v609_v51, %v531_v32 }
 0x339   :  { %v617_v57 = vadd.f32 %v570_v54, %v530_v50  ;;  %v572_v34 = vpop.f32.mrb[10].mxu0  ;;  %v613_v58 = vpop.f32.mrb[10].mxu1  ;;  %v619_v28 = vadd.f32 %v611_v55, %v532_v63  ;;  %v656_v63 = vld [vmem:[#allocation6 + $0x38] sm:$0xff] }
 0x33a   :  { %v2474_v59 = vmul.f32 -1.442695, %v616_v26  ;;  %v573_v60 = vpop.f32.mrb[11].mxu0  ;;  %v614_v61 = vpop.f32.mrb[11].mxu1 }
 0x33b   :  { %v2475_v62 = vmul.f32 -1.442695, %v617_v57  ;;  %v2476_v37 = vmul.f32 -1.442695, %v619_v28  ;;  %v650_v49 = vpop.permute.xlu1 %649 }
 0x33c   :  { %2687 = vpow2.f32 %v2474_v59  ;;  %vm651_vm2 = vcmp.eq.s32.totalorder %v650_v49, 1 }
 0x33d   :  { %2689 = vpow2.f32 %v2475_v62 }
 0x33e   :  { %2691 = vpow2.f32 %v2476_v37 }
 0x33f   :  { %2693 = vtanh.f32 %v618_v38 }
 0x346   :  { %v2688_v40 = vpop.eup %2687 }
 0x347   :  { %v2690_v42 = vpop.eup %2689  ;;  %v623_v43 = vadd.f32 1.0, %v2688_v40 }
 0x348   :  { %v629_v44 = vadd.f32 1.0, %v2690_v42  ;;  %v2692_v45 = vpop.eup %2691 }
 0x349   :  { %2695 = vrcp.f32 %v623_v43  ;;  %v2694_v46 = vpop.eup %2693  ;;  %v636_v56 = vadd.f32 1.0, %v2692_v45 }
 0x34a   :  { %2697 = vrcp.f32 %v629_v44 }
 0x34b   :  { %2699 = vrcp.f32 %v636_v56 }
 0x353   :  { %v2696_v48 = vpop.eup %2695 }
 0x354   :  { %v2698_v52 = vpop.eup %2697  ;;  %v640_v50 = vmul.f32 %v2696_v48, %v2694_v46  ;;  %v660_v46 = vunpack.c.h.bf16 %v656_v63  ;;  %v659_v48 = vunpack.c.l.bf16 %v656_v63 }
 0x355   :  { %v639_v26 = vmul.f32 %v2698_v52, %v3384_v41  ;;  %v2700_v54 = vpop.eup %2699 }
 0x357   :  { %v641_v53 = vadd.f32 %v640_v50, %v639_v26 }
 0x359   :  { %2701 = vtanh.f32 %v641_v53  ;;  %v3427_v51 = vsel %vm651_vm2, %v641_v53, %v3384_v41  ;;  %v655_v41 = vld [vmem:[#allocation6 + $0x30] sm:$0xff] }
 0x35a   :  { %v658_v59 = vunpack.c.h.bf16 %v655_v41 }
 0x363   :  { %v2702_v55 = vpop.eup %2701 }
 0x364   :  { %v643_v57 = vmul.f32 %v2702_v55, %v2700_v54 }
 0x366   :  { %v3430_v34 = vsel %vm651_vm2, %v643_v57, %v3387_v47  ;;  %v657_v47 = vunpack.c.l.bf16 %v655_v41 }
 0x367   :  { %v661_v58 = vpack.c.bf16 %v3430_v34, %v3430_v34 }
 0x369   :  { %695 = vmatmul.mubr.bf16.vlgmr.msra.gmra.mrb[12].mxu0 %v661_v58  ;;  %736 = vmatmul.mubr.bf16.vlgmr.msra.gmra.mrb[12].mxu1 %v661_v58 }
 0x36a   :  { %791 = vmatpush1.bf16.msra.mxu0 %v3166_v2  ;;  %832 = vmatpush1.bf16.msra.mxu1 %v3183_v8 }
 0x36b   :  { %792 = vmatprep.subr.bf16.mxu0 %v3171_v4  ;;  %833 = vmatprep.subr.bf16.mxu1 %v3193_v11 }
 0x36c   :  { %822 = vmatprep.mubr.bf16.mxu0 %v3077_v3  ;;  %863 = vmatprep.mubr.bf16.mxu1 %v3077_v3 }
 0x36e   :  { %793 = vmatpush1.bf16.msra.mxu0 %v3175_v5  ;;  %834 = vmatpush1.bf16.msra.mxu1 %v3195_v12 }
 0x36f   :  { %794 = vmatprep.subr.bf16.mxu0 %v3179_v6  ;;  %835 = vmatprep.subr.bf16.mxu1 %v3203_v15 }
 0x372   :  { %795 = vmatpush1.bf16.msra.mxu0 %v3186_v9  ;;  %836 = vmatpush1.bf16.msra.mxu1 %v3207_v16 }
 0x373   :  { %796 = vmatprep.subr.bf16.mxu0 %v3190_v10  ;;  %837 = vmatprep.subr.bf16.mxu1 %v3210_v17 }
 0x376   :  { %797 = vmatpush1.bf16.msra.mxu0 %v3199_v13  ;;  %838 = vmatpush1.bf16.msra.mxu1 %v3219_v20 }
 0x377   :  { %798 = vmatprep.subr.bf16.mxu0 %v3201_v14  ;;  %839 = vmatprep.subr.bf16.mxu1 %v3222_v21 }
 0x37a   :  { %799 = vmatpush1.bf16.msra.mxu0 %v3213_v18  ;;  %840 = vmatpush1.bf16.msra.mxu1 %v3231_v24 }
 0x37b   :  { %800 = vmatprep.subr.bf16.mxu0 %v3216_v19  ;;  %841 = vmatprep.subr.bf16.mxu1 %v3234_v25 }
 0x37e   :  { %801 = vmatpush1.bf16.msra.mxu0 %v3224_v22  ;;  %842 = vmatpush1.bf16.msra.mxu1 %v3251_v30 }
 0x37f   :  { %802 = vmatprep.subr.bf16.mxu0 %v3227_v23  ;;  %843 = vmatprep.subr.bf16.mxu1 %v3254_v31 }
 0x382   :  { %803 = vmatpush1.bf16.msra.mxu0 %v3243_v27  ;;  %844 = vmatpush1.bf16.msra.mxu1 %v3265_v35 }
 0x383   :  { %804 = vmatprep.subr.bf16.mxu0 %v3248_v29  ;;  %845 = vmatprep.subr.bf16.mxu1 %v3268_v36 }
 0x386   :  { %805 = vmatpush1.bf16.msra.mxu0 %v3258_v33  ;;  %846 = vmatpush1.bf16.msra.mxu1 %v3276_v39 }
 0x387   :  { %918 = vmatprep.subr.bf16.mxu0 %v3164_v1  ;;  %959 = vmatprep.subr.bf16.mxu1 %v3181_v7 }
 0x43c   :  { %v696_v60 = vpop.f32.mrb[12].mxu0  ;;  %v737_v61 = vpop.f32.mrb[12].mxu1 }
 0x43d   :  { %v744_v62 = vadd.f32 %v696_v60, %v657_v47  ;;  %v698_v28 = vpop.f32.mrb[13].mxu0  ;;  %v739_v32 = vpop.f32.mrb[13].mxu1  ;;  %v746_v56 = vadd.f32 %v737_v61, %v659_v48 }
 0x43e   :  { %v745_v37 = vadd.f32 %v698_v28, %v658_v59  ;;  %v700_v38 = vpop.f32.mrb[14].mxu0  ;;  %v741_v40 = vpop.f32.mrb[14].mxu1  ;;  %v747_v1 = vadd.f32 %v739_v32, %v660_v46 }
 0x43f   :  { %v2477_v42 = vmul.f32 -1.442695, %v744_v62  ;;  %v701_v43 = vpop.f32.mrb[15].mxu0  ;;  %v742_v44 = vpop.f32.mrb[15].mxu1 }
 0x440   :  { %v2478_v45 = vmul.f32 -1.442695, %v745_v37  ;;  %v2479_v52 = vmul.f32 -1.442695, %v747_v1  ;;  %v778_v60 = vpop.permute.xlu1 %777  ;;  %v906_v44 = vpop.permute.xlu0 %905 }
 0x441   :  { %2703 = vpow2.f32 %v2477_v42  ;;  %vm779_vm3 = vcmp.eq.s32.totalorder %v778_v60, 1  ;;  %vm907_vm4 = vcmp.eq.s32.totalorder %v906_v44, 1  ;;  %v3554_v60 = vld [vmem:[#allocation9 + $0x64] ss:$16 sps:$4 sm:$0xff]  }
 0x442   :  { %2705 = vpow2.f32 %v2478_v45 }
 0x443   :  { %2707 = vpow2.f32 %v2479_v52 }
 0x444   :  { %2709 = vtanh.f32 %v746_v56 }
 0x44b   :  { %v2704_v50 = vpop.eup %2703 }
 0x44c   :  { %v2706_v49 = vpop.eup %2705  ;;  %v751_v26 = vadd.f32 1.0, %v2704_v50 }
 0x44d   :  { %v757_v53 = vadd.f32 1.0, %v2706_v49  ;;  %v2708_v54 = vpop.eup %2707  ;;  %v3522_v49 = vld [vmem:[#allocation9] ss:$16 sps:$4 sm:$0xff]  }
 0x44e   :  { %2711 = vrcp.f32 %v751_v26  ;;  %v2710_v55 = vpop.eup %2709  ;;  %v764_v47 = vadd.f32 1.0, %v2708_v54  ;;  %v3525_v26 = vld [vmem:[#allocation9 + $0x8] ss:$16 sps:$4 sm:$0xff]   ;;  %v3531_v54 = vld [vmem:[#allocation9 + $0x2c] ss:$16 sps:$4 sm:$0xff]  }
 0x44f   :  { %2713 = vrcp.f32 %v757_v53  ;;  %v3528_v53 = vld [vmem:[#allocation9 + $0x24] ss:$16 sps:$4 sm:$0xff]  }
 0x450   :  { %2715 = vrcp.f32 %v764_v47  ;;  %v3548_v47 = vld [vmem:[#allocation9 + $0x40] ss:$16 sps:$4 sm:$0xff]  }
 0x458   :  { %v2712_v57 = vpop.eup %2711 }
 0x459   :  { %v2714_v58 = vpop.eup %2713  ;;  %v768_v41 = vmul.f32 %v2712_v57, %v2710_v55  ;;  %v3536_v55 = vld [vmem:[#allocation9 + $0x20] ss:$16 sps:$4 sm:$0xff]   ;;  %v3539_v57 = vld [vmem:[#allocation9 + $0x28] ss:$16 sps:$4 sm:$0xff]  }
 0x45a   :  { %v767_v59 = vmul.f32 %v2714_v58, %v3427_v51  ;;  %v2716_v63 = vpop.eup %2715  ;;  %v3542_v58 = vld [vmem:[#allocation9 + $0x44] ss:$16 sps:$4 sm:$0xff]  }
 0x45c   :  { %v769_v62 = vadd.f32 %v768_v41, %v767_v59  ;;  %v3545_v41 = vld [vmem:[#allocation9 + $0x4c] ss:$16 sps:$4 sm:$0xff]   ;;  %v3551_v59 = vld [vmem:[#allocation9 + $0x48] ss:$16 sps:$4 sm:$0xff]  }
 0x45e   :  { %2717 = vtanh.f32 %v769_v62  ;;  %v3470_v61 = vsel %vm779_vm3, %v769_v62, %v3427_v51  ;;  %v3557_v62 = vld [vmem:[#allocation9 + $0x6c] ss:$16 sps:$4 sm:$0xff]  }
 0x468   :  { %v2718_v28 = vpop.eup %2717 }
 0x469   :  { %v771_v32 = vmul.f32 %v2718_v28, %v2716_v63  ;;  %v3563_v63 = vld [vmem:[#allocation9 + $0x68] ss:$16 sps:$4 sm:$0xff]   ;;  %v3566_v28 = vld [vmem:[#allocation9 + $0x84] ss:$16 sps:$4 sm:$0xff]  }
 0x46b   :  { %v3473_v37 = vsel %vm779_vm3, %v771_v32, %v3430_v34  ;;  %v3569_v32 = vld [vmem:[#allocation9 + $0x8c] ss:$16 sps:$4 sm:$0xff]  }
 0x46c   :  { %v789_v38 = vpack.c.bf16 %v3473_v37, %v3473_v37 }
 0x46e   :  { %823 = vmatmul.mubr.bf16.vlgmr.msra.gmra.mrb[16].mxu0 %v789_v38  ;;  %864 = vmatmul.mubr.bf16.vlgmr.msra.gmra.mrb[16].mxu1 %v789_v38  ;;  %v3575_v38 = vld [vmem:[#allocation9 + $0x88] ss:$16 sps:$4 sm:$0xff]  }
 0x46f   :  { %919 = vmatpush1.bf16.msra.mxu0 %v3166_v2  ;;  %960 = vmatpush1.bf16.msra.mxu1 %v3183_v8  ;;  %v3509_v2 = vld [vmem:[#allocation9 + $0x4] ss:$16 sps:$4 sm:$0xff]  }
 0x470   :  { %920 = vmatprep.subr.bf16.mxu0 %v3171_v4  ;;  %961 = vmatprep.subr.bf16.mxu1 %v3193_v11  ;;  %v783_v4 = vld [vmem:[#allocation6 + $0x40] sm:$0xff]  ;;  %v784_v11 = vld [vmem:[#allocation6 + $0x48] sm:$0xff] }
 0x471   :  { %950 = vmatprep.mubr.bf16.mxu0 %v3077_v3  ;;  %991 = vmatprep.mubr.bf16.mxu1 %v3077_v3 }
 0x473   :  { %921 = vmatpush1.bf16.msra.mxu0 %v3175_v5  ;;  %962 = vmatpush1.bf16.msra.mxu1 %v3195_v12  ;;  %v785_v5 = vunpack.c.l.bf16 %v783_v4 }
 0x474   :  { %922 = vmatprep.subr.bf16.mxu0 %v3179_v6  ;;  %963 = vmatprep.subr.bf16.mxu1 %v3203_v15  ;;  %v786_v6 = vunpack.c.h.bf16 %v783_v4  ;;  %v3578_v4 = vld [vmem:[#allocation9 + $0xa4] ss:$16 sps:$4 sm:$0xff]  }
 0x477   :  { %923 = vmatpush1.bf16.msra.mxu0 %v3186_v9  ;;  %964 = vmatpush1.bf16.msra.mxu1 %v3207_v16 }
 0x478   :  { %924 = vmatprep.subr.bf16.mxu0 %v3190_v10  ;;  %965 = vmatprep.subr.bf16.mxu1 %v3210_v17 }
 0x47b   :  { %925 = vmatpush1.bf16.msra.mxu0 %v3199_v13  ;;  %966 = vmatpush1.bf16.msra.mxu1 %v3219_v20 }
 0x47c   :  { %926 = vmatprep.subr.bf16.mxu0 %v3201_v14  ;;  %967 = vmatprep.subr.bf16.mxu1 %v3222_v21  ;;  %v788_v21 = vunpack.c.h.bf16 %v784_v11 }
 0x47f   :  { %927 = vmatpush1.bf16.msra.mxu0 %v3213_v18  ;;  %968 = vmatpush1.bf16.msra.mxu1 %v3231_v24 }
 0x480   :  { %928 = vmatprep.subr.bf16.mxu0 %v3216_v19  ;;  %969 = vmatprep.subr.bf16.mxu1 %v3234_v25 }
 0x483   :  { %929 = vmatpush1.bf16.msra.mxu0 %v3224_v22  ;;  %970 = vmatpush1.bf16.msra.mxu1 %v3251_v30  ;;  %v787_v22 = vunpack.c.l.bf16 %v784_v11  ;;  %v3596_v11 = vld [vmem:[#allocation9 + $0xc0] ss:$16 sps:$4 sm:$0xff]  }
 0x484   :  { %930 = vmatprep.subr.bf16.mxu0 %v3227_v23  ;;  %971 = vmatprep.subr.bf16.mxu1 %v3254_v31 }
 0x487   :  { %931 = vmatpush1.bf16.msra.mxu0 %v3243_v27  ;;  %972 = vmatpush1.bf16.msra.mxu1 %v3265_v35 }
 0x488   :  { %932 = vmatprep.subr.bf16.mxu0 %v3248_v29  ;;  %973 = vmatprep.subr.bf16.mxu1 %v3268_v36 }
 0x48b   :  { %933 = vmatpush1.bf16.msra.mxu0 %v3258_v33  ;;  %974 = vmatpush1.bf16.msra.mxu1 %v3276_v39 }
 0x48c   :  { %1046 = vmatprep.subr.bf16.mxu0 %v3509_v2  ;;  %1087 = vmatprep.subr.bf16.mxu1 %v3181_v7 }
 0x541   :  { %v824_v8 = vpop.f32.mrb[16].mxu0  ;;  %v865_v9 = vpop.f32.mrb[16].mxu1 }
 0x542   :  { %v872_v10 = vadd.f32 %v824_v8, %v785_v5  ;;  %v826_v12 = vpop.f32.mrb[17].mxu0  ;;  %v867_v13 = vpop.f32.mrb[17].mxu1  ;;  %v874_v24 = vadd.f32 %v865_v9, %v787_v22  ;;  %v3581_v5 = vld [vmem:[#allocation9 + $0xac] ss:$16 sps:$4 sm:$0xff]   ;;  %v3587_v8 = vld [vmem:[#allocation9 + $0xa8] ss:$16 sps:$4 sm:$0xff]  }
 0x543   :  { %v873_v14 = vadd.f32 %v826_v12, %v786_v6  ;;  %v828_v15 = vpop.f32.mrb[18].mxu0  ;;  %v869_v16 = vpop.f32.mrb[18].mxu1  ;;  %v875_v7 = vadd.f32 %v867_v13, %v788_v21  ;;  %v3584_v6 = vld [vmem:[#allocation9 + $0xa0] ss:$16 sps:$4 sm:$0xff]   ;;  %v3590_v9 = vld [vmem:[#allocation9 + $0xc4] ss:$16 sps:$4 sm:$0xff]  }
 0x544   :  { %v2480_v17 = vmul.f32 -1.442695, %v872_v10  ;;  %v829_v18 = vpop.f32.mrb[19].mxu0  ;;  %v870_v19 = vpop.f32.mrb[19].mxu1  ;;  %v3593_v10 = vld [vmem:[#allocation9 + $0xcc] ss:$16 sps:$4 sm:$0xff]  }
 0x545   :  { %v2481_v20 = vmul.f32 -1.442695, %v873_v14  ;;  %v2482_v23 = vmul.f32 -1.442695, %v875_v7  ;;  %v3600_v12 = vld [vmem:[#allocation9 + $0xe4] ss:$16 sps:$4 sm:$0xff]  }
 0x546   :  { %2719 = vpow2.f32 %v2480_v17  ;;  %v3604_v13 = vld [vmem:[#allocation9 + $0xe0] ss:$16 sps:$4 sm:$0xff]   ;;  %v3609_v14 = vld [vmem:[#allocation9 + $0xc] ss:$16 sps:$4 sm:$0xff]  }
 0x547   :  { %2721 = vpow2.f32 %v2481_v20  ;;  %v911_v15 = vld [vmem:[#allocation6 + $0x50] sm:$0xff]  ;;  %v912_v20 = vld [vmem:[#allocation6 + $0x58] sm:$0xff] }
 0x548   :  { %2723 = vpow2.f32 %v2482_v23  ;;  %v914_v16 = vunpack.c.h.bf16 %v911_v15 }
 0x549   :  { %2725 = vtanh.f32 %v874_v24 }
 0x550   :  { %v2720_v25 = vpop.eup %2719 }
 0x551   :  { %v2722_v27 = vpop.eup %2721  ;;  %v879_v29 = vadd.f32 1.0, %v2720_v25 }
 0x552   :  { %v885_v30 = vadd.f32 1.0, %v2722_v27  ;;  %v2724_v31 = vpop.eup %2723 }
 0x553   :  { %2727 = vrcp.f32 %v879_v29  ;;  %v2726_v33 = vpop.eup %2725  ;;  %v892_v42 = vadd.f32 1.0, %v2724_v31  ;;  %v916_v29 = vunpack.c.h.bf16 %v912_v20  ;;  %v915_v31 = vunpack.c.l.bf16 %v912_v20 }
 0x554   :  { %2729 = vrcp.f32 %v885_v30 }
 0x555   :  { %2731 = vrcp.f32 %v892_v42 }
 0x55d   :  { %v2728_v51 = vpop.eup %2727 }
 0x55e   :  { %v2730_v34 = vpop.eup %2729  ;;  %v896_v40 = vmul.f32 %v2728_v51, %v2726_v33 }
 0x55f   :  { %v895_v43 = vmul.f32 %v2730_v34, %v3470_v61  ;;  %v2732_v1 = vpop.eup %2731 }
 0x561   :  { %v897_v45 = vadd.f32 %v896_v40, %v895_v43 }
 0x563   :  { %2733 = vtanh.f32 %v897_v45  ;;  %v3515_v46 = vsel %vm907_vm4, %v897_v45, %v3470_v61  ;;  %v3560_v61 = vld [vmem:[#allocation9 + $0x60] ss:$16 sps:$4 sm:$0xff]  }
 0x56d   :  { %v2734_v48 = vpop.eup %2733 }
 0x56e   :  { %v899_v52 = vmul.f32 %v2734_v48, %v2732_v1 }
 0x570   :  { %v3518_v56 = vsel %vm907_vm4, %v899_v52, %v3473_v37  ;;  %v3572_v37 = vld [vmem:[#allocation9 + $0x80] ss:$16 sps:$4 sm:$0xff]  }
 0x571   :  { %v917_v50 = vpack.c.bf16 %v3518_v56, %v3518_v56 }
 0x573   :  { %951 = vmatmul.mubr.bf16.vlgmr.msra.gmra.mrb[20].mxu0 %v917_v50  ;;  %992 = vmatmul.mubr.bf16.vlgmr.msra.gmra.mrb[20].mxu1 %v917_v50 }
 0x574   :  { %1047 = vmatpush1.bf16.msra.mxu0 %v3522_v49  ;;  %1088 = vmatpush1.bf16.msra.mxu1 %v3525_v26 }
 0x575   :  { %1048 = vmatprep.subr.bf16.mxu0 %v3528_v53  ;;  %1089 = vmatprep.subr.bf16.mxu1 %v3531_v54 }
 0x576   :  { %1078 = vmatprep.mubr.bf16.mxu0 %v3077_v3  ;;  %1119 = vmatprep.mubr.bf16.mxu1 %v3077_v3 }
 0x578   :  { %1049 = vmatpush1.bf16.msra.mxu0 %v3536_v55  ;;  %1090 = vmatpush1.bf16.msra.mxu1 %v3539_v57 }
 0x579   :  { %1050 = vmatprep.subr.bf16.mxu0 %v3542_v58  ;;  %1091 = vmatprep.subr.bf16.mxu1 %v3545_v41 }
 0x57c   :  { %1051 = vmatpush1.bf16.msra.mxu0 %v3548_v47  ;;  %1092 = vmatpush1.bf16.msra.mxu1 %v3551_v59 }
 0x57d   :  { %1052 = vmatprep.subr.bf16.mxu0 %v3554_v60  ;;  %1093 = vmatprep.subr.bf16.mxu1 %v3557_v62 }
 0x580   :  { %1053 = vmatpush1.bf16.msra.mxu0 %v3560_v61  ;;  %1094 = vmatpush1.bf16.msra.mxu1 %v3563_v63 }
 0x581   :  { %1054 = vmatprep.subr.bf16.mxu0 %v3566_v28  ;;  %1095 = vmatprep.subr.bf16.mxu1 %v3569_v32 }
 0x584   :  { %1055 = vmatpush1.bf16.msra.mxu0 %v3572_v37  ;;  %1096 = vmatpush1.bf16.msra.mxu1 %v3575_v38 }
 0x585   :  { %1056 = vmatprep.subr.bf16.mxu0 %v3578_v4  ;;  %1097 = vmatprep.subr.bf16.mxu1 %v3581_v5 }
 0x588   :  { %1057 = vmatpush1.bf16.msra.mxu0 %v3584_v6  ;;  %1098 = vmatpush1.bf16.msra.mxu1 %v3587_v8 }
 0x589   :  { %1058 = vmatprep.subr.bf16.mxu0 %v3590_v9  ;;  %1099 = vmatprep.subr.bf16.mxu1 %v3593_v10 }
 0x58c   :  { %1059 = vmatpush1.bf16.msra.mxu0 %v3596_v11  ;;  %1100 = vmatpush1.bf16.msra.mxu1 %v3265_v35  ;;  %v913_v35 = vunpack.c.l.bf16 %v911_v15 }
 0x58d   :  { %1060 = vmatprep.subr.bf16.mxu0 %v3600_v12  ;;  %1101 = vmatprep.subr.bf16.mxu1 %v3268_v36 }
 0x590   :  { %1061 = vmatpush1.bf16.msra.mxu0 %v3604_v13  ;;  %1102 = vmatpush1.bf16.msra.mxu1 %v3276_v39 }
 0x591   :  { %1174 = vmatprep.subr.bf16.mxu0 %v3509_v2  ;;  %1215 = vmatprep.subr.bf16.mxu1 %v3609_v14 }
 0x646   :  { %v952_v17 = vpop.f32.mrb[20].mxu0  ;;  %v993_v18 = vpop.f32.mrb[20].mxu1 }
 0x647   :  { %v1000_v19 = vadd.f32 %v952_v17, %v913_v35  ;;  %v954_v36 = vpop.f32.mrb[21].mxu0  ;;  %v995_v21 = vpop.f32.mrb[21].mxu1  ;;  %v1002_v51 = vadd.f32 %v993_v18, %v915_v31 }
 0x648   :  { %v1001_v7 = vadd.f32 %v954_v36, %v914_v16  ;;  %v956_v22 = vpop.f32.mrb[22].mxu0  ;;  %v997_v23 = vpop.f32.mrb[22].mxu1  ;;  %v1003_v30 = vadd.f32 %v995_v21, %v916_v29  ;;  %v1040_v29 = vld [vmem:[#allocation6 + $0x68] sm:$0xff] }
 0x649   :  { %v2483_v24 = vmul.f32 -1.442695, %v1000_v19  ;;  %v957_v39 = vpop.f32.mrb[23].mxu0  ;;  %v998_v25 = vpop.f32.mrb[23].mxu1  ;;  %v1039_v22 = vld [vmem:[#allocation6 + $0x60] sm:$0xff] }
 0x64a   :  { %v2484_v27 = vmul.f32 -1.442695, %v1001_v7  ;;  %v2485_v33 = vmul.f32 -1.442695, %v1003_v30  ;;  %v1034_v35 = vpop.permute.xlu1 %1033  ;;  %v3656_v7 = vld [vmem:[#allocation9 + $0xe8] ss:$16 sps:$4 sm:$0xff]   ;;  %v1041_v23 = vunpack.c.l.bf16 %v1039_v22 }
 0x64b   :  { %2735 = vpow2.f32 %v2483_v24  ;;  %vm1035_vm5 = vcmp.eq.s32.totalorder %v1034_v35, 1  ;;  %v1042_v24 = vunpack.c.h.bf16 %v1039_v22 }
 0x64c   :  { %2737 = vpow2.f32 %v2484_v27 }
 0x64d   :  { %2739 = vpow2.f32 %v2485_v33 }
 0x64e   :  { %2741 = vtanh.f32 %v1002_v51 }
 0x655   :  { %v2736_v34 = vpop.eup %2735 }
 0x656   :  { %v2738_v40 = vpop.eup %2737  ;;  %v1007_v42 = vadd.f32 1.0, %v2736_v34 }
 0x657   :  { %v1013_v43 = vadd.f32 1.0, %v2738_v40  ;;  %v2740_v44 = vpop.eup %2739 }
 0x658   :  { %2743 = vrcp.f32 %v1007_v42  ;;  %v2742_v45 = vpop.eup %2741  ;;  %v1020_v50 = vadd.f32 1.0, %v2740_v44 }
 0x659   :  { %2745 = vrcp.f32 %v1013_v43 }
 0x65a   :  { %2747 = vrcp.f32 %v1020_v50 }
 0x662   :  { %v2744_v1 = vpop.eup %2743 }
 0x663   :  { %v2746_v48 = vpop.eup %2745  ;;  %v1024_v52 = vmul.f32 %v2744_v1, %v2742_v45  ;;  %v1044_v45 = vunpack.c.h.bf16 %v1040_v29 }
 0x664   :  { %v1023_v15 = vmul.f32 %v2746_v48, %v3515_v46  ;;  %v2748_v18 = vpop.eup %2747  ;;  %v1043_v48 = vunpack.c.l.bf16 %v1040_v29 }
 0x666   :  { %v1025_v16 = vadd.f32 %v1024_v52, %v1023_v15 }
 0x668   :  { %2749 = vtanh.f32 %v1025_v16  ;;  %v3614_v17 = vsel %vm1035_vm5, %v1025_v16, %v3515_v46  ;;  %v3648_v46 = vld [vmem:[#allocation9 + $0xc8] ss:$16 sps:$4 sm:$0xff]  }
 0x672   :  { %v2750_v19 = vpop.eup %2749 }
 0x673   :  { %v1027_v20 = vmul.f32 %v2750_v19, %v2748_v18 }
 0x675   :  { %v3617_v36 = vsel %vm1035_vm5, %v1027_v20, %v3518_v56  ;;  %v3652_v56 = vld [vmem:[#allocation9 + $0xec] ss:$16 sps:$4 sm:$0xff]  }
 0x676   :  { %v1045_v21 = vpack.c.bf16 %v3617_v36, %v3617_v36 }
 0x678   :  { %1079 = vmatmul.mubr.bf16.vlgmr.msra.gmra.mrb[24].mxu0 %v1045_v21  ;;  %1120 = vmatmul.mubr.bf16.vlgmr.msra.gmra.mrb[24].mxu1 %v1045_v21 }
 0x679   :  { %1175 = vmatpush1.bf16.msra.mxu0 %v3522_v49  ;;  %1216 = vmatpush1.bf16.msra.mxu1 %v3525_v26 }
 0x67a   :  { %1176 = vmatprep.subr.bf16.mxu0 %v3528_v53  ;;  %1217 = vmatprep.subr.bf16.mxu1 %v3531_v54 }
 0x67b   :  { %1206 = vmatprep.mubr.bf16.mxu0 %v3077_v3  ;;  %1247 = vmatprep.mubr.bf16.mxu1 %v3077_v3 }
 0x67d   :  { %1177 = vmatpush1.bf16.msra.mxu0 %v3536_v55  ;;  %1218 = vmatpush1.bf16.msra.mxu1 %v3539_v57 }
 0x67e   :  { %1178 = vmatprep.subr.bf16.mxu0 %v3542_v58  ;;  %1219 = vmatprep.subr.bf16.mxu1 %v3545_v41 }
 0x681   :  { %1179 = vmatpush1.bf16.msra.mxu0 %v3548_v47  ;;  %1220 = vmatpush1.bf16.msra.mxu1 %v3551_v59 }
 0x682   :  { %1180 = vmatprep.subr.bf16.mxu0 %v3554_v60  ;;  %1221 = vmatprep.subr.bf16.mxu1 %v3557_v62 }
 0x685   :  { %1181 = vmatpush1.bf16.msra.mxu0 %v3560_v61  ;;  %1222 = vmatpush1.bf16.msra.mxu1 %v3563_v63 }
 0x686   :  { %1182 = vmatprep.subr.bf16.mxu0 %v3566_v28  ;;  %1223 = vmatprep.subr.bf16.mxu1 %v3569_v32 }
 0x689   :  { %1183 = vmatpush1.bf16.msra.mxu0 %v3572_v37  ;;  %1224 = vmatpush1.bf16.msra.mxu1 %v3575_v38 }
 0x68a   :  { %1184 = vmatprep.subr.bf16.mxu0 %v3578_v4  ;;  %1225 = vmatprep.subr.bf16.mxu1 %v3581_v5 }
 0x68d   :  { %1185 = vmatpush1.bf16.msra.mxu0 %v3584_v6  ;;  %1226 = vmatpush1.bf16.msra.mxu1 %v3587_v8 }
 0x68e   :  { %1186 = vmatprep.subr.bf16.mxu0 %v3590_v9  ;;  %1227 = vmatprep.subr.bf16.mxu1 %v3593_v10 }
 0x691   :  { %1187 = vmatpush1.bf16.msra.mxu0 %v3596_v11  ;;  %1228 = vmatpush1.bf16.msra.mxu1 %v3648_v46 }
 0x692   :  { %1188 = vmatprep.subr.bf16.mxu0 %v3600_v12  ;;  %1229 = vmatprep.subr.bf16.mxu1 %v3652_v56 }
 0x695   :  { %1189 = vmatpush1.bf16.msra.mxu0 %v3604_v13  ;;  %1230 = vmatpush1.bf16.msra.mxu1 %v3656_v7 }
 0x696   :  { %1302 = vmatprep.subr.bf16.mxu0 %v3509_v2  ;;  %1343 = vmatprep.subr.bf16.mxu1 %v3609_v14 }
 0x74b   :  { %v1080_v39 = vpop.f32.mrb[24].mxu0  ;;  %v1121_v25 = vpop.f32.mrb[24].mxu1 }
 0x74c   :  { %v1128_v27 = vadd.f32 %v1080_v39, %v1041_v23  ;;  %v1082_v30 = vpop.f32.mrb[25].mxu0  ;;  %v1123_v31 = vpop.f32.mrb[25].mxu1  ;;  %v1130_v50 = vadd.f32 %v1121_v25, %v1043_v48 }
 0x74d   :  { %v1129_v33 = vadd.f32 %v1082_v30, %v1042_v24  ;;  %v1084_v51 = vpop.f32.mrb[26].mxu0  ;;  %v1125_v34 = vpop.f32.mrb[26].mxu1  ;;  %v1131_v1 = vadd.f32 %v1123_v31, %v1044_v45  ;;  %v1168_v45 = vld [vmem:[#allocation6 + $0x78] sm:$0xff] }
 0x74e   :  { %v2486_v40 = vmul.f32 -1.442695, %v1128_v27  ;;  %v1085_v42 = vpop.f32.mrb[27].mxu0  ;;  %v1126_v43 = vpop.f32.mrb[27].mxu1 }
 0x74f   :  { %v2487_v44 = vmul.f32 -1.442695, %v1129_v33  ;;  %v2488_v52 = vmul.f32 -1.442695, %v1131_v1  ;;  %v1162_v27 = vpop.permute.xlu0 %1161 }
 0x750   :  { %2751 = vpow2.f32 %v2486_v40  ;;  %vm1163_vm6 = vcmp.eq.s32.totalorder %v1162_v27, 1 }
 0x751   :  { %2753 = vpow2.f32 %v2487_v44 }
 0x752   :  { %2755 = vpow2.f32 %v2488_v52 }
 0x753   :  { %2757 = vtanh.f32 %v1130_v50 }
 0x75a   :  { %v2752_v15 = vpop.eup %2751 }
 0x75b   :  { %v2754_v35 = vpop.eup %2753  ;;  %v1135_v16 = vadd.f32 1.0, %v2752_v15 }
 0x75c   :  { %v1141_v18 = vadd.f32 1.0, %v2754_v35  ;;  %v2756_v19 = vpop.eup %2755 }
 0x75d   :  { %2759 = vrcp.f32 %v1135_v16  ;;  %v2758_v20 = vpop.eup %2757  ;;  %v1148_v24 = vadd.f32 1.0, %v2756_v19 }
 0x75e   :  { %2761 = vrcp.f32 %v1141_v18 }
 0x75f   :  { %2763 = vrcp.f32 %v1148_v24 }
 0x767   :  { %v2760_v21 = vpop.eup %2759 }
 0x768   :  { %v2762_v22 = vpop.eup %2761  ;;  %v1152_v23 = vmul.f32 %v2760_v21, %v2758_v20  ;;  %v1172_v20 = vunpack.c.h.bf16 %v1168_v45 }
 0x769   :  { %v1151_v39 = vmul.f32 %v2762_v22, %v3614_v17  ;;  %v2764_v30 = vpop.eup %2763  ;;  %v1171_v22 = vunpack.c.l.bf16 %v1168_v45 }
 0x76b   :  { %v1153_v29 = vadd.f32 %v1152_v23, %v1151_v39 }
 0x76d   :  { %2765 = vtanh.f32 %v1153_v29  ;;  %v3663_v25 = vsel %vm1163_vm6, %v1153_v29, %v3614_v17  ;;  %v1167_v17 = vld [vmem:[#allocation6 + $0x70] sm:$0xff] }
 0x76e   :  { %v1170_v40 = vunpack.c.h.bf16 %v1167_v17 }
 0x777   :  { %v2766_v31 = vpop.eup %2765 }
 0x778   :  { %v1155_v33 = vmul.f32 %v2766_v31, %v2764_v30 }
 0x77a   :  { %v3666_v51 = vsel %vm1163_vm6, %v1155_v33, %v3617_v36  ;;  %v1169_v36 = vunpack.c.l.bf16 %v1167_v17 }
 0x77b   :  { %v1173_v34 = vpack.c.bf16 %v3666_v51, %v3666_v51 }
 0x77d   :  { %1207 = vmatmul.mubr.bf16.vlgmr.msra.gmra.mrb[28].mxu0 %v1173_v34  ;;  %1248 = vmatmul.mubr.bf16.vlgmr.msra.gmra.mrb[28].mxu1 %v1173_v34 }
 0x77e   :  { %1303 = vmatpush1.bf16.msra.mxu0 %v3522_v49  ;;  %1344 = vmatpush1.bf16.msra.mxu1 %v3525_v26 }
 0x77f   :  { %1304 = vmatprep.subr.bf16.mxu0 %v3528_v53  ;;  %1345 = vmatprep.subr.bf16.mxu1 %v3531_v54 }
 0x780   :  { %1334 = vmatprep.mubr.bf16.mxu0 %v3077_v3  ;;  %1375 = vmatprep.mubr.bf16.mxu1 %v3077_v3 }
 0x782   :  { %1305 = vmatpush1.bf16.msra.mxu0 %v3536_v55  ;;  %1346 = vmatpush1.bf16.msra.mxu1 %v3539_v57 }
 0x783   :  { %1306 = vmatprep.subr.bf16.mxu0 %v3542_v58  ;;  %1347 = vmatprep.subr.bf16.mxu1 %v3545_v41 }
 0x786   :  { %1307 = vmatpush1.bf16.msra.mxu0 %v3548_v47  ;;  %1348 = vmatpush1.bf16.msra.mxu1 %v3551_v59 }
 0x787   :  { %1308 = vmatprep.subr.bf16.mxu0 %v3554_v60  ;;  %1349 = vmatprep.subr.bf16.mxu1 %v3557_v62 }
 0x78a   :  { %1309 = vmatpush1.bf16.msra.mxu0 %v3560_v61  ;;  %1350 = vmatpush1.bf16.msra.mxu1 %v3563_v63 }
 0x78b   :  { %1310 = vmatprep.subr.bf16.mxu0 %v3566_v28  ;;  %1351 = vmatprep.subr.bf16.mxu1 %v3569_v32 }
 0x78e   :  { %1311 = vmatpush1.bf16.msra.mxu0 %v3572_v37  ;;  %1352 = vmatpush1.bf16.msra.mxu1 %v3575_v38 }
 0x78f   :  { %1312 = vmatprep.subr.bf16.mxu0 %v3578_v4  ;;  %1353 = vmatprep.subr.bf16.mxu1 %v3581_v5 }
 0x792   :  { %1313 = vmatpush1.bf16.msra.mxu0 %v3584_v6  ;;  %1354 = vmatpush1.bf16.msra.mxu1 %v3587_v8 }
 0x793   :  { %1314 = vmatprep.subr.bf16.mxu0 %v3590_v9  ;;  %1355 = vmatprep.subr.bf16.mxu1 %v3593_v10 }
 0x796   :  { %1315 = vmatpush1.bf16.msra.mxu0 %v3596_v11  ;;  %1356 = vmatpush1.bf16.msra.mxu1 %v3648_v46 }
 0x797   :  { %1316 = vmatprep.subr.bf16.mxu0 %v3600_v12  ;;  %1357 = vmatprep.subr.bf16.mxu1 %v3652_v56 }
 0x79a   :  { %1317 = vmatpush1.bf16.msra.mxu0 %v3604_v13  ;;  %1358 = vmatpush1.bf16.msra.mxu1 %v3656_v7 }
 0x79b   :  { %1430 = vmatprep.subr.bf16.mxu0 %v3509_v2  ;;  %1471 = vmatprep.subr.bf16.mxu1 %v3609_v14 }
 0x850   :  { %v1208_v42 = vpop.f32.mrb[28].mxu0  ;;  %v1249_v43 = vpop.f32.mrb[28].mxu1 }
 0x851   :  { %v1256_v44 = vadd.f32 %v1208_v42, %v1169_v36  ;;  %v1210_v1 = vpop.f32.mrb[29].mxu0  ;;  %v1251_v48 = vpop.f32.mrb[29].mxu1  ;;  %v1258_v24 = vadd.f32 %v1249_v43, %v1171_v22 }
 0x852   :  { %v1257_v52 = vadd.f32 %v1210_v1, %v1170_v40  ;;  %v1212_v50 = vpop.f32.mrb[30].mxu0  ;;  %v1253_v15 = vpop.f32.mrb[30].mxu1  ;;  %v1259_v21 = vadd.f32 %v1251_v48, %v1172_v20  ;;  %v1296_v20 = vld [vmem:[#allocation6 + $0x88] sm:$0xff] }
 0x853   :  { %v2489_v35 = vmul.f32 -1.442695, %v1256_v44  ;;  %v1213_v16 = vpop.f32.mrb[31].mxu0  ;;  %v1254_v18 = vpop.f32.mrb[31].mxu1 }
 0x854   :  { %v2490_v19 = vmul.f32 -1.442695, %v1257_v52  ;;  %v2491_v23 = vmul.f32 -1.442695, %v1259_v21  ;;  %v1290_v44 = vpop.permute.xlu1 %1289 }
 0x855   :  { %2767 = vpow2.f32 %v2489_v35  ;;  %vm1291_vm7 = vcmp.eq.s32.totalorder %v1290_v44, 1 }
 0x856   :  { %2769 = vpow2.f32 %v2490_v19 }
 0x857   :  { %2771 = vpow2.f32 %v2491_v23 }
 0x858   :  { %2773 = vtanh.f32 %v1258_v24 }
 0x85f   :  { %v2768_v39 = vpop.eup %2767 }
 0x860   :  { %v2770_v27 = vpop.eup %2769  ;;  %v1263_v29 = vadd.f32 1.0, %v2768_v39 }
 0x861   :  { %v1269_v30 = vadd.f32 1.0, %v2770_v27  ;;  %v2772_v31 = vpop.eup %2771 }
 0x862   :  { %2775 = vrcp.f32 %v1263_v29  ;;  %v2774_v33 = vpop.eup %2773  ;;  %v1276_v40 = vadd.f32 1.0, %v2772_v31 }
 0x863   :  { %2777 = vrcp.f32 %v1269_v30 }
 0x864   :  { %2779 = vrcp.f32 %v1276_v40 }
 0x86c   :  { %v2776_v34 = vpop.eup %2775 }
 0x86d   :  { %v2778_v17 = vpop.eup %2777  ;;  %v1280_v36 = vmul.f32 %v2776_v34, %v2774_v33  ;;  %v1300_v33 = vunpack.c.h.bf16 %v1296_v20 }
 0x86e   :  { %v1279_v42 = vmul.f32 %v2778_v17, %v3663_v25  ;;  %v2780_v1 = vpop.eup %2779  ;;  %v1299_v17 = vunpack.c.l.bf16 %v1296_v20 }
 0x870   :  { %v1281_v45 = vadd.f32 %v1280_v36, %v1279_v42 }
 0x872   :  { %2781 = vtanh.f32 %v1281_v45  ;;  %v3706_v43 = vsel %vm1291_vm7, %v1281_v45, %v3663_v25  ;;  %v1295_v25 = vld [vmem:[#allocation6 + $0x80] sm:$0xff] }
 0x873   :  { %v1298_v35 = vunpack.c.h.bf16 %v1295_v25 }
 0x87c   :  { %v2782_v48 = vpop.eup %2781 }
 0x87d   :  { %v1283_v52 = vmul.f32 %v2782_v48, %v2780_v1 }
 0x87f   :  { %v3709_v50 = vsel %vm1291_vm7, %v1283_v52, %v3666_v51  ;;  %v1297_v51 = vunpack.c.l.bf16 %v1295_v25 }
 0x880   :  { %v1301_v15 = vpack.c.bf16 %v3709_v50, %v3709_v50 }
 0x882   :  { %1335 = vmatmul.mubr.bf16.vlgmr.msra.gmra.mrb[32].mxu0 %v1301_v15  ;;  %1376 = vmatmul.mubr.bf16.vlgmr.msra.gmra.mrb[32].mxu1 %v1301_v15 }
 0x883   :  { %1431 = vmatpush1.bf16.msra.mxu0 %v3522_v49  ;;  %1472 = vmatpush1.bf16.msra.mxu1 %v3525_v26 }
 0x884   :  { %1432 = vmatprep.subr.bf16.mxu0 %v3528_v53  ;;  %1473 = vmatprep.subr.bf16.mxu1 %v3531_v54 }
 0x885   :  { %1462 = vmatprep.mubr.bf16.mxu0 %v3077_v3  ;;  %1503 = vmatprep.mubr.bf16.mxu1 %v3077_v3 }
 0x887   :  { %1433 = vmatpush1.bf16.msra.mxu0 %v3536_v55  ;;  %1474 = vmatpush1.bf16.msra.mxu1 %v3539_v57 }
 0x888   :  { %1434 = vmatprep.subr.bf16.mxu0 %v3542_v58  ;;  %1475 = vmatprep.subr.bf16.mxu1 %v3545_v41 }
 0x88b   :  { %1435 = vmatpush1.bf16.msra.mxu0 %v3548_v47  ;;  %1476 = vmatpush1.bf16.msra.mxu1 %v3551_v59 }
 0x88c   :  { %1436 = vmatprep.subr.bf16.mxu0 %v3554_v60  ;;  %1477 = vmatprep.subr.bf16.mxu1 %v3557_v62 }
 0x88f   :  { %1437 = vmatpush1.bf16.msra.mxu0 %v3560_v61  ;;  %1478 = vmatpush1.bf16.msra.mxu1 %v3563_v63 }
 0x890   :  { %1438 = vmatprep.subr.bf16.mxu0 %v3566_v28  ;;  %1479 = vmatprep.subr.bf16.mxu1 %v3569_v32 }
 0x893   :  { %1439 = vmatpush1.bf16.msra.mxu0 %v3572_v37  ;;  %1480 = vmatpush1.bf16.msra.mxu1 %v3575_v38 }
 0x894   :  { %1440 = vmatprep.subr.bf16.mxu0 %v3578_v4  ;;  %1481 = vmatprep.subr.bf16.mxu1 %v3581_v5 }
 0x897   :  { %1441 = vmatpush1.bf16.msra.mxu0 %v3584_v6  ;;  %1482 = vmatpush1.bf16.msra.mxu1 %v3587_v8 }
 0x898   :  { %1442 = vmatprep.subr.bf16.mxu0 %v3590_v9  ;;  %1483 = vmatprep.subr.bf16.mxu1 %v3593_v10 }
 0x89b   :  { %1443 = vmatpush1.bf16.msra.mxu0 %v3596_v11  ;;  %1484 = vmatpush1.bf16.msra.mxu1 %v3648_v46 }
 0x89c   :  { %1444 = vmatprep.subr.bf16.mxu0 %v3600_v12  ;;  %1485 = vmatprep.subr.bf16.mxu1 %v3652_v56 }
 0x89f   :  { %1445 = vmatpush1.bf16.msra.mxu0 %v3604_v13  ;;  %1486 = vmatpush1.bf16.msra.mxu1 %v3656_v7 }
 0x8a0   :  { %1558 = vmatprep.subr.bf16.mxu0 %v3509_v2  ;;  %1599 = vmatprep.subr.bf16.mxu1 %v3609_v14 }
 0x955   :  { %v1336_v16 = vpop.f32.mrb[32].mxu0  ;;  %v1377_v18 = vpop.f32.mrb[32].mxu1 }
 0x956   :  { %v1384_v19 = vadd.f32 %v1336_v16, %v1297_v51  ;;  %v1338_v21 = vpop.f32.mrb[33].mxu0  ;;  %v1379_v22 = vpop.f32.mrb[33].mxu1  ;;  %v1386_v40 = vadd.f32 %v1377_v18, %v1299_v17 }
 0x957   :  { %v1385_v23 = vadd.f32 %v1338_v21, %v1298_v35  ;;  %v1340_v24 = vpop.f32.mrb[34].mxu0  ;;  %v1381_v39 = vpop.f32.mrb[34].mxu1  ;;  %v1387_v34 = vadd.f32 %v1379_v22, %v1300_v33  ;;  %v1424_v33 = vld [vmem:[#allocation6 + $0x98] sm:$0xff] }
 0x958   :  { %v2492_v27 = vmul.f32 -1.442695, %v1384_v19  ;;  %v1341_v29 = vpop.f32.mrb[35].mxu0  ;;  %v1382_v30 = vpop.f32.mrb[35].mxu1 }
 0x959   :  { %v2493_v31 = vmul.f32 -1.442695, %v1385_v23  ;;  %v2494_v36 = vmul.f32 -1.442695, %v1387_v34  ;;  %v1418_v19 = vpop.permute.xlu0 %1417 }
 0x95a   :  { %2783 = vpow2.f32 %v2492_v27  ;;  %vm1419_vm8 = vcmp.eq.s32.totalorder %v1418_v19, 1 }
 0x95b   :  { %2785 = vpow2.f32 %v2493_v31 }
 0x95c   :  { %2787 = vpow2.f32 %v2494_v36 }
 0x95d   :  { %2789 = vtanh.f32 %v1386_v40 }
 0x964   :  { %v2784_v42 = vpop.eup %2783 }
 0x965   :  { %v2786_v44 = vpop.eup %2785  ;;  %v1391_v45 = vadd.f32 1.0, %v2784_v42 }
 0x966   :  { %v1397_v1 = vadd.f32 1.0, %v2786_v44  ;;  %v2788_v48 = vpop.eup %2787 }
 0x967   :  { %2791 = vrcp.f32 %v1391_v45  ;;  %v2790_v52 = vpop.eup %2789  ;;  %v1404_v35 = vadd.f32 1.0, %v2788_v48 }
 0x968   :  { %2793 = vrcp.f32 %v1397_v1 }
 0x969   :  { %2795 = vrcp.f32 %v1404_v35 }
 0x971   :  { %v2792_v15 = vpop.eup %2791 }
 0x972   :  { %v2794_v25 = vpop.eup %2793  ;;  %v1408_v51 = vmul.f32 %v2792_v15, %v2790_v52  ;;  %v1428_v52 = vunpack.c.h.bf16 %v1424_v33 }
 0x973   :  { %v1407_v16 = vmul.f32 %v2794_v25, %v3706_v43  ;;  %v2796_v21 = vpop.eup %2795  ;;  %v1427_v25 = vunpack.c.l.bf16 %v1424_v33 }
 0x975   :  { %v1409_v20 = vadd.f32 %v1408_v51, %v1407_v16 }
 0x977   :  { %2797 = vtanh.f32 %v1409_v20  ;;  %v3749_v18 = vsel %vm1419_vm8, %v1409_v20, %v3706_v43  ;;  %v1423_v43 = vld [vmem:[#allocation6 + $0x90] sm:$0xff] }
 0x978   :  { %v1426_v27 = vunpack.c.h.bf16 %v1423_v43 }
 0x981   :  { %v2798_v22 = vpop.eup %2797 }
 0x982   :  { %v1411_v23 = vmul.f32 %v2798_v22, %v2796_v21 }
 0x984   :  { %v3752_v24 = vsel %vm1419_vm8, %v1411_v23, %v3709_v50  ;;  %v1425_v50 = vunpack.c.l.bf16 %v1423_v43 }
 0x985   :  { %v1429_v39 = vpack.c.bf16 %v3752_v24, %v3752_v24 }
 0x987   :  { %1463 = vmatmul.mubr.bf16.vlgmr.msra.gmra.mrb[36].mxu0 %v1429_v39  ;;  %1504 = vmatmul.mubr.bf16.vlgmr.msra.gmra.mrb[36].mxu1 %v1429_v39 }
 0x988   :  { %1559 = vmatpush1.bf16.msra.mxu0 %v3522_v49  ;;  %1600 = vmatpush1.bf16.msra.mxu1 %v3525_v26 }
 0x989   :  { %1560 = vmatprep.subr.bf16.mxu0 %v3528_v53  ;;  %1601 = vmatprep.subr.bf16.mxu1 %v3531_v54 }
 0x98a   :  { %1590 = vmatprep.mubr.bf16.mxu0 %v3077_v3  ;;  %1631 = vmatprep.mubr.bf16.mxu1 %v3077_v3 }
 0x98c   :  { %1561 = vmatpush1.bf16.msra.mxu0 %v3536_v55  ;;  %1602 = vmatpush1.bf16.msra.mxu1 %v3539_v57 }
 0x98d   :  { %1562 = vmatprep.subr.bf16.mxu0 %v3542_v58  ;;  %1603 = vmatprep.subr.bf16.mxu1 %v3545_v41 }
 0x990   :  { %1563 = vmatpush1.bf16.msra.mxu0 %v3548_v47  ;;  %1604 = vmatpush1.bf16.msra.mxu1 %v3551_v59 }
 0x991   :  { %1564 = vmatprep.subr.bf16.mxu0 %v3554_v60  ;;  %1605 = vmatprep.subr.bf16.mxu1 %v3557_v62 }
 0x994   :  { %1565 = vmatpush1.bf16.msra.mxu0 %v3560_v61  ;;  %1606 = vmatpush1.bf16.msra.mxu1 %v3563_v63 }
 0x995   :  { %1566 = vmatprep.subr.bf16.mxu0 %v3566_v28  ;;  %1607 = vmatprep.subr.bf16.mxu1 %v3569_v32 }
 0x998   :  { %1567 = vmatpush1.bf16.msra.mxu0 %v3572_v37  ;;  %1608 = vmatpush1.bf16.msra.mxu1 %v3575_v38 }
 0x999   :  { %1568 = vmatprep.subr.bf16.mxu0 %v3578_v4  ;;  %1609 = vmatprep.subr.bf16.mxu1 %v3581_v5 }
 0x99c   :  { %1569 = vmatpush1.bf16.msra.mxu0 %v3584_v6  ;;  %1610 = vmatpush1.bf16.msra.mxu1 %v3587_v8 }
 0x99d   :  { %1570 = vmatprep.subr.bf16.mxu0 %v3590_v9  ;;  %1611 = vmatprep.subr.bf16.mxu1 %v3593_v10 }
 0x9a0   :  { %1571 = vmatpush1.bf16.msra.mxu0 %v3596_v11  ;;  %1612 = vmatpush1.bf16.msra.mxu1 %v3648_v46 }
 0x9a1   :  { %1572 = vmatprep.subr.bf16.mxu0 %v3600_v12  ;;  %1613 = vmatprep.subr.bf16.mxu1 %v3652_v56 }
 0x9a4   :  { %1573 = vmatpush1.bf16.msra.mxu0 %v3604_v13  ;;  %1614 = vmatpush1.bf16.msra.mxu1 %v3656_v7 }
 0x9a5   :  { %1686 = vmatprep.subr.bf16.mxu0 %v3509_v2  ;;  %1727 = vmatprep.subr.bf16.mxu1 %v3609_v14 }
 0xa5a   :  { %v1464_v29 = vpop.f32.mrb[36].mxu0  ;;  %v1505_v30 = vpop.f32.mrb[36].mxu1 }
 0xa5b   :  { %v1512_v31 = vadd.f32 %v1464_v29, %v1425_v50  ;;  %v1466_v34 = vpop.f32.mrb[37].mxu0  ;;  %v1507_v17 = vpop.f32.mrb[37].mxu1  ;;  %v1514_v35 = vadd.f32 %v1505_v30, %v1427_v25 }
 0xa5c   :  { %v1513_v36 = vadd.f32 %v1466_v34, %v1426_v27  ;;  %v1468_v40 = vpop.f32.mrb[38].mxu0  ;;  %v1509_v42 = vpop.f32.mrb[38].mxu1  ;;  %v1515_v15 = vadd.f32 %v1507_v17, %v1428_v52  ;;  %v1552_v52 = vld [vmem:[#allocation6 + $0xa8] sm:$0xff] }
 0xa5d   :  { %v2495_v44 = vmul.f32 -1.442695, %v1512_v31  ;;  %v1469_v45 = vpop.f32.mrb[39].mxu0  ;;  %v1510_v1 = vpop.f32.mrb[39].mxu1 }
 0xa5e   :  { %v2496_v48 = vmul.f32 -1.442695, %v1513_v36  ;;  %v2497_v51 = vmul.f32 -1.442695, %v1515_v15  ;;  %v1546_v31 = vpop.permute.xlu1 %1545 }
 0xa5f   :  { %2799 = vpow2.f32 %v2495_v44  ;;  %vm1547_vm9 = vcmp.eq.s32.totalorder %v1546_v31, 1 }
 0xa60   :  { %2801 = vpow2.f32 %v2496_v48 }
 0xa61   :  { %2803 = vpow2.f32 %v2497_v51 }
 0xa62   :  { %2805 = vtanh.f32 %v1514_v35 }
 0xa69   :  { %v2800_v16 = vpop.eup %2799 }
 0xa6a   :  { %v2802_v19 = vpop.eup %2801  ;;  %v1519_v20 = vadd.f32 1.0, %v2800_v16 }
 0xa6b   :  { %v1525_v21 = vadd.f32 1.0, %v2802_v19  ;;  %v2804_v22 = vpop.eup %2803 }
 0xa6c   :  { %2807 = vrcp.f32 %v1519_v20  ;;  %v2806_v23 = vpop.eup %2805  ;;  %v1532_v27 = vadd.f32 1.0, %v2804_v22 }
 0xa6d   :  { %2809 = vrcp.f32 %v1525_v21 }
 0xa6e   :  { %2811 = vrcp.f32 %v1532_v27 }
 0xa76   :  { %v2808_v39 = vpop.eup %2807 }
 0xa77   :  { %v2810_v43 = vpop.eup %2809  ;;  %v1536_v50 = vmul.f32 %v2808_v39, %v2806_v23  ;;  %v1556_v23 = vunpack.c.h.bf16 %v1552_v52  ;;  %v1555_v39 = vunpack.c.l.bf16 %v1552_v52 }
 0xa78   :  { %v1535_v29 = vmul.f32 %v2810_v43, %v3749_v18  ;;  %v2812_v34 = vpop.eup %2811 }
 0xa7a   :  { %v1537_v33 = vadd.f32 %v1536_v50, %v1535_v29 }
 0xa7c   :  { %2813 = vtanh.f32 %v1537_v33  ;;  %v3792_v30 = vsel %vm1547_vm9, %v1537_v33, %v3749_v18  ;;  %v1551_v18 = vld [vmem:[#allocation6 + $0xa0] sm:$0xff] }
 0xa7d   :  { %v1554_v44 = vunpack.c.h.bf16 %v1551_v18 }
 0xa86   :  { %v2814_v17 = vpop.eup %2813 }
 0xa87   :  { %v1539_v36 = vmul.f32 %v2814_v17, %v2812_v34 }
 0xa89   :  { %v3795_v40 = vsel %vm1547_vm9, %v1539_v36, %v3752_v24  ;;  %v1553_v24 = vunpack.c.l.bf16 %v1551_v18 }
 0xa8a   :  { %v1557_v42 = vpack.c.bf16 %v3795_v40, %v3795_v40 }
 0xa8c   :  { %1591 = vmatmul.mubr.bf16.vlgmr.msra.gmra.mrb[40].mxu0 %v1557_v42  ;;  %1632 = vmatmul.mubr.bf16.vlgmr.msra.gmra.mrb[40].mxu1 %v1557_v42 }
 0xa8d   :  { %1687 = vmatpush1.bf16.msra.mxu0 %v3522_v49  ;;  %1728 = vmatpush1.bf16.msra.mxu1 %v3525_v26 }
 0xa8e   :  { %1688 = vmatprep.subr.bf16.mxu0 %v3528_v53  ;;  %1729 = vmatprep.subr.bf16.mxu1 %v3531_v54 }
 0xa8f   :  { %1718 = vmatprep.mubr.bf16.mxu0 %v3077_v3  ;;  %1759 = vmatprep.mubr.bf16.mxu1 %v3077_v3 }
 0xa91   :  { %1689 = vmatpush1.bf16.msra.mxu0 %v3536_v55  ;;  %1730 = vmatpush1.bf16.msra.mxu1 %v3539_v57 }
 0xa92   :  { %1690 = vmatprep.subr.bf16.mxu0 %v3542_v58  ;;  %1731 = vmatprep.subr.bf16.mxu1 %v3545_v41 }
 0xa95   :  { %1691 = vmatpush1.bf16.msra.mxu0 %v3548_v47  ;;  %1732 = vmatpush1.bf16.msra.mxu1 %v3551_v59 }
 0xa96   :  { %1692 = vmatprep.subr.bf16.mxu0 %v3554_v60  ;;  %1733 = vmatprep.subr.bf16.mxu1 %v3557_v62 }
 0xa99   :  { %1693 = vmatpush1.bf16.msra.mxu0 %v3560_v61  ;;  %1734 = vmatpush1.bf16.msra.mxu1 %v3563_v63 }
 0xa9a   :  { %1694 = vmatprep.subr.bf16.mxu0 %v3566_v28  ;;  %1735 = vmatprep.subr.bf16.mxu1 %v3569_v32 }
 0xa9d   :  { %1695 = vmatpush1.bf16.msra.mxu0 %v3572_v37  ;;  %1736 = vmatpush1.bf16.msra.mxu1 %v3575_v38 }
 0xa9e   :  { %1696 = vmatprep.subr.bf16.mxu0 %v3578_v4  ;;  %1737 = vmatprep.subr.bf16.mxu1 %v3581_v5 }
 0xaa1   :  { %1697 = vmatpush1.bf16.msra.mxu0 %v3584_v6  ;;  %1738 = vmatpush1.bf16.msra.mxu1 %v3587_v8 }
 0xaa2   :  { %1698 = vmatprep.subr.bf16.mxu0 %v3590_v9  ;;  %1739 = vmatprep.subr.bf16.mxu1 %v3593_v10 }
 0xaa5   :  { %1699 = vmatpush1.bf16.msra.mxu0 %v3596_v11  ;;  %1740 = vmatpush1.bf16.msra.mxu1 %v3648_v46 }
 0xaa6   :  { %1700 = vmatprep.subr.bf16.mxu0 %v3600_v12  ;;  %1741 = vmatprep.subr.bf16.mxu1 %v3652_v56 }
 0xaa9   :  { %1701 = vmatpush1.bf16.msra.mxu0 %v3604_v13  ;;  %1742 = vmatpush1.bf16.msra.mxu1 %v3656_v7 }
 0xaaa   :  { %1814 = vmatprep.subr.bf16.mxu0 %v3509_v2  ;;  %1855 = vmatprep.subr.bf16.mxu1 %v3609_v14 }
 0xb5f   :  { %v1592_v45 = vpop.f32.mrb[40].mxu0  ;;  %v1633_v1 = vpop.f32.mrb[40].mxu1 }
 0xb60   :  { %v1640_v48 = vadd.f32 %v1592_v45, %v1553_v24  ;;  %v1594_v15 = vpop.f32.mrb[41].mxu0  ;;  %v1635_v25 = vpop.f32.mrb[41].mxu1  ;;  %v1642_v50 = vadd.f32 %v1633_v1, %v1555_v39 }
 0xb61   :  { %v1641_v51 = vadd.f32 %v1594_v15, %v1554_v44  ;;  %v1596_v35 = vpop.f32.mrb[42].mxu0  ;;  %v1637_v16 = vpop.f32.mrb[42].mxu1  ;;  %v1643_v2 = vadd.f32 %v1635_v25, %v1556_v23 }
 0xb62   :  { %v2498_v19 = vmul.f32 -1.442695, %v1640_v48  ;;  %v1597_v20 = vpop.f32.mrb[43].mxu0  ;;  %v1638_v21 = vpop.f32.mrb[43].mxu1 }
 0xb63   :  { %v2499_v22 = vmul.f32 -1.442695, %v1641_v51  ;;  %v2500_v43 = vmul.f32 -1.442695, %v1643_v2  ;;  %v1674_v45 = vpop.permute.xlu0 %1673  ;;  %v1802_v21 = vpop.permute.xlu1 %1801 }
 0xb64   :  { %2815 = vpow2.f32 %v2498_v19  ;;  %vm1675_vm10 = vcmp.eq.s32.totalorder %v1674_v45, 1  ;;  %vm1803_vm11 = vcmp.eq.s32.totalorder %v1802_v21, 1  ;;  %v3919_v45 = vld [vmem:[#allocation9 + $0x64] ss:$16 sps:$4 sm:$0xff]  }
 0xb65   :  { %2817 = vpow2.f32 %v2499_v22 }
 0xb66   :  { %2819 = vpow2.f32 %v2500_v43 }
 0xb67   :  { %2821 = vtanh.f32 %v1642_v50 }
 0xb6e   :  { %v2816_v27 = vpop.eup %2815 }
 0xb6f   :  { %v2818_v29 = vpop.eup %2817  ;;  %v1647_v31 = vadd.f32 1.0, %v2816_v27 }
 0xb70   :  { %v1653_v33 = vadd.f32 1.0, %v2818_v29  ;;  %v2820_v34 = vpop.eup %2819  ;;  %v3887_v29 = vld [vmem:[#allocation9] ss:$16 sps:$4 sm:$0xff]  }
 0xb71   :  { %2823 = vrcp.f32 %v1647_v31  ;;  %v2822_v17 = vpop.eup %2821  ;;  %v1660_v24 = vadd.f32 1.0, %v2820_v34  ;;  %v3890_v31 = vld [vmem:[#allocation9 + $0x8] ss:$16 sps:$4 sm:$0xff]   ;;  %v3896_v34 = vld [vmem:[#allocation9 + $0x2c] ss:$16 sps:$4 sm:$0xff]  }
 0xb72   :  { %2825 = vrcp.f32 %v1653_v33  ;;  %v3893_v33 = vld [vmem:[#allocation9 + $0x24] ss:$16 sps:$4 sm:$0xff]  }
 0xb73   :  { %2827 = vrcp.f32 %v1660_v24  ;;  %v3913_v24 = vld [vmem:[#allocation9 + $0x40] ss:$16 sps:$4 sm:$0xff]  }
 0xb7b   :  { %v2824_v36 = vpop.eup %2823 }
 0xb7c   :  { %v2826_v42 = vpop.eup %2825  ;;  %v1664_v18 = vmul.f32 %v2824_v36, %v2822_v17  ;;  %v3901_v17 = vld [vmem:[#allocation9 + $0x20] ss:$16 sps:$4 sm:$0xff]   ;;  %v3904_v36 = vld [vmem:[#allocation9 + $0x28] ss:$16 sps:$4 sm:$0xff]  }
 0xb7d   :  { %v1663_v44 = vmul.f32 %v2826_v42, %v3792_v30  ;;  %v2828_v52 = vpop.eup %2827  ;;  %v3907_v42 = vld [vmem:[#allocation9 + $0x44] ss:$16 sps:$4 sm:$0xff]  }
 0xb7f   :  { %v1665_v48 = vadd.f32 %v1664_v18, %v1663_v44  ;;  %v3910_v18 = vld [vmem:[#allocation9 + $0x4c] ss:$16 sps:$4 sm:$0xff]   ;;  %v3916_v44 = vld [vmem:[#allocation9 + $0x48] ss:$16 sps:$4 sm:$0xff]  }
 0xb81   :  { %2829 = vtanh.f32 %v1665_v48  ;;  %v3835_v1 = vsel %vm1675_vm10, %v1665_v48, %v3792_v30  ;;  %v3922_v48 = vld [vmem:[#allocation9 + $0x6c] ss:$16 sps:$4 sm:$0xff]  }
 0xb8b   :  { %v2830_v15 = vpop.eup %2829 }
 0xb8c   :  { %v1667_v25 = vmul.f32 %v2830_v15, %v2828_v52  ;;  %v3928_v52 = vld [vmem:[#allocation9 + $0x68] ss:$16 sps:$4 sm:$0xff]   ;;  %v3931_v15 = vld [vmem:[#allocation9 + $0x84] ss:$16 sps:$4 sm:$0xff]  }
 0xb8e   :  { %v3838_v51 = vsel %vm1675_vm10, %v1667_v25, %v3795_v40  ;;  %v3934_v25 = vld [vmem:[#allocation9 + $0x8c] ss:$16 sps:$4 sm:$0xff]  }
 0xb8f   :  { %v1685_v35 = vpack.c.bf16 %v3838_v51, %v3838_v51 }
 0xb91   :  { %1719 = vmatmul.mubr.bf16.vlgmr.msra.gmra.mrb[44].mxu0 %v1685_v35  ;;  %1760 = vmatmul.mubr.bf16.vlgmr.msra.gmra.mrb[44].mxu1 %v1685_v35  ;;  %v3940_v35 = vld [vmem:[#allocation9 + $0x88] ss:$16 sps:$4 sm:$0xff]  }
 0xb92   :  { %1815 = vmatpush1.bf16.msra.mxu0 %v3522_v49  ;;  %1856 = vmatpush1.bf16.msra.mxu1 %v3525_v26  ;;  %v3874_v49 = vld [vmem:[#allocation9 + $0x4] ss:$16 sps:$4 sm:$0xff]  }
 0xb93   :  { %1816 = vmatprep.subr.bf16.mxu0 %v3528_v53  ;;  %1857 = vmatprep.subr.bf16.mxu1 %v3531_v54  ;;  %v1679_v26 = vld [vmem:[#allocation6 + $0xb0] sm:$0xff] }
 0xb94   :  { %1846 = vmatprep.mubr.bf16.mxu0 %v3077_v3  ;;  %1887 = vmatprep.mubr.bf16.mxu1 %v3077_v3  ;;  %v1681_v53 = vunpack.c.l.bf16 %v1679_v26  ;;  %v1682_v54 = vunpack.c.h.bf16 %v1679_v26  ;;  %v3943_v26 = vld [vmem:[#allocation9 + $0xa4] ss:$16 sps:$4 sm:$0xff]  }
 0xb96   :  { %1817 = vmatpush1.bf16.msra.mxu0 %v3536_v55  ;;  %1858 = vmatpush1.bf16.msra.mxu1 %v3539_v57 }
 0xb97   :  { %1818 = vmatprep.subr.bf16.mxu0 %v3542_v58  ;;  %1859 = vmatprep.subr.bf16.mxu1 %v3545_v41  ;;  %v1680_v41 = vld [vmem:[#allocation6 + $0xb8] sm:$0xff] }
 0xb9a   :  { %1819 = vmatpush1.bf16.msra.mxu0 %v3548_v47  ;;  %1860 = vmatpush1.bf16.msra.mxu1 %v3551_v59 }
 0xb9b   :  { %1820 = vmatprep.subr.bf16.mxu0 %v3554_v60  ;;  %1861 = vmatprep.subr.bf16.mxu1 %v3557_v62 }
 0xb9e   :  { %1821 = vmatpush1.bf16.msra.mxu0 %v3560_v61  ;;  %1862 = vmatpush1.bf16.msra.mxu1 %v3563_v63 }
 0xb9f   :  { %1822 = vmatprep.subr.bf16.mxu0 %v3566_v28  ;;  %1863 = vmatprep.subr.bf16.mxu1 %v3569_v32 }
 0xba2   :  { %1823 = vmatpush1.bf16.msra.mxu0 %v3572_v37  ;;  %1864 = vmatpush1.bf16.msra.mxu1 %v3575_v38  ;;  %v1684_v38 = vunpack.c.h.bf16 %v1680_v41 }
 0xba3   :  { %1824 = vmatprep.subr.bf16.mxu0 %v3578_v4  ;;  %1865 = vmatprep.subr.bf16.mxu1 %v3581_v5  ;;  %v1683_v5 = vunpack.c.l.bf16 %v1680_v41  ;;  %v3961_v41 = vld [vmem:[#allocation9 + $0xc0] ss:$16 sps:$4 sm:$0xff]  }
 0xba6   :  { %1825 = vmatpush1.bf16.msra.mxu0 %v3584_v6  ;;  %1866 = vmatpush1.bf16.msra.mxu1 %v3587_v8 }
 0xba7   :  { %1826 = vmatprep.subr.bf16.mxu0 %v3590_v9  ;;  %1867 = vmatprep.subr.bf16.mxu1 %v3593_v10 }
 0xbaa   :  { %1827 = vmatpush1.bf16.msra.mxu0 %v3596_v11  ;;  %1868 = vmatpush1.bf16.msra.mxu1 %v3648_v46 }
 0xbab   :  { %1828 = vmatprep.subr.bf16.mxu0 %v3600_v12  ;;  %1869 = vmatprep.subr.bf16.mxu1 %v3652_v56 }
 0xbae   :  { %1829 = vmatpush1.bf16.msra.mxu0 %v3604_v13  ;;  %1870 = vmatpush1.bf16.msra.mxu1 %v3656_v7 }
 0xbaf   :  { %1942 = vmatprep.subr.bf16.mxu0 %v3874_v49  ;;  %1983 = vmatprep.subr.bf16.mxu1 %v3609_v14 }
 0xc64   :  { %v1720_v55 = vpop.f32.mrb[44].mxu0  ;;  %v1761_v57 = vpop.f32.mrb[44].mxu1 }
 0xc65   :  { %v1768_v58 = vadd.f32 %v1720_v55, %v1681_v53  ;;  %v1722_v47 = vpop.f32.mrb[45].mxu0  ;;  %v1763_v59 = vpop.f32.mrb[45].mxu1  ;;  %v1770_v8 = vadd.f32 %v1761_v57, %v1683_v5  ;;  %v3946_v53 = vld [vmem:[#allocation9 + $0xac] ss:$16 sps:$4 sm:$0xff]   ;;  %v3952_v55 = vld [vmem:[#allocation9 + $0xa8] ss:$16 sps:$4 sm:$0xff]  }
 0xc66   :  { %v1769_v60 = vadd.f32 %v1722_v47, %v1682_v54  ;;  %v1724_v62 = vpop.f32.mrb[46].mxu0  ;;  %v1765_v61 = vpop.f32.mrb[46].mxu1  ;;  %v1771_v4 = vadd.f32 %v1763_v59, %v1684_v38  ;;  %v3949_v54 = vld [vmem:[#allocation9 + $0xa0] ss:$16 sps:$4 sm:$0xff]   ;;  %v3955_v57 = vld [vmem:[#allocation9 + $0xc4] ss:$16 sps:$4 sm:$0xff]  }
 0xc67   :  { %v2501_v63 = vmul.f32 -1.442695, %v1768_v58  ;;  %v1725_v28 = vpop.f32.mrb[47].mxu0  ;;  %v1766_v32 = vpop.f32.mrb[47].mxu1  ;;  %v3958_v58 = vld [vmem:[#allocation9 + $0xcc] ss:$16 sps:$4 sm:$0xff]  }
 0xc68   :  { %v2502_v37 = vmul.f32 -1.442695, %v1769_v60  ;;  %v2503_v6 = vmul.f32 -1.442695, %v1771_v4  ;;  %v3965_v47 = vld [vmem:[#allocation9 + $0xe4] ss:$16 sps:$4 sm:$0xff]  }
 0xc69   :  { %2831 = vpow2.f32 %v2501_v63  ;;  %v3969_v59 = vld [vmem:[#allocation9 + $0xe0] ss:$16 sps:$4 sm:$0xff]   ;;  %v3974_v60 = vld [vmem:[#allocation9 + $0xc] ss:$16 sps:$4 sm:$0xff]  }
 0xc6a   :  { %2833 = vpow2.f32 %v2502_v37  ;;  %v1807_v62 = vld [vmem:[#allocation6 + $0xc0] sm:$0xff]  ;;  %v1808_v37 = vld [vmem:[#allocation6 + $0xc8] sm:$0xff] }
 0xc6b   :  { %2835 = vpow2.f32 %v2503_v6  ;;  %v1810_v61 = vunpack.c.h.bf16 %v1807_v62 }
 0xc6c   :  { %2837 = vtanh.f32 %v1770_v8 }
 0xc73   :  { %v2832_v9 = vpop.eup %2831 }
 0xc74   :  { %v2834_v10 = vpop.eup %2833  ;;  %v1775_v11 = vadd.f32 1.0, %v2832_v9 }
 0xc75   :  { %v1781_v12 = vadd.f32 1.0, %v2834_v10  ;;  %v2836_v13 = vpop.eup %2835 }
 0xc76   :  { %2839 = vrcp.f32 %v1775_v11  ;;  %v2838_v14 = vpop.eup %2837  ;;  %v1788_v19 = vadd.f32 1.0, %v2836_v13  ;;  %v1812_v11 = vunpack.c.h.bf16 %v1808_v37  ;;  %v1811_v13 = vunpack.c.l.bf16 %v1808_v37 }
 0xc77   :  { %2841 = vrcp.f32 %v1781_v12 }
 0xc78   :  { %2843 = vrcp.f32 %v1788_v19 }
 0xc80   :  { %v2840_v30 = vpop.eup %2839 }
 0xc81   :  { %v2842_v40 = vpop.eup %2841  ;;  %v1792_v16 = vmul.f32 %v2840_v30, %v2838_v14 }
 0xc82   :  { %v1791_v20 = vmul.f32 %v2842_v40, %v3835_v1  ;;  %v2844_v2 = vpop.eup %2843 }
 0xc84   :  { %v1793_v22 = vadd.f32 %v1792_v16, %v1791_v20 }
 0xc86   :  { %2845 = vtanh.f32 %v1793_v22  ;;  %v3880_v23 = vsel %vm1803_vm11, %v1793_v22, %v3835_v1  ;;  %v3925_v1 = vld [vmem:[#allocation9 + $0x60] ss:$16 sps:$4 sm:$0xff]  }
 0xc90   :  { %v2846_v39 = vpop.eup %2845 }
 0xc91   :  { %v1795_v43 = vmul.f32 %v2846_v39, %v2844_v2 }
 0xc93   :  { %v3883_v50 = vsel %vm1803_vm11, %v1795_v43, %v3838_v51  ;;  %v3937_v51 = vld [vmem:[#allocation9 + $0x80] ss:$16 sps:$4 sm:$0xff]  }
 0xc94   :  { %v1813_v27 = vpack.c.bf16 %v3883_v50, %v3883_v50 }
 0xc96   :  { %1847 = vmatmul.mubr.bf16.vlgmr.msra.gmra.mrb[48].mxu0 %v1813_v27  ;;  %1888 = vmatmul.mubr.bf16.vlgmr.msra.gmra.mrb[48].mxu1 %v1813_v27 }
 0xc97   :  { %1943 = vmatpush1.bf16.msra.mxu0 %v3887_v29  ;;  %1984 = vmatpush1.bf16.msra.mxu1 %v3890_v31 }
 0xc98   :  { %1944 = vmatprep.subr.bf16.mxu0 %v3893_v33  ;;  %1985 = vmatprep.subr.bf16.mxu1 %v3896_v34 }
 0xc99   :  { %1974 = vmatprep.mubr.bf16.mxu0 %v3077_v3  ;;  %2015 = vmatprep.mubr.bf16.mxu1 %v3077_v3 }
 0xc9b   :  { %1945 = vmatpush1.bf16.msra.mxu0 %v3901_v17  ;;  %1986 = vmatpush1.bf16.msra.mxu1 %v3904_v36 }
 0xc9c   :  { %1946 = vmatprep.subr.bf16.mxu0 %v3907_v42  ;;  %1987 = vmatprep.subr.bf16.mxu1 %v3910_v18 }
 0xc9f   :  { %1947 = vmatpush1.bf16.msra.mxu0 %v3913_v24  ;;  %1988 = vmatpush1.bf16.msra.mxu1 %v3916_v44 }
 0xca0   :  { %1948 = vmatprep.subr.bf16.mxu0 %v3919_v45  ;;  %1989 = vmatprep.subr.bf16.mxu1 %v3922_v48 }
 0xca3   :  { %1949 = vmatpush1.bf16.msra.mxu0 %v3925_v1  ;;  %1990 = vmatpush1.bf16.msra.mxu1 %v3928_v52 }
 0xca4   :  { %1950 = vmatprep.subr.bf16.mxu0 %v3931_v15  ;;  %1991 = vmatprep.subr.bf16.mxu1 %v3934_v25 }
 0xca7   :  { %1951 = vmatpush1.bf16.msra.mxu0 %v3937_v51  ;;  %1992 = vmatpush1.bf16.msra.mxu1 %v3940_v35 }
 0xca8   :  { %1952 = vmatprep.subr.bf16.mxu0 %v3943_v26  ;;  %1993 = vmatprep.subr.bf16.mxu1 %v3946_v53 }
 0xcab   :  { %1953 = vmatpush1.bf16.msra.mxu0 %v3949_v54  ;;  %1994 = vmatpush1.bf16.msra.mxu1 %v3952_v55 }
 0xcac   :  { %1954 = vmatprep.subr.bf16.mxu0 %v3955_v57  ;;  %1995 = vmatprep.subr.bf16.mxu1 %v3958_v58 }
 0xcaf   :  { %1955 = vmatpush1.bf16.msra.mxu0 %v3961_v41  ;;  %1996 = vmatpush1.bf16.msra.mxu1 %v3648_v46  ;;  %v1809_v46 = vunpack.c.l.bf16 %v1807_v62 }
 0xcb0   :  { %1956 = vmatprep.subr.bf16.mxu0 %v3965_v47  ;;  %1997 = vmatprep.subr.bf16.mxu1 %v3652_v56 }
 0xcb3   :  { %1957 = vmatpush1.bf16.msra.mxu0 %v3969_v59  ;;  %1998 = vmatpush1.bf16.msra.mxu1 %v3656_v7 }
 0xcb4   :  { %2070 = vmatprep.subr.bf16.mxu0 %v3874_v49  ;;  %2111 = vmatprep.subr.bf16.mxu1 %v3974_v60 }
 0xd69   :  { %v1848_v63 = vpop.f32.mrb[48].mxu0  ;;  %v1889_v28 = vpop.f32.mrb[48].mxu1 }
 0xd6a   :  { %v1896_v32 = vadd.f32 %v1848_v63, %v1809_v46  ;;  %v1850_v56 = vpop.f32.mrb[49].mxu0  ;;  %v1891_v38 = vpop.f32.mrb[49].mxu1  ;;  %v1898_v30 = vadd.f32 %v1889_v28, %v1811_v13 }
 0xd6b   :  { %v1897_v4 = vadd.f32 %v1850_v56, %v1810_v61  ;;  %v1852_v5 = vpop.f32.mrb[50].mxu0  ;;  %v1893_v6 = vpop.f32.mrb[50].mxu1  ;;  %v1899_v12 = vadd.f32 %v1891_v38, %v1812_v11  ;;  %v1936_v11 = vld [vmem:[#allocation6 + $0xd8] sm:$0xff] }
 0xd6c   :  { %v2504_v8 = vmul.f32 -1.442695, %v1896_v32  ;;  %v1853_v7 = vpop.f32.mrb[51].mxu0  ;;  %v1894_v9 = vpop.f32.mrb[51].mxu1  ;;  %v1935_v5 = vld [vmem:[#allocation6 + $0xd0] sm:$0xff] }
 0xd6d   :  { %v2505_v10 = vmul.f32 -1.442695, %v1897_v4  ;;  %v2506_v14 = vmul.f32 -1.442695, %v1899_v12  ;;  %v1930_v46 = vpop.permute.xlu0 %1929  ;;  %v4021_v4 = vld [vmem:[#allocation9 + $0xe8] ss:$16 sps:$4 sm:$0xff]   ;;  %v1937_v6 = vunpack.c.l.bf16 %v1935_v5 }
 0xd6e   :  { %2847 = vpow2.f32 %v2504_v8  ;;  %vm1931_vm12 = vcmp.eq.s32.totalorder %v1930_v46, 1  ;;  %v1938_v8 = vunpack.c.h.bf16 %v1935_v5 }
 0xd6f   :  { %2849 = vpow2.f32 %v2505_v10 }
 0xd70   :  { %2851 = vpow2.f32 %v2506_v14 }
 0xd71   :  { %2853 = vtanh.f32 %v1898_v30 }
 0xd78   :  { %v2848_v40 = vpop.eup %2847 }
 0xd79   :  { %v2850_v16 = vpop.eup %2849  ;;  %v1903_v19 = vadd.f32 1.0, %v2848_v40 }
 0xd7a   :  { %v1909_v20 = vadd.f32 1.0, %v2850_v16  ;;  %v2852_v21 = vpop.eup %2851 }
 0xd7b   :  { %2855 = vrcp.f32 %v1903_v19  ;;  %v2854_v22 = vpop.eup %2853  ;;  %v1916_v27 = vadd.f32 1.0, %v2852_v21 }
 0xd7c   :  { %2857 = vrcp.f32 %v1909_v20 }
 0xd7d   :  { %2859 = vrcp.f32 %v1916_v27 }
 0xd85   :  { %v2856_v2 = vpop.eup %2855 }
 0xd86   :  { %v2858_v39 = vpop.eup %2857  ;;  %v1920_v43 = vmul.f32 %v2856_v2, %v2854_v22  ;;  %v1940_v22 = vunpack.c.h.bf16 %v1936_v11 }
 0xd87   :  { %v1919_v62 = vmul.f32 %v2858_v39, %v3880_v23  ;;  %v2860_v28 = vpop.eup %2859 }
 0xd89   :  { %v1921_v61 = vadd.f32 %v1920_v43, %v1919_v62 }
 0xd8b   :  { %2861 = vtanh.f32 %v1921_v61  ;;  %v3979_v63 = vsel %vm1931_vm12, %v1921_v61, %v3880_v23  ;;  %v4013_v23 = vld [vmem:[#allocation9 + $0xc8] ss:$16 sps:$4 sm:$0xff]  }
 0xd95   :  { %v2862_v32 = vpop.eup %2861 }
 0xd96   :  { %v1923_v37 = vmul.f32 %v2862_v32, %v2860_v28 }
 0xd98   :  { %v3982_v56 = vsel %vm1931_vm12, %v1923_v37, %v3883_v50  ;;  %v4017_v50 = vld [vmem:[#allocation9 + $0xec] ss:$16 sps:$4 sm:$0xff]  }
 0xd99   :  { %v1941_v38 = vpack.c.bf16 %v3982_v56, %v3982_v56 }
 0xd9b   :  { %1975 = vmatmul.mubr.bf16.vlgmr.msra.gmra.mrb[52].mxu0 %v1941_v38  ;;  %2016 = vmatmul.mubr.bf16.vlgmr.msra.gmra.mrb[52].mxu1 %v1941_v38 }
 0xd9c   :  { %2071 = vmatpush1.bf16.msra.mxu0 %v3887_v29  ;;  %2112 = vmatpush1.bf16.msra.mxu1 %v3890_v31 }
 0xd9d   :  { %2072 = vmatprep.subr.bf16.mxu0 %v3893_v33  ;;  %2113 = vmatprep.subr.bf16.mxu1 %v3896_v34 }
 0xd9e   :  { %2102 = vmatprep.mubr.bf16.mxu0 %v3077_v3  ;;  %2143 = vmatprep.mubr.bf16.mxu1 %v3077_v3 }
 0xda0   :  { %2073 = vmatpush1.bf16.msra.mxu0 %v3901_v17  ;;  %2114 = vmatpush1.bf16.msra.mxu1 %v3904_v36 }
 0xda1   :  { %2074 = vmatprep.subr.bf16.mxu0 %v3907_v42  ;;  %2115 = vmatprep.subr.bf16.mxu1 %v3910_v18 }
 0xda4   :  { %2075 = vmatpush1.bf16.msra.mxu0 %v3913_v24  ;;  %2116 = vmatpush1.bf16.msra.mxu1 %v3916_v44 }
 0xda5   :  { %2076 = vmatprep.subr.bf16.mxu0 %v3919_v45  ;;  %2117 = vmatprep.subr.bf16.mxu1 %v3922_v48 }
 0xda8   :  { %2077 = vmatpush1.bf16.msra.mxu0 %v3925_v1  ;;  %2118 = vmatpush1.bf16.msra.mxu1 %v3928_v52 }
 0xda9   :  { %2078 = vmatprep.subr.bf16.mxu0 %v3931_v15  ;;  %2119 = vmatprep.subr.bf16.mxu1 %v3934_v25 }
 0xdac   :  { %2079 = vmatpush1.bf16.msra.mxu0 %v3937_v51  ;;  %2120 = vmatpush1.bf16.msra.mxu1 %v3940_v35 }
 0xdad   :  { %2080 = vmatprep.subr.bf16.mxu0 %v3943_v26  ;;  %2121 = vmatprep.subr.bf16.mxu1 %v3946_v53 }
 0xdb0   :  { %2081 = vmatpush1.bf16.msra.mxu0 %v3949_v54  ;;  %2122 = vmatpush1.bf16.msra.mxu1 %v3952_v55 }
 0xdb1   :  { %2082 = vmatprep.subr.bf16.mxu0 %v3955_v57  ;;  %2123 = vmatprep.subr.bf16.mxu1 %v3958_v58 }
 0xdb4   :  { %2083 = vmatpush1.bf16.msra.mxu0 %v3961_v41  ;;  %2124 = vmatpush1.bf16.msra.mxu1 %v4013_v23 }
 0xdb5   :  { %2084 = vmatprep.subr.bf16.mxu0 %v3965_v47  ;;  %2125 = vmatprep.subr.bf16.mxu1 %v4017_v50 }
 0xdb8   :  { %2085 = vmatpush1.bf16.msra.mxu0 %v3969_v59  ;;  %2126 = vmatpush1.bf16.msra.mxu1 %v4021_v4 }
 0xdb9   :  { %2198 = vmatprep.subr.bf16.mxu0 %v3874_v49  ;;  %2239 = vmatprep.subr.bf16.mxu1 %v3974_v60  ;;  %v1939_v60 = vunpack.c.l.bf16 %v1936_v11 }
 0xe6e   :  { %v1976_v7 = vpop.f32.mrb[52].mxu0  ;;  %v2017_v9 = vpop.f32.mrb[52].mxu1 }
 0xe6f   :  { %v2024_v10 = vadd.f32 %v1976_v7, %v1937_v6  ;;  %v1978_v12 = vpop.f32.mrb[53].mxu0  ;;  %v2019_v13 = vpop.f32.mrb[53].mxu1  ;;  %v2026_v39 = vadd.f32 %v2017_v9, %v1939_v60 }
 0xe70   :  { %v2025_v14 = vadd.f32 %v1978_v12, %v1938_v8  ;;  %v1980_v30 = vpop.f32.mrb[54].mxu0  ;;  %v2021_v40 = vpop.f32.mrb[54].mxu1  ;;  %v2027_v49 = vadd.f32 %v2019_v13, %v1940_v22 }
 0xe71   :  { %v2507_v16 = vmul.f32 -1.442695, %v2024_v10  ;;  %v1981_v19 = vpop.f32.mrb[55].mxu0  ;;  %v2022_v20 = vpop.f32.mrb[55].mxu1 }
 0xe72   :  { %v2508_v21 = vmul.f32 -1.442695, %v2025_v14  ;;  %v2509_v2 = vmul.f32 -1.442695, %v2027_v49  ;;  %v2058_v8 = vpop.permute.xlu1 %2057  ;;  %v2191_v49 = vld [vmem:[#allocation6 + $0xf0] sm:$0xff] }
 0xe73   :  { %2863 = vpow2.f32 %v2507_v16  ;;  %vm2059_vm13 = vcmp.eq.s32.totalorder %v2058_v8, 1  ;;  %v2193_v60 = vunpack.c.l.bf16 %v2191_v49 }
 0xe74   :  { %2865 = vpow2.f32 %v2508_v21 }
 0xe75   :  { %2867 = vpow2.f32 %v2509_v2  ;;  %v2194_v2 = vunpack.c.h.bf16 %v2191_v49 }
 0xe76   :  { %2869 = vtanh.f32 %v2026_v39 }
 0xe7d   :  { %v2864_v43 = vpop.eup %2863 }
 0xe7e   :  { %v2866_v27 = vpop.eup %2865  ;;  %v2031_v62 = vadd.f32 1.0, %v2864_v43 }
 0xe7f   :  { %v2037_v46 = vadd.f32 1.0, %v2866_v27  ;;  %v2868_v61 = vpop.eup %2867 }
 0xe80   :  { %2871 = vrcp.f32 %v2031_v62  ;;  %v2870_v28 = vpop.eup %2869  ;;  %v2044_v5 = vadd.f32 1.0, %v2868_v61  ;;  %v2192_v62 = vld [vmem:[#allocation6 + $0xf8] sm:$0xff] }
 0xe81   :  { %2873 = vrcp.f32 %v2037_v46 }
 0xe82   :  { %2875 = vrcp.f32 %v2044_v5 }
 0xe8a   :  { %v2872_v32 = vpop.eup %2871 }
 0xe8b   :  { %v2874_v37 = vpop.eup %2873  ;;  %v2048_v38 = vmul.f32 %v2872_v32, %v2870_v28 }
 0xe8c   :  { %v2047_v6 = vmul.f32 %v2874_v37, %v3979_v63  ;;  %v2876_v10 = vpop.eup %2875 }
 0xe8e   :  { %v2049_v7 = vadd.f32 %v2048_v38, %v2047_v6 }
 0xe90   :  { %2877 = vtanh.f32 %v2049_v7  ;;  %v4028_v9 = vsel %vm2059_vm13, %v2049_v7, %v3979_v63  ;;  %v2196_v7 = vunpack.c.h.bf16 %v2192_v62 }
 0xe9a   :  { %v2878_v11 = vpop.eup %2877 }
 0xe9b   :  { %v2051_v12 = vmul.f32 %v2878_v11, %v2876_v10  ;;  %v2195_v10 = vunpack.c.l.bf16 %v2192_v62 }
 0xe9d   :  { %v4031_v13 = vsel %vm2059_vm13, %v2051_v12, %v3982_v56 }
 0xe9e   :  { %v2069_v14 = vpack.c.bf16 %v4031_v13, %v4031_v13 }
 0xea0   :  { %2103 = vmatmul.mubr.bf16.vlgmr.msra.gmra.mrb[56].mxu0 %v2069_v14  ;;  %2144 = vmatmul.mubr.bf16.vlgmr.msra.gmra.mrb[56].mxu1 %v2069_v14 }
 0xea1   :  { %2199 = vmatpush1.bf16.msra.mxu0 %v3887_v29  ;;  %2240 = vmatpush1.bf16.msra.mxu1 %v3890_v31 }
 0xea2   :  { %2200 = vmatprep.subr.bf16.mxu0 %v3893_v33  ;;  %2241 = vmatprep.subr.bf16.mxu1 %v3896_v34 }
 0xea3   :  { %2230 = vmatprep.mubr.bf16.mxu0 %v3077_v3  ;;  %2271 = vmatprep.mubr.bf16.mxu1 %v3077_v3  ;;  %v2063_v3 = vld [vmem:[#allocation6 + $0xe0] sm:$0xff] }
 0xea4   :  { %v2065_v29 = vunpack.c.l.bf16 %v2063_v3  ;;  %v2066_v31 = vunpack.c.h.bf16 %v2063_v3 }
 0xea5   :  { %2201 = vmatpush1.bf16.msra.mxu0 %v3901_v17  ;;  %2242 = vmatpush1.bf16.msra.mxu1 %v3904_v36  ;;  %v2064_v36 = vld [vmem:[#allocation6 + $0xe8] sm:$0xff] }
 0xea6   :  { %2202 = vmatprep.subr.bf16.mxu0 %v3907_v42  ;;  %2243 = vmatprep.subr.bf16.mxu1 %v3910_v18 }
 0xea9   :  { %2203 = vmatpush1.bf16.msra.mxu0 %v3913_v24  ;;  %2244 = vmatpush1.bf16.msra.mxu1 %v3916_v44 }
 0xeaa   :  { %2204 = vmatprep.subr.bf16.mxu0 %v3919_v45  ;;  %2245 = vmatprep.subr.bf16.mxu1 %v3922_v48 }
 0xead   :  { %2205 = vmatpush1.bf16.msra.mxu0 %v3925_v1  ;;  %2246 = vmatpush1.bf16.msra.mxu1 %v3928_v52 }
 0xeae   :  { %2206 = vmatprep.subr.bf16.mxu0 %v3931_v15  ;;  %2247 = vmatprep.subr.bf16.mxu1 %v3934_v25  ;;  %v2068_v25 = vunpack.c.h.bf16 %v2064_v36 }
 0xeb1   :  { %2207 = vmatpush1.bf16.msra.mxu0 %v3937_v51  ;;  %2248 = vmatpush1.bf16.msra.mxu1 %v3940_v35  ;;  %v2067_v35 = vunpack.c.l.bf16 %v2064_v36 }
 0xeb2   :  { %2208 = vmatprep.subr.bf16.mxu0 %v3943_v26  ;;  %2249 = vmatprep.subr.bf16.mxu1 %v3946_v53 }
 0xeb5   :  { %2209 = vmatpush1.bf16.msra.mxu0 %v3949_v54  ;;  %2250 = vmatpush1.bf16.msra.mxu1 %v3952_v55 }
 0xeb6   :  { %2210 = vmatprep.subr.bf16.mxu0 %v3955_v57  ;;  %2251 = vmatprep.subr.bf16.mxu1 %v3958_v58 }
 0xeb9   :  { %2211 = vmatpush1.bf16.msra.mxu0 %v3961_v41  ;;  %2252 = vmatpush1.bf16.msra.mxu1 %v4013_v23 }
 0xeba   :  { %2212 = vmatprep.subr.bf16.mxu0 %v3965_v47  ;;  %2253 = vmatprep.subr.bf16.mxu1 %v4017_v50  ;;  %v2186_v50 = vpop.permute.xlu0 %2185 }
 0xebb   :  { %vm2187_vm14 = vcmp.eq.s32.totalorder %v2186_v50, 1 }
 0xebd   :  { %2213 = vmatpush1.bf16.msra.mxu0 %v3969_v59  ;;  %2254 = vmatpush1.bf16.msra.mxu1 %v4021_v4 }
 0xf73   :  { %v2104_v33 = vpop.f32.mrb[56].mxu0  ;;  %v2145_v34 = vpop.f32.mrb[56].mxu1 }
 0xf74   :  { %v2152_v17 = vadd.f32 %v2104_v33, %v2065_v29  ;;  %v2106_v42 = vpop.f32.mrb[57].mxu0  ;;  %v2147_v18 = vpop.f32.mrb[57].mxu1  ;;  %v2154_v53 = vadd.f32 %v2145_v34, %v2067_v35 }
 0xf75   :  { %v2153_v24 = vadd.f32 %v2106_v42, %v2066_v31  ;;  %v2108_v44 = vpop.f32.mrb[58].mxu0  ;;  %v2149_v45 = vpop.f32.mrb[58].mxu1  ;;  %v2155_v51 = vadd.f32 %v2147_v18, %v2068_v25 }
 0xf76   :  { %v2510_v48 = vmul.f32 -1.442695, %v2152_v17  ;;  %v2109_v1 = vpop.f32.mrb[59].mxu0  ;;  %v2150_v52 = vpop.f32.mrb[59].mxu1 }
 0xf77   :  { %v2511_v15 = vmul.f32 -1.442695, %v2153_v24  ;;  %v2512_v26 = vmul.f32 -1.442695, %v2155_v51  ;;  %v2314_v18 = vpop.permute.xlu1 %2313 }
 0xf78   :  { %2879 = vpow2.f32 %v2510_v48  ;;  %vm2315_vm15 = vcmp.eq.s32.totalorder %v2314_v18, 1 }
 0xf79   :  { %2881 = vpow2.f32 %v2511_v15 }
 0xf7a   :  { %2883 = vpow2.f32 %v2512_v26 }
 0xf7b   :  { %2885 = vtanh.f32 %v2154_v53 }
 0xf82   :  { %v2880_v54 = vpop.eup %2879 }
 0xf83   :  { %v2882_v55 = vpop.eup %2881  ;;  %v2159_v57 = vadd.f32 1.0, %v2880_v54 }
 0xf84   :  { %v2165_v58 = vadd.f32 1.0, %v2882_v55  ;;  %v2884_v41 = vpop.eup %2883 }
 0xf85   :  { %2887 = vrcp.f32 %v2159_v57  ;;  %v2886_v47 = vpop.eup %2885  ;;  %v2172_v23 = vadd.f32 1.0, %v2884_v41 }
 0xf86   :  { %2889 = vrcp.f32 %v2165_v58 }
 0xf87   :  { %2891 = vrcp.f32 %v2172_v23 }
 0xf8f   :  { %v2888_v59 = vpop.eup %2887 }
 0xf90   :  { %v2890_v63 = vpop.eup %2889  ;;  %v2176_v56 = vmul.f32 %v2888_v59, %v2886_v47 }
 0xf91   :  { %v2175_v4 = vmul.f32 %v2890_v63, %v4028_v9  ;;  %v2892_v16 = vpop.eup %2891 }
 0xf93   :  { %v2177_v30 = vadd.f32 %v2176_v56, %v2175_v4 }
 0xf95   :  { %2893 = vtanh.f32 %v2177_v30  ;;  %v2189_v40 = vsel %vm2187_vm14, %v2177_v30, %v4028_v9 }
 0xf9f   :  { %v2894_v19 = vpop.eup %2893 }
 0xfa0   :  { %v2179_v20 = vmul.f32 %v2894_v19, %v2892_v16 }
 0xfa2   :  { %v2188_v21 = vsel %vm2187_vm14, %v2179_v20, %v4031_v13 }
 0xfa3   :  { %v2197_v22 = vpack.c.bf16 %v2188_v21, %v2188_v21 }
 0xfa5   :  { %2231 = vmatmul.mubr.bf16.vlgmr.msra.gmra.mrb[60].mxu0 %v2197_v22  ;;  %2272 = vmatmul.mubr.bf16.vlgmr.msra.gmra.mrb[60].mxu1 %v2197_v22 }
0x1078   :  { %v2232_v39 = vpop.f32.mrb[60].mxu0  ;;  %v2273_v43 = vpop.f32.mrb[60].mxu1 }
0x1079   :  { %v2280_v27 = vadd.f32 %v2232_v39, %v2193_v60  ;;  %v2234_v46 = vpop.f32.mrb[61].mxu0  ;;  %v2275_v61 = vpop.f32.mrb[61].mxu1  ;;  %v2282_v12 = vadd.f32 %v2273_v43, %v2195_v10 }
0x107a   :  { %v2281_v28 = vadd.f32 %v2234_v46, %v2194_v2  ;;  %v2236_v32 = vpop.f32.mrb[62].mxu0  ;;  %v2277_v37 = vpop.f32.mrb[62].mxu1  ;;  %v2283_v9 = vadd.f32 %v2275_v61, %v2196_v7 }
0x107b   :  { %v2513_v38 = vmul.f32 -1.442695, %v2280_v27  ;;  %v2237_v5 = vpop.f32.mrb[63].mxu0  ;;  %v2278_v6 = vpop.f32.mrb[63].mxu1 }
0x107c   :  { %v2514_v8 = vmul.f32 -1.442695, %v2281_v28  ;;  %v2515_v11 = vmul.f32 -1.442695, %v2283_v9 }
0x107d   :  { %2895 = vpow2.f32 %v2513_v38 }
0x107e   :  { %2897 = vpow2.f32 %v2514_v8 }
0x107f   :  { %2899 = vpow2.f32 %v2515_v11 }
0x1080   :  { %2901 = vtanh.f32 %v2282_v12 }
0x1087   :  { %v2896_v13 = vpop.eup %2895 }
0x1088   :  { %v2898_v14 = vpop.eup %2897  ;;  %v2287_v3 = vadd.f32 1.0, %v2896_v13 }
0x1089   :  { %v2293_v29 = vadd.f32 1.0, %v2898_v14  ;;  %v2900_v31 = vpop.eup %2899 }
0x108a   :  { %2903 = vrcp.f32 %v2287_v3  ;;  %v2902_v33 = vpop.eup %2901  ;;  %v2300_v42 = vadd.f32 1.0, %v2900_v31 }
0x108b   :  { %2905 = vrcp.f32 %v2293_v29 }
0x108c   :  { %2907 = vrcp.f32 %v2300_v42 }
0x1094   :  { %v2904_v34 = vpop.eup %2903 }
0x1095   :  { %v2906_v17 = vpop.eup %2905  ;;  %v2304_v36 = vmul.f32 %v2904_v34, %v2902_v33 }
0x1096   :  { %v2303_v24 = vmul.f32 %v2906_v17, %v2189_v40  ;;  %v2908_v48 = vpop.eup %2907 }
0x1098   :  { %v2305_v44 = vadd.f32 %v2304_v36, %v2303_v24 }
0x109a   :  { %2909 = vtanh.f32 %v2305_v44  ;;  %v2317_v45 = vsel %vm2315_vm15, %v2305_v44, %v2189_v40 }
0x109b   :  { %2319 = vst [vmem:[#allocation3] sm:$0xff] %v2317_v45 }
0x10a4   :  { %v2910_v1 = vpop.eup %2909 }
0x10a5   :  { %v2307_v52 = vmul.f32 %v2910_v1, %v2908_v48 }
0x10a7   :  { %v2316_v15 = vsel %vm2315_vm15, %v2307_v52, %v2188_v21 }
0x10a8   :  { %2318 = vst [vmem:[#allocation2] sm:$0xff] %v2316_v15 }
0x10a9 PF:  { %v2324_v25 = vld [vmem:[#allocation11] sm:$0xff]  ;;  %v2325_v51 = vld [vmem:[#allocation11 + $0x8] sm:$0xff]  ;;  %v2326_v35 = vld [vmem:[#allocation11 + $0x10] sm:$0xff]  ;;  %v3078_v26 = vmov 0.0|0.0   ;;  %vm3079_vm0 = vmmov 0   ;;  %s3080_s14 = smov [#allocation12]  }
0x10aa   :  { %2569 = vmatprep.subr.bf16.mxu0 %v3078_v26  ;;  %v2570_v53 = vpack.c.bf16 %v2325_v51, %v2324_v25  ;;  %v2327_v54 = vld [vmem:[#allocation11 + $0x18] sm:$0xff]  ;;  %2566 = vmatprep.mubr.msk.f32.mxu0 %vm3079_vm0, %v3076_v0  ;;  %v2328_v57 = vld [vmem:[#allocation11 + $0x20] sm:$0xff]  ;;  %v2329_v58 = vld [vmem:[#allocation11 + $0x28] sm:$0xff]  ;;  %s2424_s15 = sshll.u32 %s3080_s14, 4  ;;  %s2425_s15 = int_to_ptr.vmem [resolvable:$true] %s2424_s15 }
0x10ab   :  { %v2573_v55 = vpack.c.bf16 %v2327_v54, %v2326_v35  ;;  %v2576_v41 = vpack.c.bf16 %v2329_v58, %v2328_v57  ;;  %v2330_v47 = vld [vmem:[#allocation11 + $0x30] sm:$0xff]  ;;  %v2331_v59 = vld [vmem:[#allocation11 + $0x38] sm:$0xff]  ;;  %v2332_v56 = vld [vmem:[#allocation11 + $0x40] sm:$0xff]  ;;  %s3041_s16 = scalar_lea.vmem %s2425_s15, 128  ;;  %p3046_p12 = scmp.lt.s32.totalorder %s2425_s15, %s2425_s15 }
0x10ac   :  { %2571 = vmatpush3.bf16.msra.mxu0 %v2570_v53  ;;  %v2579_v63 = vpack.c.bf16 %v2331_v59, %v2330_v47  ;;  %v2333_v23 = vld [vmem:[#allocation11 + $0x48] sm:$0xff]  ;;  %v2334_v4 = vld [vmem:[#allocation11 + $0x50] sm:$0xff]  ;;  %v2335_v0 = vld [vmem:[#allocation11 + $0x58] sm:$0xff]  ;;  %p3042_p11 = scmp.ne.s32.totalorder %s2425_s15, %s3041_s16  ;;  %p3047_p13 = scmp.lt.s32.totalorder %s3041_s16, %s3041_s16 }
0x10ad   :  { %2572 = vmatprep.subr.bf16.mxu0 %v3078_v26  ;;  %v2582_v50 = vpack.c.bf16 %v2333_v23, %v2332_v56  ;;  %v2585_v30 = vpack.c.bf16 %v2335_v0, %v2334_v4  ;;  %v2336_v40 = vld [vmem:[#allocation11 + $0x60] sm:$0xff]  ;;  %v2337_v16 = vld [vmem:[#allocation11 + $0x68] sm:$0xff]  ;;  %v2338_v20 = vld [vmem:[#allocation11 + $0x70] sm:$0xff] }
0x10ae   :  { %v2588_v19 = vpack.c.bf16 %v2337_v16, %v2336_v40  ;;  %v2339_v21 = vld [vmem:[#allocation11 + $0x78] sm:$0xff]  ;;  %v2516_v60 = vld [vmem:[%s4091_s5] ss:$0 sm:$0xff]  ;;  %p3048_p0 = por %p3047_p13, %p3046_p12 }
0x10af   :  { %v2591_v22 = vpack.c.bf16 %v2339_v21, %v2338_v20  ;;  %v2323_v49 = vld [vmem:[#allocation2] sm:$0xff] }
0x10b0   :  { %2574 = vmatpush3.bf16.msra.mxu0 %v2573_v55  ;;  %p3049_p1 = pnand %p3048_p0, %p3042_p11 }
0x10b1   :  { %2575 = vmatprep.subr.bf16.mxu0 %v3078_v26 }
0x10b4   :  { %2577 = vmatpush3.bf16.msra.mxu0 %v2576_v41 }
0x10b5   :  { %2578 = vmatprep.subr.bf16.mxu0 %v3078_v26 }
0x10b8   :  { %2580 = vmatpush3.bf16.msra.mxu0 %v2579_v63 }
0x10b9   :  { %2581 = vmatprep.subr.bf16.mxu0 %v3078_v26 }
0x10bc   :  { %2583 = vmatpush3.bf16.msra.mxu0 %v2582_v50 }
0x10bd   :  { %2584 = vmatprep.subr.bf16.mxu0 %v3078_v26 }
0x10c0   :  { %2586 = vmatpush3.bf16.msra.mxu0 %v2585_v30 }
0x10c1   :  { %2587 = vmatprep.subr.bf16.mxu0 %v3078_v26 }
0x10c4   :  { %2589 = vmatpush3.bf16.msra.mxu0 %v2588_v19 }
0x10c5   :  { %2590 = vmatprep.subr.bf16.mxu0 %v3078_v26 }
0x10c8   :  { %2592 = vmatpush3.bf16.msra.mxu0 %v2591_v22 }
0x10cb   :  { %2567 = vmatmul.mubr.f32.vlgmr.msra.gmra.mrb[0].mxu0 %v2323_v49 }
0x119e   :  { %v2413_v2 = vpop.f32.mrb[0].mxu0 }
0x119f   :  { %v2414_v39 = vadd.f32 %v2516_v60, %v2413_v2  ;;  %v2568_v43 = vpop.f32.mrb[1].mxu0 }
0x11a1   :  { %2417 = vst [vmem:[#allocation12] sm:$0xff] %v2414_v39 }
0x11a2   :  { %3052 = shalt.err (!%p3049_p1)
}
0x11a3   :  { %s3053_s19 = scalar_lea.hbm %s4092_s6, 128 }
0x11a4   :  { %p3054_p2 = scmp.ne.s32.totalorder %s4092_s6, %s3053_s19  ;;  %p3057_p3 = scmp.lt.u32.totalorder %s3053_s19, %s4092_s6 }
0x11a6   :  { %p3059_p4 = pnand %p3057_p3, %p3054_p2 }
0x11a8   :  { %3062 = shalt.err (!%p3059_p4)
}
0x11a9   :  { %2427 = dma.vmem_to_hbm [thread:$0]  %s2425_s15, 128, %s4092_s6, [#allocation8]  }
0x11aa   :  { %3067 = dma.done.wait [#allocation8], 128  }
0x11ab   :  { %3068 = vsyncadd [#allocation8], 4294967168 }
0x11ac   :  { %2431 = vsyncpa [#allocation7], 1 }
0x11ad   :  { %2432 = vsyncpa [#allocation10], 1 }
0x11ae   :  { %2433 = vsyncpa [#allocation8], 1 }

// kernel: tpu_custom_call.1
= control target key start
LH: loop header
LB: loop body
LE: loop exit
PB: predicated region body
PF: predicated region fallthrough
CT: control target
= control target key end

     0   :  { %12 = vsyncpa [#allocation7], 0  ;;  %s4086_s0 = inlined_call_operand.<no memory space> [shape: s32[1], index: 0, kind: input, shape index: {}]   ;;  %s4087_s1 = inlined_call_operand.vmem [shape: s32[8,1], index: 1, kind: input, shape index: {}]   ;;  %s4088_s2 = inlined_call_operand.hbm [shape: bf16[16,8,512], index: 2, kind: input, shape index: {}]   ;;  %s4089_s3 = inlined_call_operand.hbm [shape: bf16[128,512], index: 3, kind: input, shape index: {}]   ;;  %s4090_s4 = inlined_call_operand.hbm [shape: f32[128,128], index: 4, kind: input, shape index: {}]   ;;  %s4091_s5 = inlined_call_operand.vmem [shape: f32[1,128], index: 5, kind: input, shape index: {}]   ;;  %s4092_s6 = inlined_call_operand.hbm [shape: f32[8,128], index: 6, kind: output, shape index: {}]  }
   0x1   :  { %13 = vsyncpa [#allocation10], 0 }
   0x2   :  { %14 = vsyncpa [#allocation8], 0  ;;  %s3069_s21 = smov [#allocation9]   ;;  %s3070_s23 = smov [#allocation6]  }
   0x3   :  { %s34_s22 = sshll.u32 %s3069_s21, 4  ;;  %s22_s24 = sshll.u32 %s3070_s23, 4  ;;  %s35_s22 = int_to_ptr.vmem [resolvable:$true] %s34_s22  ;;  %s3116_s24 = int_to_ptr.vmem [resolvable:$true] %s22_s24 }
   0x4   :  { %s2975_s27 = scalar_lea.hbm %s4089_s3, 4096 }
   0x5   :  { %p2976_p0 = scmp.ne.s32.totalorder %s4089_s3, %s2975_s27  ;;  %p2979_p1 = scmp.lt.u32.totalorder %s2975_s27, %s4089_s3 }
   0x7   :  { %p2981_p2 = pnand %p2979_p1, %p2976_p0 }
   0x9   :  { %2984 = shalt.err (!%p2981_p2)
}
   0xa   :  { %s2985_s8 = scalar_lea.vmem %s35_s22, 4096  ;;  %p2990_p4 = scmp.lt.s32.totalorder %s35_s22, %s35_s22 }
   0xb   :  { %p2986_p3 = scmp.ne.s32.totalorder %s35_s22, %s2985_s8  ;;  %p2991_p5 = scmp.lt.s32.totalorder %s2985_s8, %s2985_s8 }
   0xd   :  { %p2992_p6 = por %p2991_p5, %p2990_p4 }
   0xf   :  { %p2993_p7 = pnand %p2992_p6, %p2986_p3 }
  0x11   :  { %2996 = shalt.err (!%p2993_p7)
}
  0x12   :  { %s3071_s9 = smov 256   ;;  %s3072_s10 = smov 16  }
  0x13   :  { %40 = dma.hbm_to_vmem [thread:$0]  %s4089_s3, 4096, %s35_s22, [#allocation10], %s3071_s9, %s3071_s9, %s3072_s10  }
  0x14   :  { %s2997_s15 = scalar_lea.hbm %s4088_s2, 4096 }
  0x15   :  { %p2998_p8 = scmp.ne.s32.totalorder %s4088_s2, %s2997_s15  ;;  %p3001_p9 = scmp.lt.u32.totalorder %s2997_s15, %s4088_s2 }
  0x17   :  { %p3003_p10 = pnand %p3001_p9, %p2998_p8 }
  0x19   :  { %3006 = shalt.err (!%p3003_p10)
}
  0x1a   :  { %s3007_s20 = scalar_lea.vmem %s3116_s24, 4096  ;;  %p3012_p12 = scmp.lt.s32.totalorder %s3116_s24, %s3116_s24 }
  0x1b   :  { %p3008_p11 = scmp.ne.s32.totalorder %s3116_s24, %s3007_s20  ;;  %p3013_p13 = scmp.lt.s32.totalorder %s3007_s20, %s3007_s20 }
  0x1d   :  { %p3014_p0 = por %p3013_p13, %p3012_p12 }
  0x1f   :  { %p3015_p1 = pnand %p3014_p0, %p3008_p11 }
  0x21   :  { %3018 = shalt.err (!%p3015_p1)
}
  0x22   :  { %28 = dma.hbm_to_vmem [thread:$0]  %s4088_s2, 4096, %s3116_s24, [#allocation7], %s3071_s9, %s3071_s9, %s3072_s10  }
  0x23   :  { %s3073_s22 = smov [#allocation11]   ;;  %s3019_s27 = scalar_lea.hbm %s4090_s4, 2048 }
  0x24   :  { %s46_s23 = sshll.u32 %s3073_s22, 4  ;;  %p3020_p2 = scmp.ne.s32.totalorder %s4090_s4, %s3019_s27  ;;  %s47_s23 = int_to_ptr.vmem [resolvable:$true] %s46_s23 }
  0x25   :  { %p3023_p3 = scmp.lt.u32.totalorder %s3019_s27, %s4090_s4 }
  0x27   :  { %p3025_p4 = pnand %p3023_p3, %p3020_p2 }
  0x29   :  { %3028 = shalt.err (!%p3025_p4)
}
  0x2a   :  { %s3029_s8 = scalar_lea.vmem %s47_s23, 2048  ;;  %p3034_p6 = scmp.lt.s32.totalorder %s47_s23, %s47_s23 }
  0x2b   :  { %p3030_p5 = scmp.ne.s32.totalorder %s47_s23, %s3029_s8  ;;  %p3035_p7 = scmp.lt.s32.totalorder %s3029_s8, %s3029_s8 }
  0x2d   :  { %p3036_p8 = por %p3035_p7, %p3034_p6 }
  0x2f   :  { %p3037_p9 = pnand %p3036_p8, %p3030_p5 }
  0x31   :  { %3040 = shalt.err (!%p3037_p9)
}
  0x32   :  { %s3074_s2 = smov 128   ;;  %s3075_s24 = smov 8  }
  0x33   :  { %52 = dma.hbm_to_vmem [thread:$0]  %s4090_s4, 2048, %s47_s23, [#allocation10], %s3074_s2, %s3074_s2, %s3075_s24  }
  0x34   :  { %3063 = dma.done.wait [#allocation7], 4096  }
  0x35   :  { %3064 = vsyncadd [#allocation7], 4294963200 }
  0x36   :  { %3065 = dma.done.wait [#allocation10], 6144  }
  0x37   :  { %3066 = vsyncadd [#allocation10], 4294961152  ;;  %v3076_v0 = vmov 0.0   ;;  %p2435_p10 = scmp.le.s32.totalorder %s4086_s0, 0 }
  0x38   :  { %69 = vst [vmem:[#allocation2] sm:$0xff] %v3076_v0  ;;  %70 = vst [vmem:[#allocation3] sm:$0xff] %v3076_v0  ;;  %v3164_v1 = vld [vmem:[#allocation9 + $0x4] ss:$16 sps:$4 sm:$0xff] (!%p2435_p10)   ;;  %v3166_v2 = vld [vmem:[#allocation9] ss:$16 sps:$4 sm:$0xff] (!%p2435_p10)  }
  0x39   :  { %76 = sbr.rel (%p2435_p10) target bundleno = 4265 (0x10a9), region = 41  ;;  %v3077_v3 = vmov (!%p2435_p10), 0   ;;  %279 = vmatprep.subr.bf16.mxu0 (!%p2435_p10), %v3164_v1  ;;  %v3171_v4 = vld [vmem:[#allocation9 + $0x24] ss:$16 sps:$4 sm:$0xff] (!%p2435_p10)   ;;  %v3175_v5 = vld [vmem:[#allocation9 + $0x20] ss:$16 sps:$4 sm:$0xff] (!%p2435_p10)  }
  0x3a   :  { %311 = vmatprep.mubr.bf16.mxu0 (!%p2435_p10), %v3077_v3  ;;  %352 = vmatprep.mubr.bf16.mxu1 (!%p2435_p10), %v3077_v3  ;;  %v3179_v6 = vld [vmem:[#allocation9 + $0x44] ss:$16 sps:$4 sm:$0xff] (!%p2435_p10)   ;;  %v3181_v7 = vld [vmem:[#allocation9 + $0xc] ss:$16 sps:$4 sm:$0xff] (!%p2435_p10)   ;;  %v3183_v8 = vld [vmem:[#allocation9 + $0x8] ss:$16 sps:$4 sm:$0xff] (!%p2435_p10)  }
  0x3b   :  { %2605 = vset.pattern.permute.xlu0 (!%p2435_p10), %v3077_v3  ;;  %280 = vmatpush1.bf16.msra.mxu0 (!%p2435_p10), %v3166_v2  ;;  %v3186_v9 = vld [vmem:[#allocation9 + $0x40] ss:$16 sps:$4 sm:$0xff] (!%p2435_p10)   ;;  %v3190_v10 = vld [vmem:[#allocation9 + $0x64] ss:$16 sps:$4 sm:$0xff] (!%p2435_p10)   ;;  %v3193_v11 = vld [vmem:[#allocation9 + $0x2c] ss:$16 sps:$4 sm:$0xff] (!%p2435_p10)  }
  0x3c   :  { %2606 = vset.pattern.permute.xlu1 (!%p2435_p10), %v3077_v3  ;;  %281 = vmatprep.subr.bf16.mxu0 (!%p2435_p10), %v3171_v4  ;;  %v3195_v12 = vld [vmem:[#allocation9 + $0x28] ss:$16 sps:$4 sm:$0xff] (!%p2435_p10)   ;;  %v3199_v13 = vld [vmem:[#allocation9 + $0x60] ss:$16 sps:$4 sm:$0xff] (!%p2435_p10)   ;;  %v3201_v14 = vld [vmem:[#allocation9 + $0x84] ss:$16 sps:$4 sm:$0xff] (!%p2435_p10)  }
  0x3d   :  { %320 = vmatprep.subr.bf16.mxu1 (!%p2435_p10), %v3181_v7  ;;  %v3203_v15 = vld [vmem:[#allocation9 + $0x4c] ss:$16 sps:$4 sm:$0xff] (!%p2435_p10)   ;;  %v3207_v16 = vld [vmem:[#allocation9 + $0x48] ss:$16 sps:$4 sm:$0xff] (!%p2435_p10)   ;;  %v3213_v18 = vld [vmem:[#allocation9 + $0x80] ss:$16 sps:$4 sm:$0xff] (!%p2435_p10)  }
  0x3e   :  { %321 = vmatpush1.bf16.msra.mxu1 (!%p2435_p10), %v3183_v8  ;;  %v3210_v17 = vld [vmem:[#allocation9 + $0x6c] ss:$16 sps:$4 sm:$0xff] (!%p2435_p10)   ;;  %v3216_v19 = vld [vmem:[#allocation9 + $0xa4] ss:$16 sps:$4 sm:$0xff] (!%p2435_p10)   ;;  %v3219_v20 = vld [vmem:[#allocation9 + $0x68] ss:$16 sps:$4 sm:$0xff] (!%p2435_p10)  }
  0x3f   :  { %282 = vmatpush1.bf16.msra.mxu0 (!%p2435_p10), %v3175_v5  ;;  %322 = vmatprep.subr.bf16.mxu1 (!%p2435_p10), %v3193_v11  ;;  %v3222_v21 = vld [vmem:[#allocation9 + $0x8c] ss:$16 sps:$4 sm:$0xff] (!%p2435_p10)   ;;  %v3224_v22 = vld [vmem:[#allocation9 + $0xa0] ss:$16 sps:$4 sm:$0xff] (!%p2435_p10)   ;;  %v3227_v23 = vld [vmem:[#allocation9 + $0xc4] ss:$16 sps:$4 sm:$0xff] (!%p2435_p10)  }
  0x40   :  { %283 = vmatprep.subr.bf16.mxu0 %v3179_v6  ;;  %v3231_v24 = vld [vmem:[#allocation9 + $0x88] ss:$16 sps:$4 sm:$0xff]   ;;  %v3234_v25 = vld [vmem:[#allocation9 + $0xac] ss:$16 sps:$4 sm:$0xff]   ;;  %v3239_v26 = vld [vmem:[%s4087_s1] sm:$0xff] }
  0x41   :  { %vm390_vm0 = vcmp.gt.s32.totalorder %v3239_v26, 0  ;;  %v3243_v27 = vld [vmem:[#allocation9 + $0xc0] ss:$16 sps:$4 sm:$0xff]   ;;  %vm518_vm1 = vcmp.gt.s32.totalorder %v3239_v26, 1  ;;  %v3248_v29 = vld [vmem:[#allocation9 + $0xe4] ss:$16 sps:$4 sm:$0xff]  }
  0x42   :  { %323 = vmatpush1.bf16.msra.mxu1 %v3195_v12  ;;  %v391_v28 = vsel %vm390_vm0, 1, %v3077_v3  ;;  %v3251_v30 = vld [vmem:[#allocation9 + $0xa8] ss:$16 sps:$4 sm:$0xff]   ;;  %v3254_v31 = vld [vmem:[#allocation9 + $0xcc] ss:$16 sps:$4 sm:$0xff]   ;;  %v519_v32 = vsel %vm518_vm1, 1, %v3077_v3 }
  0x43   :  { %284 = vmatpush1.bf16.msra.mxu0 %v3186_v9  ;;  %324 = vmatprep.subr.bf16.mxu1 %v3203_v15  ;;  %v3258_v33 = vld [vmem:[#allocation9 + $0xe0] ss:$16 sps:$4 sm:$0xff]   ;;  %vm902_vm2 = vcmp.gt.s32.totalorder %v3239_v26, 4  ;;  %v3265_v35 = vld [vmem:[#allocation9 + $0xc8] ss:$16 sps:$4 sm:$0xff]   ;;  %vm1158_vm3 = vcmp.gt.s32.totalorder %v3239_v26, 6 }
  0x44   :  { %285 = vmatprep.subr.bf16.mxu0 %v3190_v10  ;;  %393 = vperm.xlu0 %2605, %v391_v28   ;;  %v3260_v34 = vld [vmem:[#allocation2] sm:$0xff]  ;;  %v3268_v36 = vld [vmem:[#allocation9 + $0xec] ss:$16 sps:$4 sm:$0xff]   ;;  %v903_v38 = vsel %vm902_vm2, 1, %v3077_v3  ;;  %v3276_v39 = vld [vmem:[#allocation9 + $0xe8] ss:$16 sps:$4 sm:$0xff]  }
  0x45   :  { %v86_v37 = vpack.c.bf16 %v3260_v34, %v3260_v34  ;;  %v1159_v40 = vsel %vm1158_vm3, 1, %v3077_v3  ;;  %vm1414_vm4 = vcmp.gt.s32.totalorder %v3239_v26, 8  ;;  %vm1670_vm5 = vcmp.gt.s32.totalorder %v3239_v26, 10  ;;  %v80_v45 = vld [vmem:[#allocation6] sm:$0xff]  ;;  %v81_v49 = vld [vmem:[#allocation6 + $0x8] sm:$0xff] }
  0x46   :  { %325 = vmatpush1.bf16.msra.mxu1 %v3207_v16  ;;  %v1415_v41 = vsel %vm1414_vm4, 1, %v3077_v3  ;;  %v1671_v42 = vsel %vm1670_vm5, 1, %v3077_v3  ;;  %vm1926_vm6 = vcmp.gt.s32.totalorder %v3239_v26, 12  ;;  %vm2182_vm7 = vcmp.gt.s32.totalorder %v3239_v26, 14 }
  0x47   :  { %286 = vmatpush1.bf16.msra.mxu0 %v3199_v13  ;;  %326 = vmatprep.subr.bf16.mxu1 %v3210_v17  ;;  %v1927_v43 = vsel %vm1926_vm6, 1, %v3077_v3  ;;  %v2183_v44 = vsel %vm2182_vm7, 1, %v3077_v3  ;;  %v82_v46 = vunpack.c.l.bf16 %v80_v45  ;;  %v83_v47 = vunpack.c.h.bf16 %v80_v45 }
  0x48   :  { %287 = vmatprep.subr.bf16.mxu0 %v3201_v14  ;;  %521 = vperm.xlu0 %2605, %v519_v32   ;;  %v85_v56 = vunpack.c.h.bf16 %v81_v49  ;;  %v84_v62 = vunpack.c.l.bf16 %v81_v49  ;;  %vm646_vm9 = vcmp.gt.s32.totalorder %v3239_v26, 2  ;;  %vm774_vm10 = vcmp.gt.s32.totalorder %v3239_v26, 3 }
  0x49   :  { %vm1030_vm11 = vcmp.gt.s32.totalorder %v3239_v26, 5  ;;  %vm1286_vm12 = vcmp.gt.s32.totalorder %v3239_v26, 7  ;;  %vm1542_vm13 = vcmp.gt.s32.totalorder %v3239_v26, 9  ;;  %vm1798_vm14 = vcmp.gt.s32.totalorder %v3239_v26, 11 }
  0x4a   :  { %327 = vmatpush1.bf16.msra.mxu1 %v3219_v20  ;;  %vm2054_vm15 = vcmp.gt.s32.totalorder %v3239_v26, 13  ;;  %vm2310_vm0 = vcmp.gt.s32.totalorder %v3239_v26, 15 }
  0x4b   :  { %288 = vmatpush1.bf16.msra.mxu0 %v3213_v18  ;;  %328 = vmatprep.subr.bf16.mxu1 %v3222_v21 }
  0x4c   :  { %289 = vmatprep.subr.bf16.mxu0 %v3216_v19  ;;  %905 = vperm.xlu0 %2605, %v903_v38  }
  0x4e   :  { %329 = vmatpush1.bf16.msra.mxu1 %v3231_v24 }
  0x4f   :  { %290 = vmatpush1.bf16.msra.mxu0 %v3224_v22  ;;  %330 = vmatprep.subr.bf16.mxu1 %v3234_v25 }
  0x50   :  { %291 = vmatprep.subr.bf16.mxu0 %v3227_v23  ;;  %1161 = vperm.xlu0 %2605, %v1159_v40  }
  0x52   :  { %331 = vmatpush1.bf16.msra.mxu1 %v3251_v30 }
  0x53   :  { %292 = vmatpush1.bf16.msra.mxu0 %v3243_v27  ;;  %332 = vmatprep.subr.bf16.mxu1 %v3254_v31 }
  0x54   :  { %293 = vmatprep.subr.bf16.mxu0 %v3248_v29  ;;  %1417 = vperm.xlu0 %2605, %v1415_v41  }
  0x56   :  { %333 = vmatpush1.bf16.msra.mxu1 %v3265_v35 }
  0x57   :  { %294 = vmatpush1.bf16.msra.mxu0 %v3258_v33  ;;  %334 = vmatprep.subr.bf16.mxu1 %v3268_v36 }
  0x58   :  { %406 = vmatprep.subr.bf16.mxu0 %v3164_v1  ;;  %1673 = vperm.xlu0 %2605, %v1671_v42  }
  0x5a   :  { %312 = vmatmul.mubr.bf16.vlgmr.msra.gmra.mrb[0].mxu0 %v86_v37  ;;  %335 = vmatpush1.bf16.msra.mxu1 %v3276_v39 }
  0x5b   :  { %407 = vmatpush1.bf16.msra.mxu0 %v3166_v2  ;;  %438 = vmatprep.mubr.bf16.mxu0 %v3077_v3 }
  0x5c   :  { %408 = vmatprep.subr.bf16.mxu0 %v3171_v4  ;;  %447 = vmatprep.subr.bf16.mxu1 %v3181_v7 }
  0x5d   :  { %353 = vmatmul.mubr.bf16.vlgmr.msra.gmra.mrb[0].mxu1 %v86_v37  ;;  %1929 = vperm.xlu0 %2605, %v1927_v43  }
  0x5e   :  { %448 = vmatpush1.bf16.msra.mxu1 %v3183_v8  ;;  %479 = vmatprep.mubr.bf16.mxu1 %v3077_v3 }
  0x5f   :  { %409 = vmatpush1.bf16.msra.mxu0 %v3175_v5  ;;  %449 = vmatprep.subr.bf16.mxu1 %v3193_v11 }
  0x60   :  { %410 = vmatprep.subr.bf16.mxu0 %v3179_v6 }
  0x61   :  { %2185 = vperm.xlu0 %2605, %v2183_v44   ;;  %v79_v44 = vld [vmem:[#allocation3] sm:$0xff] }
  0x62   :  { %450 = vmatpush1.bf16.msra.mxu1 %v3195_v12 }
  0x63   :  { %411 = vmatpush1.bf16.msra.mxu0 %v3186_v9  ;;  %451 = vmatprep.subr.bf16.mxu1 %v3203_v15 }
  0x64   :  { %412 = vmatprep.subr.bf16.mxu0 %v3190_v10 }
  0x66   :  { %452 = vmatpush1.bf16.msra.mxu1 %v3207_v16 }
  0x67   :  { %413 = vmatpush1.bf16.msra.mxu0 %v3199_v13  ;;  %453 = vmatprep.subr.bf16.mxu1 %v3210_v17 }
  0x68   :  { %414 = vmatprep.subr.bf16.mxu0 %v3201_v14 }
  0x6a   :  { %454 = vmatpush1.bf16.msra.mxu1 %v3219_v20 }
  0x6b   :  { %415 = vmatpush1.bf16.msra.mxu0 %v3213_v18  ;;  %455 = vmatprep.subr.bf16.mxu1 %v3222_v21 }
  0x6c   :  { %416 = vmatprep.subr.bf16.mxu0 %v3216_v19 }
  0x6e   :  { %456 = vmatpush1.bf16.msra.mxu1 %v3231_v24 }
  0x6f   :  { %417 = vmatpush1.bf16.msra.mxu0 %v3224_v22  ;;  %457 = vmatprep.subr.bf16.mxu1 %v3234_v25 }
  0x70   :  { %418 = vmatprep.subr.bf16.mxu0 %v3227_v23 }
  0x72   :  { %458 = vmatpush1.bf16.msra.mxu1 %v3251_v30 }
  0x73   :  { %419 = vmatpush1.bf16.msra.mxu0 %v3243_v27  ;;  %459 = vmatprep.subr.bf16.mxu1 %v3254_v31 }
  0x74   :  { %420 = vmatprep.subr.bf16.mxu0 %v3248_v29 }
  0x76   :  { %460 = vmatpush1.bf16.msra.mxu1 %v3265_v35 }
  0x77   :  { %421 = vmatpush1.bf16.msra.mxu0 %v3258_v33  ;;  %461 = vmatprep.subr.bf16.mxu1 %v3268_v36 }
  0x78   :  { %534 = vmatprep.subr.bf16.mxu0 %v3164_v1 }
  0x7a   :  { %462 = vmatpush1.bf16.msra.mxu1 %v3276_v39 }
  0x7b   :  { %575 = vmatprep.subr.bf16.mxu1 %v3181_v7 }
  0xc3   :  { %v394_v49 = vpop.permute.xlu0 %393 }
  0xc4   :  { %vm395_vm8 = vcmp.eq.s32.totalorder %v394_v49, 1 }
 0x12d   :  { %v313_v48 = vpop.f32.mrb[0].mxu0 }
 0x12e   :  { %v361_v50 = vadd.f32 %v313_v48, %v82_v46  ;;  %v315_v51 = vpop.f32.mrb[1].mxu0 }
 0x12f   :  { %v362_v52 = vadd.f32 %v315_v51, %v83_v47  ;;  %v317_v53 = vpop.f32.mrb[2].mxu0 }
 0x130   :  { %v2468_v54 = vmul.f32 -1.442695, %v361_v50  ;;  %v318_v55 = vpop.f32.mrb[3].mxu0  ;;  %v354_v58 = vpop.f32.mrb[0].mxu1 }
 0x131   :  { %v2469_v57 = vmul.f32 -1.442695, %v362_v52  ;;  %v356_v59 = vpop.f32.mrb[1].mxu1  ;;  %v363_v32 = vadd.f32 %v354_v58, %v84_v62  ;;  %v775_v58 = vsel %vm774_vm10, 1, %v3077_v3  ;;  %v1799_v62 = vsel %vm1798_vm14, 1, %v3077_v3 }
 0x132   :  { %2655 = vpow2.f32 %v2468_v54  ;;  %v364_v60 = vadd.f32 %v356_v59, %v85_v56  ;;  %v358_v61 = vpop.f32.mrb[2].mxu1  ;;  %v1031_v59 = vsel %vm1030_vm11, 1, %v3077_v3 }
 0x133   :  { %2657 = vpow2.f32 %v2469_v57  ;;  %v359_v63 = vpop.f32.mrb[3].mxu1  ;;  %v1543_v61 = vsel %vm1542_vm13, 1, %v3077_v3 }
 0x134   :  { %v2470_v28 = vmul.f32 -1.442695, %v364_v60  ;;  %v1287_v60 = vsel %vm1286_vm12, 1, %v3077_v3  ;;  %v2055_v63 = vsel %vm2054_vm15, 1, %v3077_v3 }
 0x136   :  { %2659 = vpow2.f32 %v2470_v28  ;;  %v2311_v28 = vsel %vm2310_vm0, 1, %v3077_v3 }
 0x137   :  { %2661 = vtanh.f32 %v363_v32  ;;  %v399_v32 = vld [vmem:[#allocation6 + $0x10] sm:$0xff] }
 0x13c   :  { %v2656_v37 = vpop.eup %2655 }
 0x13d   :  { %v2658_v38 = vpop.eup %2657  ;;  %v368_v40 = vadd.f32 1.0, %v2656_v37  ;;  %v401_v37 = vunpack.c.l.bf16 %v399_v32 }
 0x13e   :  { %v374_v41 = vadd.f32 1.0, %v2658_v38  ;;  %v402_v38 = vunpack.c.h.bf16 %v399_v32 }
 0x13f   :  { %2663 = vrcp.f32 %v368_v40 }
 0x140   :  { %2665 = vrcp.f32 %v374_v41  ;;  %v2660_v42 = vpop.eup %2659 }
 0x141   :  { %v2662_v43 = vpop.eup %2661  ;;  %v381_v46 = vadd.f32 1.0, %v2660_v42 }
 0x143   :  { %2667 = vrcp.f32 %v381_v46 }
 0x149   :  { %v2664_v45 = vpop.eup %2663 }
 0x14a   :  { %v2666_v47 = vpop.eup %2665  ;;  %v385_v48 = vmul.f32 %v2664_v45, %v2662_v43  ;;  %v400_v43 = vld [vmem:[#allocation6 + $0x18] sm:$0xff] }
 0x14b   :  { %v384_v50 = vmul.f32 %v2666_v47, %v79_v44 }
 0x14d   :  { %v386_v51 = vadd.f32 %v385_v48, %v384_v50  ;;  %v2668_v53 = vpop.eup %2667 }
 0x14f   :  { %2669 = vtanh.f32 %v386_v51  ;;  %v3325_v52 = vsel %vm395_vm8, %v386_v51, %v79_v44 }
 0x159   :  { %v2670_v54 = vpop.eup %2669 }
 0x15a   :  { %v388_v55 = vmul.f32 %v2670_v54, %v2668_v53  ;;  %v404_v53 = vunpack.c.h.bf16 %v400_v43 }
 0x15c   :  { %v3328_v56 = vsel %vm395_vm8, %v388_v55, %v3260_v34  ;;  %v647_v34 = vsel %vm646_vm9, 1, %v3077_v3  ;;  %v403_v55 = vunpack.c.l.bf16 %v400_v43 }
 0x15d   :  { %v405_v57 = vpack.c.bf16 %v3328_v56, %v3328_v56  ;;  %649 = vperm.xlu1 %2606, %v647_v34  }
 0x15f   :  { %439 = vmatmul.mubr.bf16.vlgmr.msra.gmra.mrb[4].mxu0 %v405_v57  ;;  %480 = vmatmul.mubr.bf16.vlgmr.msra.gmra.mrb[4].mxu1 %v405_v57 }
 0x160   :  { %535 = vmatpush1.bf16.msra.mxu0 %v3166_v2  ;;  %576 = vmatpush1.bf16.msra.mxu1 %v3183_v8 }
 0x161   :  { %536 = vmatprep.subr.bf16.mxu0 %v3171_v4  ;;  %577 = vmatprep.subr.bf16.mxu1 %v3193_v11 }
 0x162   :  { %566 = vmatprep.mubr.bf16.mxu0 %v3077_v3  ;;  %607 = vmatprep.mubr.bf16.mxu1 %v3077_v3 }
 0x163   :  { %777 = vperm.xlu1 %2606, %v775_v58  }
 0x164   :  { %537 = vmatpush1.bf16.msra.mxu0 %v3175_v5  ;;  %578 = vmatpush1.bf16.msra.mxu1 %v3195_v12 }
 0x165   :  { %538 = vmatprep.subr.bf16.mxu0 %v3179_v6  ;;  %579 = vmatprep.subr.bf16.mxu1 %v3203_v15 }
 0x167   :  { %1033 = vperm.xlu1 %2606, %v1031_v59  }
 0x168   :  { %539 = vmatpush1.bf16.msra.mxu0 %v3186_v9  ;;  %580 = vmatpush1.bf16.msra.mxu1 %v3207_v16 }
 0x169   :  { %540 = vmatprep.subr.bf16.mxu0 %v3190_v10  ;;  %581 = vmatprep.subr.bf16.mxu1 %v3210_v17 }
 0x16b   :  { %1289 = vperm.xlu1 %2606, %v1287_v60  }
 0x16c   :  { %541 = vmatpush1.bf16.msra.mxu0 %v3199_v13  ;;  %582 = vmatpush1.bf16.msra.mxu1 %v3219_v20 }
 0x16d   :  { %542 = vmatprep.subr.bf16.mxu0 %v3201_v14  ;;  %583 = vmatprep.subr.bf16.mxu1 %v3222_v21 }
 0x16f   :  { %1545 = vperm.xlu1 %2606, %v1543_v61  }
 0x170   :  { %543 = vmatpush1.bf16.msra.mxu0 %v3213_v18  ;;  %584 = vmatpush1.bf16.msra.mxu1 %v3231_v24 }
 0x171   :  { %544 = vmatprep.subr.bf16.mxu0 %v3216_v19  ;;  %585 = vmatprep.subr.bf16.mxu1 %v3234_v25 }
 0x173   :  { %1801 = vperm.xlu1 %2606, %v1799_v62  }
 0x174   :  { %545 = vmatpush1.bf16.msra.mxu0 %v3224_v22  ;;  %586 = vmatpush1.bf16.msra.mxu1 %v3251_v30 }
 0x175   :  { %546 = vmatprep.subr.bf16.mxu0 %v3227_v23  ;;  %587 = vmatprep.subr.bf16.mxu1 %v3254_v31 }
 0x177   :  { %2057 = vperm.xlu1 %2606, %v2055_v63  }
 0x178   :  { %547 = vmatpush1.bf16.msra.mxu0 %v3243_v27  ;;  %588 = vmatpush1.bf16.msra.mxu1 %v3265_v35 }
 0x179   :  { %548 = vmatprep.subr.bf16.mxu0 %v3248_v29  ;;  %589 = vmatprep.subr.bf16.mxu1 %v3268_v36 }
 0x17b   :  { %2313 = vperm.xlu1 %2606, %v2311_v28  }
 0x17c   :  { %549 = vmatpush1.bf16.msra.mxu0 %v3258_v33  ;;  %590 = vmatpush1.bf16.msra.mxu1 %v3276_v39 }
 0x17d   :  { %662 = vmatprep.subr.bf16.mxu0 %v3164_v1  ;;  %703 = vmatprep.subr.bf16.mxu1 %v3181_v7 }
 0x232   :  { %v440_v40 = vpop.f32.mrb[4].mxu0  ;;  %v481_v41 = vpop.f32.mrb[4].mxu1 }
 0x233   :  { %v488_v42 = vadd.f32 %v440_v40, %v401_v37  ;;  %v442_v44 = vpop.f32.mrb[5].mxu0  ;;  %v483_v45 = vpop.f32.mrb[5].mxu1  ;;  %v490_v34 = vadd.f32 %v481_v41, %v403_v55 }
 0x234   :  { %v489_v46 = vadd.f32 %v442_v44, %v402_v38  ;;  %v444_v47 = vpop.f32.mrb[6].mxu0  ;;  %v485_v48 = vpop.f32.mrb[6].mxu1  ;;  %v491_v54 = vadd.f32 %v483_v45, %v404_v53  ;;  %v528_v53 = vld [vmem:[#allocation6 + $0x28] sm:$0xff] }
 0x235   :  { %v2471_v50 = vmul.f32 -1.442695, %v488_v42  ;;  %v445_v49 = vpop.f32.mrb[7].mxu0  ;;  %v486_v51 = vpop.f32.mrb[7].mxu1 }
 0x236   :  { %v2472_v26 = vmul.f32 -1.442695, %v489_v46  ;;  %v2473_v57 = vmul.f32 -1.442695, %v491_v54  ;;  %v522_v42 = vpop.permute.xlu0 %521 }
 0x237   :  { %2671 = vpow2.f32 %v2471_v50  ;;  %vm523_vm1 = vcmp.eq.s32.totalorder %v522_v42, 1 }
 0x238   :  { %2673 = vpow2.f32 %v2472_v26 }
 0x239   :  { %2675 = vpow2.f32 %v2473_v57 }
 0x23a   :  { %2677 = vtanh.f32 %v490_v34 }
 0x241   :  { %v2672_v58 = vpop.eup %2671 }
 0x242   :  { %v2674_v59 = vpop.eup %2673  ;;  %v495_v60 = vadd.f32 1.0, %v2672_v58 }
 0x243   :  { %v501_v61 = vadd.f32 1.0, %v2674_v59  ;;  %v2676_v62 = vpop.eup %2675 }
 0x244   :  { %2679 = vrcp.f32 %v495_v60  ;;  %v2678_v63 = vpop.eup %2677  ;;  %v508_v38 = vadd.f32 1.0, %v2676_v62 }
 0x245   :  { %2681 = vrcp.f32 %v501_v61 }
 0x246   :  { %2683 = vrcp.f32 %v508_v38 }
 0x24e   :  { %v2680_v28 = vpop.eup %2679 }
 0x24f   :  { %v2682_v32 = vpop.eup %2681  ;;  %v512_v37 = vmul.f32 %v2680_v28, %v2678_v63  ;;  %v532_v63 = vunpack.c.h.bf16 %v528_v53 }
 0x250   :  { %v511_v40 = vmul.f32 %v2682_v32, %v3325_v52  ;;  %v2684_v44 = vpop.eup %2683  ;;  %v531_v32 = vunpack.c.l.bf16 %v528_v53 }
 0x252   :  { %v513_v43 = vadd.f32 %v512_v37, %v511_v40 }
 0x254   :  { %2685 = vtanh.f32 %v513_v43  ;;  %v3384_v41 = vsel %vm523_vm1, %v513_v43, %v3325_v52  ;;  %v527_v52 = vld [vmem:[#allocation6 + $0x20] sm:$0xff] }
 0x255   :  { %v530_v50 = vunpack.c.h.bf16 %v527_v52 }
 0x25e   :  { %v2686_v45 = vpop.eup %2685 }
 0x25f   :  { %v515_v46 = vmul.f32 %v2686_v45, %v2684_v44 }
 0x261   :  { %v3387_v47 = vsel %vm523_vm1, %v515_v46, %v3328_v56  ;;  %v529_v56 = vunpack.c.l.bf16 %v527_v52 }
 0x262   :  { %v533_v48 = vpack.c.bf16 %v3387_v47, %v3387_v47 }
 0x264   :  { %567 = vmatmul.mubr.bf16.vlgmr.msra.gmra.mrb[8].mxu0 %v533_v48  ;;  %608 = vmatmul.mubr.bf16.vlgmr.msra.gmra.mrb[8].mxu1 %v533_v48 }
 0x265   :  { %663 = vmatpush1.bf16.msra.mxu0 %v3166_v2  ;;  %704 = vmatpush1.bf16.msra.mxu1 %v3183_v8 }
 0x266   :  { %664 = vmatprep.subr.bf16.mxu0 %v3171_v4  ;;  %705 = vmatprep.subr.bf16.mxu1 %v3193_v11 }
 0x267   :  { %694 = vmatprep.mubr.bf16.mxu0 %v3077_v3  ;;  %735 = vmatprep.mubr.bf16.mxu1 %v3077_v3 }
 0x269   :  { %665 = vmatpush1.bf16.msra.mxu0 %v3175_v5  ;;  %706 = vmatpush1.bf16.msra.mxu1 %v3195_v12 }
 0x26a   :  { %666 = vmatprep.subr.bf16.mxu0 %v3179_v6  ;;  %707 = vmatprep.subr.bf16.mxu1 %v3203_v15 }
 0x26d   :  { %667 = vmatpush1.bf16.msra.mxu0 %v3186_v9  ;;  %708 = vmatpush1.bf16.msra.mxu1 %v3207_v16 }
 0x26e   :  { %668 = vmatprep.subr.bf16.mxu0 %v3190_v10  ;;  %709 = vmatprep.subr.bf16.mxu1 %v3210_v17 }
 0x271   :  { %669 = vmatpush1.bf16.msra.mxu0 %v3199_v13  ;;  %710 = vmatpush1.bf16.msra.mxu1 %v3219_v20 }
 0x272   :  { %670 = vmatprep.subr.bf16.mxu0 %v3201_v14  ;;  %711 = vmatprep.subr.bf16.mxu1 %v3222_v21 }
 0x275   :  { %671 = vmatpush1.bf16.msra.mxu0 %v3213_v18  ;;  %712 = vmatpush1.bf16.msra.mxu1 %v3231_v24 }
 0x276   :  { %672 = vmatprep.subr.bf16.mxu0 %v3216_v19  ;;  %713 = vmatprep.subr.bf16.mxu1 %v3234_v25 }
 0x279   :  { %673 = vmatpush1.bf16.msra.mxu0 %v3224_v22  ;;  %714 = vmatpush1.bf16.msra.mxu1 %v3251_v30 }
 0x27a   :  { %674 = vmatprep.subr.bf16.mxu0 %v3227_v23  ;;  %715 = vmatprep.subr.bf16.mxu1 %v3254_v31 }
 0x27d   :  { %675 = vmatpush1.bf16.msra.mxu0 %v3243_v27  ;;  %716 = vmatpush1.bf16.msra.mxu1 %v3265_v35 }
 0x27e   :  { %676 = vmatprep.subr.bf16.mxu0 %v3248_v29  ;;  %717 = vmatprep.subr.bf16.mxu1 %v3268_v36 }
 0x281   :  { %677 = vmatpush1.bf16.msra.mxu0 %v3258_v33  ;;  %718 = vmatpush1.bf16.msra.mxu1 %v3276_v39 }
 0x282   :  { %790 = vmatprep.subr.bf16.mxu0 %v3164_v1  ;;  %831 = vmatprep.subr.bf16.mxu1 %v3181_v7 }
 0x337   :  { %v568_v49 = vpop.f32.mrb[8].mxu0  ;;  %v609_v51 = vpop.f32.mrb[8].mxu1 }
 0x338   :  { %v616_v26 = vadd.f32 %v568_v49, %v529_v56  ;;  %v570_v54 = vpop.f32.mrb[9].mxu0  ;;  %v611_v55 = vpop.f32.mrb[9].mxu1  ;;  %v618_v38 = vadd.f32 %v609_v51, %v531_v32 }
 0x339   :  { %v617_v57 = vadd.f32 %v570_v54, %v530_v50  ;;  %v572_v34 = vpop.f32.mrb[10].mxu0  ;;  %v613_v58 = vpop.f32.mrb[10].mxu1  ;;  %v619_v28 = vadd.f32 %v611_v55, %v532_v63  ;;  %v656_v63 = vld [vmem:[#allocation6 + $0x38] sm:$0xff] }
 0x33a   :  { %v2474_v59 = vmul.f32 -1.442695, %v616_v26  ;;  %v573_v60 = vpop.f32.mrb[11].mxu0  ;;  %v614_v61 = vpop.f32.mrb[11].mxu1 }
 0x33b   :  { %v2475_v62 = vmul.f32 -1.442695, %v617_v57  ;;  %v2476_v37 = vmul.f32 -1.442695, %v619_v28  ;;  %v650_v49 = vpop.permute.xlu1 %649 }
 0x33c   :  { %2687 = vpow2.f32 %v2474_v59  ;;  %vm651_vm2 = vcmp.eq.s32.totalorder %v650_v49, 1 }
 0x33d   :  { %2689 = vpow2.f32 %v2475_v62 }
 0x33e   :  { %2691 = vpow2.f32 %v2476_v37 }
 0x33f   :  { %2693 = vtanh.f32 %v618_v38 }
 0x346   :  { %v2688_v40 = vpop.eup %2687 }
 0x347   :  { %v2690_v42 = vpop.eup %2689  ;;  %v623_v43 = vadd.f32 1.0, %v2688_v40 }
 0x348   :  { %v629_v44 = vadd.f32 1.0, %v2690_v42  ;;  %v2692_v45 = vpop.eup %2691 }
 0x349   :  { %2695 = vrcp.f32 %v623_v43  ;;  %v2694_v46 = vpop.eup %2693  ;;  %v636_v56 = vadd.f32 1.0, %v2692_v45 }
 0x34a   :  { %2697 = vrcp.f32 %v629_v44 }
 0x34b   :  { %2699 = vrcp.f32 %v636_v56 }
 0x353   :  { %v2696_v48 = vpop.eup %2695 }
 0x354   :  { %v2698_v52 = vpop.eup %2697  ;;  %v640_v50 = vmul.f32 %v2696_v48, %v2694_v46  ;;  %v660_v46 = vunpack.c.h.bf16 %v656_v63  ;;  %v659_v48 = vunpack.c.l.bf16 %v656_v63 }
 0x355   :  { %v639_v26 = vmul.f32 %v2698_v52, %v3384_v41  ;;  %v2700_v54 = vpop.eup %2699 }
 0x357   :  { %v641_v53 = vadd.f32 %v640_v50, %v639_v26 }
 0x359   :  { %2701 = vtanh.f32 %v641_v53  ;;  %v3427_v51 = vsel %vm651_vm2, %v641_v53, %v3384_v41  ;;  %v655_v41 = vld [vmem:[#allocation6 + $0x30] sm:$0xff] }
 0x35a   :  { %v658_v59 = vunpack.c.h.bf16 %v655_v41 }
 0x363   :  { %v2702_v55 = vpop.eup %2701 }
 0x364   :  { %v643_v57 = vmul.f32 %v2702_v55, %v2700_v54 }
 0x366   :  { %v3430_v34 = vsel %vm651_vm2, %v643_v57, %v3387_v47  ;;  %v657_v47 = vunpack.c.l.bf16 %v655_v41 }
 0x367   :  { %v661_v58 = vpack.c.bf16 %v3430_v34, %v3430_v34 }
 0x369   :  { %695 = vmatmul.mubr.bf16.vlgmr.msra.gmra.mrb[12].mxu0 %v661_v58  ;;  %736 = vmatmul.mubr.bf16.vlgmr.msra.gmra.mrb[12].mxu1 %v661_v58 }
 0x36a   :  { %791 = vmatpush1.bf16.msra.mxu0 %v3166_v2  ;;  %832 = vmatpush1.bf16.msra.mxu1 %v3183_v8 }
 0x36b   :  { %792 = vmatprep.subr.bf16.mxu0 %v3171_v4  ;;  %833 = vmatprep.subr.bf16.mxu1 %v3193_v11 }
 0x36c   :  { %822 = vmatprep.mubr.bf16.mxu0 %v3077_v3  ;;  %863 = vmatprep.mubr.bf16.mxu1 %v3077_v3 }
 0x36e   :  { %793 = vmatpush1.bf16.msra.mxu0 %v3175_v5  ;;  %834 = vmatpush1.bf16.msra.mxu1 %v3195_v12 }
 0x36f   :  { %794 = vmatprep.subr.bf16.mxu0 %v3179_v6  ;;  %835 = vmatprep.subr.bf16.mxu1 %v3203_v15 }
 0x372   :  { %795 = vmatpush1.bf16.msra.mxu0 %v3186_v9  ;;  %836 = vmatpush1.bf16.msra.mxu1 %v3207_v16 }
 0x373   :  { %796 = vmatprep.subr.bf16.mxu0 %v3190_v10  ;;  %837 = vmatprep.subr.bf16.mxu1 %v3210_v17 }
 0x376   :  { %797 = vmatpush1.bf16.msra.mxu0 %v3199_v13  ;;  %838 = vmatpush1.bf16.msra.mxu1 %v3219_v20 }
 0x377   :  { %798 = vmatprep.subr.bf16.mxu0 %v3201_v14  ;;  %839 = vmatprep.subr.bf16.mxu1 %v3222_v21 }
 0x37a   :  { %799 = vmatpush1.bf16.msra.mxu0 %v3213_v18  ;;  %840 = vmatpush1.bf16.msra.mxu1 %v3231_v24 }
 0x37b   :  { %800 = vmatprep.subr.bf16.mxu0 %v3216_v19  ;;  %841 = vmatprep.subr.bf16.mxu1 %v3234_v25 }
 0x37e   :  { %801 = vmatpush1.bf16.msra.mxu0 %v3224_v22  ;;  %842 = vmatpush1.bf16.msra.mxu1 %v3251_v30 }
 0x37f   :  { %802 = vmatprep.subr.bf16.mxu0 %v3227_v23  ;;  %843 = vmatprep.subr.bf16.mxu1 %v3254_v31 }
 0x382   :  { %803 = vmatpush1.bf16.msra.mxu0 %v3243_v27  ;;  %844 = vmatpush1.bf16.msra.mxu1 %v3265_v35 }
 0x383   :  { %804 = vmatprep.subr.bf16.mxu0 %v3248_v29  ;;  %845 = vmatprep.subr.bf16.mxu1 %v3268_v36 }
 0x386   :  { %805 = vmatpush1.bf16.msra.mxu0 %v3258_v33  ;;  %846 = vmatpush1.bf16.msra.mxu1 %v3276_v39 }
 0x387   :  { %918 = vmatprep.subr.bf16.mxu0 %v3164_v1  ;;  %959 = vmatprep.subr.bf16.mxu1 %v3181_v7 }
 0x43c   :  { %v696_v60 = vpop.f32.mrb[12].mxu0  ;;  %v737_v61 = vpop.f32.mrb[12].mxu1 }
 0x43d   :  { %v744_v62 = vadd.f32 %v696_v60, %v657_v47  ;;  %v698_v28 = vpop.f32.mrb[13].mxu0  ;;  %v739_v32 = vpop.f32.mrb[13].mxu1  ;;  %v746_v56 = vadd.f32 %v737_v61, %v659_v48 }
 0x43e   :  { %v745_v37 = vadd.f32 %v698_v28, %v658_v59  ;;  %v700_v38 = vpop.f32.mrb[14].mxu0  ;;  %v741_v40 = vpop.f32.mrb[14].mxu1  ;;  %v747_v1 = vadd.f32 %v739_v32, %v660_v46 }
 0x43f   :  { %v2477_v42 = vmul.f32 -1.442695, %v744_v62  ;;  %v701_v43 = vpop.f32.mrb[15].mxu0  ;;  %v742_v44 = vpop.f32.mrb[15].mxu1 }
 0x440   :  { %v2478_v45 = vmul.f32 -1.442695, %v745_v37  ;;  %v2479_v52 = vmul.f32 -1.442695, %v747_v1  ;;  %v778_v60 = vpop.permute.xlu1 %777  ;;  %v906_v44 = vpop.permute.xlu0 %905 }
 0x441   :  { %2703 = vpow2.f32 %v2477_v42  ;;  %vm779_vm3 = vcmp.eq.s32.totalorder %v778_v60, 1  ;;  %vm907_vm4 = vcmp.eq.s32.totalorder %v906_v44, 1  ;;  %v3554_v60 = vld [vmem:[#allocation9 + $0x64] ss:$16 sps:$4 sm:$0xff]  }
 0x442   :  { %2705 = vpow2.f32 %v2478_v45 }
 0x443   :  { %2707 = vpow2.f32 %v2479_v52 }
 0x444   :  { %2709 = vtanh.f32 %v746_v56 }
 0x44b   :  { %v2704_v50 = vpop.eup %2703 }
 0x44c   :  { %v2706_v49 = vpop.eup %2705  ;;  %v751_v26 = vadd.f32 1.0, %v2704_v50 }
 0x44d   :  { %v757_v53 = vadd.f32 1.0, %v2706_v49  ;;  %v2708_v54 = vpop.eup %2707  ;;  %v3522_v49 = vld [vmem:[#allocation9] ss:$16 sps:$4 sm:$0xff]  }
 0x44e   :  { %2711 = vrcp.f32 %v751_v26  ;;  %v2710_v55 = vpop.eup %2709  ;;  %v764_v47 = vadd.f32 1.0, %v2708_v54  ;;  %v3525_v26 = vld [vmem:[#allocation9 + $0x8] ss:$16 sps:$4 sm:$0xff]   ;;  %v3531_v54 = vld [vmem:[#allocation9 + $0x2c] ss:$16 sps:$4 sm:$0xff]  }
 0x44f   :  { %2713 = vrcp.f32 %v757_v53  ;;  %v3528_v53 = vld [vmem:[#allocation9 + $0x24] ss:$16 sps:$4 sm:$0xff]  }
 0x450   :  { %2715 = vrcp.f32 %v764_v47  ;;  %v3548_v47 = vld [vmem:[#allocation9 + $0x40] ss:$16 sps:$4 sm:$0xff]  }
 0x458   :  { %v2712_v57 = vpop.eup %2711 }
 0x459   :  { %v2714_v58 = vpop.eup %2713  ;;  %v768_v41 = vmul.f32 %v2712_v57, %v2710_v55  ;;  %v3536_v55 = vld [vmem:[#allocation9 + $0x20] ss:$16 sps:$4 sm:$0xff]   ;;  %v3539_v57 = vld [vmem:[#allocation9 + $0x28] ss:$16 sps:$4 sm:$0xff]  }
 0x45a   :  { %v767_v59 = vmul.f32 %v2714_v58, %v3427_v51  ;;  %v2716_v63 = vpop.eup %2715  ;;  %v3542_v58 = vld [vmem:[#allocation9 + $0x44] ss:$16 sps:$4 sm:$0xff]  }
 0x45c   :  { %v769_v62 = vadd.f32 %v768_v41, %v767_v59  ;;  %v3545_v41 = vld [vmem:[#allocation9 + $0x4c] ss:$16 sps:$4 sm:$0xff]   ;;  %v3551_v59 = vld [vmem:[#allocation9 + $0x48] ss:$16 sps:$4 sm:$0xff]  }
 0x45e   :  { %2717 = vtanh.f32 %v769_v62  ;;  %v3470_v61 = vsel %vm779_vm3, %v769_v62, %v3427_v51  ;;  %v3557_v62 = vld [vmem:[#allocation9 + $0x6c] ss:$16 sps:$4 sm:$0xff]  }
 0x468   :  { %v2718_v28 = vpop.eup %2717 }
 0x469   :  { %v771_v32 = vmul.f32 %v2718_v28, %v2716_v63  ;;  %v3563_v63 = vld [vmem:[#allocation9 + $0x68] ss:$16 sps:$4 sm:$0xff]   ;;  %v3566_v28 = vld [vmem:[#allocation9 + $0x84] ss:$16 sps:$4 sm:$0xff]  }
 0x46b   :  { %v3473_v37 = vsel %vm779_vm3, %v771_v32, %v3430_v34  ;;  %v3569_v32 = vld [vmem:[#allocation9 + $0x8c] ss:$16 sps:$4 sm:$0xff]  }
 0x46c   :  { %v789_v38 = vpack.c.bf16 %v3473_v37, %v3473_v37 }
 0x46e   :  { %823 = vmatmul.mubr.bf16.vlgmr.msra.gmra.mrb[16].mxu0 %v789_v38  ;;  %864 = vmatmul.mubr.bf16.vlgmr.msra.gmra.mrb[16].mxu1 %v789_v38  ;;  %v3575_v38 = vld [vmem:[#allocation9 + $0x88] ss:$16 sps:$4 sm:$0xff]  }
 0x46f   :  { %919 = vmatpush1.bf16.msra.mxu0 %v3166_v2  ;;  %960 = vmatpush1.bf16.msra.mxu1 %v3183_v8  ;;  %v3509_v2 = vld [vmem:[#allocation9 + $0x4] ss:$16 sps:$4 sm:$0xff]  }
 0x470   :  { %920 = vmatprep.subr.bf16.mxu0 %v3171_v4  ;;  %961 = vmatprep.subr.bf16.mxu1 %v3193_v11  ;;  %v783_v4 = vld [vmem:[#allocation6 + $0x40] sm:$0xff]  ;;  %v784_v11 = vld [vmem:[#allocation6 + $0x48] sm:$0xff] }
 0x471   :  { %950 = vmatprep.mubr.bf16.mxu0 %v3077_v3  ;;  %991 = vmatprep.mubr.bf16.mxu1 %v3077_v3 }
 0x473   :  { %921 = vmatpush1.bf16.msra.mxu0 %v3175_v5  ;;  %962 = vmatpush1.bf16.msra.mxu1 %v3195_v12  ;;  %v785_v5 = vunpack.c.l.bf16 %v783_v4 }
 0x474   :  { %922 = vmatprep.subr.bf16.mxu0 %v3179_v6  ;;  %963 = vmatprep.subr.bf16.mxu1 %v3203_v15  ;;  %v786_v6 = vunpack.c.h.bf16 %v783_v4  ;;  %v3578_v4 = vld [vmem:[#allocation9 + $0xa4] ss:$16 sps:$4 sm:$0xff]  }
 0x477   :  { %923 = vmatpush1.bf16.msra.mxu0 %v3186_v9  ;;  %964 = vmatpush1.bf16.msra.mxu1 %v3207_v16 }
 0x478   :  { %924 = vmatprep.subr.bf16.mxu0 %v3190_v10  ;;  %965 = vmatprep.subr.bf16.mxu1 %v3210_v17 }
 0x47b   :  { %925 = vmatpush1.bf16.msra.mxu0 %v3199_v13  ;;  %966 = vmatpush1.bf16.msra.mxu1 %v3219_v20 }
 0x47c   :  { %926 = vmatprep.subr.bf16.mxu0 %v3201_v14  ;;  %967 = vmatprep.subr.bf16.mxu1 %v3222_v21  ;;  %v788_v21 = vunpack.c.h.bf16 %v784_v11 }
 0x47f   :  { %927 = vmatpush1.bf16.msra.mxu0 %v3213_v18  ;;  %968 = vmatpush1.bf16.msra.mxu1 %v3231_v24 }
 0x480   :  { %928 = vmatprep.subr.bf16.mxu0 %v3216_v19  ;;  %969 = vmatprep.subr.bf16.mxu1 %v3234_v25 }
 0x483   :  { %929 = vmatpush1.bf16.msra.mxu0 %v3224_v22  ;;  %970 = vmatpush1.bf16.msra.mxu1 %v3251_v30  ;;  %v787_v22 = vunpack.c.l.bf16 %v784_v11  ;;  %v3596_v11 = vld [vmem:[#allocation9 + $0xc0] ss:$16 sps:$4 sm:$0xff]  }
 0x484   :  { %930 = vmatprep.subr.bf16.mxu0 %v3227_v23  ;;  %971 = vmatprep.subr.bf16.mxu1 %v3254_v31 }
 0x487   :  { %931 = vmatpush1.bf16.msra.mxu0 %v3243_v27  ;;  %972 = vmatpush1.bf16.msra.mxu1 %v3265_v35 }
 0x488   :  { %932 = vmatprep.subr.bf16.mxu0 %v3248_v29  ;;  %973 = vmatprep.subr.bf16.mxu1 %v3268_v36 }
 0x48b   :  { %933 = vmatpush1.bf16.msra.mxu0 %v3258_v33  ;;  %974 = vmatpush1.bf16.msra.mxu1 %v3276_v39 }
 0x48c   :  { %1046 = vmatprep.subr.bf16.mxu0 %v3509_v2  ;;  %1087 = vmatprep.subr.bf16.mxu1 %v3181_v7 }
 0x541   :  { %v824_v8 = vpop.f32.mrb[16].mxu0  ;;  %v865_v9 = vpop.f32.mrb[16].mxu1 }
 0x542   :  { %v872_v10 = vadd.f32 %v824_v8, %v785_v5  ;;  %v826_v12 = vpop.f32.mrb[17].mxu0  ;;  %v867_v13 = vpop.f32.mrb[17].mxu1  ;;  %v874_v24 = vadd.f32 %v865_v9, %v787_v22  ;;  %v3581_v5 = vld [vmem:[#allocation9 + $0xac] ss:$16 sps:$4 sm:$0xff]   ;;  %v3587_v8 = vld [vmem:[#allocation9 + $0xa8] ss:$16 sps:$4 sm:$0xff]  }
 0x543   :  { %v873_v14 = vadd.f32 %v826_v12, %v786_v6  ;;  %v828_v15 = vpop.f32.mrb[18].mxu0  ;;  %v869_v16 = vpop.f32.mrb[18].mxu1  ;;  %v875_v7 = vadd.f32 %v867_v13, %v788_v21  ;;  %v3584_v6 = vld [vmem:[#allocation9 + $0xa0] ss:$16 sps:$4 sm:$0xff]   ;;  %v3590_v9 = vld [vmem:[#allocation9 + $0xc4] ss:$16 sps:$4 sm:$0xff]  }
 0x544   :  { %v2480_v17 = vmul.f32 -1.442695, %v872_v10  ;;  %v829_v18 = vpop.f32.mrb[19].mxu0  ;;  %v870_v19 = vpop.f32.mrb[19].mxu1  ;;  %v3593_v10 = vld [vmem:[#allocation9 + $0xcc] ss:$16 sps:$4 sm:$0xff]  }
 0x545   :  { %v2481_v20 = vmul.f32 -1.442695, %v873_v14  ;;  %v2482_v23 = vmul.f32 -1.442695, %v875_v7  ;;  %v3600_v12 = vld [vmem:[#allocation9 + $0xe4] ss:$16 sps:$4 sm:$0xff]  }
 0x546   :  { %2719 = vpow2.f32 %v2480_v17  ;;  %v3604_v13 = vld [vmem:[#allocation9 + $0xe0] ss:$16 sps:$4 sm:$0xff]   ;;  %v3609_v14 = vld [vmem:[#allocation9 + $0xc] ss:$16 sps:$4 sm:$0xff]  }
 0x547   :  { %2721 = vpow2.f32 %v2481_v20  ;;  %v911_v15 = vld [vmem:[#allocation6 + $0x50] sm:$0xff]  ;;  %v912_v20 = vld [vmem:[#allocation6 + $0x58] sm:$0xff] }
 0x548   :  { %2723 = vpow2.f32 %v2482_v23  ;;  %v914_v16 = vunpack.c.h.bf16 %v911_v15 }
 0x549   :  { %2725 = vtanh.f32 %v874_v24 }
 0x550   :  { %v2720_v25 = vpop.eup %2719 }
 0x551   :  { %v2722_v27 = vpop.eup %2721  ;;  %v879_v29 = vadd.f32 1.0, %v2720_v25 }
 0x552   :  { %v885_v30 = vadd.f32 1.0, %v2722_v27  ;;  %v2724_v31 = vpop.eup %2723 }
 0x553   :  { %2727 = vrcp.f32 %v879_v29  ;;  %v2726_v33 = vpop.eup %2725  ;;  %v892_v42 = vadd.f32 1.0, %v2724_v31  ;;  %v916_v29 = vunpack.c.h.bf16 %v912_v20  ;;  %v915_v31 = vunpack.c.l.bf16 %v912_v20 }
 0x554   :  { %2729 = vrcp.f32 %v885_v30 }
 0x555   :  { %2731 = vrcp.f32 %v892_v42 }
 0x55d   :  { %v2728_v51 = vpop.eup %2727 }
 0x55e   :  { %v2730_v34 = vpop.eup %2729  ;;  %v896_v40 = vmul.f32 %v2728_v51, %v2726_v33 }
 0x55f   :  { %v895_v43 = vmul.f32 %v2730_v34, %v3470_v61  ;;  %v2732_v1 = vpop.eup %2731 }
 0x561   :  { %v897_v45 = vadd.f32 %v896_v40, %v895_v43 }
 0x563   :  { %2733 = vtanh.f32 %v897_v45  ;;  %v3515_v46 = vsel %vm907_vm4, %v897_v45, %v3470_v61  ;;  %v3560_v61 = vld [vmem:[#allocation9 + $0x60] ss:$16 sps:$4 sm:$0xff]  }
 0x56d   :  { %v2734_v48 = vpop.eup %2733 }
 0x56e   :  { %v899_v52 = vmul.f32 %v2734_v48, %v2732_v1 }
 0x570   :  { %v3518_v56 = vsel %vm907_vm4, %v899_v52, %v3473_v37  ;;  %v3572_v37 = vld [vmem:[#allocation9 + $0x80] ss:$16 sps:$4 sm:$0xff]  }
 0x571   :  { %v917_v50 = vpack.c.bf16 %v3518_v56, %v3518_v56 }
 0x573   :  { %951 = vmatmul.mubr.bf16.vlgmr.msra.gmra.mrb[20].mxu0 %v917_v50  ;;  %992 = vmatmul.mubr.bf16.vlgmr.msra.gmra.mrb[20].mxu1 %v917_v50 }
 0x574   :  { %1047 = vmatpush1.bf16.msra.mxu0 %v3522_v49  ;;  %1088 = vmatpush1.bf16.msra.mxu1 %v3525_v26 }
 0x575   :  { %1048 = vmatprep.subr.bf16.mxu0 %v3528_v53  ;;  %1089 = vmatprep.subr.bf16.mxu1 %v3531_v54 }
 0x576   :  { %1078 = vmatprep.mubr.bf16.mxu0 %v3077_v3  ;;  %1119 = vmatprep.mubr.bf16.mxu1 %v3077_v3 }
 0x578   :  { %1049 = vmatpush1.bf16.msra.mxu0 %v3536_v55  ;;  %1090 = vmatpush1.bf16.msra.mxu1 %v3539_v57 }
 0x579   :  { %1050 = vmatprep.subr.bf16.mxu0 %v3542_v58  ;;  %1091 = vmatprep.subr.bf16.mxu1 %v3545_v41 }
 0x57c   :  { %1051 = vmatpush1.bf16.msra.mxu0 %v3548_v47  ;;  %1092 = vmatpush1.bf16.msra.mxu1 %v3551_v59 }
 0x57d   :  { %1052 = vmatprep.subr.bf16.mxu0 %v3554_v60  ;;  %1093 = vmatprep.subr.bf16.mxu1 %v3557_v62 }
 0x580   :  { %1053 = vmatpush1.bf16.msra.mxu0 %v3560_v61  ;;  %1094 = vmatpush1.bf16.msra.mxu1 %v3563_v63 }
 0x581   :  { %1054 = vmatprep.subr.bf16.mxu0 %v3566_v28  ;;  %1095 = vmatprep.subr.bf16.mxu1 %v3569_v32 }
 0x584   :  { %1055 = vmatpush1.bf16.msra.mxu0 %v3572_v37  ;;  %1096 = vmatpush1.bf16.msra.mxu1 %v3575_v38 }
 0x585   :  { %1056 = vmatprep.subr.bf16.mxu0 %v3578_v4  ;;  %1097 = vmatprep.subr.bf16.mxu1 %v3581_v5 }
 0x588   :  { %1057 = vmatpush1.bf16.msra.mxu0 %v3584_v6  ;;  %1098 = vmatpush1.bf16.msra.mxu1 %v3587_v8 }
 0x589   :  { %1058 = vmatprep.subr.bf16.mxu0 %v3590_v9  ;;  %1099 = vmatprep.subr.bf16.mxu1 %v3593_v10 }
 0x58c   :  { %1059 = vmatpush1.bf16.msra.mxu0 %v3596_v11  ;;  %1100 = vmatpush1.bf16.msra.mxu1 %v3265_v35  ;;  %v913_v35 = vunpack.c.l.bf16 %v911_v15 }
 0x58d   :  { %1060 = vmatprep.subr.bf16.mxu0 %v3600_v12  ;;  %1101 = vmatprep.subr.bf16.mxu1 %v3268_v36 }
 0x590   :  { %1061 = vmatpush1.bf16.msra.mxu0 %v3604_v13  ;;  %1102 = vmatpush1.bf16.msra.mxu1 %v3276_v39 }
 0x591   :  { %1174 = vmatprep.subr.bf16.mxu0 %v3509_v2  ;;  %1215 = vmatprep.subr.bf16.mxu1 %v3609_v14 }
 0x646   :  { %v952_v17 = vpop.f32.mrb[20].mxu0  ;;  %v993_v18 = vpop.f32.mrb[20].mxu1 }
 0x647   :  { %v1000_v19 = vadd.f32 %v952_v17, %v913_v35  ;;  %v954_v36 = vpop.f32.mrb[21].mxu0  ;;  %v995_v21 = vpop.f32.mrb[21].mxu1  ;;  %v1002_v51 = vadd.f32 %v993_v18, %v915_v31 }
 0x648   :  { %v1001_v7 = vadd.f32 %v954_v36, %v914_v16  ;;  %v956_v22 = vpop.f32.mrb[22].mxu0  ;;  %v997_v23 = vpop.f32.mrb[22].mxu1  ;;  %v1003_v30 = vadd.f32 %v995_v21, %v916_v29  ;;  %v1040_v29 = vld [vmem:[#allocation6 + $0x68] sm:$0xff] }
 0x649   :  { %v2483_v24 = vmul.f32 -1.442695, %v1000_v19  ;;  %v957_v39 = vpop.f32.mrb[23].mxu0  ;;  %v998_v25 = vpop.f32.mrb[23].mxu1  ;;  %v1039_v22 = vld [vmem:[#allocation6 + $0x60] sm:$0xff] }
 0x64a   :  { %v2484_v27 = vmul.f32 -1.442695, %v1001_v7  ;;  %v2485_v33 = vmul.f32 -1.442695, %v1003_v30  ;;  %v1034_v35 = vpop.permute.xlu1 %1033  ;;  %v3656_v7 = vld [vmem:[#allocation9 + $0xe8] ss:$16 sps:$4 sm:$0xff]   ;;  %v1041_v23 = vunpack.c.l.bf16 %v1039_v22 }
 0x64b   :  { %2735 = vpow2.f32 %v2483_v24  ;;  %vm1035_vm5 = vcmp.eq.s32.totalorder %v1034_v35, 1  ;;  %v1042_v24 = vunpack.c.h.bf16 %v1039_v22 }
 0x64c   :  { %2737 = vpow2.f32 %v2484_v27 }
 0x64d   :  { %2739 = vpow2.f32 %v2485_v33 }
 0x64e   :  { %2741 = vtanh.f32 %v1002_v51 }
 0x655   :  { %v2736_v34 = vpop.eup %2735 }
 0x656   :  { %v2738_v40 = vpop.eup %2737  ;;  %v1007_v42 = vadd.f32 1.0, %v2736_v34 }
 0x657   :  { %v1013_v43 = vadd.f32 1.0, %v2738_v40  ;;  %v2740_v44 = vpop.eup %2739 }
 0x658   :  { %2743 = vrcp.f32 %v1007_v42  ;;  %v2742_v45 = vpop.eup %2741  ;;  %v1020_v50 = vadd.f32 1.0, %v2740_v44 }
 0x659   :  { %2745 = vrcp.f32 %v1013_v43 }
 0x65a   :  { %2747 = vrcp.f32 %v1020_v50 }
 0x662   :  { %v2744_v1 = vpop.eup %2743 }
 0x663   :  { %v2746_v48 = vpop.eup %2745  ;;  %v1024_v52 = vmul.f32 %v2744_v1, %v2742_v45  ;;  %v1044_v45 = vunpack.c.h.bf16 %v1040_v29 }
 0x664   :  { %v1023_v15 = vmul.f32 %v2746_v48, %v3515_v46  ;;  %v2748_v18 = vpop.eup %2747  ;;  %v1043_v48 = vunpack.c.l.bf16 %v1040_v29 }
 0x666   :  { %v1025_v16 = vadd.f32 %v1024_v52, %v1023_v15 }
 0x668   :  { %2749 = vtanh.f32 %v1025_v16  ;;  %v3614_v17 = vsel %vm1035_vm5, %v1025_v16, %v3515_v46  ;;  %v3648_v46 = vld [vmem:[#allocation9 + $0xc8] ss:$16 sps:$4 sm:$0xff]  }
 0x672   :  { %v2750_v19 = vpop.eup %2749 }
 0x673   :  { %v1027_v20 = vmul.f32 %v2750_v19, %v2748_v18 }
 0x675   :  { %v3617_v36 = vsel %vm1035_vm5, %v1027_v20, %v3518_v56  ;;  %v3652_v56 = vld [vmem:[#allocation9 + $0xec] ss:$16 sps:$4 sm:$0xff]  }
 0x676   :  { %v1045_v21 = vpack.c.bf16 %v3617_v36, %v3617_v36 }
 0x678   :  { %1079 = vmatmul.mubr.bf16.vlgmr.msra.gmra.mrb[24].mxu0 %v1045_v21  ;;  %1120 = vmatmul.mubr.bf16.vlgmr.msra.gmra.mrb[24].mxu1 %v1045_v21 }
 0x679   :  { %1175 = vmatpush1.bf16.msra.mxu0 %v3522_v49  ;;  %1216 = vmatpush1.bf16.msra.mxu1 %v3525_v26 }
 0x67a   :  { %1176 = vmatprep.subr.bf16.mxu0 %v3528_v53  ;;  %1217 = vmatprep.subr.bf16.mxu1 %v3531_v54 }
 0x67b   :  { %1206 = vmatprep.mubr.bf16.mxu0 %v3077_v3  ;;  %1247 = vmatprep.mubr.bf16.mxu1 %v3077_v3 }
 0x67d   :  { %1177 = vmatpush1.bf16.msra.mxu0 %v3536_v55  ;;  %1218 = vmatpush1.bf16.msra.mxu1 %v3539_v57 }
 0x67e   :  { %1178 = vmatprep.subr.bf16.mxu0 %v3542_v58  ;;  %1219 = vmatprep.subr.bf16.mxu1 %v3545_v41 }
 0x681   :  { %1179 = vmatpush1.bf16.msra.mxu0 %v3548_v47  ;;  %1220 = vmatpush1.bf16.msra.mxu1 %v3551_v59 }
 0x682   :  { %1180 = vmatprep.subr.bf16.mxu0 %v3554_v60  ;;  %1221 = vmatprep.subr.bf16.mxu1 %v3557_v62 }
 0x685   :  { %1181 = vmatpush1.bf16.msra.mxu0 %v3560_v61  ;;  %1222 = vmatpush1.bf16.msra.mxu1 %v3563_v63 }
 0x686   :  { %1182 = vmatprep.subr.bf16.mxu0 %v3566_v28  ;;  %1223 = vmatprep.subr.bf16.mxu1 %v3569_v32 }
 0x689   :  { %1183 = vmatpush1.bf16.msra.mxu0 %v3572_v37  ;;  %1224 = vmatpush1.bf16.msra.mxu1 %v3575_v38 }
 0x68a   :  { %1184 = vmatprep.subr.bf16.mxu0 %v3578_v4  ;;  %1225 = vmatprep.subr.bf16.mxu1 %v3581_v5 }
 0x68d   :  { %1185 = vmatpush1.bf16.msra.mxu0 %v3584_v6  ;;  %1226 = vmatpush1.bf16.msra.mxu1 %v3587_v8 }
 0x68e   :  { %1186 = vmatprep.subr.bf16.mxu0 %v3590_v9  ;;  %1227 = vmatprep.subr.bf16.mxu1 %v3593_v10 }
 0x691   :  { %1187 = vmatpush1.bf16.msra.mxu0 %v3596_v11  ;;  %1228 = vmatpush1.bf16.msra.mxu1 %v3648_v46 }
 0x692   :  { %1188 = vmatprep.subr.bf16.mxu0 %v3600_v12  ;;  %1229 = vmatprep.subr.bf16.mxu1 %v3652_v56 }
 0x695   :  { %1189 = vmatpush1.bf16.msra.mxu0 %v3604_v13  ;;  %1230 = vmatpush1.bf16.msra.mxu1 %v3656_v7 }
 0x696   :  { %1302 = vmatprep.subr.bf16.mxu0 %v3509_v2  ;;  %1343 = vmatprep.subr.bf16.mxu1 %v3609_v14 }
 0x74b   :  { %v1080_v39 = vpop.f32.mrb[24].mxu0  ;;  %v1121_v25 = vpop.f32.mrb[24].mxu1 }
 0x74c   :  { %v1128_v27 = vadd.f32 %v1080_v39, %v1041_v23  ;;  %v1082_v30 = vpop.f32.mrb[25].mxu0  ;;  %v1123_v31 = vpop.f32.mrb[25].mxu1  ;;  %v1130_v50 = vadd.f32 %v1121_v25, %v1043_v48 }
 0x74d   :  { %v1129_v33 = vadd.f32 %v1082_v30, %v1042_v24  ;;  %v1084_v51 = vpop.f32.mrb[26].mxu0  ;;  %v1125_v34 = vpop.f32.mrb[26].mxu1  ;;  %v1131_v1 = vadd.f32 %v1123_v31, %v1044_v45  ;;  %v1168_v45 = vld [vmem:[#allocation6 + $0x78] sm:$0xff] }
 0x74e   :  { %v2486_v40 = vmul.f32 -1.442695, %v1128_v27  ;;  %v1085_v42 = vpop.f32.mrb[27].mxu0  ;;  %v1126_v43 = vpop.f32.mrb[27].mxu1 }
 0x74f   :  { %v2487_v44 = vmul.f32 -1.442695, %v1129_v33  ;;  %v2488_v52 = vmul.f32 -1.442695, %v1131_v1  ;;  %v1162_v27 = vpop.permute.xlu0 %1161 }
 0x750   :  { %2751 = vpow2.f32 %v2486_v40  ;;  %vm1163_vm6 = vcmp.eq.s32.totalorder %v1162_v27, 1 }
 0x751   :  { %2753 = vpow2.f32 %v2487_v44 }
 0x752   :  { %2755 = vpow2.f32 %v2488_v52 }
 0x753   :  { %2757 = vtanh.f32 %v1130_v50 }
 0x75a   :  { %v2752_v15 = vpop.eup %2751 }
 0x75b   :  { %v2754_v35 = vpop.eup %2753  ;;  %v1135_v16 = vadd.f32 1.0, %v2752_v15 }
 0x75c   :  { %v1141_v18 = vadd.f32 1.0, %v2754_v35  ;;  %v2756_v19 = vpop.eup %2755 }
 0x75d   :  { %2759 = vrcp.f32 %v1135_v16  ;;  %v2758_v20 = vpop.eup %2757  ;;  %v1148_v24 = vadd.f32 1.0, %v2756_v19 }
 0x75e   :  { %2761 = vrcp.f32 %v1141_v18 }
 0x75f   :  { %2763 = vrcp.f32 %v1148_v24 }
 0x767   :  { %v2760_v21 = vpop.eup %2759 }
 0x768   :  { %v2762_v22 = vpop.eup %2761  ;;  %v1152_v23 = vmul.f32 %v2760_v21, %v2758_v20  ;;  %v1172_v20 = vunpack.c.h.bf16 %v1168_v45 }
 0x769   :  { %v1151_v39 = vmul.f32 %v2762_v22, %v3614_v17  ;;  %v2764_v30 = vpop.eup %2763  ;;  %v1171_v22 = vunpack.c.l.bf16 %v1168_v45 }
 0x76b   :  { %v1153_v29 = vadd.f32 %v1152_v23, %v1151_v39 }
 0x76d   :  { %2765 = vtanh.f32 %v1153_v29  ;;  %v3663_v25 = vsel %vm1163_vm6, %v1153_v29, %v3614_v17  ;;  %v1167_v17 = vld [vmem:[#allocation6 + $0x70] sm:$0xff] }
 0x76e   :  { %v1170_v40 = vunpack.c.h.bf16 %v1167_v17 }
 0x777   :  { %v2766_v31 = vpop.eup %2765 }
 0x778   :  { %v1155_v33 = vmul.f32 %v2766_v31, %v2764_v30 }
 0x77a   :  { %v3666_v51 = vsel %vm1163_vm6, %v1155_v33, %v3617_v36  ;;  %v1169_v36 = vunpack.c.l.bf16 %v1167_v17 }
 0x77b   :  { %v1173_v34 = vpack.c.bf16 %v3666_v51, %v3666_v51 }
 0x77d   :  { %1207 = vmatmul.mubr.bf16.vlgmr.msra.gmra.mrb[28].mxu0 %v1173_v34  ;;  %1248 = vmatmul.mubr.bf16.vlgmr.msra.gmra.mrb[28].mxu1 %v1173_v34 }
 0x77e   :  { %1303 = vmatpush1.bf16.msra.mxu0 %v3522_v49  ;;  %1344 = vmatpush1.bf16.msra.mxu1 %v3525_v26 }
 0x77f   :  { %1304 = vmatprep.subr.bf16.mxu0 %v3528_v53  ;;  %1345 = vmatprep.subr.bf16.mxu1 %v3531_v54 }
 0x780   :  { %1334 = vmatprep.mubr.bf16.mxu0 %v3077_v3  ;;  %1375 = vmatprep.mubr.bf16.mxu1 %v3077_v3 }
 0x782   :  { %1305 = vmatpush1.bf16.msra.mxu0 %v3536_v55  ;;  %1346 = vmatpush1.bf16.msra.mxu1 %v3539_v57 }
 0x783   :  { %1306 = vmatprep.subr.bf16.mxu0 %v3542_v58  ;;  %1347 = vmatprep.subr.bf16.mxu1 %v3545_v41 }
 0x786   :  { %1307 = vmatpush1.bf16.msra.mxu0 %v3548_v47  ;;  %1348 = vmatpush1.bf16.msra.mxu1 %v3551_v59 }
 0x787   :  { %1308 = vmatprep.subr.bf16.mxu0 %v3554_v60  ;;  %1349 = vmatprep.subr.bf16.mxu1 %v3557_v62 }
 0x78a   :  { %1309 = vmatpush1.bf16.msra.mxu0 %v3560_v61  ;;  %1350 = vmatpush1.bf16.msra.mxu1 %v3563_v63 }
 0x78b   :  { %1310 = vmatprep.subr.bf16.mxu0 %v3566_v28  ;;  %1351 = vmatprep.subr.bf16.mxu1 %v3569_v32 }
 0x78e   :  { %1311 = vmatpush1.bf16.msra.mxu0 %v3572_v37  ;;  %1352 = vmatpush1.bf16.msra.mxu1 %v3575_v38 }
 0x78f   :  { %1312 = vmatprep.subr.bf16.mxu0 %v3578_v4  ;;  %1353 = vmatprep.subr.bf16.mxu1 %v3581_v5 }
 0x792   :  { %1313 = vmatpush1.bf16.msra.mxu0 %v3584_v6  ;;  %1354 = vmatpush1.bf16.msra.mxu1 %v3587_v8 }
 0x793   :  { %1314 = vmatprep.subr.bf16.mxu0 %v3590_v9  ;;  %1355 = vmatprep.subr.bf16.mxu1 %v3593_v10 }
 0x796   :  { %1315 = vmatpush1.bf16.msra.mxu0 %v3596_v11  ;;  %1356 = vmatpush1.bf16.msra.mxu1 %v3648_v46 }
 0x797   :  { %1316 = vmatprep.subr.bf16.mxu0 %v3600_v12  ;;  %1357 = vmatprep.subr.bf16.mxu1 %v3652_v56 }
 0x79a   :  { %1317 = vmatpush1.bf16.msra.mxu0 %v3604_v13  ;;  %1358 = vmatpush1.bf16.msra.mxu1 %v3656_v7 }
 0x79b   :  { %1430 = vmatprep.subr.bf16.mxu0 %v3509_v2  ;;  %1471 = vmatprep.subr.bf16.mxu1 %v3609_v14 }
 0x850   :  { %v1208_v42 = vpop.f32.mrb[28].mxu0  ;;  %v1249_v43 = vpop.f32.mrb[28].mxu1 }
 0x851   :  { %v1256_v44 = vadd.f32 %v1208_v42, %v1169_v36  ;;  %v1210_v1 = vpop.f32.mrb[29].mxu0  ;;  %v1251_v48 = vpop.f32.mrb[29].mxu1  ;;  %v1258_v24 = vadd.f32 %v1249_v43, %v1171_v22 }
 0x852   :  { %v1257_v52 = vadd.f32 %v1210_v1, %v1170_v40  ;;  %v1212_v50 = vpop.f32.mrb[30].mxu0  ;;  %v1253_v15 = vpop.f32.mrb[30].mxu1  ;;  %v1259_v21 = vadd.f32 %v1251_v48, %v1172_v20  ;;  %v1296_v20 = vld [vmem:[#allocation6 + $0x88] sm:$0xff] }
 0x853   :  { %v2489_v35 = vmul.f32 -1.442695, %v1256_v44  ;;  %v1213_v16 = vpop.f32.mrb[31].mxu0  ;;  %v1254_v18 = vpop.f32.mrb[31].mxu1 }
 0x854   :  { %v2490_v19 = vmul.f32 -1.442695, %v1257_v52  ;;  %v2491_v23 = vmul.f32 -1.442695, %v1259_v21  ;;  %v1290_v44 = vpop.permute.xlu1 %1289 }
 0x855   :  { %2767 = vpow2.f32 %v2489_v35  ;;  %vm1291_vm7 = vcmp.eq.s32.totalorder %v1290_v44, 1 }
 0x856   :  { %2769 = vpow2.f32 %v2490_v19 }
 0x857   :  { %2771 = vpow2.f32 %v2491_v23 }
 0x858   :  { %2773 = vtanh.f32 %v1258_v24 }
 0x85f   :  { %v2768_v39 = vpop.eup %2767 }
 0x860   :  { %v2770_v27 = vpop.eup %2769  ;;  %v1263_v29 = vadd.f32 1.0, %v2768_v39 }
 0x861   :  { %v1269_v30 = vadd.f32 1.0, %v2770_v27  ;;  %v2772_v31 = vpop.eup %2771 }
 0x862   :  { %2775 = vrcp.f32 %v1263_v29  ;;  %v2774_v33 = vpop.eup %2773  ;;  %v1276_v40 = vadd.f32 1.0, %v2772_v31 }
 0x863   :  { %2777 = vrcp.f32 %v1269_v30 }
 0x864   :  { %2779 = vrcp.f32 %v1276_v40 }
 0x86c   :  { %v2776_v34 = vpop.eup %2775 }
 0x86d   :  { %v2778_v17 = vpop.eup %2777  ;;  %v1280_v36 = vmul.f32 %v2776_v34, %v2774_v33  ;;  %v1300_v33 = vunpack.c.h.bf16 %v1296_v20 }
 0x86e   :  { %v1279_v42 = vmul.f32 %v2778_v17, %v3663_v25  ;;  %v2780_v1 = vpop.eup %2779  ;;  %v1299_v17 = vunpack.c.l.bf16 %v1296_v20 }
 0x870   :  { %v1281_v45 = vadd.f32 %v1280_v36, %v1279_v42 }
 0x872   :  { %2781 = vtanh.f32 %v1281_v45  ;;  %v3706_v43 = vsel %vm1291_vm7, %v1281_v45, %v3663_v25  ;;  %v1295_v25 = vld [vmem:[#allocation6 + $0x80] sm:$0xff] }
 0x873   :  { %v1298_v35 = vunpack.c.h.bf16 %v1295_v25 }
 0x87c   :  { %v2782_v48 = vpop.eup %2781 }
 0x87d   :  { %v1283_v52 = vmul.f32 %v2782_v48, %v2780_v1 }
 0x87f   :  { %v3709_v50 = vsel %vm1291_vm7, %v1283_v52, %v3666_v51  ;;  %v1297_v51 = vunpack.c.l.bf16 %v1295_v25 }
 0x880   :  { %v1301_v15 = vpack.c.bf16 %v3709_v50, %v3709_v50 }
 0x882   :  { %1335 = vmatmul.mubr.bf16.vlgmr.msra.gmra.mrb[32].mxu0 %v1301_v15  ;;  %1376 = vmatmul.mubr.bf16.vlgmr.msra.gmra.mrb[32].mxu1 %v1301_v15 }
 0x883   :  { %1431 = vmatpush1.bf16.msra.mxu0 %v3522_v49  ;;  %1472 = vmatpush1.bf16.msra.mxu1 %v3525_v26 }
 0x884   :  { %1432 = vmatprep.subr.bf16.mxu0 %v3528_v53  ;;  %1473 = vmatprep.subr.bf16.mxu1 %v3531_v54 }
 0x885   :  { %1462 = vmatprep.mubr.bf16.mxu0 %v3077_v3  ;;  %1503 = vmatprep.mubr.bf16.mxu1 %v3077_v3 }
 0x887   :  { %1433 = vmatpush1.bf16.msra.mxu0 %v3536_v55  ;;  %1474 = vmatpush1.bf16.msra.mxu1 %v3539_v57 }
 0x888   :  { %1434 = vmatprep.subr.bf16.mxu0 %v3542_v58  ;;  %1475 = vmatprep.subr.bf16.mxu1 %v3545_v41 }
 0x88b   :  { %1435 = vmatpush1.bf16.msra.mxu0 %v3548_v47  ;;  %1476 = vmatpush1.bf16.msra.mxu1 %v3551_v59 }
 0x88c   :  { %1436 = vmatprep.subr.bf16.mxu0 %v3554_v60  ;;  %1477 = vmatprep.subr.bf16.mxu1 %v3557_v62 }
 0x88f   :  { %1437 = vmatpush1.bf16.msra.mxu0 %v3560_v61  ;;  %1478 = vmatpush1.bf16.msra.mxu1 %v3563_v63 }
 0x890   :  { %1438 = vmatprep.subr.bf16.mxu0 %v3566_v28  ;;  %1479 = vmatprep.subr.bf16.mxu1 %v3569_v32 }
 0x893   :  { %1439 = vmatpush1.bf16.msra.mxu0 %v3572_v37  ;;  %1480 = vmatpush1.bf16.msra.mxu1 %v3575_v38 }
 0x894   :  { %1440 = vmatprep.subr.bf16.mxu0 %v3578_v4  ;;  %1481 = vmatprep.subr.bf16.mxu1 %v3581_v5 }
 0x897   :  { %1441 = vmatpush1.bf16.msra.mxu0 %v3584_v6  ;;  %1482 = vmatpush1.bf16.msra.mxu1 %v3587_v8 }
 0x898   :  { %1442 = vmatprep.subr.bf16.mxu0 %v3590_v9  ;;  %1483 = vmatprep.subr.bf16.mxu1 %v3593_v10 }
 0x89b   :  { %1443 = vmatpush1.bf16.msra.mxu0 %v3596_v11  ;;  %1484 = vmatpush1.bf16.msra.mxu1 %v3648_v46 }
 0x89c   :  { %1444 = vmatprep.subr.bf16.mxu0 %v3600_v12  ;;  %1485 = vmatprep.subr.bf16.mxu1 %v3652_v56 }
 0x89f   :  { %1445 = vmatpush1.bf16.msra.mxu0 %v3604_v13  ;;  %1486 = vmatpush1.bf16.msra.mxu1 %v3656_v7 }
 0x8a0   :  { %1558 = vmatprep.subr.bf16.mxu0 %v3509_v2  ;;  %1599 = vmatprep.subr.bf16.mxu1 %v3609_v14 }
 0x955   :  { %v1336_v16 = vpop.f32.mrb[32].mxu0  ;;  %v1377_v18 = vpop.f32.mrb[32].mxu1 }
 0x956   :  { %v1384_v19 = vadd.f32 %v1336_v16, %v1297_v51  ;;  %v1338_v21 = vpop.f32.mrb[33].mxu0  ;;  %v1379_v22 = vpop.f32.mrb[33].mxu1  ;;  %v1386_v40 = vadd.f32 %v1377_v18, %v1299_v17 }
 0x957   :  { %v1385_v23 = vadd.f32 %v1338_v21, %v1298_v35  ;;  %v1340_v24 = vpop.f32.mrb[34].mxu0  ;;  %v1381_v39 = vpop.f32.mrb[34].mxu1  ;;  %v1387_v34 = vadd.f32 %v1379_v22, %v1300_v33  ;;  %v1424_v33 = vld [vmem:[#allocation6 + $0x98] sm:$0xff] }
 0x958   :  { %v2492_v27 = vmul.f32 -1.442695, %v1384_v19  ;;  %v1341_v29 = vpop.f32.mrb[35].mxu0  ;;  %v1382_v30 = vpop.f32.mrb[35].mxu1 }
 0x959   :  { %v2493_v31 = vmul.f32 -1.442695, %v1385_v23  ;;  %v2494_v36 = vmul.f32 -1.442695, %v1387_v34  ;;  %v1418_v19 = vpop.permute.xlu0 %1417 }
 0x95a   :  { %2783 = vpow2.f32 %v2492_v27  ;;  %vm1419_vm8 = vcmp.eq.s32.totalorder %v1418_v19, 1 }
 0x95b   :  { %2785 = vpow2.f32 %v2493_v31 }
 0x95c   :  { %2787 = vpow2.f32 %v2494_v36 }
 0x95d   :  { %2789 = vtanh.f32 %v1386_v40 }
 0x964   :  { %v2784_v42 = vpop.eup %2783 }
 0x965   :  { %v2786_v44 = vpop.eup %2785  ;;  %v1391_v45 = vadd.f32 1.0, %v2784_v42 }
 0x966   :  { %v1397_v1 = vadd.f32 1.0, %v2786_v44  ;;  %v2788_v48 = vpop.eup %2787 }
 0x967   :  { %2791 = vrcp.f32 %v1391_v45  ;;  %v2790_v52 = vpop.eup %2789  ;;  %v1404_v35 = vadd.f32 1.0, %v2788_v48 }
 0x968   :  { %2793 = vrcp.f32 %v1397_v1 }
 0x969   :  { %2795 = vrcp.f32 %v1404_v35 }
 0x971   :  { %v2792_v15 = vpop.eup %2791 }
 0x972   :  { %v2794_v25 = vpop.eup %2793  ;;  %v1408_v51 = vmul.f32 %v2792_v15, %v2790_v52  ;;  %v1428_v52 = vunpack.c.h.bf16 %v1424_v33 }
 0x973   :  { %v1407_v16 = vmul.f32 %v2794_v25, %v3706_v43  ;;  %v2796_v21 = vpop.eup %2795  ;;  %v1427_v25 = vunpack.c.l.bf16 %v1424_v33 }
 0x975   :  { %v1409_v20 = vadd.f32 %v1408_v51, %v1407_v16 }
 0x977   :  { %2797 = vtanh.f32 %v1409_v20  ;;  %v3749_v18 = vsel %vm1419_vm8, %v1409_v20, %v3706_v43  ;;  %v1423_v43 = vld [vmem:[#allocation6 + $0x90] sm:$0xff] }
 0x978   :  { %v1426_v27 = vunpack.c.h.bf16 %v1423_v43 }
 0x981   :  { %v2798_v22 = vpop.eup %2797 }
 0x982   :  { %v1411_v23 = vmul.f32 %v2798_v22, %v2796_v21 }
 0x984   :  { %v3752_v24 = vsel %vm1419_vm8, %v1411_v23, %v3709_v50  ;;  %v1425_v50 = vunpack.c.l.bf16 %v1423_v43 }
 0x985   :  { %v1429_v39 = vpack.c.bf16 %v3752_v24, %v3752_v24 }
 0x987   :  { %1463 = vmatmul.mubr.bf16.vlgmr.msra.gmra.mrb[36].mxu0 %v1429_v39  ;;  %1504 = vmatmul.mubr.bf16.vlgmr.msra.gmra.mrb[36].mxu1 %v1429_v39 }
 0x988   :  { %1559 = vmatpush1.bf16.msra.mxu0 %v3522_v49  ;;  %1600 = vmatpush1.bf16.msra.mxu1 %v3525_v26 }
 0x989   :  { %1560 = vmatprep.subr.bf16.mxu0 %v3528_v53  ;;  %1601 = vmatprep.subr.bf16.mxu1 %v3531_v54 }
 0x98a   :  { %1590 = vmatprep.mubr.bf16.mxu0 %v3077_v3  ;;  %1631 = vmatprep.mubr.bf16.mxu1 %v3077_v3 }
 0x98c   :  { %1561 = vmatpush1.bf16.msra.mxu0 %v3536_v55  ;;  %1602 = vmatpush1.bf16.msra.mxu1 %v3539_v57 }
 0x98d   :  { %1562 = vmatprep.subr.bf16.mxu0 %v3542_v58  ;;  %1603 = vmatprep.subr.bf16.mxu1 %v3545_v41 }
 0x990   :  { %1563 = vmatpush1.bf16.msra.mxu0 %v3548_v47  ;;  %1604 = vmatpush1.bf16.msra.mxu1 %v3551_v59 }
 0x991   :  { %1564 = vmatprep.subr.bf16.mxu0 %v3554_v60  ;;  %1605 = vmatprep.subr.bf16.mxu1 %v3557_v62 }
 0x994   :  { %1565 = vmatpush1.bf16.msra.mxu0 %v3560_v61  ;;  %1606 = vmatpush1.bf16.msra.mxu1 %v3563_v63 }
 0x995   :  { %1566 = vmatprep.subr.bf16.mxu0 %v3566_v28  ;;  %1607 = vmatprep.subr.bf16.mxu1 %v3569_v32 }
 0x998   :  { %1567 = vmatpush1.bf16.msra.mxu0 %v3572_v37  ;;  %1608 = vmatpush1.bf16.msra.mxu1 %v3575_v38 }
 0x999   :  { %1568 = vmatprep.subr.bf16.mxu0 %v3578_v4  ;;  %1609 = vmatprep.subr.bf16.mxu1 %v3581_v5 }
 0x99c   :  { %1569 = vmatpush1.bf16.msra.mxu0 %v3584_v6  ;;  %1610 = vmatpush1.bf16.msra.mxu1 %v3587_v8 }
 0x99d   :  { %1570 = vmatprep.subr.bf16.mxu0 %v3590_v9  ;;  %1611 = vmatprep.subr.bf16.mxu1 %v3593_v10 }
 0x9a0   :  { %1571 = vmatpush1.bf16.msra.mxu0 %v3596_v11  ;;  %1612 = vmatpush1.bf16.msra.mxu1 %v3648_v46 }
 0x9a1   :  { %1572 = vmatprep.subr.bf16.mxu0 %v3600_v12  ;;  %1613 = vmatprep.subr.bf16.mxu1 %v3652_v56 }
 0x9a4   :  { %1573 = vmatpush1.bf16.msra.mxu0 %v3604_v13  ;;  %1614 = vmatpush1.bf16.msra.mxu1 %v3656_v7 }
 0x9a5   :  { %1686 = vmatprep.subr.bf16.mxu0 %v3509_v2  ;;  %1727 = vmatprep.subr.bf16.mxu1 %v3609_v14 }
 0xa5a   :  { %v1464_v29 = vpop.f32.mrb[36].mxu0  ;;  %v1505_v30 = vpop.f32.mrb[36].mxu1 }
 0xa5b   :  { %v1512_v31 = vadd.f32 %v1464_v29, %v1425_v50  ;;  %v1466_v34 = vpop.f32.mrb[37].mxu0  ;;  %v1507_v17 = vpop.f32.mrb[37].mxu1  ;;  %v1514_v35 = vadd.f32 %v1505_v30, %v1427_v25 }
 0xa5c   :  { %v1513_v36 = vadd.f32 %v1466_v34, %v1426_v27  ;;  %v1468_v40 = vpop.f32.mrb[38].mxu0  ;;  %v1509_v42 = vpop.f32.mrb[38].mxu1  ;;  %v1515_v15 = vadd.f32 %v1507_v17, %v1428_v52  ;;  %v1552_v52 = vld [vmem:[#allocation6 + $0xa8] sm:$0xff] }
 0xa5d   :  { %v2495_v44 = vmul.f32 -1.442695, %v1512_v31  ;;  %v1469_v45 = vpop.f32.mrb[39].mxu0  ;;  %v1510_v1 = vpop.f32.mrb[39].mxu1 }
 0xa5e   :  { %v2496_v48 = vmul.f32 -1.442695, %v1513_v36  ;;  %v2497_v51 = vmul.f32 -1.442695, %v1515_v15  ;;  %v1546_v31 = vpop.permute.xlu1 %1545 }
 0xa5f   :  { %2799 = vpow2.f32 %v2495_v44  ;;  %vm1547_vm9 = vcmp.eq.s32.totalorder %v1546_v31, 1 }
 0xa60   :  { %2801 = vpow2.f32 %v2496_v48 }
 0xa61   :  { %2803 = vpow2.f32 %v2497_v51 }
 0xa62   :  { %2805 = vtanh.f32 %v1514_v35 }
 0xa69   :  { %v2800_v16 = vpop.eup %2799 }
 0xa6a   :  { %v2802_v19 = vpop.eup %2801  ;;  %v1519_v20 = vadd.f32 1.0, %v2800_v16 }
 0xa6b   :  { %v1525_v21 = vadd.f32 1.0, %v2802_v19  ;;  %v2804_v22 = vpop.eup %2803 }
 0xa6c   :  { %2807 = vrcp.f32 %v1519_v20  ;;  %v2806_v23 = vpop.eup %2805  ;;  %v1532_v27 = vadd.f32 1.0, %v2804_v22 }
 0xa6d   :  { %2809 = vrcp.f32 %v1525_v21 }
 0xa6e   :  { %2811 = vrcp.f32 %v1532_v27 }
 0xa76   :  { %v2808_v39 = vpop.eup %2807 }
 0xa77   :  { %v2810_v43 = vpop.eup %2809  ;;  %v1536_v50 = vmul.f32 %v2808_v39, %v2806_v23  ;;  %v1556_v23 = vunpack.c.h.bf16 %v1552_v52  ;;  %v1555_v39 = vunpack.c.l.bf16 %v1552_v52 }
 0xa78   :  { %v1535_v29 = vmul.f32 %v2810_v43, %v3749_v18  ;;  %v2812_v34 = vpop.eup %2811 }
 0xa7a   :  { %v1537_v33 = vadd.f32 %v1536_v50, %v1535_v29 }
 0xa7c   :  { %2813 = vtanh.f32 %v1537_v33  ;;  %v3792_v30 = vsel %vm1547_vm9, %v1537_v33, %v3749_v18  ;;  %v1551_v18 = vld [vmem:[#allocation6 + $0xa0] sm:$0xff] }
 0xa7d   :  { %v1554_v44 = vunpack.c.h.bf16 %v1551_v18 }
 0xa86   :  { %v2814_v17 = vpop.eup %2813 }
 0xa87   :  { %v1539_v36 = vmul.f32 %v2814_v17, %v2812_v34 }
 0xa89   :  { %v3795_v40 = vsel %vm1547_vm9, %v1539_v36, %v3752_v24  ;;  %v1553_v24 = vunpack.c.l.bf16 %v1551_v18 }
 0xa8a   :  { %v1557_v42 = vpack.c.bf16 %v3795_v40, %v3795_v40 }
 0xa8c   :  { %1591 = vmatmul.mubr.bf16.vlgmr.msra.gmra.mrb[40].mxu0 %v1557_v42  ;;  %1632 = vmatmul.mubr.bf16.vlgmr.msra.gmra.mrb[40].mxu1 %v1557_v42 }
 0xa8d   :  { %1687 = vmatpush1.bf16.msra.mxu0 %v3522_v49  ;;  %1728 = vmatpush1.bf16.msra.mxu1 %v3525_v26 }
 0xa8e   :  { %1688 = vmatprep.subr.bf16.mxu0 %v3528_v53  ;;  %1729 = vmatprep.subr.bf16.mxu1 %v3531_v54 }
 0xa8f   :  { %1718 = vmatprep.mubr.bf16.mxu0 %v3077_v3  ;;  %1759 = vmatprep.mubr.bf16.mxu1 %v3077_v3 }
 0xa91   :  { %1689 = vmatpush1.bf16.msra.mxu0 %v3536_v55  ;;  %1730 = vmatpush1.bf16.msra.mxu1 %v3539_v57 }
 0xa92   :  { %1690 = vmatprep.subr.bf16.mxu0 %v3542_v58  ;;  %1731 = vmatprep.subr.bf16.mxu1 %v3545_v41 }
 0xa95   :  { %1691 = vmatpush1.bf16.msra.mxu0 %v3548_v47  ;;  %1732 = vmatpush1.bf16.msra.mxu1 %v3551_v59 }
 0xa96   :  { %1692 = vmatprep.subr.bf16.mxu0 %v3554_v60  ;;  %1733 = vmatprep.subr.bf16.mxu1 %v3557_v62 }
 0xa99   :  { %1693 = vmatpush1.bf16.msra.mxu0 %v3560_v61  ;;  %1734 = vmatpush1.bf16.msra.mxu1 %v3563_v63 }
 0xa9a   :  { %1694 = vmatprep.subr.bf16.mxu0 %v3566_v28  ;;  %1735 = vmatprep.subr.bf16.mxu1 %v3569_v32 }
 0xa9d   :  { %1695 = vmatpush1.bf16.msra.mxu0 %v3572_v37  ;;  %1736 = vmatpush1.bf16.msra.mxu1 %v3575_v38 }
 0xa9e   :  { %1696 = vmatprep.subr.bf16.mxu0 %v3578_v4  ;;  %1737 = vmatprep.subr.bf16.mxu1 %v3581_v5 }
 0xaa1   :  { %1697 = vmatpush1.bf16.msra.mxu0 %v3584_v6  ;;  %1738 = vmatpush1.bf16.msra.mxu1 %v3587_v8 }
 0xaa2   :  { %1698 = vmatprep.subr.bf16.mxu0 %v3590_v9  ;;  %1739 = vmatprep.subr.bf16.mxu1 %v3593_v10 }
 0xaa5   :  { %1699 = vmatpush1.bf16.msra.mxu0 %v3596_v11  ;;  %1740 = vmatpush1.bf16.msra.mxu1 %v3648_v46 }
 0xaa6   :  { %1700 = vmatprep.subr.bf16.mxu0 %v3600_v12  ;;  %1741 = vmatprep.subr.bf16.mxu1 %v3652_v56 }
 0xaa9   :  { %1701 = vmatpush1.bf16.msra.mxu0 %v3604_v13  ;;  %1742 = vmatpush1.bf16.msra.mxu1 %v3656_v7 }
 0xaaa   :  { %1814 = vmatprep.subr.bf16.mxu0 %v3509_v2  ;;  %1855 = vmatprep.subr.bf16.mxu1 %v3609_v14 }
 0xb5f   :  { %v1592_v45 = vpop.f32.mrb[40].mxu0  ;;  %v1633_v1 = vpop.f32.mrb[40].mxu1 }
 0xb60   :  { %v1640_v48 = vadd.f32 %v1592_v45, %v1553_v24  ;;  %v1594_v15 = vpop.f32.mrb[41].mxu0  ;;  %v1635_v25 = vpop.f32.mrb[41].mxu1  ;;  %v1642_v50 = vadd.f32 %v1633_v1, %v1555_v39 }
 0xb61   :  { %v1641_v51 = vadd.f32 %v1594_v15, %v1554_v44  ;;  %v1596_v35 = vpop.f32.mrb[42].mxu0  ;;  %v1637_v16 = vpop.f32.mrb[42].mxu1  ;;  %v1643_v2 = vadd.f32 %v1635_v25, %v1556_v23 }
 0xb62   :  { %v2498_v19 = vmul.f32 -1.442695, %v1640_v48  ;;  %v1597_v20 = vpop.f32.mrb[43].mxu0  ;;  %v1638_v21 = vpop.f32.mrb[43].mxu1 }
 0xb63   :  { %v2499_v22 = vmul.f32 -1.442695, %v1641_v51  ;;  %v2500_v43 = vmul.f32 -1.442695, %v1643_v2  ;;  %v1674_v45 = vpop.permute.xlu0 %1673  ;;  %v1802_v21 = vpop.permute.xlu1 %1801 }
 0xb64   :  { %2815 = vpow2.f32 %v2498_v19  ;;  %vm1675_vm10 = vcmp.eq.s32.totalorder %v1674_v45, 1  ;;  %vm1803_vm11 = vcmp.eq.s32.totalorder %v1802_v21, 1  ;;  %v3919_v45 = vld [vmem:[#allocation9 + $0x64] ss:$16 sps:$4 sm:$0xff]  }
 0xb65   :  { %2817 = vpow2.f32 %v2499_v22 }
 0xb66   :  { %2819 = vpow2.f32 %v2500_v43 }
 0xb67   :  { %2821 = vtanh.f32 %v1642_v50 }
 0xb6e   :  { %v2816_v27 = vpop.eup %2815 }
 0xb6f   :  { %v2818_v29 = vpop.eup %2817  ;;  %v1647_v31 = vadd.f32 1.0, %v2816_v27 }
 0xb70   :  { %v1653_v33 = vadd.f32 1.0, %v2818_v29  ;;  %v2820_v34 = vpop.eup %2819  ;;  %v3887_v29 = vld [vmem:[#allocation9] ss:$16 sps:$4 sm:$0xff]  }
 0xb71   :  { %2823 = vrcp.f32 %v1647_v31  ;;  %v2822_v17 = vpop.eup %2821  ;;  %v1660_v24 = vadd.f32 1.0, %v2820_v34  ;;  %v3890_v31 = vld [vmem:[#allocation9 + $0x8] ss:$16 sps:$4 sm:$0xff]   ;;  %v3896_v34 = vld [vmem:[#allocation9 + $0x2c] ss:$16 sps:$4 sm:$0xff]  }
 0xb72   :  { %2825 = vrcp.f32 %v1653_v33  ;;  %v3893_v33 = vld [vmem:[#allocation9 + $0x24] ss:$16 sps:$4 sm:$0xff]  }
 0xb73   :  { %2827 = vrcp.f32 %v1660_v24  ;;  %v3913_v24 = vld [vmem:[#allocation9 + $0x40] ss:$16 sps:$4 sm:$0xff]  }
 0xb7b   :  { %v2824_v36 = vpop.eup %2823 }
 0xb7c   :  { %v2826_v42 = vpop.eup %2825  ;;  %v1664_v18 = vmul.f32 %v2824_v36, %v2822_v17  ;;  %v3901_v17 = vld [vmem:[#allocation9 + $0x20] ss:$16 sps:$4 sm:$0xff]   ;;  %v3904_v36 = vld [vmem:[#allocation9 + $0x28] ss:$16 sps:$4 sm:$0xff]  }
 0xb7d   :  { %v1663_v44 = vmul.f32 %v2826_v42, %v3792_v30  ;;  %v2828_v52 = vpop.eup %2827  ;;  %v3907_v42 = vld [vmem:[#allocation9 + $0x44] ss:$16 sps:$4 sm:$0xff]  }
 0xb7f   :  { %v1665_v48 = vadd.f32 %v1664_v18, %v1663_v44  ;;  %v3910_v18 = vld [vmem:[#allocation9 + $0x4c] ss:$16 sps:$4 sm:$0xff]   ;;  %v3916_v44 = vld [vmem:[#allocation9 + $0x48] ss:$16 sps:$4 sm:$0xff]  }
 0xb81   :  { %2829 = vtanh.f32 %v1665_v48  ;;  %v3835_v1 = vsel %vm1675_vm10, %v1665_v48, %v3792_v30  ;;  %v3922_v48 = vld [vmem:[#allocation9 + $0x6c] ss:$16 sps:$4 sm:$0xff]  }
 0xb8b   :  { %v2830_v15 = vpop.eup %2829 }
 0xb8c   :  { %v1667_v25 = vmul.f32 %v2830_v15, %v2828_v52  ;;  %v3928_v52 = vld [vmem:[#allocation9 + $0x68] ss:$16 sps:$4 sm:$0xff]   ;;  %v3931_v15 = vld [vmem:[#allocation9 + $0x84] ss:$16 sps:$4 sm:$0xff]  }
 0xb8e   :  { %v3838_v51 = vsel %vm1675_vm10, %v1667_v25, %v3795_v40  ;;  %v3934_v25 = vld [vmem:[#allocation9 + $0x8c] ss:$16 sps:$4 sm:$0xff]  }
 0xb8f   :  { %v1685_v35 = vpack.c.bf16 %v3838_v51, %v3838_v51 }
 0xb91   :  { %1719 = vmatmul.mubr.bf16.vlgmr.msra.gmra.mrb[44].mxu0 %v1685_v35  ;;  %1760 = vmatmul.mubr.bf16.vlgmr.msra.gmra.mrb[44].mxu1 %v1685_v35  ;;  %v3940_v35 = vld [vmem:[#allocation9 + $0x88] ss:$16 sps:$4 sm:$0xff]  }
 0xb92   :  { %1815 = vmatpush1.bf16.msra.mxu0 %v3522_v49  ;;  %1856 = vmatpush1.bf16.msra.mxu1 %v3525_v26  ;;  %v3874_v49 = vld [vmem:[#allocation9 + $0x4] ss:$16 sps:$4 sm:$0xff]  }
 0xb93   :  { %1816 = vmatprep.subr.bf16.mxu0 %v3528_v53  ;;  %1857 = vmatprep.subr.bf16.mxu1 %v3531_v54  ;;  %v1679_v26 = vld [vmem:[#allocation6 + $0xb0] sm:$0xff] }
 0xb94   :  { %1846 = vmatprep.mubr.bf16.mxu0 %v3077_v3  ;;  %1887 = vmatprep.mubr.bf16.mxu1 %v3077_v3  ;;  %v1681_v53 = vunpack.c.l.bf16 %v1679_v26  ;;  %v1682_v54 = vunpack.c.h.bf16 %v1679_v26  ;;  %v3943_v26 = vld [vmem:[#allocation9 + $0xa4] ss:$16 sps:$4 sm:$0xff]  }
 0xb96   :  { %1817 = vmatpush1.bf16.msra.mxu0 %v3536_v55  ;;  %1858 = vmatpush1.bf16.msra.mxu1 %v3539_v57 }
 0xb97   :  { %1818 = vmatprep.subr.bf16.mxu0 %v3542_v58  ;;  %1859 = vmatprep.subr.bf16.mxu1 %v3545_v41  ;;  %v1680_v41 = vld [vmem:[#allocation6 + $0xb8] sm:$0xff] }
 0xb9a   :  { %1819 = vmatpush1.bf16.msra.mxu0 %v3548_v47  ;;  %1860 = vmatpush1.bf16.msra.mxu1 %v3551_v59 }
 0xb9b   :  { %1820 = vmatprep.subr.bf16.mxu0 %v3554_v60  ;;  %1861 = vmatprep.subr.bf16.mxu1 %v3557_v62 }
 0xb9e   :  { %1821 = vmatpush1.bf16.msra.mxu0 %v3560_v61  ;;  %1862 = vmatpush1.bf16.msra.mxu1 %v3563_v63 }
 0xb9f   :  { %1822 = vmatprep.subr.bf16.mxu0 %v3566_v28  ;;  %1863 = vmatprep.subr.bf16.mxu1 %v3569_v32 }
 0xba2   :  { %1823 = vmatpush1.bf16.msra.mxu0 %v3572_v37  ;;  %1864 = vmatpush1.bf16.msra.mxu1 %v3575_v38  ;;  %v1684_v38 = vunpack.c.h.bf16 %v1680_v41 }
 0xba3   :  { %1824 = vmatprep.subr.bf16.mxu0 %v3578_v4  ;;  %1865 = vmatprep.subr.bf16.mxu1 %v3581_v5  ;;  %v1683_v5 = vunpack.c.l.bf16 %v1680_v41  ;;  %v3961_v41 = vld [vmem:[#allocation9 + $0xc0] ss:$16 sps:$4 sm:$0xff]  }
 0xba6   :  { %1825 = vmatpush1.bf16.msra.mxu0 %v3584_v6  ;;  %1866 = vmatpush1.bf16.msra.mxu1 %v3587_v8 }
 0xba7   :  { %1826 = vmatprep.subr.bf16.mxu0 %v3590_v9  ;;  %1867 = vmatprep.subr.bf16.mxu1 %v3593_v10 }
 0xbaa   :  { %1827 = vmatpush1.bf16.msra.mxu0 %v3596_v11  ;;  %1868 = vmatpush1.bf16.msra.mxu1 %v3648_v46 }
 0xbab   :  { %1828 = vmatprep.subr.bf16.mxu0 %v3600_v12  ;;  %1869 = vmatprep.subr.bf16.mxu1 %v3652_v56 }
 0xbae   :  { %1829 = vmatpush1.bf16.msra.mxu0 %v3604_v13  ;;  %1870 = vmatpush1.bf16.msra.mxu1 %v3656_v7 }
 0xbaf   :  { %1942 = vmatprep.subr.bf16.mxu0 %v3874_v49  ;;  %1983 = vmatprep.subr.bf16.mxu1 %v3609_v14 }
 0xc64   :  { %v1720_v55 = vpop.f32.mrb[44].mxu0  ;;  %v1761_v57 = vpop.f32.mrb[44].mxu1 }
 0xc65   :  { %v1768_v58 = vadd.f32 %v1720_v55, %v1681_v53  ;;  %v1722_v47 = vpop.f32.mrb[45].mxu0  ;;  %v1763_v59 = vpop.f32.mrb[45].mxu1  ;;  %v1770_v8 = vadd.f32 %v1761_v57, %v1683_v5  ;;  %v3946_v53 = vld [vmem:[#allocation9 + $0xac] ss:$16 sps:$4 sm:$0xff]   ;;  %v3952_v55 = vld [vmem:[#allocation9 + $0xa8] ss:$16 sps:$4 sm:$0xff]  }
 0xc66   :  { %v1769_v60 = vadd.f32 %v1722_v47, %v1682_v54  ;;  %v1724_v62 = vpop.f32.mrb[46].mxu0  ;;  %v1765_v61 = vpop.f32.mrb[46].mxu1  ;;  %v1771_v4 = vadd.f32 %v1763_v59, %v1684_v38  ;;  %v3949_v54 = vld [vmem:[#allocation9 + $0xa0] ss:$16 sps:$4 sm:$0xff]   ;;  %v3955_v57 = vld [vmem:[#allocation9 + $0xc4] ss:$16 sps:$4 sm:$0xff]  }
 0xc67   :  { %v2501_v63 = vmul.f32 -1.442695, %v1768_v58  ;;  %v1725_v28 = vpop.f32.mrb[47].mxu0  ;;  %v1766_v32 = vpop.f32.mrb[47].mxu1  ;;  %v3958_v58 = vld [vmem:[#allocation9 + $0xcc] ss:$16 sps:$4 sm:$0xff]  }
 0xc68   :  { %v2502_v37 = vmul.f32 -1.442695, %v1769_v60  ;;  %v2503_v6 = vmul.f32 -1.442695, %v1771_v4  ;;  %v3965_v47 = vld [vmem:[#allocation9 + $0xe4] ss:$16 sps:$4 sm:$0xff]  }
 0xc69   :  { %2831 = vpow2.f32 %v2501_v63  ;;  %v3969_v59 = vld [vmem:[#allocation9 + $0xe0] ss:$16 sps:$4 sm:$0xff]   ;;  %v3974_v60 = vld [vmem:[#allocation9 + $0xc] ss:$16 sps:$4 sm:$0xff]  }
 0xc6a   :  { %2833 = vpow2.f32 %v2502_v37  ;;  %v1807_v62 = vld [vmem:[#allocation6 + $0xc0] sm:$0xff]  ;;  %v1808_v37 = vld [vmem:[#allocation6 + $0xc8] sm:$0xff] }
 0xc6b   :  { %2835 = vpow2.f32 %v2503_v6  ;;  %v1810_v61 = vunpack.c.h.bf16 %v1807_v62 }
 0xc6c   :  { %2837 = vtanh.f32 %v1770_v8 }
 0xc73   :  { %v2832_v9 = vpop.eup %2831 }
 0xc74   :  { %v2834_v10 = vpop.eup %2833  ;;  %v1775_v11 = vadd.f32 1.0, %v2832_v9 }
 0xc75   :  { %v1781_v12 = vadd.f32 1.0, %v2834_v10  ;;  %v2836_v13 = vpop.eup %2835 }
 0xc76   :  { %2839 = vrcp.f32 %v1775_v11  ;;  %v2838_v14 = vpop.eup %2837  ;;  %v1788_v19 = vadd.f32 1.0, %v2836_v13  ;;  %v1812_v11 = vunpack.c.h.bf16 %v1808_v37  ;;  %v1811_v13 = vunpack.c.l.bf16 %v1808_v37 }
 0xc77   :  { %2841 = vrcp.f32 %v1781_v12 }
 0xc78   :  { %2843 = vrcp.f32 %v1788_v19 }
 0xc80   :  { %v2840_v30 = vpop.eup %2839 }
 0xc81   :  { %v2842_v40 = vpop.eup %2841  ;;  %v1792_v16 = vmul.f32 %v2840_v30, %v2838_v14 }
 0xc82   :  { %v1791_v20 = vmul.f32 %v2842_v40, %v3835_v1  ;;  %v2844_v2 = vpop.eup %2843 }
 0xc84   :  { %v1793_v22 = vadd.f32 %v1792_v16, %v1791_v20 }
 0xc86   :  { %2845 = vtanh.f32 %v1793_v22  ;;  %v3880_v23 = vsel %vm1803_vm11, %v1793_v22, %v3835_v1  ;;  %v3925_v1 = vld [vmem:[#allocation9 + $0x60] ss:$16 sps:$4 sm:$0xff]  }
 0xc90   :  { %v2846_v39 = vpop.eup %2845 }
 0xc91   :  { %v1795_v43 = vmul.f32 %v2846_v39, %v2844_v2 }
 0xc93   :  { %v3883_v50 = vsel %vm1803_vm11, %v1795_v43, %v3838_v51  ;;  %v3937_v51 = vld [vmem:[#allocation9 + $0x80] ss:$16 sps:$4 sm:$0xff]  }
 0xc94   :  { %v1813_v27 = vpack.c.bf16 %v3883_v50, %v3883_v50 }
 0xc96   :  { %1847 = vmatmul.mubr.bf16.vlgmr.msra.gmra.mrb[48].mxu0 %v1813_v27  ;;  %1888 = vmatmul.mubr.bf16.vlgmr.msra.gmra.mrb[48].mxu1 %v1813_v27 }
 0xc97   :  { %1943 = vmatpush1.bf16.msra.mxu0 %v3887_v29  ;;  %1984 = vmatpush1.bf16.msra.mxu1 %v3890_v31 }
 0xc98   :  { %1944 = vmatprep.subr.bf16.mxu0 %v3893_v33  ;;  %1985 = vmatprep.subr.bf16.mxu1 %v3896_v34 }
 0xc99   :  { %1974 = vmatprep.mubr.bf16.mxu0 %v3077_v3  ;;  %2015 = vmatprep.mubr.bf16.mxu1 %v3077_v3 }
 0xc9b   :  { %1945 = vmatpush1.bf16.msra.mxu0 %v3901_v17  ;;  %1986 = vmatpush1.bf16.msra.mxu1 %v3904_v36 }
 0xc9c   :  { %1946 = vmatprep.subr.bf16.mxu0 %v3907_v42  ;;  %1987 = vmatprep.subr.bf16.mxu1 %v3910_v18 }
 0xc9f   :  { %1947 = vmatpush1.bf16.msra.mxu0 %v3913_v24  ;;  %1988 = vmatpush1.bf16.msra.mxu1 %v3916_v44 }
 0xca0   :  { %1948 = vmatprep.subr.bf16.mxu0 %v3919_v45  ;;  %1989 = vmatprep.subr.bf16.mxu1 %v3922_v48 }
 0xca3   :  { %1949 = vmatpush1.bf16.msra.mxu0 %v3925_v1  ;;  %1990 = vmatpush1.bf16.msra.mxu1 %v3928_v52 }
 0xca4   :  { %1950 = vmatprep.subr.bf16.mxu0 %v3931_v15  ;;  %1991 = vmatprep.subr.bf16.mxu1 %v3934_v25 }
 0xca7   :  { %1951 = vmatpush1.bf16.msra.mxu0 %v3937_v51  ;;  %1992 = vmatpush1.bf16.msra.mxu1 %v3940_v35 }
 0xca8   :  { %1952 = vmatprep.subr.bf16.mxu0 %v3943_v26  ;;  %1993 = vmatprep.subr.bf16.mxu1 %v3946_v53 }
 0xcab   :  { %1953 = vmatpush1.bf16.msra.mxu0 %v3949_v54  ;;  %1994 = vmatpush1.bf16.msra.mxu1 %v3952_v55 }
 0xcac   :  { %1954 = vmatprep.subr.bf16.mxu0 %v3955_v57  ;;  %1995 = vmatprep.subr.bf16.mxu1 %v3958_v58 }
 0xcaf   :  { %1955 = vmatpush1.bf16.msra.mxu0 %v3961_v41  ;;  %1996 = vmatpush1.bf16.msra.mxu1 %v3648_v46  ;;  %v1809_v46 = vunpack.c.l.bf16 %v1807_v62 }
 0xcb0   :  { %1956 = vmatprep.subr.bf16.mxu0 %v3965_v47  ;;  %1997 = vmatprep.subr.bf16.mxu1 %v3652_v56 }
 0xcb3   :  { %1957 = vmatpush1.bf16.msra.mxu0 %v3969_v59  ;;  %1998 = vmatpush1.bf16.msra.mxu1 %v3656_v7 }
 0xcb4   :  { %2070 = vmatprep.subr.bf16.mxu0 %v3874_v49  ;;  %2111 = vmatprep.subr.bf16.mxu1 %v3974_v60 }
 0xd69   :  { %v1848_v63 = vpop.f32.mrb[48].mxu0  ;;  %v1889_v28 = vpop.f32.mrb[48].mxu1 }
 0xd6a   :  { %v1896_v32 = vadd.f32 %v1848_v63, %v1809_v46  ;;  %v1850_v56 = vpop.f32.mrb[49].mxu0  ;;  %v1891_v38 = vpop.f32.mrb[49].mxu1  ;;  %v1898_v30 = vadd.f32 %v1889_v28, %v1811_v13 }
 0xd6b   :  { %v1897_v4 = vadd.f32 %v1850_v56, %v1810_v61  ;;  %v1852_v5 = vpop.f32.mrb[50].mxu0  ;;  %v1893_v6 = vpop.f32.mrb[50].mxu1  ;;  %v1899_v12 = vadd.f32 %v1891_v38, %v1812_v11  ;;  %v1936_v11 = vld [vmem:[#allocation6 + $0xd8] sm:$0xff] }
 0xd6c   :  { %v2504_v8 = vmul.f32 -1.442695, %v1896_v32  ;;  %v1853_v7 = vpop.f32.mrb[51].mxu0  ;;  %v1894_v9 = vpop.f32.mrb[51].mxu1  ;;  %v1935_v5 = vld [vmem:[#allocation6 + $0xd0] sm:$0xff] }
 0xd6d   :  { %v2505_v10 = vmul.f32 -1.442695, %v1897_v4  ;;  %v2506_v14 = vmul.f32 -1.442695, %v1899_v12  ;;  %v1930_v46 = vpop.permute.xlu0 %1929  ;;  %v4021_v4 = vld [vmem:[#allocation9 + $0xe8] ss:$16 sps:$4 sm:$0xff]   ;;  %v1937_v6 = vunpack.c.l.bf16 %v1935_v5 }
 0xd6e   :  { %2847 = vpow2.f32 %v2504_v8  ;;  %vm1931_vm12 = vcmp.eq.s32.totalorder %v1930_v46, 1  ;;  %v1938_v8 = vunpack.c.h.bf16 %v1935_v5 }
 0xd6f   :  { %2849 = vpow2.f32 %v2505_v10 }
 0xd70   :  { %2851 = vpow2.f32 %v2506_v14 }
 0xd71   :  { %2853 = vtanh.f32 %v1898_v30 }
 0xd78   :  { %v2848_v40 = vpop.eup %2847 }
 0xd79   :  { %v2850_v16 = vpop.eup %2849  ;;  %v1903_v19 = vadd.f32 1.0, %v2848_v40 }
 0xd7a   :  { %v1909_v20 = vadd.f32 1.0, %v2850_v16  ;;  %v2852_v21 = vpop.eup %2851 }
 0xd7b   :  { %2855 = vrcp.f32 %v1903_v19  ;;  %v2854_v22 = vpop.eup %2853  ;;  %v1916_v27 = vadd.f32 1.0, %v2852_v21 }
 0xd7c   :  { %2857 = vrcp.f32 %v1909_v20 }
 0xd7d   :  { %2859 = vrcp.f32 %v1916_v27 }
 0xd85   :  { %v2856_v2 = vpop.eup %2855 }
 0xd86   :  { %v2858_v39 = vpop.eup %2857  ;;  %v1920_v43 = vmul.f32 %v2856_v2, %v2854_v22  ;;  %v1940_v22 = vunpack.c.h.bf16 %v1936_v11 }
 0xd87   :  { %v1919_v62 = vmul.f32 %v2858_v39, %v3880_v23  ;;  %v2860_v28 = vpop.eup %2859 }
 0xd89   :  { %v1921_v61 = vadd.f32 %v1920_v43, %v1919_v62 }
 0xd8b   :  { %2861 = vtanh.f32 %v1921_v61  ;;  %v3979_v63 = vsel %vm1931_vm12, %v1921_v61, %v3880_v23  ;;  %v4013_v23 = vld [vmem:[#allocation9 + $0xc8] ss:$16 sps:$4 sm:$0xff]  }
 0xd95   :  { %v2862_v32 = vpop.eup %2861 }
 0xd96   :  { %v1923_v37 = vmul.f32 %v2862_v32, %v2860_v28 }
 0xd98   :  { %v3982_v56 = vsel %vm1931_vm12, %v1923_v37, %v3883_v50  ;;  %v4017_v50 = vld [vmem:[#allocation9 + $0xec] ss:$16 sps:$4 sm:$0xff]  }
 0xd99   :  { %v1941_v38 = vpack.c.bf16 %v3982_v56, %v3982_v56 }
 0xd9b   :  { %1975 = vmatmul.mubr.bf16.vlgmr.msra.gmra.mrb[52].mxu0 %v1941_v38  ;;  %2016 = vmatmul.mubr.bf16.vlgmr.msra.gmra.mrb[52].mxu1 %v1941_v38 }
 0xd9c   :  { %2071 = vmatpush1.bf16.msra.mxu0 %v3887_v29  ;;  %2112 = vmatpush1.bf16.msra.mxu1 %v3890_v31 }
 0xd9d   :  { %2072 = vmatprep.subr.bf16.mxu0 %v3893_v33  ;;  %2113 = vmatprep.subr.bf16.mxu1 %v3896_v34 }
 0xd9e   :  { %2102 = vmatprep.mubr.bf16.mxu0 %v3077_v3  ;;  %2143 = vmatprep.mubr.bf16.mxu1 %v3077_v3 }
 0xda0   :  { %2073 = vmatpush1.bf16.msra.mxu0 %v3901_v17  ;;  %2114 = vmatpush1.bf16.msra.mxu1 %v3904_v36 }
 0xda1   :  { %2074 = vmatprep.subr.bf16.mxu0 %v3907_v42  ;;  %2115 = vmatprep.subr.bf16.mxu1 %v3910_v18 }
 0xda4   :  { %2075 = vmatpush1.bf16.msra.mxu0 %v3913_v24  ;;  %2116 = vmatpush1.bf16.msra.mxu1 %v3916_v44 }
 0xda5   :  { %2076 = vmatprep.subr.bf16.mxu0 %v3919_v45  ;;  %2117 = vmatprep.subr.bf16.mxu1 %v3922_v48 }
 0xda8   :  { %2077 = vmatpush1.bf16.msra.mxu0 %v3925_v1  ;;  %2118 = vmatpush1.bf16.msra.mxu1 %v3928_v52 }
 0xda9   :  { %2078 = vmatprep.subr.bf16.mxu0 %v3931_v15  ;;  %2119 = vmatprep.subr.bf16.mxu1 %v3934_v25 }
 0xdac   :  { %2079 = vmatpush1.bf16.msra.mxu0 %v3937_v51  ;;  %2120 = vmatpush1.bf16.msra.mxu1 %v3940_v35 }
 0xdad   :  { %2080 = vmatprep.subr.bf16.mxu0 %v3943_v26  ;;  %2121 = vmatprep.subr.bf16.mxu1 %v3946_v53 }
 0xdb0   :  { %2081 = vmatpush1.bf16.msra.mxu0 %v3949_v54  ;;  %2122 = vmatpush1.bf16.msra.mxu1 %v3952_v55 }
 0xdb1   :  { %2082 = vmatprep.subr.bf16.mxu0 %v3955_v57  ;;  %2123 = vmatprep.subr.bf16.mxu1 %v3958_v58 }
 0xdb4   :  { %2083 = vmatpush1.bf16.msra.mxu0 %v3961_v41  ;;  %2124 = vmatpush1.bf16.msra.mxu1 %v4013_v23 }
 0xdb5   :  { %2084 = vmatprep.subr.bf16.mxu0 %v3965_v47  ;;  %2125 = vmatprep.subr.bf16.mxu1 %v4017_v50 }
 0xdb8   :  { %2085 = vmatpush1.bf16.msra.mxu0 %v3969_v59  ;;  %2126 = vmatpush1.bf16.msra.mxu1 %v4021_v4 }
 0xdb9   :  { %2198 = vmatprep.subr.bf16.mxu0 %v3874_v49  ;;  %2239 = vmatprep.subr.bf16.mxu1 %v3974_v60  ;;  %v1939_v60 = vunpack.c.l.bf16 %v1936_v11 }
 0xe6e   :  { %v1976_v7 = vpop.f32.mrb[52].mxu0  ;;  %v2017_v9 = vpop.f32.mrb[52].mxu1 }
 0xe6f   :  { %v2024_v10 = vadd.f32 %v1976_v7, %v1937_v6  ;;  %v1978_v12 = vpop.f32.mrb[53].mxu0  ;;  %v2019_v13 = vpop.f32.mrb[53].mxu1  ;;  %v2026_v39 = vadd.f32 %v2017_v9, %v1939_v60 }
 0xe70   :  { %v2025_v14 = vadd.f32 %v1978_v12, %v1938_v8  ;;  %v1980_v30 = vpop.f32.mrb[54].mxu0  ;;  %v2021_v40 = vpop.f32.mrb[54].mxu1  ;;  %v2027_v49 = vadd.f32 %v2019_v13, %v1940_v22 }
 0xe71   :  { %v2507_v16 = vmul.f32 -1.442695, %v2024_v10  ;;  %v1981_v19 = vpop.f32.mrb[55].mxu0  ;;  %v2022_v20 = vpop.f32.mrb[55].mxu1 }
 0xe72   :  { %v2508_v21 = vmul.f32 -1.442695, %v2025_v14  ;;  %v2509_v2 = vmul.f32 -1.442695, %v2027_v49  ;;  %v2058_v8 = vpop.permute.xlu1 %2057  ;;  %v2191_v49 = vld [vmem:[#allocation6 + $0xf0] sm:$0xff] }
 0xe73   :  { %2863 = vpow2.f32 %v2507_v16  ;;  %vm2059_vm13 = vcmp.eq.s32.totalorder %v2058_v8, 1  ;;  %v2193_v60 = vunpack.c.l.bf16 %v2191_v49 }
 0xe74   :  { %2865 = vpow2.f32 %v2508_v21 }
 0xe75   :  { %2867 = vpow2.f32 %v2509_v2  ;;  %v2194_v2 = vunpack.c.h.bf16 %v2191_v49 }
 0xe76   :  { %2869 = vtanh.f32 %v2026_v39 }
 0xe7d   :  { %v2864_v43 = vpop.eup %2863 }
 0xe7e   :  { %v2866_v27 = vpop.eup %2865  ;;  %v2031_v62 = vadd.f32 1.0, %v2864_v43 }
 0xe7f   :  { %v2037_v46 = vadd.f32 1.0, %v2866_v27  ;;  %v2868_v61 = vpop.eup %2867 }
 0xe80   :  { %2871 = vrcp.f32 %v2031_v62  ;;  %v2870_v28 = vpop.eup %2869  ;;  %v2044_v5 = vadd.f32 1.0, %v2868_v61  ;;  %v2192_v62 = vld [vmem:[#allocation6 + $0xf8] sm:$0xff] }
 0xe81   :  { %2873 = vrcp.f32 %v2037_v46 }
 0xe82   :  { %2875 = vrcp.f32 %v2044_v5 }
 0xe8a   :  { %v2872_v32 = vpop.eup %2871 }
 0xe8b   :  { %v2874_v37 = vpop.eup %2873  ;;  %v2048_v38 = vmul.f32 %v2872_v32, %v2870_v28 }
 0xe8c   :  { %v2047_v6 = vmul.f32 %v2874_v37, %v3979_v63  ;;  %v2876_v10 = vpop.eup %2875 }
 0xe8e   :  { %v2049_v7 = vadd.f32 %v2048_v38, %v2047_v6 }
 0xe90   :  { %2877 = vtanh.f32 %v2049_v7  ;;  %v4028_v9 = vsel %vm2059_vm13, %v2049_v7, %v3979_v63  ;;  %v2196_v7 = vunpack.c.h.bf16 %v2192_v62 }
 0xe9a   :  { %v2878_v11 = vpop.eup %2877 }
 0xe9b   :  { %v2051_v12 = vmul.f32 %v2878_v11, %v2876_v10  ;;  %v2195_v10 = vunpack.c.l.bf16 %v2192_v62 }
 0xe9d   :  { %v4031_v13 = vsel %vm2059_vm13, %v2051_v12, %v3982_v56 }
 0xe9e   :  { %v2069_v14 = vpack.c.bf16 %v4031_v13, %v4031_v13 }
 0xea0   :  { %2103 = vmatmul.mubr.bf16.vlgmr.msra.gmra.mrb[56].mxu0 %v2069_v14  ;;  %2144 = vmatmul.mubr.bf16.vlgmr.msra.gmra.mrb[56].mxu1 %v2069_v14 }
 0xea1   :  { %2199 = vmatpush1.bf16.msra.mxu0 %v3887_v29  ;;  %2240 = vmatpush1.bf16.msra.mxu1 %v3890_v31 }
 0xea2   :  { %2200 = vmatprep.subr.bf16.mxu0 %v3893_v33  ;;  %2241 = vmatprep.subr.bf16.mxu1 %v3896_v34 }
 0xea3   :  { %2230 = vmatprep.mubr.bf16.mxu0 %v3077_v3  ;;  %2271 = vmatprep.mubr.bf16.mxu1 %v3077_v3  ;;  %v2063_v3 = vld [vmem:[#allocation6 + $0xe0] sm:$0xff] }
 0xea4   :  { %v2065_v29 = vunpack.c.l.bf16 %v2063_v3  ;;  %v2066_v31 = vunpack.c.h.bf16 %v2063_v3 }
 0xea5   :  { %2201 = vmatpush1.bf16.msra.mxu0 %v3901_v17  ;;  %2242 = vmatpush1.bf16.msra.mxu1 %v3904_v36  ;;  %v2064_v36 = vld [vmem:[#allocation6 + $0xe8] sm:$0xff] }
 0xea6   :  { %2202 = vmatprep.subr.bf16.mxu0 %v3907_v42  ;;  %2243 = vmatprep.subr.bf16.mxu1 %v3910_v18 }
 0xea9   :  { %2203 = vmatpush1.bf16.msra.mxu0 %v3913_v24  ;;  %2244 = vmatpush1.bf16.msra.mxu1 %v3916_v44 }
 0xeaa   :  { %2204 = vmatprep.subr.bf16.mxu0 %v3919_v45  ;;  %2245 = vmatprep.subr.bf16.mxu1 %v3922_v48 }
 0xead   :  { %2205 = vmatpush1.bf16.msra.mxu0 %v3925_v1  ;;  %2246 = vmatpush1.bf16.msra.mxu1 %v3928_v52 }
 0xeae   :  { %2206 = vmatprep.subr.bf16.mxu0 %v3931_v15  ;;  %2247 = vmatprep.subr.bf16.mxu1 %v3934_v25  ;;  %v2068_v25 = vunpack.c.h.bf16 %v2064_v36 }
 0xeb1   :  { %2207 = vmatpush1.bf16.msra.mxu0 %v3937_v51  ;;  %2248 = vmatpush1.bf16.msra.mxu1 %v3940_v35  ;;  %v2067_v35 = vunpack.c.l.bf16 %v2064_v36 }
 0xeb2   :  { %2208 = vmatprep.subr.bf16.mxu0 %v3943_v26  ;;  %2249 = vmatprep.subr.bf16.mxu1 %v3946_v53 }
 0xeb5   :  { %2209 = vmatpush1.bf16.msra.mxu0 %v3949_v54  ;;  %2250 = vmatpush1.bf16.msra.mxu1 %v3952_v55 }
 0xeb6   :  { %2210 = vmatprep.subr.bf16.mxu0 %v3955_v57  ;;  %2251 = vmatprep.subr.bf16.mxu1 %v3958_v58 }
 0xeb9   :  { %2211 = vmatpush1.bf16.msra.mxu0 %v3961_v41  ;;  %2252 = vmatpush1.bf16.msra.mxu1 %v4013_v23 }
 0xeba   :  { %2212 = vmatprep.subr.bf16.mxu0 %v3965_v47  ;;  %2253 = vmatprep.subr.bf16.mxu1 %v4017_v50  ;;  %v2186_v50 = vpop.permute.xlu0 %2185 }
 0xebb   :  { %vm2187_vm14 = vcmp.eq.s32.totalorder %v2186_v50, 1 }
 0xebd   :  { %2213 = vmatpush1.bf16.msra.mxu0 %v3969_v59  ;;  %2254 = vmatpush1.bf16.msra.mxu1 %v4021_v4 }
 0xf73   :  { %v2104_v33 = vpop.f32.mrb[56].mxu0  ;;  %v2145_v34 = vpop.f32.mrb[56].mxu1 }
 0xf74   :  { %v2152_v17 = vadd.f32 %v2104_v33, %v2065_v29  ;;  %v2106_v42 = vpop.f32.mrb[57].mxu0  ;;  %v2147_v18 = vpop.f32.mrb[57].mxu1  ;;  %v2154_v53 = vadd.f32 %v2145_v34, %v2067_v35 }
 0xf75   :  { %v2153_v24 = vadd.f32 %v2106_v42, %v2066_v31  ;;  %v2108_v44 = vpop.f32.mrb[58].mxu0  ;;  %v2149_v45 = vpop.f32.mrb[58].mxu1  ;;  %v2155_v51 = vadd.f32 %v2147_v18, %v2068_v25 }
 0xf76   :  { %v2510_v48 = vmul.f32 -1.442695, %v2152_v17  ;;  %v2109_v1 = vpop.f32.mrb[59].mxu0  ;;  %v2150_v52 = vpop.f32.mrb[59].mxu1 }
 0xf77   :  { %v2511_v15 = vmul.f32 -1.442695, %v2153_v24  ;;  %v2512_v26 = vmul.f32 -1.442695, %v2155_v51  ;;  %v2314_v18 = vpop.permute.xlu1 %2313 }
 0xf78   :  { %2879 = vpow2.f32 %v2510_v48  ;;  %vm2315_vm15 = vcmp.eq.s32.totalorder %v2314_v18, 1 }
 0xf79   :  { %2881 = vpow2.f32 %v2511_v15 }
 0xf7a   :  { %2883 = vpow2.f32 %v2512_v26 }
 0xf7b   :  { %2885 = vtanh.f32 %v2154_v53 }
 0xf82   :  { %v2880_v54 = vpop.eup %2879 }
 0xf83   :  { %v2882_v55 = vpop.eup %2881  ;;  %v2159_v57 = vadd.f32 1.0, %v2880_v54 }
 0xf84   :  { %v2165_v58 = vadd.f32 1.0, %v2882_v55  ;;  %v2884_v41 = vpop.eup %2883 }
 0xf85   :  { %2887 = vrcp.f32 %v2159_v57  ;;  %v2886_v47 = vpop.eup %2885  ;;  %v2172_v23 = vadd.f32 1.0, %v2884_v41 }
 0xf86   :  { %2889 = vrcp.f32 %v2165_v58 }
 0xf87   :  { %2891 = vrcp.f32 %v2172_v23 }
 0xf8f   :  { %v2888_v59 = vpop.eup %2887 }
 0xf90   :  { %v2890_v63 = vpop.eup %2889  ;;  %v2176_v56 = vmul.f32 %v2888_v59, %v2886_v47 }
 0xf91   :  { %v2175_v4 = vmul.f32 %v2890_v63, %v4028_v9  ;;  %v2892_v16 = vpop.eup %2891 }
 0xf93   :  { %v2177_v30 = vadd.f32 %v2176_v56, %v2175_v4 }
 0xf95   :  { %2893 = vtanh.f32 %v2177_v30  ;;  %v2189_v40 = vsel %vm2187_vm14, %v2177_v30, %v4028_v9 }
 0xf9f   :  { %v2894_v19 = vpop.eup %2893 }
 0xfa0   :  { %v2179_v20 = vmul.f32 %v2894_v19, %v2892_v16 }
 0xfa2   :  { %v2188_v21 = vsel %vm2187_vm14, %v2179_v20, %v4031_v13 }
 0xfa3   :  { %v2197_v22 = vpack.c.bf16 %v2188_v21, %v2188_v21 }
 0xfa5   :  { %2231 = vmatmul.mubr.bf16.vlgmr.msra.gmra.mrb[60].mxu0 %v2197_v22  ;;  %2272 = vmatmul.mubr.bf16.vlgmr.msra.gmra.mrb[60].mxu1 %v2197_v22 }
0x1078   :  { %v2232_v39 = vpop.f32.mrb[60].mxu0  ;;  %v2273_v43 = vpop.f32.mrb[60].mxu1 }
0x1079   :  { %v2280_v27 = vadd.f32 %v2232_v39, %v2193_v60  ;;  %v2234_v46 = vpop.f32.mrb[61].mxu0  ;;  %v2275_v61 = vpop.f32.mrb[61].mxu1  ;;  %v2282_v12 = vadd.f32 %v2273_v43, %v2195_v10 }
0x107a   :  { %v2281_v28 = vadd.f32 %v2234_v46, %v2194_v2  ;;  %v2236_v32 = vpop.f32.mrb[62].mxu0  ;;  %v2277_v37 = vpop.f32.mrb[62].mxu1  ;;  %v2283_v9 = vadd.f32 %v2275_v61, %v2196_v7 }
0x107b   :  { %v2513_v38 = vmul.f32 -1.442695, %v2280_v27  ;;  %v2237_v5 = vpop.f32.mrb[63].mxu0  ;;  %v2278_v6 = vpop.f32.mrb[63].mxu1 }
0x107c   :  { %v2514_v8 = vmul.f32 -1.442695, %v2281_v28  ;;  %v2515_v11 = vmul.f32 -1.442695, %v2283_v9 }
0x107d   :  { %2895 = vpow2.f32 %v2513_v38 }
0x107e   :  { %2897 = vpow2.f32 %v2514_v8 }
0x107f   :  { %2899 = vpow2.f32 %v2515_v11 }
0x1080   :  { %2901 = vtanh.f32 %v2282_v12 }
0x1087   :  { %v2896_v13 = vpop.eup %2895 }
0x1088   :  { %v2898_v14 = vpop.eup %2897  ;;  %v2287_v3 = vadd.f32 1.0, %v2896_v13 }
0x1089   :  { %v2293_v29 = vadd.f32 1.0, %v2898_v14  ;;  %v2900_v31 = vpop.eup %2899 }
0x108a   :  { %2903 = vrcp.f32 %v2287_v3  ;;  %v2902_v33 = vpop.eup %2901  ;;  %v2300_v42 = vadd.f32 1.0, %v2900_v31 }
0x108b   :  { %2905 = vrcp.f32 %v2293_v29 }
0x108c   :  { %2907 = vrcp.f32 %v2300_v42 }
0x1094   :  { %v2904_v34 = vpop.eup %2903 }
0x1095   :  { %v2906_v17 = vpop.eup %2905  ;;  %v2304_v36 = vmul.f32 %v2904_v34, %v2902_v33 }
0x1096   :  { %v2303_v24 = vmul.f32 %v2906_v17, %v2189_v40  ;;  %v2908_v48 = vpop.eup %2907 }
0x1098   :  { %v2305_v44 = vadd.f32 %v2304_v36, %v2303_v24 }
0x109a   :  { %2909 = vtanh.f32 %v2305_v44  ;;  %v2317_v45 = vsel %vm2315_vm15, %v2305_v44, %v2189_v40 }
0x109b   :  { %2319 = vst [vmem:[#allocation3] sm:$0xff] %v2317_v45 }
0x10a4   :  { %v2910_v1 = vpop.eup %2909 }
0x10a5   :  { %v2307_v52 = vmul.f32 %v2910_v1, %v2908_v48 }
0x10a7   :  { %v2316_v15 = vsel %vm2315_vm15, %v2307_v52, %v2188_v21 }
0x10a8   :  { %2318 = vst [vmem:[#allocation2] sm:$0xff] %v2316_v15 }
0x10a9 PF:  { %v2324_v25 = vld [vmem:[#allocation11] sm:$0xff]  ;;  %v2325_v51 = vld [vmem:[#allocation11 + $0x8] sm:$0xff]  ;;  %v2326_v35 = vld [vmem:[#allocation11 + $0x10] sm:$0xff]  ;;  %v3078_v26 = vmov 0.0|0.0   ;;  %vm3079_vm0 = vmmov 0   ;;  %s3080_s14 = smov [#allocation12]  }
0x10aa   :  { %2569 = vmatprep.subr.bf16.mxu0 %v3078_v26  ;;  %v2570_v53 = vpack.c.bf16 %v2325_v51, %v2324_v25  ;;  %v2327_v54 = vld [vmem:[#allocation11 + $0x18] sm:$0xff]  ;;  %2566 = vmatprep.mubr.msk.f32.mxu0 %vm3079_vm0, %v3076_v0  ;;  %v2328_v57 = vld [vmem:[#allocation11 + $0x20] sm:$0xff]  ;;  %v2329_v58 = vld [vmem:[#allocation11 + $0x28] sm:$0xff]  ;;  %s2424_s15 = sshll.u32 %s3080_s14, 4  ;;  %s2425_s15 = int_to_ptr.vmem [resolvable:$true] %s2424_s15 }
0x10ab   :  { %v2573_v55 = vpack.c.bf16 %v2327_v54, %v2326_v35  ;;  %v2576_v41 = vpack.c.bf16 %v2329_v58, %v2328_v57  ;;  %v2330_v47 = vld [vmem:[#allocation11 + $0x30] sm:$0xff]  ;;  %v2331_v59 = vld [vmem:[#allocation11 + $0x38] sm:$0xff]  ;;  %v2332_v56 = vld [vmem:[#allocation11 + $0x40] sm:$0xff]  ;;  %s3041_s16 = scalar_lea.vmem %s2425_s15, 128  ;;  %p3046_p12 = scmp.lt.s32.totalorder %s2425_s15, %s2425_s15 }
0x10ac   :  { %2571 = vmatpush3.bf16.msra.mxu0 %v2570_v53  ;;  %v2579_v63 = vpack.c.bf16 %v2331_v59, %v2330_v47  ;;  %v2333_v23 = vld [vmem:[#allocation11 + $0x48] sm:$0xff]  ;;  %v2334_v4 = vld [vmem:[#allocation11 + $0x50] sm:$0xff]  ;;  %v2335_v0 = vld [vmem:[#allocation11 + $0x58] sm:$0xff]  ;;  %p3042_p11 = scmp.ne.s32.totalorder %s2425_s15, %s3041_s16  ;;  %p3047_p13 = scmp.lt.s32.totalorder %s3041_s16, %s3041_s16 }
0x10ad   :  { %2572 = vmatprep.subr.bf16.mxu0 %v3078_v26  ;;  %v2582_v50 = vpack.c.bf16 %v2333_v23, %v2332_v56  ;;  %v2585_v30 = vpack.c.bf16 %v2335_v0, %v2334_v4  ;;  %v2336_v40 = vld [vmem:[#allocation11 + $0x60] sm:$0xff]  ;;  %v2337_v16 = vld [vmem:[#allocation11 + $0x68] sm:$0xff]  ;;  %v2338_v20 = vld [vmem:[#allocation11 + $0x70] sm:$0xff] }
0x10ae   :  { %v2588_v19 = vpack.c.bf16 %v2337_v16, %v2336_v40  ;;  %v2339_v21 = vld [vmem:[#allocation11 + $0x78] sm:$0xff]  ;;  %v2516_v60 = vld [vmem:[%s4091_s5] ss:$0 sm:$0xff]  ;;  %p3048_p0 = por %p3047_p13, %p3046_p12 }
0x10af   :  { %v2591_v22 = vpack.c.bf16 %v2339_v21, %v2338_v20  ;;  %v2323_v49 = vld [vmem:[#allocation2] sm:$0xff] }
0x10b0   :  { %2574 = vmatpush3.bf16.msra.mxu0 %v2573_v55  ;;  %p3049_p1 = pnand %p3048_p0, %p3042_p11 }
0x10b1   :  { %2575 = vmatprep.subr.bf16.mxu0 %v3078_v26 }
0x10b4   :  { %2577 = vmatpush3.bf16.msra.mxu0 %v2576_v41 }
0x10b5   :  { %2578 = vmatprep.subr.bf16.mxu0 %v3078_v26 }
0x10b8   :  { %2580 = vmatpush3.bf16.msra.mxu0 %v2579_v63 }
0x10b9   :  { %2581 = vmatprep.subr.bf16.mxu0 %v3078_v26 }
0x10bc   :  { %2583 = vmatpush3.bf16.msra.mxu0 %v2582_v50 }
0x10bd   :  { %2584 = vmatprep.subr.bf16.mxu0 %v3078_v26 }
0x10c0   :  { %2586 = vmatpush3.bf16.msra.mxu0 %v2585_v30 }
0x10c1   :  { %2587 = vmatprep.subr.bf16.mxu0 %v3078_v26 }
0x10c4   :  { %2589 = vmatpush3.bf16.msra.mxu0 %v2588_v19 }
0x10c5   :  { %2590 = vmatprep.subr.bf16.mxu0 %v3078_v26 }
0x10c8   :  { %2592 = vmatpush3.bf16.msra.mxu0 %v2591_v22 }
0x10cb   :  { %2567 = vmatmul.mubr.f32.vlgmr.msra.gmra.mrb[0].mxu0 %v2323_v49 }
0x119e   :  { %v2413_v2 = vpop.f32.mrb[0].mxu0 }
0x119f   :  { %v2414_v39 = vadd.f32 %v2516_v60, %v2413_v2  ;;  %v2568_v43 = vpop.f32.mrb[1].mxu0 }
0x11a1   :  { %2417 = vst [vmem:[#allocation12] sm:$0xff] %v2414_v39 }
0x11a2   :  { %3052 = shalt.err (!%p3049_p1)
}
0x11a3   :  { %s3053_s19 = scalar_lea.hbm %s4092_s6, 128 }
0x11a4   :  { %p3054_p2 = scmp.ne.s32.totalorder %s4092_s6, %s3053_s19  ;;  %p3057_p3 = scmp.lt.u32.totalorder %s3053_s19, %s4092_s6 }
0x11a6   :  { %p3059_p4 = pnand %p3057_p3, %p3054_p2 }
0x11a8   :  { %3062 = shalt.err (!%p3059_p4)
}
0x11a9   :  { %2427 = dma.vmem_to_hbm [thread:$0]  %s2425_s15, 128, %s4092_s6, [#allocation8]  }
0x11aa   :  { %3067 = dma.done.wait [#allocation8], 128  }
0x11ab   :  { %3068 = vsyncadd [#allocation8], 4294967168 }
0x11ac   :  { %2431 = vsyncpa [#allocation7], 1 }
0x11ad   :  { %2432 = vsyncpa [#allocation10], 1 }
0x11ae   :  { %2433 = vsyncpa [#allocation8], 1 }

</bundles_post_ra>
